<compile_context>
chip_gen: v7x
topology: tpu7x:2x2x1
jax: 0.10.0
libtpu: 0.0.40
codegen_flags: <defaults>
</compile_context>

<pallas_src>
import functools
import numpy as np

import jax
import jax.numpy as jnp
from jax.experimental import pallas as pl
from jax.experimental.pallas import tpu as pltpu

K = 3            # receptive-field kernel size (module default)
KK = K * K       # 9


# ----------------------------------------------------------------------------
# Pallas kernel (one batch element per grid step)
# ----------------------------------------------------------------------------
def _rsca_kernel(x_ref, w_se1t_ref, w_se2_ref, w_big_ref, b_gen_ref,
                 w_sa_ref, w_f2_ref, b_f2_ref, jmask_ref, o_ref,
                 xpad_ref, xs_ref, gf_ref, mpad_ref,
                 *, C, H, W, O):
    HW = H * W
    PADW = W + 1                      # flattened-spatial halo on each side
    f32 = jnp.float32
    hi = jax.lax.Precision.HIGHEST

    x2 = x_ref[...].reshape(C, HW)                                   # (C, HW) lane-dense

    # ---------------- SE channel attention (VPU / XLU only) ------------------
    g_col = jnp.sum(x2, axis=1, keepdims=True) * (1.0 / HW)          # (C, 1)  global avg pool
    h_row = jnp.maximum(
        jnp.sum(w_se1t_ref[...] * g_col, axis=0, keepdims=True), 0.0)  # (1, R)  relu(W1 @ g)
    ca_pre = jnp.sum(w_se2_ref[...] * h_row, axis=1, keepdims=True)    # (C, 1)  W2 @ h
    ca_col = 1.0 / (1.0 + jnp.exp(-ca_pre))                            # (C, 1)  sigmoid

    # ---------------- column-validity masks for spatial shifts ---------------
    mask_m1 = jmask_ref[0:1, :]       # valid when reading column j-1
    mask_p1 = jmask_ref[1:2, :]       # valid when reading column j+1
    jmask = {-1: mask_m1, 0: None, 1: mask_p1}

    # ---------------- 9 shifted copies of x -> XS (9C, HW) -------------------
    xpad_ref[...] = jnp.zeros_like(xpad_ref)
    xpad_ref[:, PADW:PADW + HW] = x2
    for di in (-1, 0, 1):
        for dj in (-1, 0, 1):
            t = (di + 1) * K + (dj + 1)                    # tap index kh*3+kw
            start = PADW + di * W + dj
            sh = xpad_ref[:, start:start + HW]             # (C, HW)
            if dj != 0:
                sh = sh * jmask[dj]
            xs_ref[t * C:(t + 1) * C, :] = sh

    # ---------------- generate: depthwise conv + BN + ReLU as one matmul -----
    gf = jnp.dot(w_big_ref[...], xs_ref[...],
                 preferred_element_type=f32, precision=hi)            # (9C, HW)
    gf_ref[...] = jnp.maximum(gf + b_gen_ref[...], 0.0)

    # ---------------- per-offset channel max / mean maps ---------------------
    mpad_ref[...] = jnp.zeros_like(mpad_ref)
    for m in range(KK):
        blk = gf_ref[m * C:(m + 1) * C, :]                            # (C, HW)
        mpad_ref[0, m:m + 1, PADW:PADW + HW] = jnp.max(blk, axis=0, keepdims=True)
        mpad_ref[1, m:m + 1, PADW:PADW + HW] = (
            jnp.sum(blk, axis=0, keepdims=True) * (1.0 / C))

    # ---------------- receptive-field attention + modulation -----------------
    # 3x3 conv (2->1, pad=1) over the virtual (3H, 3W) grid, evaluated directly
    # in (m, p) indexing.  xs_ref is reused as the modulated-feature buffer.
    for m in range(KK):
        n1, n2 = m // K, m % K
        acc = None
        for a in (-1, 0, 1):
            q1 = n1 + a
            dI = -1 if q1 < 0 else (1 if q1 >= K else 0)
            n1s = q1 % K
            for b in (-1, 0, 1):
                q2 = n2 + b
                dJ = -1 if q2 < 0 else (1 if q2 >= K else 0)
                n2s = q2 % K
                msrc = n1s * K + n2s
                start = PADW + dI * W + dJ
                row_mx = mpad_ref[0, msrc:msrc + 1, start:start + HW]   # (1, HW)
                row_mn = mpad_ref[1, msrc:msrc + 1, start:start + HW]
                if dJ != 0:
                    row_mx = row_mx * jmask[dJ]
                    row_mn = row_mn * jmask[dJ]
                tap = (a + 1) * K + (b + 1)
                contrib = (w_sa_ref[0, tap] * row_mx
                           + w_sa_ref[1, tap] * row_mn)
                acc = contrib if acc is None else acc + contrib
        rfa_row = 1.0 / (1.0 + jnp.exp(-acc))                           # (1, HW)
        # conv_data block for this offset: gf * channel-attn * rf-attn
        xs_ref[m * C:(m + 1) * C, :] = (
            gf_ref[m * C:(m + 1) * C, :] * ca_col * rfa_row)

    # ---------------- final conv (k=3, stride=3) + bias/BN + ReLU ------------
    out = jnp.dot(w_f2_ref[...], xs_ref[...],
                  preferred_element_type=f32, precision=hi) + b_f2_ref[...]
    o_ref[...] = jnp.maximum(out, 0.0).reshape(1, O, HW)


# ----------------------------------------------------------------------------
# Weight folding / repacking (plain numpy, one-time setup)
# ----------------------------------------------------------------------------
def _fold_and_pack(p, C, O, eps=1e-5):
    # generate: depthwise conv (C*9,1,3,3) -> block-diagonal (9C, 9C), BN folded.
    s_g = np.asarray(p['bn_g_gamma']) / np.sqrt(np.asarray(p['bn_g_var']) + eps)
    b_g = np.asarray(p['bn_g_beta']) - np.asarray(p['bn_g_mean']) * s_g
    w_gen = np.asarray(p['w_gen']).reshape(C, KK, KK) * s_g.reshape(C, KK, 1)  # [c,m,t]
    w_big = np.zeros((KK * C, KK * C), np.float32)
    for c in range(C):
        rows = np.arange(KK) * C + c                 # output row  m*C + c
        cols = np.arange(KK) * C + c                 # XS row      t*C + c
        w_big[rows[:, None], cols[None, :]] = w_gen[c]
    b_gen = b_g.reshape(C, KK).T.reshape(KK * C, 1).astype(np.float32)

    # final conv (O, C, 3, 3) + bias + BN  ->  (O, 9C) matmul weight, columns m*C+c.
    s_f = np.asarray(p['bn_f_gamma']) / np.sqrt(np.asarray(p['bn_f_var']) + eps)
    w_f2 = (np.asarray(p['w_fin']) * s_f[:, None, None, None]).reshape(O, C, KK)
    w_f2 = np.transpose(w_f2, (0, 2, 1)).reshape(O, KK * C).astype(np.float32)
    b_f2 = (s_f * (np.asarray(p['b_fin']) - np.asarray(p['bn_f_mean']))
            + np.asarray(p['bn_f_beta'])).reshape(O, 1).astype(np.float32)

    w_sa = np.asarray(p['w_sa']).reshape(2, KK).astype(np.float32)     # (1,2,3,3)->(2,9)
    w_se1t = np.ascontiguousarray(np.asarray(p['w_se1']).T).astype(np.float32)  # (C, R)
    w_se2 = np.asarray(p['w_se2']).astype(np.float32)                  # (C, R)
    return tuple(jnp.asarray(a) for a in
                 (w_se1t, w_se2, w_big, b_gen, w_sa, w_f2, b_f2))


# ----------------------------------------------------------------------------
# Wrapper
# ----------------------------------------------------------------------------
def rsca_attention_pallas(x, params):
    """x: (B, C, H, W) float32 (NCHW). Returns (B, O, H, W)."""
    B, C, H, W = x.shape
    O = params['w_fin'].shape[0]
    R = params['w_se1'].shape[0]
    HW = H * W
    # TODO(synk): generate-conv stride != 1 / dilation != 1 not implemented
    # (module defaults stride=1, dilation=1 are what the forward pass uses).

    w_se1t, w_se2, w_big, b_gen, w_sa, w_f2, b_f2 = _fold_and_pack(params, C, O)

    jj = np.arange(HW) % W
    jmask = np.stack([(jj >= 1), (jj <= W - 2)]).astype(np.float32)    # (2, HW)

    kernel = functools.partial(_rsca_kernel, C=C, H=H, W=W, O=O)
    padw = HW + 2 * (W + 1)

    out_flat = pl.pallas_call(
        kernel,
        out_shape=jax.ShapeDtypeStruct((B, O, HW), jnp.float32),
        grid_spec=pltpu.PrefetchScalarGridSpec(
            num_scalar_prefetch=0,
            grid=(B,),
            in_specs=[
                pl.BlockSpec((1, C, HW), lambda b: (b, 0, 0)),          # x (lane-dense)
                pl.BlockSpec((C, R), lambda b: (0, 0)),                 # SE W1^T
                pl.BlockSpec((C, R), lambda b: (0, 0)),                 # SE W2
                pl.BlockSpec((KK * C, KK * C), lambda b: (0, 0)),       # generate (folded)
                pl.BlockSpec((KK * C, 1), lambda b: (0, 0)),            # generate bias
                pl.BlockSpec(memory_space=pltpu.MemorySpace.SMEM),      # 3x3 attn weights
                pl.BlockSpec((O, KK * C), lambda b: (0, 0)),            # final conv (folded)
                pl.BlockSpec((O, 1), lambda b: (0, 0)),                 # final bias
                pl.BlockSpec((2, HW), lambda b: (0, 0)),                # column masks
            ],
            out_specs=pl.BlockSpec((1, O, HW), lambda b: (b, 0, 0)),
            scratch_shapes=[
                pltpu.VMEM((C, padw), jnp.float32),                     # padded x
                pltpu.VMEM((KK * C, HW), jnp.float32),                  # XS / modulated feats
                pltpu.VMEM((KK * C, HW), jnp.float32),                  # gf
                pltpu.VMEM((2, KK, padw), jnp.float32),                 # padded max/mean maps
            ],
        ),
        compiler_params=pltpu.CompilerParams(
            dimension_semantics=("parallel",)),
    )(x.reshape(B, C, HW), w_se1t, w_se2, w_big, b_gen, w_sa, w_f2, b_f2,
      jnp.asarray(jmask))

    return out_flat.reshape(B, O, H, W)


# ----------------------------------------------------------------------------
# Pure-JAX reference (mirrors the PyTorch module op-by-op)
# ----------------------------------------------------------------------------
def rsca_reference(x, p, eps=1e-5):
    B, C, H, W = x.shape
    hi = jax.lax.Precision.HIGHEST
    dn = ('NCHW', 'OIHW', 'NCHW')

    g = jnp.mean(x, axis=(2, 3))                                            # SE
    h = jax.nn.relu(jnp.dot(g, p['w_se1'].T, precision=hi))
    ca = jax.nn.sigmoid(jnp.dot(h, p['w_se2'].T, precision=hi))             # (B, C)

    gf = jax.lax.conv_general_dilated(                                       # generate
        x, p['w_gen'], window_strides=(1, 1), padding=((1, 1), (1, 1)),
        feature_group_count=C, dimension_numbers=dn, precision=hi)
    s_g = p['bn_g_gamma'] / jnp.sqrt(p['bn_g_var'] + eps)
    gf = jax.nn.relu(gf * s_g[None, :, None, None]
                     + (p['bn_g_beta'] - p['bn_g_mean'] * s_g)[None, :, None, None])

    ge = gf.reshape(B, C, K, K, H, W).transpose(0, 1, 4, 2, 5, 3) \
           .reshape(B, C, K * H, K * W)                                      # rearrange

    unfold = ge * ca[:, :, None, None]
    mx = jnp.max(ge, axis=1, keepdims=True)
    mn = jnp.mean(ge, axis=1, keepdims=True)
    rfa = jax.nn.sigmoid(jax.lax.conv_general_dilated(
        jnp.concatenate([mx, mn], axis=1), p['w_sa'],
        window_strides=(1, 1), padding=((1, 1), (1, 1)),
        dimension_numbers=dn, precision=hi))

    y = jax.lax.conv_general_dilated(
        unfold * rfa, p['w_fin'], window_strides=(K, K), padding='VALID',
        dimension_numbers=dn, precision=hi)
    y = y + p['b_fin'][None, :, None, None]
    s_f = p['bn_f_gamma'] / jnp.sqrt(p['bn_f_var'] + eps)
    y = y * s_f[None, :, None, None] \
        + (p['bn_f_beta'] - p['bn_f_mean'] * s_f)[None, :, None, None]
    return jax.nn.relu(y)


# ----------------------------------------------------------------------------
if __name__ == "__main__":
    B, C, O, H, W, R = 2, 16, 32, 16, 16, 16   # in_channel=16, out_channel=32, ratio=16

    key = jax.random.PRNGKey(0)
    ks = jax.random.split(key, 16)

    x = jax.random.normal(ks[0], (B, C, H, W), jnp.float32)

    params = dict(
        w_se1=0.3 * jax.random.normal(ks[1], (R, C), jnp.float32),
        w_se2=0.3 * jax.random.normal(ks[2], (C, R), jnp.float32),
        w_gen=0.3 * jax.random.normal(ks[3], (C * KK, 1, K, K), jnp.float32),
        bn_g_gamma=1.0 + 0.1 * jax.random.normal(ks[4], (C * KK,), jnp.float32),
        bn_g_beta=0.1 * jax.random.normal(ks[5], (C * KK,), jnp.float32),
        bn_g_mean=0.1 * jax.random.normal(ks[6], (C * KK,), jnp.float32),
        bn_g_var=0.5 + jnp.abs(jax.random.normal(ks[7], (C * KK,), jnp.float32)),
        w_sa=0.3 * jax.random.normal(ks[8], (1, 2, K, K), jnp.float32),
        w_fin=0.1 * jax.random.normal(ks[9], (O, C, K, K), jnp.float32),
        b_fin=0.1 * jax.random.normal(ks[10], (O,), jnp.float32),
        bn_f_gamma=1.0 + 0.1 * jax.random.normal(ks[11], (O,), jnp.float32),
        bn_f_beta=0.1 * jax.random.normal(ks[12], (O,), jnp.float32),
        bn_f_mean=0.1 * jax.random.normal(ks[13], (O,), jnp.float32),
        bn_f_var=0.5 + jnp.abs(jax.random.normal(ks[14], (O,), jnp.float32)),
    )

    out = rsca_attention_pallas(x, params)
    out = jax.block_until_ready(out)

    ref = rsca_reference(x, params)
    np.testing.assert_allclose(np.asarray(out), np.asarray(ref), rtol=1e-3, atol=1e-3)

    print("KERNEL_OK")
</pallas_src>

<mosaic_0001>
module attributes {stable_mosaic.version = 11 : i64} {
  func.func @_rsca_kernel(%arg0: i32, %arg1: memref<1x16x256xf32, #tpu.memory_space<vmem>>, %arg2: memref<16x16xf32, #tpu.memory_space<vmem>>, %arg3: memref<16x16xf32, #tpu.memory_space<vmem>>, %arg4: memref<144x144xf32, #tpu.memory_space<vmem>>, %arg5: memref<144x1xf32, #tpu.memory_space<vmem>>, %arg6: memref<2x9xf32, #tpu.memory_space<smem>>, %arg7: memref<32x144xf32, #tpu.memory_space<vmem>>, %arg8: memref<32x1xf32, #tpu.memory_space<vmem>>, %arg9: memref<2x256xf32, #tpu.memory_space<vmem>>, %arg10: memref<1x32x256xf32, #tpu.memory_space<vmem>>, %arg11: memref<16x290xf32, #tpu.memory_space<vmem>>, %arg12: memref<144x256xf32, #tpu.memory_space<vmem>>, %arg13: memref<144x256xf32, #tpu.memory_space<vmem>>, %arg14: memref<2x9x290xf32, #tpu.memory_space<vmem>>) attributes {dimension_semantics = [#tpu.dimension_semantics<parallel>], iteration_bounds = array<i64: 2>, scalar_prefetch = 0 : i64, scratch_operands = 4 : i64, tpu.core_type = #tpu.core_type<tc>, window_params = [{transform_indices = @transform_0, window_bounds = array<i64: 1, 16, 256>}, {pipeline_mode = #tpu.pipeline_mode<synchronous>, transform_indices = @transform_1, window_bounds = array<i64: 16, 16>}, {pipeline_mode = #tpu.pipeline_mode<synchronous>, transform_indices = @transform_2, window_bounds = array<i64: 16, 16>}, {pipeline_mode = #tpu.pipeline_mode<synchronous>, transform_indices = @transform_3, window_bounds = array<i64: 144, 144>}, {pipeline_mode = #tpu.pipeline_mode<synchronous>, transform_indices = @transform_4, window_bounds = array<i64: 144, 1>}, {transform_indices = @transform_5, window_bounds = array<i64: 2, 9>}, {pipeline_mode = #tpu.pipeline_mode<synchronous>, transform_indices = @transform_6, window_bounds = array<i64: 32, 144>}, {pipeline_mode = #tpu.pipeline_mode<synchronous>, transform_indices = @transform_7, window_bounds = array<i64: 32, 1>}, {pipeline_mode = #tpu.pipeline_mode<synchronous>, transform_indices = @transform_8, window_bounds = array<i64: 2, 256>}, {transform_indices = @transform_9, window_bounds = array<i64: 1, 32, 256>}]} {
    %c0 = arith.constant 0 : index
    %c0_0 = arith.constant 0 : index
    %c0_1 = arith.constant 0 : index
    %0 = vector.load %arg1[%c0, %c0_0, %c0_1] : memref<1x16x256xf32, #tpu.memory_space<vmem>>, vector<1x16x256xf32>
    %1 = vector.shape_cast %0 : vector<1x16x256xf32> to vector<16x256xf32>
    %cst = arith.constant dense<0.000000e+00> : vector<16xf32>
    %2 = vector.multi_reduction <add>, %1, %cst [1] : vector<16x256xf32> to vector<16xf32>
    %3 = vector.shape_cast %2 : vector<16xf32> to vector<16x1xf32>
    %cst_2 = arith.constant 3.906250e-03 : f32
    %4 = vector.broadcast %cst_2 : f32 to vector<16x1xf32>
    %5 = arith.mulf %3, %4 : vector<16x1xf32>
    %c0_3 = arith.constant 0 : index
    %c0_4 = arith.constant 0 : index
    %6 = vector.load %arg2[%c0_3, %c0_4] : memref<16x16xf32, #tpu.memory_space<vmem>>, vector<16x16xf32>
    %7 = vector.broadcast %5 : vector<16x1xf32> to vector<16x16xf32>
    %8 = arith.mulf %6, %7 : vector<16x16xf32>
    %cst_5 = arith.constant dense<0.000000e+00> : vector<16xf32>
    %9 = vector.multi_reduction <add>, %8, %cst_5 [0] : vector<16x16xf32> to vector<16xf32>
    %10 = vector.shape_cast %9 : vector<16xf32> to vector<1x16xf32>
    %cst_6 = arith.constant 0.000000e+00 : f32
    %11 = vector.broadcast %cst_6 : f32 to vector<1x16xf32>
    %12 = arith.maximumf %10, %11 : vector<1x16xf32>
    %c0_7 = arith.constant 0 : index
    %c0_8 = arith.constant 0 : index
    %13 = vector.load %arg3[%c0_7, %c0_8] : memref<16x16xf32, #tpu.memory_space<vmem>>, vector<16x16xf32>
    %14 = vector.broadcast %12 : vector<1x16xf32> to vector<16x16xf32>
    %15 = arith.mulf %13, %14 : vector<16x16xf32>
    %cst_9 = arith.constant dense<0.000000e+00> : vector<16xf32>
    %16 = vector.multi_reduction <add>, %15, %cst_9 [1] : vector<16x16xf32> to vector<16xf32>
    %17 = vector.shape_cast %16 : vector<16xf32> to vector<16x1xf32>
    %cst_10 = arith.constant 0.000000e+00 : f32
    %18 = vector.broadcast %cst_10 : f32 to vector<16x1xf32>
    %19 = arith.subf %18, %17 : vector<16x1xf32>
    %20 = math.exp %19 : vector<16x1xf32>
    %cst_11 = arith.constant 1.000000e+00 : f32
    %21 = vector.broadcast %cst_11 : f32 to vector<16x1xf32>
    %22 = arith.addf %21, %20 : vector<16x1xf32>
    %cst_12 = arith.constant 1.000000e+00 : f32
    %23 = vector.broadcast %cst_12 : f32 to vector<16x1xf32>
    %24 = arith.divf %23, %22 : vector<16x1xf32>
    %c0_13 = arith.constant 0 : index
    %c0_14 = arith.constant 0 : index
    %25 = vector.load %arg9[%c0_13, %c0_14] : memref<2x256xf32, #tpu.memory_space<vmem>>, vector<1x256xf32>
    %c1 = arith.constant 1 : index
    %c0_15 = arith.constant 0 : index
    %26 = vector.load %arg9[%c1, %c0_15] : memref<2x256xf32, #tpu.memory_space<vmem>>, vector<1x256xf32>
    %cst_16 = arith.constant 0.000000e+00 : f32
    %27 = vector.broadcast %cst_16 : f32 to vector<16x290xf32>
    %c0_17 = arith.constant 0 : index
    %c0_18 = arith.constant 0 : index
    %28 = vector.load %arg11[%c0_17, %c0_18] : memref<16x290xf32, #tpu.memory_space<vmem>>, vector<16x290xf32>
    tpu.vector_store %arg11[%c0_17, %c0_18], %27 {strides = array<i32>} : memref<16x290xf32, #tpu.memory_space<vmem>>, vector<16x290xf32>,
    %c0_19 = arith.constant 0 : index
    %c17 = arith.constant 17 : index
    %29 = vector.load %arg11[%c0_19, %c17] : memref<16x290xf32, #tpu.memory_space<vmem>>, vector<16x256xf32>
    tpu.vector_store %arg11[%c0_19, %c17], %1 {strides = array<i32>} : memref<16x290xf32, #tpu.memory_space<vmem>>, vector<16x256xf32>,
    %c0_20 = arith.constant 0 : index
    %c0_21 = arith.constant 0 : index
    %30 = vector.load %arg11[%c0_20, %c0_21] : memref<16x290xf32, #tpu.memory_space<vmem>>, vector<16x256xf32>
    %31 = vector.broadcast %25 : vector<1x256xf32> to vector<16x256xf32>
    %32 = arith.mulf %30, %31 : vector<16x256xf32>
    %c0_22 = arith.constant 0 : index
    %c0_23 = arith.constant 0 : index
    %33 = vector.load %arg12[%c0_22, %c0_23] : memref<144x256xf32, #tpu.memory_space<vmem>>, vector<16x256xf32>
    tpu.vector_store %arg12[%c0_22, %c0_23], %32 {strides = array<i32>} : memref<144x256xf32, #tpu.memory_space<vmem>>, vector<16x256xf32>,
    %c0_24 = arith.constant 0 : index
    %c1_25 = arith.constant 1 : index
    %34 = vector.load %arg11[%c0_24, %c1_25] : memref<16x290xf32, #tpu.memory_space<vmem>>, vector<16x256xf32>
    %c16 = arith.constant 16 : index
    %c0_26 = arith.constant 0 : index
    %35 = vector.load %arg12[%c16, %c0_26] : memref<144x256xf32, #tpu.memory_space<vmem>>, vector<16x256xf32>
    tpu.vector_store %arg12[%c16, %c0_26], %34 {strides = array<i32>} : memref<144x256xf32, #tpu.memory_space<vmem>>, vector<16x256xf32>,
    %c0_27 = arith.constant 0 : index
    %c2 = arith.constant 2 : index
    %36 = vector.load %arg11[%c0_27, %c2] : memref<16x290xf32, #tpu.memory_space<vmem>>, vector<16x256xf32>
    %37 = vector.broadcast %26 : vector<1x256xf32> to vector<16x256xf32>
    %38 = arith.mulf %36, %37 : vector<16x256xf32>
    %c32 = arith.constant 32 : index
    %c0_28 = arith.constant 0 : index
    %39 = vector.load %arg12[%c32, %c0_28] : memref<144x256xf32, #tpu.memory_space<vmem>>, vector<16x256xf32>
    tpu.vector_store %arg12[%c32, %c0_28], %38 {strides = array<i32>} : memref<144x256xf32, #tpu.memory_space<vmem>>, vector<16x256xf32>,
    %c0_29 = arith.constant 0 : index
    %c16_30 = arith.constant 16 : index
    %40 = vector.load %arg11[%c0_29, %c16_30] : memref<16x290xf32, #tpu.memory_space<vmem>>, vector<16x256xf32>
    %41 = vector.broadcast %25 : vector<1x256xf32> to vector<16x256xf32>
    %42 = arith.mulf %40, %41 : vector<16x256xf32>
    %c48 = arith.constant 48 : index
    %c0_31 = arith.constant 0 : index
    %43 = vector.load %arg12[%c48, %c0_31] : memref<144x256xf32, #tpu.memory_space<vmem>>, vector<16x256xf32>
    tpu.vector_store %arg12[%c48, %c0_31], %42 {strides = array<i32>} : memref<144x256xf32, #tpu.memory_space<vmem>>, vector<16x256xf32>,
    %c0_32 = arith.constant 0 : index
    %c17_33 = arith.constant 17 : index
    %44 = vector.load %arg11[%c0_32, %c17_33] : memref<16x290xf32, #tpu.memory_space<vmem>>, vector<16x256xf32>
    %c64 = arith.constant 64 : index
    %c0_34 = arith.constant 0 : index
    %45 = vector.load %arg12[%c64, %c0_34] : memref<144x256xf32, #tpu.memory_space<vmem>>, vector<16x256xf32>
    tpu.vector_store %arg12[%c64, %c0_34], %44 {strides = array<i32>} : memref<144x256xf32, #tpu.memory_space<vmem>>, vector<16x256xf32>,
    %c0_35 = arith.constant 0 : index
    %c18 = arith.constant 18 : index
    %46 = vector.load %arg11[%c0_35, %c18] : memref<16x290xf32, #tpu.memory_space<vmem>>, vector<16x256xf32>
    %47 = vector.broadcast %26 : vector<1x256xf32> to vector<16x256xf32>
    %48 = arith.mulf %46, %47 : vector<16x256xf32>
    %c80 = arith.constant 80 : index
    %c0_36 = arith.constant 0 : index
    %49 = vector.load %arg12[%c80, %c0_36] : memref<144x256xf32, #tpu.memory_space<vmem>>, vector<16x256xf32>
    tpu.vector_store %arg12[%c80, %c0_36], %48 {strides = array<i32>} : memref<144x256xf32, #tpu.memory_space<vmem>>, vector<16x256xf32>,
    %c0_37 = arith.constant 0 : index
    %c32_38 = arith.constant 32 : index
    %50 = vector.load %arg11[%c0_37, %c32_38] : memref<16x290xf32, #tpu.memory_space<vmem>>, vector<16x256xf32>
    %51 = vector.broadcast %25 : vector<1x256xf32> to vector<16x256xf32>
    %52 = arith.mulf %50, %51 : vector<16x256xf32>
    %c96 = arith.constant 96 : index
    %c0_39 = arith.constant 0 : index
    %53 = vector.load %arg12[%c96, %c0_39] : memref<144x256xf32, #tpu.memory_space<vmem>>, vector<16x256xf32>
    tpu.vector_store %arg12[%c96, %c0_39], %52 {strides = array<i32>} : memref<144x256xf32, #tpu.memory_space<vmem>>, vector<16x256xf32>,
    %c0_40 = arith.constant 0 : index
    %c33 = arith.constant 33 : index
    %54 = vector.load %arg11[%c0_40, %c33] : memref<16x290xf32, #tpu.memory_space<vmem>>, vector<16x256xf32>
    %c112 = arith.constant 112 : index
    %c0_41 = arith.constant 0 : index
    %55 = vector.load %arg12[%c112, %c0_41] : memref<144x256xf32, #tpu.memory_space<vmem>>, vector<16x256xf32>
    tpu.vector_store %arg12[%c112, %c0_41], %54 {strides = array<i32>} : memref<144x256xf32, #tpu.memory_space<vmem>>, vector<16x256xf32>,
    %c0_42 = arith.constant 0 : index
    %c34 = arith.constant 34 : index
    %56 = vector.load %arg11[%c0_42, %c34] : memref<16x290xf32, #tpu.memory_space<vmem>>, vector<16x256xf32>
    %57 = vector.broadcast %26 : vector<1x256xf32> to vector<16x256xf32>
    %58 = arith.mulf %56, %57 : vector<16x256xf32>
    %c128 = arith.constant 128 : index
    %c0_43 = arith.constant 0 : index
    %59 = vector.load %arg12[%c128, %c0_43] : memref<144x256xf32, #tpu.memory_space<vmem>>, vector<16x256xf32>
    tpu.vector_store %arg12[%c128, %c0_43], %58 {strides = array<i32>} : memref<144x256xf32, #tpu.memory_space<vmem>>, vector<16x256xf32>,
    %c0_44 = arith.constant 0 : index
    %c0_45 = arith.constant 0 : index
    %60 = vector.load %arg4[%c0_44, %c0_45] : memref<144x144xf32, #tpu.memory_space<vmem>>, vector<144x144xf32>
    %c0_46 = arith.constant 0 : index
    %c0_47 = arith.constant 0 : index
    %61 = vector.load %arg12[%c0_46, %c0_47] : memref<144x256xf32, #tpu.memory_space<vmem>>, vector<144x256xf32>
    %cst_48 = arith.constant dense<0.000000e+00> : vector<144x256xf32>
    %62 = tpu.matmul %60, %61, %cst_48 {dimension_numbers = #tpu.dot_dimension_numbers<[1], [0], [0], [1], [0, 0, 1, 1], [], []>, precision = #tpu.contract_precision<fp32>} : vector<144x144xf32>, vector<144x256xf32>, vector<144x256xf32> -> vector<144x256xf32>
    %c0_49 = arith.constant 0 : index
    %c0_50 = arith.constant 0 : index
    %63 = vector.load %arg5[%c0_49, %c0_50] : memref<144x1xf32, #tpu.memory_space<vmem>>, vector<144x1xf32>
    %64 = vector.broadcast %63 : vector<144x1xf32> to vector<144x256xf32>
    %65 = arith.addf %62, %64 : vector<144x256xf32>
    %cst_51 = arith.constant 0.000000e+00 : f32
    %66 = vector.broadcast %cst_51 : f32 to vector<144x256xf32>
    %67 = arith.maximumf %65, %66 : vector<144x256xf32>
    %c0_52 = arith.constant 0 : index
    %c0_53 = arith.constant 0 : index
    %68 = vector.load %arg13[%c0_52, %c0_53] : memref<144x256xf32, #tpu.memory_space<vmem>>, vector<144x256xf32>
    tpu.vector_store %arg13[%c0_52, %c0_53], %67 {strides = array<i32>} : memref<144x256xf32, #tpu.memory_space<vmem>>, vector<144x256xf32>,
    %cst_54 = arith.constant 0.000000e+00 : f32
    %69 = vector.broadcast %cst_54 : f32 to vector<2x9x290xf32>
    %c0_55 = arith.constant 0 : index
    %c0_56 = arith.constant 0 : index
    %c0_57 = arith.constant 0 : index
    %70 = vector.load %arg14[%c0_55, %c0_56, %c0_57] : memref<2x9x290xf32, #tpu.memory_space<vmem>>, vector<2x9x290xf32>
    tpu.vector_store %arg14[%c0_55, %c0_56, %c0_57], %69 {strides = array<i32>} : memref<2x9x290xf32, #tpu.memory_space<vmem>>, vector<2x9x290xf32>,
    %c0_58 = arith.constant 0 : index
    %c0_59 = arith.constant 0 : index
    %71 = vector.load %arg13[%c0_58, %c0_59] : memref<144x256xf32, #tpu.memory_space<vmem>>, vector<16x256xf32>
    %cst_60 = arith.constant dense<0xFF800000> : vector<256xf32>
    %72 = vector.multi_reduction <maximumf>, %71, %cst_60 [0] : vector<16x256xf32> to vector<256xf32>
    %73 = vector.shape_cast %72 : vector<256xf32> to vector<1x256xf32>
    %c0_61 = arith.constant 0 : index
    %c0_62 = arith.constant 0 : index
    %c17_63 = arith.constant 17 : index
    %74 = vector.load %arg14[%c0_61, %c0_62, %c17_63] : memref<2x9x290xf32, #tpu.memory_space<vmem>>, vector<1x1x256xf32>
    %75 = vector.shape_cast %74 : vector<1x1x256xf32> to vector<1x256xf32>
    %76 = vector.shape_cast %73 : vector<1x256xf32> to vector<1x1x256xf32>
    tpu.vector_store %arg14[%c0_61, %c0_62, %c17_63], %76 {strides = array<i32>} : memref<2x9x290xf32, #tpu.memory_space<vmem>>, vector<1x1x256xf32>,
    %cst_64 = arith.constant dense<0.000000e+00> : vector<256xf32>
    %77 = vector.multi_reduction <add>, %71, %cst_64 [0] : vector<16x256xf32> to vector<256xf32>
    %78 = vector.shape_cast %77 : vector<256xf32> to vector<1x256xf32>
    %cst_65 = arith.constant 6.250000e-02 : f32
    %79 = vector.broadcast %cst_65 : f32 to vector<1x256xf32>
    %80 = arith.mulf %78, %79 : vector<1x256xf32>
    %c1_66 = arith.constant 1 : index
    %c0_67 = arith.constant 0 : index
    %c17_68 = arith.constant 17 : index
    %81 = vector.load %arg14[%c1_66, %c0_67, %c17_68] : memref<2x9x290xf32, #tpu.memory_space<vmem>>, vector<1x1x256xf32>
    %82 = vector.shape_cast %81 : vector<1x1x256xf32> to vector<1x256xf32>
    %83 = vector.shape_cast %80 : vector<1x256xf32> to vector<1x1x256xf32>
    tpu.vector_store %arg14[%c1_66, %c0_67, %c17_68], %83 {strides = array<i32>} : memref<2x9x290xf32, #tpu.memory_space<vmem>>, vector<1x1x256xf32>,
    %c16_69 = arith.constant 16 : index
    %c0_70 = arith.constant 0 : index
    %84 = vector.load %arg13[%c16_69, %c0_70] : memref<144x256xf32, #tpu.memory_space<vmem>>, vector<16x256xf32>
    %cst_71 = arith.constant dense<0xFF800000> : vector<256xf32>
    %85 = vector.multi_reduction <maximumf>, %84, %cst_71 [0] : vector<16x256xf32> to vector<256xf32>
    %86 = vector.shape_cast %85 : vector<256xf32> to vector<1x256xf32>
    %c0_72 = arith.constant 0 : index
    %c1_73 = arith.constant 1 : index
    %c17_74 = arith.constant 17 : index
    %87 = vector.load %arg14[%c0_72, %c1_73, %c17_74] : memref<2x9x290xf32, #tpu.memory_space<vmem>>, vector<1x1x256xf32>
    %88 = vector.shape_cast %87 : vector<1x1x256xf32> to vector<1x256xf32>
    %89 = vector.shape_cast %86 : vector<1x256xf32> to vector<1x1x256xf32>
    tpu.vector_store %arg14[%c0_72, %c1_73, %c17_74], %89 {strides = array<i32>} : memref<2x9x290xf32, #tpu.memory_space<vmem>>, vector<1x1x256xf32>,
    %cst_75 = arith.constant dense<0.000000e+00> : vector<256xf32>
    %90 = vector.multi_reduction <add>, %84, %cst_75 [0] : vector<16x256xf32> to vector<256xf32>
    %91 = vector.shape_cast %90 : vector<256xf32> to vector<1x256xf32>
    %cst_76 = arith.constant 6.250000e-02 : f32
    %92 = vector.broadcast %cst_76 : f32 to vector<1x256xf32>
    %93 = arith.mulf %91, %92 : vector<1x256xf32>
    %c1_77 = arith.constant 1 : index
    %c1_78 = arith.constant 1 : index
    %c17_79 = arith.constant 17 : index
    %94 = vector.load %arg14[%c1_77, %c1_78, %c17_79] : memref<2x9x290xf32, #tpu.memory_space<vmem>>, vector<1x1x256xf32>
    %95 = vector.shape_cast %94 : vector<1x1x256xf32> to vector<1x256xf32>
    %96 = vector.shape_cast %93 : vector<1x256xf32> to vector<1x1x256xf32>
    tpu.vector_store %arg14[%c1_77, %c1_78, %c17_79], %96 {strides = array<i32>} : memref<2x9x290xf32, #tpu.memory_space<vmem>>, vector<1x1x256xf32>,
    %c32_80 = arith.constant 32 : index
    %c0_81 = arith.constant 0 : index
    %97 = vector.load %arg13[%c32_80, %c0_81] : memref<144x256xf32, #tpu.memory_space<vmem>>, vector<16x256xf32>
    %cst_82 = arith.constant dense<0xFF800000> : vector<256xf32>
    %98 = vector.multi_reduction <maximumf>, %97, %cst_82 [0] : vector<16x256xf32> to vector<256xf32>
    %99 = vector.shape_cast %98 : vector<256xf32> to vector<1x256xf32>
    %c0_83 = arith.constant 0 : index
    %c2_84 = arith.constant 2 : index
    %c17_85 = arith.constant 17 : index
    %100 = vector.load %arg14[%c0_83, %c2_84, %c17_85] : memref<2x9x290xf32, #tpu.memory_space<vmem>>, vector<1x1x256xf32>
    %101 = vector.shape_cast %100 : vector<1x1x256xf32> to vector<1x256xf32>
    %102 = vector.shape_cast %99 : vector<1x256xf32> to vector<1x1x256xf32>
    tpu.vector_store %arg14[%c0_83, %c2_84, %c17_85], %102 {strides = array<i32>} : memref<2x9x290xf32, #tpu.memory_space<vmem>>, vector<1x1x256xf32>,
    %cst_86 = arith.constant dense<0.000000e+00> : vector<256xf32>
    %103 = vector.multi_reduction <add>, %97, %cst_86 [0] : vector<16x256xf32> to vector<256xf32>
    %104 = vector.shape_cast %103 : vector<256xf32> to vector<1x256xf32>
    %cst_87 = arith.constant 6.250000e-02 : f32
    %105 = vector.broadcast %cst_87 : f32 to vector<1x256xf32>
    %106 = arith.mulf %104, %105 : vector<1x256xf32>
    %c1_88 = arith.constant 1 : index
    %c2_89 = arith.constant 2 : index
    %c17_90 = arith.constant 17 : index
    %107 = vector.load %arg14[%c1_88, %c2_89, %c17_90] : memref<2x9x290xf32, #tpu.memory_space<vmem>>, vector<1x1x256xf32>
    %108 = vector.shape_cast %107 : vector<1x1x256xf32> to vector<1x256xf32>
    %109 = vector.shape_cast %106 : vector<1x256xf32> to vector<1x1x256xf32>
    tpu.vector_store %arg14[%c1_88, %c2_89, %c17_90], %109 {strides = array<i32>} : memref<2x9x290xf32, #tpu.memory_space<vmem>>, vector<1x1x256xf32>,
    %c48_91 = arith.constant 48 : index
    %c0_92 = arith.constant 0 : index
    %110 = vector.load %arg13[%c48_91, %c0_92] : memref<144x256xf32, #tpu.memory_space<vmem>>, vector<16x256xf32>
    %cst_93 = arith.constant dense<0xFF800000> : vector<256xf32>
    %111 = vector.multi_reduction <maximumf>, %110, %cst_93 [0] : vector<16x256xf32> to vector<256xf32>
    %112 = vector.shape_cast %111 : vector<256xf32> to vector<1x256xf32>
    %c0_94 = arith.constant 0 : index
    %c3 = arith.constant 3 : index
    %c17_95 = arith.constant 17 : index
    %113 = vector.load %arg14[%c0_94, %c3, %c17_95] : memref<2x9x290xf32, #tpu.memory_space<vmem>>, vector<1x1x256xf32>
    %114 = vector.shape_cast %113 : vector<1x1x256xf32> to vector<1x256xf32>
    %115 = vector.shape_cast %112 : vector<1x256xf32> to vector<1x1x256xf32>
    tpu.vector_store %arg14[%c0_94, %c3, %c17_95], %115 {strides = array<i32>} : memref<2x9x290xf32, #tpu.memory_space<vmem>>, vector<1x1x256xf32>,
    %cst_96 = arith.constant dense<0.000000e+00> : vector<256xf32>
    %116 = vector.multi_reduction <add>, %110, %cst_96 [0] : vector<16x256xf32> to vector<256xf32>
    %117 = vector.shape_cast %116 : vector<256xf32> to vector<1x256xf32>
    %cst_97 = arith.constant 6.250000e-02 : f32
    %118 = vector.broadcast %cst_97 : f32 to vector<1x256xf32>
    %119 = arith.mulf %117, %118 : vector<1x256xf32>
    %c1_98 = arith.constant 1 : index
    %c3_99 = arith.constant 3 : index
    %c17_100 = arith.constant 17 : index
    %120 = vector.load %arg14[%c1_98, %c3_99, %c17_100] : memref<2x9x290xf32, #tpu.memory_space<vmem>>, vector<1x1x256xf32>
    %121 = vector.shape_cast %120 : vector<1x1x256xf32> to vector<1x256xf32>
    %122 = vector.shape_cast %119 : vector<1x256xf32> to vector<1x1x256xf32>
    tpu.vector_store %arg14[%c1_98, %c3_99, %c17_100], %122 {strides = array<i32>} : memref<2x9x290xf32, #tpu.memory_space<vmem>>, vector<1x1x256xf32>,
    %c64_101 = arith.constant 64 : index
    %c0_102 = arith.constant 0 : index
    %123 = vector.load %arg13[%c64_101, %c0_102] : memref<144x256xf32, #tpu.memory_space<vmem>>, vector<16x256xf32>
    %cst_103 = arith.constant dense<0xFF800000> : vector<256xf32>
    %124 = vector.multi_reduction <maximumf>, %123, %cst_103 [0] : vector<16x256xf32> to vector<256xf32>
    %125 = vector.shape_cast %124 : vector<256xf32> to vector<1x256xf32>
    %c0_104 = arith.constant 0 : index
    %c4 = arith.constant 4 : index
    %c17_105 = arith.constant 17 : index
    %126 = vector.load %arg14[%c0_104, %c4, %c17_105] : memref<2x9x290xf32, #tpu.memory_space<vmem>>, vector<1x1x256xf32>
    %127 = vector.shape_cast %126 : vector<1x1x256xf32> to vector<1x256xf32>
    %128 = vector.shape_cast %125 : vector<1x256xf32> to vector<1x1x256xf32>
    tpu.vector_store %arg14[%c0_104, %c4, %c17_105], %128 {strides = array<i32>} : memref<2x9x290xf32, #tpu.memory_space<vmem>>, vector<1x1x256xf32>,
    %cst_106 = arith.constant dense<0.000000e+00> : vector<256xf32>
    %129 = vector.multi_reduction <add>, %123, %cst_106 [0] : vector<16x256xf32> to vector<256xf32>
    %130 = vector.shape_cast %129 : vector<256xf32> to vector<1x256xf32>
    %cst_107 = arith.constant 6.250000e-02 : f32
    %131 = vector.broadcast %cst_107 : f32 to vector<1x256xf32>
    %132 = arith.mulf %130, %131 : vector<1x256xf32>
    %c1_108 = arith.constant 1 : index
    %c4_109 = arith.constant 4 : index
    %c17_110 = arith.constant 17 : index
    %133 = vector.load %arg14[%c1_108, %c4_109, %c17_110] : memref<2x9x290xf32, #tpu.memory_space<vmem>>, vector<1x1x256xf32>
    %134 = vector.shape_cast %133 : vector<1x1x256xf32> to vector<1x256xf32>
    %135 = vector.shape_cast %132 : vector<1x256xf32> to vector<1x1x256xf32>
    tpu.vector_store %arg14[%c1_108, %c4_109, %c17_110], %135 {strides = array<i32>} : memref<2x9x290xf32, #tpu.memory_space<vmem>>, vector<1x1x256xf32>,
    %c80_111 = arith.constant 80 : index
    %c0_112 = arith.constant 0 : index
    %136 = vector.load %arg13[%c80_111, %c0_112] : memref<144x256xf32, #tpu.memory_space<vmem>>, vector<16x256xf32>
    %cst_113 = arith.constant dense<0xFF800000> : vector<256xf32>
    %137 = vector.multi_reduction <maximumf>, %136, %cst_113 [0] : vector<16x256xf32> to vector<256xf32>
    %138 = vector.shape_cast %137 : vector<256xf32> to vector<1x256xf32>
    %c0_114 = arith.constant 0 : index
    %c5 = arith.constant 5 : index
    %c17_115 = arith.constant 17 : index
    %139 = vector.load %arg14[%c0_114, %c5, %c17_115] : memref<2x9x290xf32, #tpu.memory_space<vmem>>, vector<1x1x256xf32>
    %140 = vector.shape_cast %139 : vector<1x1x256xf32> to vector<1x256xf32>
    %141 = vector.shape_cast %138 : vector<1x256xf32> to vector<1x1x256xf32>
    tpu.vector_store %arg14[%c0_114, %c5, %c17_115], %141 {strides = array<i32>} : memref<2x9x290xf32, #tpu.memory_space<vmem>>, vector<1x1x256xf32>,
    %cst_116 = arith.constant dense<0.000000e+00> : vector<256xf32>
    %142 = vector.multi_reduction <add>, %136, %cst_116 [0] : vector<16x256xf32> to vector<256xf32>
    %143 = vector.shape_cast %142 : vector<256xf32> to vector<1x256xf32>
    %cst_117 = arith.constant 6.250000e-02 : f32
    %144 = vector.broadcast %cst_117 : f32 to vector<1x256xf32>
    %145 = arith.mulf %143, %144 : vector<1x256xf32>
    %c1_118 = arith.constant 1 : index
    %c5_119 = arith.constant 5 : index
    %c17_120 = arith.constant 17 : index
    %146 = vector.load %arg14[%c1_118, %c5_119, %c17_120] : memref<2x9x290xf32, #tpu.memory_space<vmem>>, vector<1x1x256xf32>
    %147 = vector.shape_cast %146 : vector<1x1x256xf32> to vector<1x256xf32>
    %148 = vector.shape_cast %145 : vector<1x256xf32> to vector<1x1x256xf32>
    tpu.vector_store %arg14[%c1_118, %c5_119, %c17_120], %148 {strides = array<i32>} : memref<2x9x290xf32, #tpu.memory_space<vmem>>, vector<1x1x256xf32>,
    %c96_121 = arith.constant 96 : index
    %c0_122 = arith.constant 0 : index
    %149 = vector.load %arg13[%c96_121, %c0_122] : memref<144x256xf32, #tpu.memory_space<vmem>>, vector<16x256xf32>
    %cst_123 = arith.constant dense<0xFF800000> : vector<256xf32>
    %150 = vector.multi_reduction <maximumf>, %149, %cst_123 [0] : vector<16x256xf32> to vector<256xf32>
    %151 = vector.shape_cast %150 : vector<256xf32> to vector<1x256xf32>
    %c0_124 = arith.constant 0 : index
    %c6 = arith.constant 6 : index
    %c17_125 = arith.constant 17 : index
    %152 = vector.load %arg14[%c0_124, %c6, %c17_125] : memref<2x9x290xf32, #tpu.memory_space<vmem>>, vector<1x1x256xf32>
    %153 = vector.shape_cast %152 : vector<1x1x256xf32> to vector<1x256xf32>
    %154 = vector.shape_cast %151 : vector<1x256xf32> to vector<1x1x256xf32>
    tpu.vector_store %arg14[%c0_124, %c6, %c17_125], %154 {strides = array<i32>} : memref<2x9x290xf32, #tpu.memory_space<vmem>>, vector<1x1x256xf32>,
    %cst_126 = arith.constant dense<0.000000e+00> : vector<256xf32>
    %155 = vector.multi_reduction <add>, %149, %cst_126 [0] : vector<16x256xf32> to vector<256xf32>
    %156 = vector.shape_cast %155 : vector<256xf32> to vector<1x256xf32>
    %cst_127 = arith.constant 6.250000e-02 : f32
    %157 = vector.broadcast %cst_127 : f32 to vector<1x256xf32>
    %158 = arith.mulf %156, %157 : vector<1x256xf32>
    %c1_128 = arith.constant 1 : index
    %c6_129 = arith.constant 6 : index
    %c17_130 = arith.constant 17 : index
    %159 = vector.load %arg14[%c1_128, %c6_129, %c17_130] : memref<2x9x290xf32, #tpu.memory_space<vmem>>, vector<1x1x256xf32>
    %160 = vector.shape_cast %159 : vector<1x1x256xf32> to vector<1x256xf32>
    %161 = vector.shape_cast %158 : vector<1x256xf32> to vector<1x1x256xf32>
    tpu.vector_store %arg14[%c1_128, %c6_129, %c17_130], %161 {strides = array<i32>} : memref<2x9x290xf32, #tpu.memory_space<vmem>>, vector<1x1x256xf32>,
    %c112_131 = arith.constant 112 : index
    %c0_132 = arith.constant 0 : index
    %162 = vector.load %arg13[%c112_131, %c0_132] : memref<144x256xf32, #tpu.memory_space<vmem>>, vector<16x256xf32>
    %cst_133 = arith.constant dense<0xFF800000> : vector<256xf32>
    %163 = vector.multi_reduction <maximumf>, %162, %cst_133 [0] : vector<16x256xf32> to vector<256xf32>
    %164 = vector.shape_cast %163 : vector<256xf32> to vector<1x256xf32>
    %c0_134 = arith.constant 0 : index
    %c7 = arith.constant 7 : index
    %c17_135 = arith.constant 17 : index
    %165 = vector.load %arg14[%c0_134, %c7, %c17_135] : memref<2x9x290xf32, #tpu.memory_space<vmem>>, vector<1x1x256xf32>
    %166 = vector.shape_cast %165 : vector<1x1x256xf32> to vector<1x256xf32>
    %167 = vector.shape_cast %164 : vector<1x256xf32> to vector<1x1x256xf32>
    tpu.vector_store %arg14[%c0_134, %c7, %c17_135], %167 {strides = array<i32>} : memref<2x9x290xf32, #tpu.memory_space<vmem>>, vector<1x1x256xf32>,
    %cst_136 = arith.constant dense<0.000000e+00> : vector<256xf32>
    %168 = vector.multi_reduction <add>, %162, %cst_136 [0] : vector<16x256xf32> to vector<256xf32>
    %169 = vector.shape_cast %168 : vector<256xf32> to vector<1x256xf32>
    %cst_137 = arith.constant 6.250000e-02 : f32
    %170 = vector.broadcast %cst_137 : f32 to vector<1x256xf32>
    %171 = arith.mulf %169, %170 : vector<1x256xf32>
    %c1_138 = arith.constant 1 : index
    %c7_139 = arith.constant 7 : index
    %c17_140 = arith.constant 17 : index
    %172 = vector.load %arg14[%c1_138, %c7_139, %c17_140] : memref<2x9x290xf32, #tpu.memory_space<vmem>>, vector<1x1x256xf32>
    %173 = vector.shape_cast %172 : vector<1x1x256xf32> to vector<1x256xf32>
    %174 = vector.shape_cast %171 : vector<1x256xf32> to vector<1x1x256xf32>
    tpu.vector_store %arg14[%c1_138, %c7_139, %c17_140], %174 {strides = array<i32>} : memref<2x9x290xf32, #tpu.memory_space<vmem>>, vector<1x1x256xf32>,
    %c128_141 = arith.constant 128 : index
    %c0_142 = arith.constant 0 : index
    %175 = vector.load %arg13[%c128_141, %c0_142] : memref<144x256xf32, #tpu.memory_space<vmem>>, vector<16x256xf32>
    %cst_143 = arith.constant dense<0xFF800000> : vector<256xf32>
    %176 = vector.multi_reduction <maximumf>, %175, %cst_143 [0] : vector<16x256xf32> to vector<256xf32>
    %177 = vector.shape_cast %176 : vector<256xf32> to vector<1x256xf32>
    %c0_144 = arith.constant 0 : index
    %c8 = arith.constant 8 : index
    %c17_145 = arith.constant 17 : index
    %178 = vector.load %arg14[%c0_144, %c8, %c17_145] : memref<2x9x290xf32, #tpu.memory_space<vmem>>, vector<1x1x256xf32>
    %179 = vector.shape_cast %178 : vector<1x1x256xf32> to vector<1x256xf32>
    %180 = vector.shape_cast %177 : vector<1x256xf32> to vector<1x1x256xf32>
    tpu.vector_store %arg14[%c0_144, %c8, %c17_145], %180 {strides = array<i32>} : memref<2x9x290xf32, #tpu.memory_space<vmem>>, vector<1x1x256xf32>,
    %cst_146 = arith.constant dense<0.000000e+00> : vector<256xf32>
    %181 = vector.multi_reduction <add>, %175, %cst_146 [0] : vector<16x256xf32> to vector<256xf32>
    %182 = vector.shape_cast %181 : vector<256xf32> to vector<1x256xf32>
    %cst_147 = arith.constant 6.250000e-02 : f32
    %183 = vector.broadcast %cst_147 : f32 to vector<1x256xf32>
    %184 = arith.mulf %182, %183 : vector<1x256xf32>
    %c1_148 = arith.constant 1 : index
    %c8_149 = arith.constant 8 : index
    %c17_150 = arith.constant 17 : index
    %185 = vector.load %arg14[%c1_148, %c8_149, %c17_150] : memref<2x9x290xf32, #tpu.memory_space<vmem>>, vector<1x1x256xf32>
    %186 = vector.shape_cast %185 : vector<1x1x256xf32> to vector<1x256xf32>
    %187 = vector.shape_cast %184 : vector<1x256xf32> to vector<1x1x256xf32>
    tpu.vector_store %arg14[%c1_148, %c8_149, %c17_150], %187 {strides = array<i32>} : memref<2x9x290xf32, #tpu.memory_space<vmem>>, vector<1x1x256xf32>,
    %c0_151 = arith.constant 0 : index
    %c8_152 = arith.constant 8 : index
    %c0_153 = arith.constant 0 : index
    %188 = vector.load %arg14[%c0_151, %c8_152, %c0_153] : memref<2x9x290xf32, #tpu.memory_space<vmem>>, vector<1x1x256xf32>
    %189 = vector.shape_cast %188 : vector<1x1x256xf32> to vector<1x256xf32>
    %c1_154 = arith.constant 1 : index
    %c8_155 = arith.constant 8 : index
    %c0_156 = arith.constant 0 : index
    %190 = vector.load %arg14[%c1_154, %c8_155, %c0_156] : memref<2x9x290xf32, #tpu.memory_space<vmem>>, vector<1x1x256xf32>
    %191 = vector.shape_cast %190 : vector<1x1x256xf32> to vector<1x256xf32>
    %192 = arith.mulf %189, %25 : vector<1x256xf32>
    %193 = arith.mulf %191, %25 : vector<1x256xf32>
    %c0_157 = arith.constant 0 : index
    %c0_158 = arith.constant 0 : index
    %194 = memref.load %arg6[%c0_157, %c0_158] : memref<2x9xf32, #tpu.memory_space<smem>>
    %195 = vector.broadcast %194 : f32 to vector<1x256xf32>
    %196 = arith.mulf %195, %192 : vector<1x256xf32>
    %c1_159 = arith.constant 1 : index
    %c0_160 = arith.constant 0 : index
    %197 = memref.load %arg6[%c1_159, %c0_160] : memref<2x9xf32, #tpu.memory_space<smem>>
    %198 = vector.broadcast %197 : f32 to vector<1x256xf32>
    %199 = arith.mulf %198, %193 : vector<1x256xf32>
    %200 = arith.addf %196, %199 : vector<1x256xf32>
    %c0_161 = arith.constant 0 : index
    %c6_162 = arith.constant 6 : index
    %c1_163 = arith.constant 1 : index
    %201 = vector.load %arg14[%c0_161, %c6_162, %c1_163] : memref<2x9x290xf32, #tpu.memory_space<vmem>>, vector<1x1x256xf32>
    %202 = vector.shape_cast %201 : vector<1x1x256xf32> to vector<1x256xf32>
    %c1_164 = arith.constant 1 : index
    %c6_165 = arith.constant 6 : index
    %c1_166 = arith.constant 1 : index
    %203 = vector.load %arg14[%c1_164, %c6_165, %c1_166] : memref<2x9x290xf32, #tpu.memory_space<vmem>>, vector<1x1x256xf32>
    %204 = vector.shape_cast %203 : vector<1x1x256xf32> to vector<1x256xf32>
    %c0_167 = arith.constant 0 : index
    %c1_168 = arith.constant 1 : index
    %205 = memref.load %arg6[%c0_167, %c1_168] : memref<2x9xf32, #tpu.memory_space<smem>>
    %206 = vector.broadcast %205 : f32 to vector<1x256xf32>
    %207 = arith.mulf %206, %202 : vector<1x256xf32>
    %c1_169 = arith.constant 1 : index
    %c1_170 = arith.constant 1 : index
    %208 = memref.load %arg6[%c1_169, %c1_170] : memref<2x9xf32, #tpu.memory_space<smem>>
    %209 = vector.broadcast %208 : f32 to vector<1x256xf32>
    %210 = arith.mulf %209, %204 : vector<1x256xf32>
    %211 = arith.addf %207, %210 : vector<1x256xf32>
    %212 = arith.addf %200, %211 : vector<1x256xf32>
    %c0_171 = arith.constant 0 : index
    %c7_172 = arith.constant 7 : index
    %c1_173 = arith.constant 1 : index
    %213 = vector.load %arg14[%c0_171, %c7_172, %c1_173] : memref<2x9x290xf32, #tpu.memory_space<vmem>>, vector<1x1x256xf32>
    %214 = vector.shape_cast %213 : vector<1x1x256xf32> to vector<1x256xf32>
    %c1_174 = arith.constant 1 : index
    %c7_175 = arith.constant 7 : index
    %c1_176 = arith.constant 1 : index
    %215 = vector.load %arg14[%c1_174, %c7_175, %c1_176] : memref<2x9x290xf32, #tpu.memory_space<vmem>>, vector<1x1x256xf32>
    %216 = vector.shape_cast %215 : vector<1x1x256xf32> to vector<1x256xf32>
    %c0_177 = arith.constant 0 : index
    %c2_178 = arith.constant 2 : index
    %217 = memref.load %arg6[%c0_177, %c2_178] : memref<2x9xf32, #tpu.memory_space<smem>>
    %218 = vector.broadcast %217 : f32 to vector<1x256xf32>
    %219 = arith.mulf %218, %214 : vector<1x256xf32>
    %c1_179 = arith.constant 1 : index
    %c2_180 = arith.constant 2 : index
    %220 = memref.load %arg6[%c1_179, %c2_180] : memref<2x9xf32, #tpu.memory_space<smem>>
    %221 = vector.broadcast %220 : f32 to vector<1x256xf32>
    %222 = arith.mulf %221, %216 : vector<1x256xf32>
    %223 = arith.addf %219, %222 : vector<1x256xf32>
    %224 = arith.addf %212, %223 : vector<1x256xf32>
    %c0_181 = arith.constant 0 : index
    %c2_182 = arith.constant 2 : index
    %c16_183 = arith.constant 16 : index
    %225 = vector.load %arg14[%c0_181, %c2_182, %c16_183] : memref<2x9x290xf32, #tpu.memory_space<vmem>>, vector<1x1x256xf32>
    %226 = vector.shape_cast %225 : vector<1x1x256xf32> to vector<1x256xf32>
    %c1_184 = arith.constant 1 : index
    %c2_185 = arith.constant 2 : index
    %c16_186 = arith.constant 16 : index
    %227 = vector.load %arg14[%c1_184, %c2_185, %c16_186] : memref<2x9x290xf32, #tpu.memory_space<vmem>>, vector<1x1x256xf32>
    %228 = vector.shape_cast %227 : vector<1x1x256xf32> to vector<1x256xf32>
    %229 = arith.mulf %226, %25 : vector<1x256xf32>
    %230 = arith.mulf %228, %25 : vector<1x256xf32>
    %c0_187 = arith.constant 0 : index
    %c3_188 = arith.constant 3 : index
    %231 = memref.load %arg6[%c0_187, %c3_188] : memref<2x9xf32, #tpu.memory_space<smem>>
    %232 = vector.broadcast %231 : f32 to vector<1x256xf32>
    %233 = arith.mulf %232, %229 : vector<1x256xf32>
    %c1_189 = arith.constant 1 : index
    %c3_190 = arith.constant 3 : index
    %234 = memref.load %arg6[%c1_189, %c3_190] : memref<2x9xf32, #tpu.memory_space<smem>>
    %235 = vector.broadcast %234 : f32 to vector<1x256xf32>
    %236 = arith.mulf %235, %230 : vector<1x256xf32>
    %237 = arith.addf %233, %236 : vector<1x256xf32>
    %238 = arith.addf %224, %237 : vector<1x256xf32>
    %c0_191 = arith.constant 0 : index
    %c0_192 = arith.constant 0 : index
    %c17_193 = arith.constant 17 : index
    %239 = vector.load %arg14[%c0_191, %c0_192, %c17_193] : memref<2x9x290xf32, #tpu.memory_space<vmem>>, vector<1x1x256xf32>
    %240 = vector.shape_cast %239 : vector<1x1x256xf32> to vector<1x256xf32>
    %c1_194 = arith.constant 1 : index
    %c0_195 = arith.constant 0 : index
    %c17_196 = arith.constant 17 : index
    %241 = vector.load %arg14[%c1_194, %c0_195, %c17_196] : memref<2x9x290xf32, #tpu.memory_space<vmem>>, vector<1x1x256xf32>
    %242 = vector.shape_cast %241 : vector<1x1x256xf32> to vector<1x256xf32>
    %c0_197 = arith.constant 0 : index
    %c4_198 = arith.constant 4 : index
    %243 = memref.load %arg6[%c0_197, %c4_198] : memref<2x9xf32, #tpu.memory_space<smem>>
    %244 = vector.broadcast %243 : f32 to vector<1x256xf32>
    %245 = arith.mulf %244, %240 : vector<1x256xf32>
    %c1_199 = arith.constant 1 : index
    %c4_200 = arith.constant 4 : index
    %246 = memref.load %arg6[%c1_199, %c4_200] : memref<2x9xf32, #tpu.memory_space<smem>>
    %247 = vector.broadcast %246 : f32 to vector<1x256xf32>
    %248 = arith.mulf %247, %242 : vector<1x256xf32>
    %249 = arith.addf %245, %248 : vector<1x256xf32>
    %250 = arith.addf %238, %249 : vector<1x256xf32>
    %c0_201 = arith.constant 0 : index
    %c1_202 = arith.constant 1 : index
    %c17_203 = arith.constant 17 : index
    %251 = vector.load %arg14[%c0_201, %c1_202, %c17_203] : memref<2x9x290xf32, #tpu.memory_space<vmem>>, vector<1x1x256xf32>
    %252 = vector.shape_cast %251 : vector<1x1x256xf32> to vector<1x256xf32>
    %c1_204 = arith.constant 1 : index
    %c1_205 = arith.constant 1 : index
    %c17_206 = arith.constant 17 : index
    %253 = vector.load %arg14[%c1_204, %c1_205, %c17_206] : memref<2x9x290xf32, #tpu.memory_space<vmem>>, vector<1x1x256xf32>
    %254 = vector.shape_cast %253 : vector<1x1x256xf32> to vector<1x256xf32>
    %c0_207 = arith.constant 0 : index
    %c5_208 = arith.constant 5 : index
    %255 = memref.load %arg6[%c0_207, %c5_208] : memref<2x9xf32, #tpu.memory_space<smem>>
    %256 = vector.broadcast %255 : f32 to vector<1x256xf32>
    %257 = arith.mulf %256, %252 : vector<1x256xf32>
    %c1_209 = arith.constant 1 : index
    %c5_210 = arith.constant 5 : index
    %258 = memref.load %arg6[%c1_209, %c5_210] : memref<2x9xf32, #tpu.memory_space<smem>>
    %259 = vector.broadcast %258 : f32 to vector<1x256xf32>
    %260 = arith.mulf %259, %254 : vector<1x256xf32>
    %261 = arith.addf %257, %260 : vector<1x256xf32>
    %262 = arith.addf %250, %261 : vector<1x256xf32>
    %c0_211 = arith.constant 0 : index
    %c5_212 = arith.constant 5 : index
    %c16_213 = arith.constant 16 : index
    %263 = vector.load %arg14[%c0_211, %c5_212, %c16_213] : memref<2x9x290xf32, #tpu.memory_space<vmem>>, vector<1x1x256xf32>
    %264 = vector.shape_cast %263 : vector<1x1x256xf32> to vector<1x256xf32>
    %c1_214 = arith.constant 1 : index
    %c5_215 = arith.constant 5 : index
    %c16_216 = arith.constant 16 : index
    %265 = vector.load %arg14[%c1_214, %c5_215, %c16_216] : memref<2x9x290xf32, #tpu.memory_space<vmem>>, vector<1x1x256xf32>
    %266 = vector.shape_cast %265 : vector<1x1x256xf32> to vector<1x256xf32>
    %267 = arith.mulf %264, %25 : vector<1x256xf32>
    %268 = arith.mulf %266, %25 : vector<1x256xf32>
    %c0_217 = arith.constant 0 : index
    %c6_218 = arith.constant 6 : index
    %269 = memref.load %arg6[%c0_217, %c6_218] : memref<2x9xf32, #tpu.memory_space<smem>>
    %270 = vector.broadcast %269 : f32 to vector<1x256xf32>
    %271 = arith.mulf %270, %267 : vector<1x256xf32>
    %c1_219 = arith.constant 1 : index
    %c6_220 = arith.constant 6 : index
    %272 = memref.load %arg6[%c1_219, %c6_220] : memref<2x9xf32, #tpu.memory_space<smem>>
    %273 = vector.broadcast %272 : f32 to vector<1x256xf32>
    %274 = arith.mulf %273, %268 : vector<1x256xf32>
    %275 = arith.addf %271, %274 : vector<1x256xf32>
    %276 = arith.addf %262, %275 : vector<1x256xf32>
    %c0_221 = arith.constant 0 : index
    %c3_222 = arith.constant 3 : index
    %c17_223 = arith.constant 17 : index
    %277 = vector.load %arg14[%c0_221, %c3_222, %c17_223] : memref<2x9x290xf32, #tpu.memory_space<vmem>>, vector<1x1x256xf32>
    %278 = vector.shape_cast %277 : vector<1x1x256xf32> to vector<1x256xf32>
    %c1_224 = arith.constant 1 : index
    %c3_225 = arith.constant 3 : index
    %c17_226 = arith.constant 17 : index
    %279 = vector.load %arg14[%c1_224, %c3_225, %c17_226] : memref<2x9x290xf32, #tpu.memory_space<vmem>>, vector<1x1x256xf32>
    %280 = vector.shape_cast %279 : vector<1x1x256xf32> to vector<1x256xf32>
    %c0_227 = arith.constant 0 : index
    %c7_228 = arith.constant 7 : index
    %281 = memref.load %arg6[%c0_227, %c7_228] : memref<2x9xf32, #tpu.memory_space<smem>>
    %282 = vector.broadcast %281 : f32 to vector<1x256xf32>
    %283 = arith.mulf %282, %278 : vector<1x256xf32>
    %c1_229 = arith.constant 1 : index
    %c7_230 = arith.constant 7 : index
    %284 = memref.load %arg6[%c1_229, %c7_230] : memref<2x9xf32, #tpu.memory_space<smem>>
    %285 = vector.broadcast %284 : f32 to vector<1x256xf32>
    %286 = arith.mulf %285, %280 : vector<1x256xf32>
    %287 = arith.addf %283, %286 : vector<1x256xf32>
    %288 = arith.addf %276, %287 : vector<1x256xf32>
    %c0_231 = arith.constant 0 : index
    %c4_232 = arith.constant 4 : index
    %c17_233 = arith.constant 17 : index
    %289 = vector.load %arg14[%c0_231, %c4_232, %c17_233] : memref<2x9x290xf32, #tpu.memory_space<vmem>>, vector<1x1x256xf32>
    %290 = vector.shape_cast %289 : vector<1x1x256xf32> to vector<1x256xf32>
    %c1_234 = arith.constant 1 : index
    %c4_235 = arith.constant 4 : index
    %c17_236 = arith.constant 17 : index
    %291 = vector.load %arg14[%c1_234, %c4_235, %c17_236] : memref<2x9x290xf32, #tpu.memory_space<vmem>>, vector<1x1x256xf32>
    %292 = vector.shape_cast %291 : vector<1x1x256xf32> to vector<1x256xf32>
    %c0_237 = arith.constant 0 : index
    %c8_238 = arith.constant 8 : index
    %293 = memref.load %arg6[%c0_237, %c8_238] : memref<2x9xf32, #tpu.memory_space<smem>>
    %294 = vector.broadcast %293 : f32 to vector<1x256xf32>
    %295 = arith.mulf %294, %290 : vector<1x256xf32>
    %c1_239 = arith.constant 1 : index
    %c8_240 = arith.constant 8 : index
    %296 = memref.load %arg6[%c1_239, %c8_240] : memref<2x9xf32, #tpu.memory_space<smem>>
    %297 = vector.broadcast %296 : f32 to vector<1x256xf32>
    %298 = arith.mulf %297, %292 : vector<1x256xf32>
    %299 = arith.addf %295, %298 : vector<1x256xf32>
    %300 = arith.addf %288, %299 : vector<1x256xf32>
    %cst_241 = arith.constant 0.000000e+00 : f32
    %301 = vector.broadcast %cst_241 : f32 to vector<1x256xf32>
    %302 = arith.subf %301, %300 : vector<1x256xf32>
    %303 = math.exp %302 : vector<1x256xf32>
    %cst_242 = arith.constant 1.000000e+00 : f32
    %304 = vector.broadcast %cst_242 : f32 to vector<1x256xf32>
    %305 = arith.addf %304, %303 : vector<1x256xf32>
    %cst_243 = arith.constant 1.000000e+00 : f32
    %306 = vector.broadcast %cst_243 : f32 to vector<1x256xf32>
    %307 = arith.divf %306, %305 : vector<1x256xf32>
    %c0_244 = arith.constant 0 : index
    %c0_245 = arith.constant 0 : index
    %308 = vector.load %arg13[%c0_244, %c0_245] : memref<144x256xf32, #tpu.memory_space<vmem>>, vector<16x256xf32>
    %309 = vector.broadcast %24 : vector<16x1xf32> to vector<16x256xf32>
    %310 = arith.mulf %308, %309 : vector<16x256xf32>
    %311 = vector.broadcast %307 : vector<1x256xf32> to vector<16x256xf32>
    %312 = arith.mulf %310, %311 : vector<16x256xf32>
    %c0_246 = arith.constant 0 : index
    %c0_247 = arith.constant 0 : index
    %313 = vector.load %arg12[%c0_246, %c0_247] : memref<144x256xf32, #tpu.memory_space<vmem>>, vector<16x256xf32>
    tpu.vector_store %arg12[%c0_246, %c0_247], %312 {strides = array<i32>} : memref<144x256xf32, #tpu.memory_space<vmem>>, vector<16x256xf32>,
    %c0_248 = arith.constant 0 : index
    %c6_249 = arith.constant 6 : index
    %c1_250 = arith.constant 1 : index
    %314 = vector.load %arg14[%c0_248, %c6_249, %c1_250] : memref<2x9x290xf32, #tpu.memory_space<vmem>>, vector<1x1x256xf32>
    %315 = vector.shape_cast %314 : vector<1x1x256xf32> to vector<1x256xf32>
    %c1_251 = arith.constant 1 : index
    %c6_252 = arith.constant 6 : index
    %c1_253 = arith.constant 1 : index
    %316 = vector.load %arg14[%c1_251, %c6_252, %c1_253] : memref<2x9x290xf32, #tpu.memory_space<vmem>>, vector<1x1x256xf32>
    %317 = vector.shape_cast %316 : vector<1x1x256xf32> to vector<1x256xf32>
    %c0_254 = arith.constant 0 : index
    %c0_255 = arith.constant 0 : index
    %318 = memref.load %arg6[%c0_254, %c0_255] : memref<2x9xf32, #tpu.memory_space<smem>>
    %319 = vector.broadcast %318 : f32 to vector<1x256xf32>
    %320 = arith.mulf %319, %315 : vector<1x256xf32>
    %c1_256 = arith.constant 1 : index
    %c0_257 = arith.constant 0 : index
    %321 = memref.load %arg6[%c1_256, %c0_257] : memref<2x9xf32, #tpu.memory_space<smem>>
    %322 = vector.broadcast %321 : f32 to vector<1x256xf32>
    %323 = arith.mulf %322, %317 : vector<1x256xf32>
    %324 = arith.addf %320, %323 : vector<1x256xf32>
    %c0_258 = arith.constant 0 : index
    %c7_259 = arith.constant 7 : index
    %c1_260 = arith.constant 1 : index
    %325 = vector.load %arg14[%c0_258, %c7_259, %c1_260] : memref<2x9x290xf32, #tpu.memory_space<vmem>>, vector<1x1x256xf32>
    %326 = vector.shape_cast %325 : vector<1x1x256xf32> to vector<1x256xf32>
    %c1_261 = arith.constant 1 : index
    %c7_262 = arith.constant 7 : index
    %c1_263 = arith.constant 1 : index
    %327 = vector.load %arg14[%c1_261, %c7_262, %c1_263] : memref<2x9x290xf32, #tpu.memory_space<vmem>>, vector<1x1x256xf32>
    %328 = vector.shape_cast %327 : vector<1x1x256xf32> to vector<1x256xf32>
    %c0_264 = arith.constant 0 : index
    %c1_265 = arith.constant 1 : index
    %329 = memref.load %arg6[%c0_264, %c1_265] : memref<2x9xf32, #tpu.memory_space<smem>>
    %330 = vector.broadcast %329 : f32 to vector<1x256xf32>
    %331 = arith.mulf %330, %326 : vector<1x256xf32>
    %c1_266 = arith.constant 1 : index
    %c1_267 = arith.constant 1 : index
    %332 = memref.load %arg6[%c1_266, %c1_267] : memref<2x9xf32, #tpu.memory_space<smem>>
    %333 = vector.broadcast %332 : f32 to vector<1x256xf32>
    %334 = arith.mulf %333, %328 : vector<1x256xf32>
    %335 = arith.addf %331, %334 : vector<1x256xf32>
    %336 = arith.addf %324, %335 : vector<1x256xf32>
    %c0_268 = arith.constant 0 : index
    %c8_269 = arith.constant 8 : index
    %c1_270 = arith.constant 1 : index
    %337 = vector.load %arg14[%c0_268, %c8_269, %c1_270] : memref<2x9x290xf32, #tpu.memory_space<vmem>>, vector<1x1x256xf32>
    %338 = vector.shape_cast %337 : vector<1x1x256xf32> to vector<1x256xf32>
    %c1_271 = arith.constant 1 : index
    %c8_272 = arith.constant 8 : index
    %c1_273 = arith.constant 1 : index
    %339 = vector.load %arg14[%c1_271, %c8_272, %c1_273] : memref<2x9x290xf32, #tpu.memory_space<vmem>>, vector<1x1x256xf32>
    %340 = vector.shape_cast %339 : vector<1x1x256xf32> to vector<1x256xf32>
    %c0_274 = arith.constant 0 : index
    %c2_275 = arith.constant 2 : index
    %341 = memref.load %arg6[%c0_274, %c2_275] : memref<2x9xf32, #tpu.memory_space<smem>>
    %342 = vector.broadcast %341 : f32 to vector<1x256xf32>
    %343 = arith.mulf %342, %338 : vector<1x256xf32>
    %c1_276 = arith.constant 1 : index
    %c2_277 = arith.constant 2 : index
    %344 = memref.load %arg6[%c1_276, %c2_277] : memref<2x9xf32, #tpu.memory_space<smem>>
    %345 = vector.broadcast %344 : f32 to vector<1x256xf32>
    %346 = arith.mulf %345, %340 : vector<1x256xf32>
    %347 = arith.addf %343, %346 : vector<1x256xf32>
    %348 = arith.addf %336, %347 : vector<1x256xf32>
    %c0_278 = arith.constant 0 : index
    %c0_279 = arith.constant 0 : index
    %c17_280 = arith.constant 17 : index
    %349 = vector.load %arg14[%c0_278, %c0_279, %c17_280] : memref<2x9x290xf32, #tpu.memory_space<vmem>>, vector<1x1x256xf32>
    %350 = vector.shape_cast %349 : vector<1x1x256xf32> to vector<1x256xf32>
    %c1_281 = arith.constant 1 : index
    %c0_282 = arith.constant 0 : index
    %c17_283 = arith.constant 17 : index
    %351 = vector.load %arg14[%c1_281, %c0_282, %c17_283] : memref<2x9x290xf32, #tpu.memory_space<vmem>>, vector<1x1x256xf32>
    %352 = vector.shape_cast %351 : vector<1x1x256xf32> to vector<1x256xf32>
    %c0_284 = arith.constant 0 : index
    %c3_285 = arith.constant 3 : index
    %353 = memref.load %arg6[%c0_284, %c3_285] : memref<2x9xf32, #tpu.memory_space<smem>>
    %354 = vector.broadcast %353 : f32 to vector<1x256xf32>
    %355 = arith.mulf %354, %350 : vector<1x256xf32>
    %c1_286 = arith.constant 1 : index
    %c3_287 = arith.constant 3 : index
    %356 = memref.load %arg6[%c1_286, %c3_287] : memref<2x9xf32, #tpu.memory_space<smem>>
    %357 = vector.broadcast %356 : f32 to vector<1x256xf32>
    %358 = arith.mulf %357, %352 : vector<1x256xf32>
    %359 = arith.addf %355, %358 : vector<1x256xf32>
    %360 = arith.addf %348, %359 : vector<1x256xf32>
    %c0_288 = arith.constant 0 : index
    %c1_289 = arith.constant 1 : index
    %c17_290 = arith.constant 17 : index
    %361 = vector.load %arg14[%c0_288, %c1_289, %c17_290] : memref<2x9x290xf32, #tpu.memory_space<vmem>>, vector<1x1x256xf32>
    %362 = vector.shape_cast %361 : vector<1x1x256xf32> to vector<1x256xf32>
    %c1_291 = arith.constant 1 : index
    %c1_292 = arith.constant 1 : index
    %c17_293 = arith.constant 17 : index
    %363 = vector.load %arg14[%c1_291, %c1_292, %c17_293] : memref<2x9x290xf32, #tpu.memory_space<vmem>>, vector<1x1x256xf32>
    %364 = vector.shape_cast %363 : vector<1x1x256xf32> to vector<1x256xf32>
    %c0_294 = arith.constant 0 : index
    %c4_295 = arith.constant 4 : index
    %365 = memref.load %arg6[%c0_294, %c4_295] : memref<2x9xf32, #tpu.memory_space<smem>>
    %366 = vector.broadcast %365 : f32 to vector<1x256xf32>
    %367 = arith.mulf %366, %362 : vector<1x256xf32>
    %c1_296 = arith.constant 1 : index
    %c4_297 = arith.constant 4 : index
    %368 = memref.load %arg6[%c1_296, %c4_297] : memref<2x9xf32, #tpu.memory_space<smem>>
    %369 = vector.broadcast %368 : f32 to vector<1x256xf32>
    %370 = arith.mulf %369, %364 : vector<1x256xf32>
    %371 = arith.addf %367, %370 : vector<1x256xf32>
    %372 = arith.addf %360, %371 : vector<1x256xf32>
    %c0_298 = arith.constant 0 : index
    %c2_299 = arith.constant 2 : index
    %c17_300 = arith.constant 17 : index
    %373 = vector.load %arg14[%c0_298, %c2_299, %c17_300] : memref<2x9x290xf32, #tpu.memory_space<vmem>>, vector<1x1x256xf32>
    %374 = vector.shape_cast %373 : vector<1x1x256xf32> to vector<1x256xf32>
    %c1_301 = arith.constant 1 : index
    %c2_302 = arith.constant 2 : index
    %c17_303 = arith.constant 17 : index
    %375 = vector.load %arg14[%c1_301, %c2_302, %c17_303] : memref<2x9x290xf32, #tpu.memory_space<vmem>>, vector<1x1x256xf32>
    %376 = vector.shape_cast %375 : vector<1x1x256xf32> to vector<1x256xf32>
    %c0_304 = arith.constant 0 : index
    %c5_305 = arith.constant 5 : index
    %377 = memref.load %arg6[%c0_304, %c5_305] : memref<2x9xf32, #tpu.memory_space<smem>>
    %378 = vector.broadcast %377 : f32 to vector<1x256xf32>
    %379 = arith.mulf %378, %374 : vector<1x256xf32>
    %c1_306 = arith.constant 1 : index
    %c5_307 = arith.constant 5 : index
    %380 = memref.load %arg6[%c1_306, %c5_307] : memref<2x9xf32, #tpu.memory_space<smem>>
    %381 = vector.broadcast %380 : f32 to vector<1x256xf32>
    %382 = arith.mulf %381, %376 : vector<1x256xf32>
    %383 = arith.addf %379, %382 : vector<1x256xf32>
    %384 = arith.addf %372, %383 : vector<1x256xf32>
    %c0_308 = arith.constant 0 : index
    %c3_309 = arith.constant 3 : index
    %c17_310 = arith.constant 17 : index
    %385 = vector.load %arg14[%c0_308, %c3_309, %c17_310] : memref<2x9x290xf32, #tpu.memory_space<vmem>>, vector<1x1x256xf32>
    %386 = vector.shape_cast %385 : vector<1x1x256xf32> to vector<1x256xf32>
    %c1_311 = arith.constant 1 : index
    %c3_312 = arith.constant 3 : index
    %c17_313 = arith.constant 17 : index
    %387 = vector.load %arg14[%c1_311, %c3_312, %c17_313] : memref<2x9x290xf32, #tpu.memory_space<vmem>>, vector<1x1x256xf32>
    %388 = vector.shape_cast %387 : vector<1x1x256xf32> to vector<1x256xf32>
    %c0_314 = arith.constant 0 : index
    %c6_315 = arith.constant 6 : index
    %389 = memref.load %arg6[%c0_314, %c6_315] : memref<2x9xf32, #tpu.memory_space<smem>>
    %390 = vector.broadcast %389 : f32 to vector<1x256xf32>
    %391 = arith.mulf %390, %386 : vector<1x256xf32>
    %c1_316 = arith.constant 1 : index
    %c6_317 = arith.constant 6 : index
    %392 = memref.load %arg6[%c1_316, %c6_317] : memref<2x9xf32, #tpu.memory_space<smem>>
    %393 = vector.broadcast %392 : f32 to vector<1x256xf32>
    %394 = arith.mulf %393, %388 : vector<1x256xf32>
    %395 = arith.addf %391, %394 : vector<1x256xf32>
    %396 = arith.addf %384, %395 : vector<1x256xf32>
    %c0_318 = arith.constant 0 : index
    %c4_319 = arith.constant 4 : index
    %c17_320 = arith.constant 17 : index
    %397 = vector.load %arg14[%c0_318, %c4_319, %c17_320] : memref<2x9x290xf32, #tpu.memory_space<vmem>>, vector<1x1x256xf32>
    %398 = vector.shape_cast %397 : vector<1x1x256xf32> to vector<1x256xf32>
    %c1_321 = arith.constant 1 : index
    %c4_322 = arith.constant 4 : index
    %c17_323 = arith.constant 17 : index
    %399 = vector.load %arg14[%c1_321, %c4_322, %c17_323] : memref<2x9x290xf32, #tpu.memory_space<vmem>>, vector<1x1x256xf32>
    %400 = vector.shape_cast %399 : vector<1x1x256xf32> to vector<1x256xf32>
    %c0_324 = arith.constant 0 : index
    %c7_325 = arith.constant 7 : index
    %401 = memref.load %arg6[%c0_324, %c7_325] : memref<2x9xf32, #tpu.memory_space<smem>>
    %402 = vector.broadcast %401 : f32 to vector<1x256xf32>
    %403 = arith.mulf %402, %398 : vector<1x256xf32>
    %c1_326 = arith.constant 1 : index
    %c7_327 = arith.constant 7 : index
    %404 = memref.load %arg6[%c1_326, %c7_327] : memref<2x9xf32, #tpu.memory_space<smem>>
    %405 = vector.broadcast %404 : f32 to vector<1x256xf32>
    %406 = arith.mulf %405, %400 : vector<1x256xf32>
    %407 = arith.addf %403, %406 : vector<1x256xf32>
    %408 = arith.addf %396, %407 : vector<1x256xf32>
    %c0_328 = arith.constant 0 : index
    %c5_329 = arith.constant 5 : index
    %c17_330 = arith.constant 17 : index
    %409 = vector.load %arg14[%c0_328, %c5_329, %c17_330] : memref<2x9x290xf32, #tpu.memory_space<vmem>>, vector<1x1x256xf32>
    %410 = vector.shape_cast %409 : vector<1x1x256xf32> to vector<1x256xf32>
    %c1_331 = arith.constant 1 : index
    %c5_332 = arith.constant 5 : index
    %c17_333 = arith.constant 17 : index
    %411 = vector.load %arg14[%c1_331, %c5_332, %c17_333] : memref<2x9x290xf32, #tpu.memory_space<vmem>>, vector<1x1x256xf32>
    %412 = vector.shape_cast %411 : vector<1x1x256xf32> to vector<1x256xf32>
    %c0_334 = arith.constant 0 : index
    %c8_335 = arith.constant 8 : index
    %413 = memref.load %arg6[%c0_334, %c8_335] : memref<2x9xf32, #tpu.memory_space<smem>>
    %414 = vector.broadcast %413 : f32 to vector<1x256xf32>
    %415 = arith.mulf %414, %410 : vector<1x256xf32>
    %c1_336 = arith.constant 1 : index
    %c8_337 = arith.constant 8 : index
    %416 = memref.load %arg6[%c1_336, %c8_337] : memref<2x9xf32, #tpu.memory_space<smem>>
    %417 = vector.broadcast %416 : f32 to vector<1x256xf32>
    %418 = arith.mulf %417, %412 : vector<1x256xf32>
    %419 = arith.addf %415, %418 : vector<1x256xf32>
    %420 = arith.addf %408, %419 : vector<1x256xf32>
    %cst_338 = arith.constant 0.000000e+00 : f32
    %421 = vector.broadcast %cst_338 : f32 to vector<1x256xf32>
    %422 = arith.subf %421, %420 : vector<1x256xf32>
    %423 = math.exp %422 : vector<1x256xf32>
    %cst_339 = arith.constant 1.000000e+00 : f32
    %424 = vector.broadcast %cst_339 : f32 to vector<1x256xf32>
    %425 = arith.addf %424, %423 : vector<1x256xf32>
    %cst_340 = arith.constant 1.000000e+00 : f32
    %426 = vector.broadcast %cst_340 : f32 to vector<1x256xf32>
    %427 = arith.divf %426, %425 : vector<1x256xf32>
    %c16_341 = arith.constant 16 : index
    %c0_342 = arith.constant 0 : index
    %428 = vector.load %arg13[%c16_341, %c0_342] : memref<144x256xf32, #tpu.memory_space<vmem>>, vector<16x256xf32>
    %429 = vector.broadcast %24 : vector<16x1xf32> to vector<16x256xf32>
    %430 = arith.mulf %428, %429 : vector<16x256xf32>
    %431 = vector.broadcast %427 : vector<1x256xf32> to vector<16x256xf32>
    %432 = arith.mulf %430, %431 : vector<16x256xf32>
    %c16_343 = arith.constant 16 : index
    %c0_344 = arith.constant 0 : index
    %433 = vector.load %arg12[%c16_343, %c0_344] : memref<144x256xf32, #tpu.memory_space<vmem>>, vector<16x256xf32>
    tpu.vector_store %arg12[%c16_343, %c0_344], %432 {strides = array<i32>} : memref<144x256xf32, #tpu.memory_space<vmem>>, vector<16x256xf32>,
    %c0_345 = arith.constant 0 : index
    %c7_346 = arith.constant 7 : index
    %c1_347 = arith.constant 1 : index
    %434 = vector.load %arg14[%c0_345, %c7_346, %c1_347] : memref<2x9x290xf32, #tpu.memory_space<vmem>>, vector<1x1x256xf32>
    %435 = vector.shape_cast %434 : vector<1x1x256xf32> to vector<1x256xf32>
    %c1_348 = arith.constant 1 : index
    %c7_349 = arith.constant 7 : index
    %c1_350 = arith.constant 1 : index
    %436 = vector.load %arg14[%c1_348, %c7_349, %c1_350] : memref<2x9x290xf32, #tpu.memory_space<vmem>>, vector<1x1x256xf32>
    %437 = vector.shape_cast %436 : vector<1x1x256xf32> to vector<1x256xf32>
    %c0_351 = arith.constant 0 : index
    %c0_352 = arith.constant 0 : index
    %438 = memref.load %arg6[%c0_351, %c0_352] : memref<2x9xf32, #tpu.memory_space<smem>>
    %439 = vector.broadcast %438 : f32 to vector<1x256xf32>
    %440 = arith.mulf %439, %435 : vector<1x256xf32>
    %c1_353 = arith.constant 1 : index
    %c0_354 = arith.constant 0 : index
    %441 = memref.load %arg6[%c1_353, %c0_354] : memref<2x9xf32, #tpu.memory_space<smem>>
    %442 = vector.broadcast %441 : f32 to vector<1x256xf32>
    %443 = arith.mulf %442, %437 : vector<1x256xf32>
    %444 = arith.addf %440, %443 : vector<1x256xf32>
    %c0_355 = arith.constant 0 : index
    %c8_356 = arith.constant 8 : index
    %c1_357 = arith.constant 1 : index
    %445 = vector.load %arg14[%c0_355, %c8_356, %c1_357] : memref<2x9x290xf32, #tpu.memory_space<vmem>>, vector<1x1x256xf32>
    %446 = vector.shape_cast %445 : vector<1x1x256xf32> to vector<1x256xf32>
    %c1_358 = arith.constant 1 : index
    %c8_359 = arith.constant 8 : index
    %c1_360 = arith.constant 1 : index
    %447 = vector.load %arg14[%c1_358, %c8_359, %c1_360] : memref<2x9x290xf32, #tpu.memory_space<vmem>>, vector<1x1x256xf32>
    %448 = vector.shape_cast %447 : vector<1x1x256xf32> to vector<1x256xf32>
    %c0_361 = arith.constant 0 : index
    %c1_362 = arith.constant 1 : index
    %449 = memref.load %arg6[%c0_361, %c1_362] : memref<2x9xf32, #tpu.memory_space<smem>>
    %450 = vector.broadcast %449 : f32 to vector<1x256xf32>
    %451 = arith.mulf %450, %446 : vector<1x256xf32>
    %c1_363 = arith.constant 1 : index
    %c1_364 = arith.constant 1 : index
    %452 = memref.load %arg6[%c1_363, %c1_364] : memref<2x9xf32, #tpu.memory_space<smem>>
    %453 = vector.broadcast %452 : f32 to vector<1x256xf32>
    %454 = arith.mulf %453, %448 : vector<1x256xf32>
    %455 = arith.addf %451, %454 : vector<1x256xf32>
    %456 = arith.addf %444, %455 : vector<1x256xf32>
    %c0_365 = arith.constant 0 : index
    %c6_366 = arith.constant 6 : index
    %c2_367 = arith.constant 2 : index
    %457 = vector.load %arg14[%c0_365, %c6_366, %c2_367] : memref<2x9x290xf32, #tpu.memory_space<vmem>>, vector<1x1x256xf32>
    %458 = vector.shape_cast %457 : vector<1x1x256xf32> to vector<1x256xf32>
    %c1_368 = arith.constant 1 : index
    %c6_369 = arith.constant 6 : index
    %c2_370 = arith.constant 2 : index
    %459 = vector.load %arg14[%c1_368, %c6_369, %c2_370] : memref<2x9x290xf32, #tpu.memory_space<vmem>>, vector<1x1x256xf32>
    %460 = vector.shape_cast %459 : vector<1x1x256xf32> to vector<1x256xf32>
    %461 = arith.mulf %458, %26 : vector<1x256xf32>
    %462 = arith.mulf %460, %26 : vector<1x256xf32>
    %c0_371 = arith.constant 0 : index
    %c2_372 = arith.constant 2 : index
    %463 = memref.load %arg6[%c0_371, %c2_372] : memref<2x9xf32, #tpu.memory_space<smem>>
    %464 = vector.broadcast %463 : f32 to vector<1x256xf32>
    %465 = arith.mulf %464, %461 : vector<1x256xf32>
    %c1_373 = arith.constant 1 : index
    %c2_374 = arith.constant 2 : index
    %466 = memref.load %arg6[%c1_373, %c2_374] : memref<2x9xf32, #tpu.memory_space<smem>>
    %467 = vector.broadcast %466 : f32 to vector<1x256xf32>
    %468 = arith.mulf %467, %462 : vector<1x256xf32>
    %469 = arith.addf %465, %468 : vector<1x256xf32>
    %470 = arith.addf %456, %469 : vector<1x256xf32>
    %c0_375 = arith.constant 0 : index
    %c1_376 = arith.constant 1 : index
    %c17_377 = arith.constant 17 : index
    %471 = vector.load %arg14[%c0_375, %c1_376, %c17_377] : memref<2x9x290xf32, #tpu.memory_space<vmem>>, vector<1x1x256xf32>
    %472 = vector.shape_cast %471 : vector<1x1x256xf32> to vector<1x256xf32>
    %c1_378 = arith.constant 1 : index
    %c1_379 = arith.constant 1 : index
    %c17_380 = arith.constant 17 : index
    %473 = vector.load %arg14[%c1_378, %c1_379, %c17_380] : memref<2x9x290xf32, #tpu.memory_space<vmem>>, vector<1x1x256xf32>
    %474 = vector.shape_cast %473 : vector<1x1x256xf32> to vector<1x256xf32>
    %c0_381 = arith.constant 0 : index
    %c3_382 = arith.constant 3 : index
    %475 = memref.load %arg6[%c0_381, %c3_382] : memref<2x9xf32, #tpu.memory_space<smem>>
    %476 = vector.broadcast %475 : f32 to vector<1x256xf32>
    %477 = arith.mulf %476, %472 : vector<1x256xf32>
    %c1_383 = arith.constant 1 : index
    %c3_384 = arith.constant 3 : index
    %478 = memref.load %arg6[%c1_383, %c3_384] : memref<2x9xf32, #tpu.memory_space<smem>>
    %479 = vector.broadcast %478 : f32 to vector<1x256xf32>
    %480 = arith.mulf %479, %474 : vector<1x256xf32>
    %481 = arith.addf %477, %480 : vector<1x256xf32>
    %482 = arith.addf %470, %481 : vector<1x256xf32>
    %c0_385 = arith.constant 0 : index
    %c2_386 = arith.constant 2 : index
    %c17_387 = arith.constant 17 : index
    %483 = vector.load %arg14[%c0_385, %c2_386, %c17_387] : memref<2x9x290xf32, #tpu.memory_space<vmem>>, vector<1x1x256xf32>
    %484 = vector.shape_cast %483 : vector<1x1x256xf32> to vector<1x256xf32>
    %c1_388 = arith.constant 1 : index
    %c2_389 = arith.constant 2 : index
    %c17_390 = arith.constant 17 : index
    %485 = vector.load %arg14[%c1_388, %c2_389, %c17_390] : memref<2x9x290xf32, #tpu.memory_space<vmem>>, vector<1x1x256xf32>
    %486 = vector.shape_cast %485 : vector<1x1x256xf32> to vector<1x256xf32>
    %c0_391 = arith.constant 0 : index
    %c4_392 = arith.constant 4 : index
    %487 = memref.load %arg6[%c0_391, %c4_392] : memref<2x9xf32, #tpu.memory_space<smem>>
    %488 = vector.broadcast %487 : f32 to vector<1x256xf32>
    %489 = arith.mulf %488, %484 : vector<1x256xf32>
    %c1_393 = arith.constant 1 : index
    %c4_394 = arith.constant 4 : index
    %490 = memref.load %arg6[%c1_393, %c4_394] : memref<2x9xf32, #tpu.memory_space<smem>>
    %491 = vector.broadcast %490 : f32 to vector<1x256xf32>
    %492 = arith.mulf %491, %486 : vector<1x256xf32>
    %493 = arith.addf %489, %492 : vector<1x256xf32>
    %494 = arith.addf %482, %493 : vector<1x256xf32>
    %c0_395 = arith.constant 0 : index
    %c0_396 = arith.constant 0 : index
    %c18_397 = arith.constant 18 : index
    %495 = vector.load %arg14[%c0_395, %c0_396, %c18_397] : memref<2x9x290xf32, #tpu.memory_space<vmem>>, vector<1x1x256xf32>
    %496 = vector.shape_cast %495 : vector<1x1x256xf32> to vector<1x256xf32>
    %c1_398 = arith.constant 1 : index
    %c0_399 = arith.constant 0 : index
    %c18_400 = arith.constant 18 : index
    %497 = vector.load %arg14[%c1_398, %c0_399, %c18_400] : memref<2x9x290xf32, #tpu.memory_space<vmem>>, vector<1x1x256xf32>
    %498 = vector.shape_cast %497 : vector<1x1x256xf32> to vector<1x256xf32>
    %499 = arith.mulf %496, %26 : vector<1x256xf32>
    %500 = arith.mulf %498, %26 : vector<1x256xf32>
    %c0_401 = arith.constant 0 : index
    %c5_402 = arith.constant 5 : index
    %501 = memref.load %arg6[%c0_401, %c5_402] : memref<2x9xf32, #tpu.memory_space<smem>>
    %502 = vector.broadcast %501 : f32 to vector<1x256xf32>
    %503 = arith.mulf %502, %499 : vector<1x256xf32>
    %c1_403 = arith.constant 1 : index
    %c5_404 = arith.constant 5 : index
    %504 = memref.load %arg6[%c1_403, %c5_404] : memref<2x9xf32, #tpu.memory_space<smem>>
    %505 = vector.broadcast %504 : f32 to vector<1x256xf32>
    %506 = arith.mulf %505, %500 : vector<1x256xf32>
    %507 = arith.addf %503, %506 : vector<1x256xf32>
    %508 = arith.addf %494, %507 : vector<1x256xf32>
    %c0_405 = arith.constant 0 : index
    %c4_406 = arith.constant 4 : index
    %c17_407 = arith.constant 17 : index
    %509 = vector.load %arg14[%c0_405, %c4_406, %c17_407] : memref<2x9x290xf32, #tpu.memory_space<vmem>>, vector<1x1x256xf32>
    %510 = vector.shape_cast %509 : vector<1x1x256xf32> to vector<1x256xf32>
    %c1_408 = arith.constant 1 : index
    %c4_409 = arith.constant 4 : index
    %c17_410 = arith.constant 17 : index
    %511 = vector.load %arg14[%c1_408, %c4_409, %c17_410] : memref<2x9x290xf32, #tpu.memory_space<vmem>>, vector<1x1x256xf32>
    %512 = vector.shape_cast %511 : vector<1x1x256xf32> to vector<1x256xf32>
    %c0_411 = arith.constant 0 : index
    %c6_412 = arith.constant 6 : index
    %513 = memref.load %arg6[%c0_411, %c6_412] : memref<2x9xf32, #tpu.memory_space<smem>>
    %514 = vector.broadcast %513 : f32 to vector<1x256xf32>
    %515 = arith.mulf %514, %510 : vector<1x256xf32>
    %c1_413 = arith.constant 1 : index
    %c6_414 = arith.constant 6 : index
    %516 = memref.load %arg6[%c1_413, %c6_414] : memref<2x9xf32, #tpu.memory_space<smem>>
    %517 = vector.broadcast %516 : f32 to vector<1x256xf32>
    %518 = arith.mulf %517, %512 : vector<1x256xf32>
    %519 = arith.addf %515, %518 : vector<1x256xf32>
    %520 = arith.addf %508, %519 : vector<1x256xf32>
    %c0_415 = arith.constant 0 : index
    %c5_416 = arith.constant 5 : index
    %c17_417 = arith.constant 17 : index
    %521 = vector.load %arg14[%c0_415, %c5_416, %c17_417] : memref<2x9x290xf32, #tpu.memory_space<vmem>>, vector<1x1x256xf32>
    %522 = vector.shape_cast %521 : vector<1x1x256xf32> to vector<1x256xf32>
    %c1_418 = arith.constant 1 : index
    %c5_419 = arith.constant 5 : index
    %c17_420 = arith.constant 17 : index
    %523 = vector.load %arg14[%c1_418, %c5_419, %c17_420] : memref<2x9x290xf32, #tpu.memory_space<vmem>>, vector<1x1x256xf32>
    %524 = vector.shape_cast %523 : vector<1x1x256xf32> to vector<1x256xf32>
    %c0_421 = arith.constant 0 : index
    %c7_422 = arith.constant 7 : index
    %525 = memref.load %arg6[%c0_421, %c7_422] : memref<2x9xf32, #tpu.memory_space<smem>>
    %526 = vector.broadcast %525 : f32 to vector<1x256xf32>
    %527 = arith.mulf %526, %522 : vector<1x256xf32>
    %c1_423 = arith.constant 1 : index
    %c7_424 = arith.constant 7 : index
    %528 = memref.load %arg6[%c1_423, %c7_424] : memref<2x9xf32, #tpu.memory_space<smem>>
    %529 = vector.broadcast %528 : f32 to vector<1x256xf32>
    %530 = arith.mulf %529, %524 : vector<1x256xf32>
    %531 = arith.addf %527, %530 : vector<1x256xf32>
    %532 = arith.addf %520, %531 : vector<1x256xf32>
    %c0_425 = arith.constant 0 : index
    %c3_426 = arith.constant 3 : index
    %c18_427 = arith.constant 18 : index
    %533 = vector.load %arg14[%c0_425, %c3_426, %c18_427] : memref<2x9x290xf32, #tpu.memory_space<vmem>>, vector<1x1x256xf32>
    %534 = vector.shape_cast %533 : vector<1x1x256xf32> to vector<1x256xf32>
    %c1_428 = arith.constant 1 : index
    %c3_429 = arith.constant 3 : index
    %c18_430 = arith.constant 18 : index
    %535 = vector.load %arg14[%c1_428, %c3_429, %c18_430] : memref<2x9x290xf32, #tpu.memory_space<vmem>>, vector<1x1x256xf32>
    %536 = vector.shape_cast %535 : vector<1x1x256xf32> to vector<1x256xf32>
    %537 = arith.mulf %534, %26 : vector<1x256xf32>
    %538 = arith.mulf %536, %26 : vector<1x256xf32>
    %c0_431 = arith.constant 0 : index
    %c8_432 = arith.constant 8 : index
    %539 = memref.load %arg6[%c0_431, %c8_432] : memref<2x9xf32, #tpu.memory_space<smem>>
    %540 = vector.broadcast %539 : f32 to vector<1x256xf32>
    %541 = arith.mulf %540, %537 : vector<1x256xf32>
    %c1_433 = arith.constant 1 : index
    %c8_434 = arith.constant 8 : index
    %542 = memref.load %arg6[%c1_433, %c8_434] : memref<2x9xf32, #tpu.memory_space<smem>>
    %543 = vector.broadcast %542 : f32 to vector<1x256xf32>
    %544 = arith.mulf %543, %538 : vector<1x256xf32>
    %545 = arith.addf %541, %544 : vector<1x256xf32>
    %546 = arith.addf %532, %545 : vector<1x256xf32>
    %cst_435 = arith.constant 0.000000e+00 : f32
    %547 = vector.broadcast %cst_435 : f32 to vector<1x256xf32>
    %548 = arith.subf %547, %546 : vector<1x256xf32>
    %549 = math.exp %548 : vector<1x256xf32>
    %cst_436 = arith.constant 1.000000e+00 : f32
    %550 = vector.broadcast %cst_436 : f32 to vector<1x256xf32>
    %551 = arith.addf %550, %549 : vector<1x256xf32>
    %cst_437 = arith.constant 1.000000e+00 : f32
    %552 = vector.broadcast %cst_437 : f32 to vector<1x256xf32>
    %553 = arith.divf %552, %551 : vector<1x256xf32>
    %c32_438 = arith.constant 32 : index
    %c0_439 = arith.constant 0 : index
    %554 = vector.load %arg13[%c32_438, %c0_439] : memref<144x256xf32, #tpu.memory_space<vmem>>, vector<16x256xf32>
    %555 = vector.broadcast %24 : vector<16x1xf32> to vector<16x256xf32>
    %556 = arith.mulf %554, %555 : vector<16x256xf32>
    %557 = vector.broadcast %553 : vector<1x256xf32> to vector<16x256xf32>
    %558 = arith.mulf %556, %557 : vector<16x256xf32>
    %c32_440 = arith.constant 32 : index
    %c0_441 = arith.constant 0 : index
    %559 = vector.load %arg12[%c32_440, %c0_441] : memref<144x256xf32, #tpu.memory_space<vmem>>, vector<16x256xf32>
    tpu.vector_store %arg12[%c32_440, %c0_441], %558 {strides = array<i32>} : memref<144x256xf32, #tpu.memory_space<vmem>>, vector<16x256xf32>,
    %c0_442 = arith.constant 0 : index
    %c2_443 = arith.constant 2 : index
    %c16_444 = arith.constant 16 : index
    %560 = vector.load %arg14[%c0_442, %c2_443, %c16_444] : memref<2x9x290xf32, #tpu.memory_space<vmem>>, vector<1x1x256xf32>
    %561 = vector.shape_cast %560 : vector<1x1x256xf32> to vector<1x256xf32>
    %c1_445 = arith.constant 1 : index
    %c2_446 = arith.constant 2 : index
    %c16_447 = arith.constant 16 : index
    %562 = vector.load %arg14[%c1_445, %c2_446, %c16_447] : memref<2x9x290xf32, #tpu.memory_space<vmem>>, vector<1x1x256xf32>
    %563 = vector.shape_cast %562 : vector<1x1x256xf32> to vector<1x256xf32>
    %564 = arith.mulf %561, %25 : vector<1x256xf32>
    %565 = arith.mulf %563, %25 : vector<1x256xf32>
    %c0_448 = arith.constant 0 : index
    %c0_449 = arith.constant 0 : index
    %566 = memref.load %arg6[%c0_448, %c0_449] : memref<2x9xf32, #tpu.memory_space<smem>>
    %567 = vector.broadcast %566 : f32 to vector<1x256xf32>
    %568 = arith.mulf %567, %564 : vector<1x256xf32>
    %c1_450 = arith.constant 1 : index
    %c0_451 = arith.constant 0 : index
    %569 = memref.load %arg6[%c1_450, %c0_451] : memref<2x9xf32, #tpu.memory_space<smem>>
    %570 = vector.broadcast %569 : f32 to vector<1x256xf32>
    %571 = arith.mulf %570, %565 : vector<1x256xf32>
    %572 = arith.addf %568, %571 : vector<1x256xf32>
    %c0_452 = arith.constant 0 : index
    %c0_453 = arith.constant 0 : index
    %c17_454 = arith.constant 17 : index
    %573 = vector.load %arg14[%c0_452, %c0_453, %c17_454] : memref<2x9x290xf32, #tpu.memory_space<vmem>>, vector<1x1x256xf32>
    %574 = vector.shape_cast %573 : vector<1x1x256xf32> to vector<1x256xf32>
    %c1_455 = arith.constant 1 : index
    %c0_456 = arith.constant 0 : index
    %c17_457 = arith.constant 17 : index
    %575 = vector.load %arg14[%c1_455, %c0_456, %c17_457] : memref<2x9x290xf32, #tpu.memory_space<vmem>>, vector<1x1x256xf32>
    %576 = vector.shape_cast %575 : vector<1x1x256xf32> to vector<1x256xf32>
    %c0_458 = arith.constant 0 : index
    %c1_459 = arith.constant 1 : index
    %577 = memref.load %arg6[%c0_458, %c1_459] : memref<2x9xf32, #tpu.memory_space<smem>>
    %578 = vector.broadcast %577 : f32 to vector<1x256xf32>
    %579 = arith.mulf %578, %574 : vector<1x256xf32>
    %c1_460 = arith.constant 1 : index
    %c1_461 = arith.constant 1 : index
    %580 = memref.load %arg6[%c1_460, %c1_461] : memref<2x9xf32, #tpu.memory_space<smem>>
    %581 = vector.broadcast %580 : f32 to vector<1x256xf32>
    %582 = arith.mulf %581, %576 : vector<1x256xf32>
    %583 = arith.addf %579, %582 : vector<1x256xf32>
    %584 = arith.addf %572, %583 : vector<1x256xf32>
    %c0_462 = arith.constant 0 : index
    %c1_463 = arith.constant 1 : index
    %c17_464 = arith.constant 17 : index
    %585 = vector.load %arg14[%c0_462, %c1_463, %c17_464] : memref<2x9x290xf32, #tpu.memory_space<vmem>>, vector<1x1x256xf32>
    %586 = vector.shape_cast %585 : vector<1x1x256xf32> to vector<1x256xf32>
    %c1_465 = arith.constant 1 : index
    %c1_466 = arith.constant 1 : index
    %c17_467 = arith.constant 17 : index
    %587 = vector.load %arg14[%c1_465, %c1_466, %c17_467] : memref<2x9x290xf32, #tpu.memory_space<vmem>>, vector<1x1x256xf32>
    %588 = vector.shape_cast %587 : vector<1x1x256xf32> to vector<1x256xf32>
    %c0_468 = arith.constant 0 : index
    %c2_469 = arith.constant 2 : index
    %589 = memref.load %arg6[%c0_468, %c2_469] : memref<2x9xf32, #tpu.memory_space<smem>>
    %590 = vector.broadcast %589 : f32 to vector<1x256xf32>
    %591 = arith.mulf %590, %586 : vector<1x256xf32>
    %c1_470 = arith.constant 1 : index
    %c2_471 = arith.constant 2 : index
    %592 = memref.load %arg6[%c1_470, %c2_471] : memref<2x9xf32, #tpu.memory_space<smem>>
    %593 = vector.broadcast %592 : f32 to vector<1x256xf32>
    %594 = arith.mulf %593, %588 : vector<1x256xf32>
    %595 = arith.addf %591, %594 : vector<1x256xf32>
    %596 = arith.addf %584, %595 : vector<1x256xf32>
    %c0_472 = arith.constant 0 : index
    %c5_473 = arith.constant 5 : index
    %c16_474 = arith.constant 16 : index
    %597 = vector.load %arg14[%c0_472, %c5_473, %c16_474] : memref<2x9x290xf32, #tpu.memory_space<vmem>>, vector<1x1x256xf32>
    %598 = vector.shape_cast %597 : vector<1x1x256xf32> to vector<1x256xf32>
    %c1_475 = arith.constant 1 : index
    %c5_476 = arith.constant 5 : index
    %c16_477 = arith.constant 16 : index
    %599 = vector.load %arg14[%c1_475, %c5_476, %c16_477] : memref<2x9x290xf32, #tpu.memory_space<vmem>>, vector<1x1x256xf32>
    %600 = vector.shape_cast %599 : vector<1x1x256xf32> to vector<1x256xf32>
    %601 = arith.mulf %598, %25 : vector<1x256xf32>
    %602 = arith.mulf %600, %25 : vector<1x256xf32>
    %c0_478 = arith.constant 0 : index
    %c3_479 = arith.constant 3 : index
    %603 = memref.load %arg6[%c0_478, %c3_479] : memref<2x9xf32, #tpu.memory_space<smem>>
    %604 = vector.broadcast %603 : f32 to vector<1x256xf32>
    %605 = arith.mulf %604, %601 : vector<1x256xf32>
    %c1_480 = arith.constant 1 : index
    %c3_481 = arith.constant 3 : index
    %606 = memref.load %arg6[%c1_480, %c3_481] : memref<2x9xf32, #tpu.memory_space<smem>>
    %607 = vector.broadcast %606 : f32 to vector<1x256xf32>
    %608 = arith.mulf %607, %602 : vector<1x256xf32>
    %609 = arith.addf %605, %608 : vector<1x256xf32>
    %610 = arith.addf %596, %609 : vector<1x256xf32>
    %c0_482 = arith.constant 0 : index
    %c3_483 = arith.constant 3 : index
    %c17_484 = arith.constant 17 : index
    %611 = vector.load %arg14[%c0_482, %c3_483, %c17_484] : memref<2x9x290xf32, #tpu.memory_space<vmem>>, vector<1x1x256xf32>
    %612 = vector.shape_cast %611 : vector<1x1x256xf32> to vector<1x256xf32>
    %c1_485 = arith.constant 1 : index
    %c3_486 = arith.constant 3 : index
    %c17_487 = arith.constant 17 : index
    %613 = vector.load %arg14[%c1_485, %c3_486, %c17_487] : memref<2x9x290xf32, #tpu.memory_space<vmem>>, vector<1x1x256xf32>
    %614 = vector.shape_cast %613 : vector<1x1x256xf32> to vector<1x256xf32>
    %c0_488 = arith.constant 0 : index
    %c4_489 = arith.constant 4 : index
    %615 = memref.load %arg6[%c0_488, %c4_489] : memref<2x9xf32, #tpu.memory_space<smem>>
    %616 = vector.broadcast %615 : f32 to vector<1x256xf32>
    %617 = arith.mulf %616, %612 : vector<1x256xf32>
    %c1_490 = arith.constant 1 : index
    %c4_491 = arith.constant 4 : index
    %618 = memref.load %arg6[%c1_490, %c4_491] : memref<2x9xf32, #tpu.memory_space<smem>>
    %619 = vector.broadcast %618 : f32 to vector<1x256xf32>
    %620 = arith.mulf %619, %614 : vector<1x256xf32>
    %621 = arith.addf %617, %620 : vector<1x256xf32>
    %622 = arith.addf %610, %621 : vector<1x256xf32>
    %c0_492 = arith.constant 0 : index
    %c4_493 = arith.constant 4 : index
    %c17_494 = arith.constant 17 : index
    %623 = vector.load %arg14[%c0_492, %c4_493, %c17_494] : memref<2x9x290xf32, #tpu.memory_space<vmem>>, vector<1x1x256xf32>
    %624 = vector.shape_cast %623 : vector<1x1x256xf32> to vector<1x256xf32>
    %c1_495 = arith.constant 1 : index
    %c4_496 = arith.constant 4 : index
    %c17_497 = arith.constant 17 : index
    %625 = vector.load %arg14[%c1_495, %c4_496, %c17_497] : memref<2x9x290xf32, #tpu.memory_space<vmem>>, vector<1x1x256xf32>
    %626 = vector.shape_cast %625 : vector<1x1x256xf32> to vector<1x256xf32>
    %c0_498 = arith.constant 0 : index
    %c5_499 = arith.constant 5 : index
    %627 = memref.load %arg6[%c0_498, %c5_499] : memref<2x9xf32, #tpu.memory_space<smem>>
    %628 = vector.broadcast %627 : f32 to vector<1x256xf32>
    %629 = arith.mulf %628, %624 : vector<1x256xf32>
    %c1_500 = arith.constant 1 : index
    %c5_501 = arith.constant 5 : index
    %630 = memref.load %arg6[%c1_500, %c5_501] : memref<2x9xf32, #tpu.memory_space<smem>>
    %631 = vector.broadcast %630 : f32 to vector<1x256xf32>
    %632 = arith.mulf %631, %626 : vector<1x256xf32>
    %633 = arith.addf %629, %632 : vector<1x256xf32>
    %634 = arith.addf %622, %633 : vector<1x256xf32>
    %c0_502 = arith.constant 0 : index
    %c8_503 = arith.constant 8 : index
    %c16_504 = arith.constant 16 : index
    %635 = vector.load %arg14[%c0_502, %c8_503, %c16_504] : memref<2x9x290xf32, #tpu.memory_space<vmem>>, vector<1x1x256xf32>
    %636 = vector.shape_cast %635 : vector<1x1x256xf32> to vector<1x256xf32>
    %c1_505 = arith.constant 1 : index
    %c8_506 = arith.constant 8 : index
    %c16_507 = arith.constant 16 : index
    %637 = vector.load %arg14[%c1_505, %c8_506, %c16_507] : memref<2x9x290xf32, #tpu.memory_space<vmem>>, vector<1x1x256xf32>
    %638 = vector.shape_cast %637 : vector<1x1x256xf32> to vector<1x256xf32>
    %639 = arith.mulf %636, %25 : vector<1x256xf32>
    %640 = arith.mulf %638, %25 : vector<1x256xf32>
    %c0_508 = arith.constant 0 : index
    %c6_509 = arith.constant 6 : index
    %641 = memref.load %arg6[%c0_508, %c6_509] : memref<2x9xf32, #tpu.memory_space<smem>>
    %642 = vector.broadcast %641 : f32 to vector<1x256xf32>
    %643 = arith.mulf %642, %639 : vector<1x256xf32>
    %c1_510 = arith.constant 1 : index
    %c6_511 = arith.constant 6 : index
    %644 = memref.load %arg6[%c1_510, %c6_511] : memref<2x9xf32, #tpu.memory_space<smem>>
    %645 = vector.broadcast %644 : f32 to vector<1x256xf32>
    %646 = arith.mulf %645, %640 : vector<1x256xf32>
    %647 = arith.addf %643, %646 : vector<1x256xf32>
    %648 = arith.addf %634, %647 : vector<1x256xf32>
    %c0_512 = arith.constant 0 : index
    %c6_513 = arith.constant 6 : index
    %c17_514 = arith.constant 17 : index
    %649 = vector.load %arg14[%c0_512, %c6_513, %c17_514] : memref<2x9x290xf32, #tpu.memory_space<vmem>>, vector<1x1x256xf32>
    %650 = vector.shape_cast %649 : vector<1x1x256xf32> to vector<1x256xf32>
    %c1_515 = arith.constant 1 : index
    %c6_516 = arith.constant 6 : index
    %c17_517 = arith.constant 17 : index
    %651 = vector.load %arg14[%c1_515, %c6_516, %c17_517] : memref<2x9x290xf32, #tpu.memory_space<vmem>>, vector<1x1x256xf32>
    %652 = vector.shape_cast %651 : vector<1x1x256xf32> to vector<1x256xf32>
    %c0_518 = arith.constant 0 : index
    %c7_519 = arith.constant 7 : index
    %653 = memref.load %arg6[%c0_518, %c7_519] : memref<2x9xf32, #tpu.memory_space<smem>>
    %654 = vector.broadcast %653 : f32 to vector<1x256xf32>
    %655 = arith.mulf %654, %650 : vector<1x256xf32>
    %c1_520 = arith.constant 1 : index
    %c7_521 = arith.constant 7 : index
    %656 = memref.load %arg6[%c1_520, %c7_521] : memref<2x9xf32, #tpu.memory_space<smem>>
    %657 = vector.broadcast %656 : f32 to vector<1x256xf32>
    %658 = arith.mulf %657, %652 : vector<1x256xf32>
    %659 = arith.addf %655, %658 : vector<1x256xf32>
    %660 = arith.addf %648, %659 : vector<1x256xf32>
    %c0_522 = arith.constant 0 : index
    %c7_523 = arith.constant 7 : index
    %c17_524 = arith.constant 17 : index
    %661 = vector.load %arg14[%c0_522, %c7_523, %c17_524] : memref<2x9x290xf32, #tpu.memory_space<vmem>>, vector<1x1x256xf32>
    %662 = vector.shape_cast %661 : vector<1x1x256xf32> to vector<1x256xf32>
    %c1_525 = arith.constant 1 : index
    %c7_526 = arith.constant 7 : index
    %c17_527 = arith.constant 17 : index
    %663 = vector.load %arg14[%c1_525, %c7_526, %c17_527] : memref<2x9x290xf32, #tpu.memory_space<vmem>>, vector<1x1x256xf32>
    %664 = vector.shape_cast %663 : vector<1x1x256xf32> to vector<1x256xf32>
    %c0_528 = arith.constant 0 : index
    %c8_529 = arith.constant 8 : index
    %665 = memref.load %arg6[%c0_528, %c8_529] : memref<2x9xf32, #tpu.memory_space<smem>>
    %666 = vector.broadcast %665 : f32 to vector<1x256xf32>
    %667 = arith.mulf %666, %662 : vector<1x256xf32>
    %c1_530 = arith.constant 1 : index
    %c8_531 = arith.constant 8 : index
    %668 = memref.load %arg6[%c1_530, %c8_531] : memref<2x9xf32, #tpu.memory_space<smem>>
    %669 = vector.broadcast %668 : f32 to vector<1x256xf32>
    %670 = arith.mulf %669, %664 : vector<1x256xf32>
    %671 = arith.addf %667, %670 : vector<1x256xf32>
    %672 = arith.addf %660, %671 : vector<1x256xf32>
    %cst_532 = arith.constant 0.000000e+00 : f32
    %673 = vector.broadcast %cst_532 : f32 to vector<1x256xf32>
    %674 = arith.subf %673, %672 : vector<1x256xf32>
    %675 = math.exp %674 : vector<1x256xf32>
    %cst_533 = arith.constant 1.000000e+00 : f32
    %676 = vector.broadcast %cst_533 : f32 to vector<1x256xf32>
    %677 = arith.addf %676, %675 : vector<1x256xf32>
    %cst_534 = arith.constant 1.000000e+00 : f32
    %678 = vector.broadcast %cst_534 : f32 to vector<1x256xf32>
    %679 = arith.divf %678, %677 : vector<1x256xf32>
    %c48_535 = arith.constant 48 : index
    %c0_536 = arith.constant 0 : index
    %680 = vector.load %arg13[%c48_535, %c0_536] : memref<144x256xf32, #tpu.memory_space<vmem>>, vector<16x256xf32>
    %681 = vector.broadcast %24 : vector<16x1xf32> to vector<16x256xf32>
    %682 = arith.mulf %680, %681 : vector<16x256xf32>
    %683 = vector.broadcast %679 : vector<1x256xf32> to vector<16x256xf32>
    %684 = arith.mulf %682, %683 : vector<16x256xf32>
    %c48_537 = arith.constant 48 : index
    %c0_538 = arith.constant 0 : index
    %685 = vector.load %arg12[%c48_537, %c0_538] : memref<144x256xf32, #tpu.memory_space<vmem>>, vector<16x256xf32>
    tpu.vector_store %arg12[%c48_537, %c0_538], %684 {strides = array<i32>} : memref<144x256xf32, #tpu.memory_space<vmem>>, vector<16x256xf32>,
    %c0_539 = arith.constant 0 : index
    %c0_540 = arith.constant 0 : index
    %c17_541 = arith.constant 17 : index
    %686 = vector.load %arg14[%c0_539, %c0_540, %c17_541] : memref<2x9x290xf32, #tpu.memory_space<vmem>>, vector<1x1x256xf32>
    %687 = vector.shape_cast %686 : vector<1x1x256xf32> to vector<1x256xf32>
    %c1_542 = arith.constant 1 : index
    %c0_543 = arith.constant 0 : index
    %c17_544 = arith.constant 17 : index
    %688 = vector.load %arg14[%c1_542, %c0_543, %c17_544] : memref<2x9x290xf32, #tpu.memory_space<vmem>>, vector<1x1x256xf32>
    %689 = vector.shape_cast %688 : vector<1x1x256xf32> to vector<1x256xf32>
    %c0_545 = arith.constant 0 : index
    %c0_546 = arith.constant 0 : index
    %690 = memref.load %arg6[%c0_545, %c0_546] : memref<2x9xf32, #tpu.memory_space<smem>>
    %691 = vector.broadcast %690 : f32 to vector<1x256xf32>
    %692 = arith.mulf %691, %687 : vector<1x256xf32>
    %c1_547 = arith.constant 1 : index
    %c0_548 = arith.constant 0 : index
    %693 = memref.load %arg6[%c1_547, %c0_548] : memref<2x9xf32, #tpu.memory_space<smem>>
    %694 = vector.broadcast %693 : f32 to vector<1x256xf32>
    %695 = arith.mulf %694, %689 : vector<1x256xf32>
    %696 = arith.addf %692, %695 : vector<1x256xf32>
    %c0_549 = arith.constant 0 : index
    %c1_550 = arith.constant 1 : index
    %c17_551 = arith.constant 17 : index
    %697 = vector.load %arg14[%c0_549, %c1_550, %c17_551] : memref<2x9x290xf32, #tpu.memory_space<vmem>>, vector<1x1x256xf32>
    %698 = vector.shape_cast %697 : vector<1x1x256xf32> to vector<1x256xf32>
    %c1_552 = arith.constant 1 : index
    %c1_553 = arith.constant 1 : index
    %c17_554 = arith.constant 17 : index
    %699 = vector.load %arg14[%c1_552, %c1_553, %c17_554] : memref<2x9x290xf32, #tpu.memory_space<vmem>>, vector<1x1x256xf32>
    %700 = vector.shape_cast %699 : vector<1x1x256xf32> to vector<1x256xf32>
    %c0_555 = arith.constant 0 : index
    %c1_556 = arith.constant 1 : index
    %701 = memref.load %arg6[%c0_555, %c1_556] : memref<2x9xf32, #tpu.memory_space<smem>>
    %702 = vector.broadcast %701 : f32 to vector<1x256xf32>
    %703 = arith.mulf %702, %698 : vector<1x256xf32>
    %c1_557 = arith.constant 1 : index
    %c1_558 = arith.constant 1 : index
    %704 = memref.load %arg6[%c1_557, %c1_558] : memref<2x9xf32, #tpu.memory_space<smem>>
    %705 = vector.broadcast %704 : f32 to vector<1x256xf32>
    %706 = arith.mulf %705, %700 : vector<1x256xf32>
    %707 = arith.addf %703, %706 : vector<1x256xf32>
    %708 = arith.addf %696, %707 : vector<1x256xf32>
    %c0_559 = arith.constant 0 : index
    %c2_560 = arith.constant 2 : index
    %c17_561 = arith.constant 17 : index
    %709 = vector.load %arg14[%c0_559, %c2_560, %c17_561] : memref<2x9x290xf32, #tpu.memory_space<vmem>>, vector<1x1x256xf32>
    %710 = vector.shape_cast %709 : vector<1x1x256xf32> to vector<1x256xf32>
    %c1_562 = arith.constant 1 : index
    %c2_563 = arith.constant 2 : index
    %c17_564 = arith.constant 17 : index
    %711 = vector.load %arg14[%c1_562, %c2_563, %c17_564] : memref<2x9x290xf32, #tpu.memory_space<vmem>>, vector<1x1x256xf32>
    %712 = vector.shape_cast %711 : vector<1x1x256xf32> to vector<1x256xf32>
    %c0_565 = arith.constant 0 : index
    %c2_566 = arith.constant 2 : index
    %713 = memref.load %arg6[%c0_565, %c2_566] : memref<2x9xf32, #tpu.memory_space<smem>>
    %714 = vector.broadcast %713 : f32 to vector<1x256xf32>
    %715 = arith.mulf %714, %710 : vector<1x256xf32>
    %c1_567 = arith.constant 1 : index
    %c2_568 = arith.constant 2 : index
    %716 = memref.load %arg6[%c1_567, %c2_568] : memref<2x9xf32, #tpu.memory_space<smem>>
    %717 = vector.broadcast %716 : f32 to vector<1x256xf32>
    %718 = arith.mulf %717, %712 : vector<1x256xf32>
    %719 = arith.addf %715, %718 : vector<1x256xf32>
    %720 = arith.addf %708, %719 : vector<1x256xf32>
    %c0_569 = arith.constant 0 : index
    %c3_570 = arith.constant 3 : index
    %c17_571 = arith.constant 17 : index
    %721 = vector.load %arg14[%c0_569, %c3_570, %c17_571] : memref<2x9x290xf32, #tpu.memory_space<vmem>>, vector<1x1x256xf32>
    %722 = vector.shape_cast %721 : vector<1x1x256xf32> to vector<1x256xf32>
    %c1_572 = arith.constant 1 : index
    %c3_573 = arith.constant 3 : index
    %c17_574 = arith.constant 17 : index
    %723 = vector.load %arg14[%c1_572, %c3_573, %c17_574] : memref<2x9x290xf32, #tpu.memory_space<vmem>>, vector<1x1x256xf32>
    %724 = vector.shape_cast %723 : vector<1x1x256xf32> to vector<1x256xf32>
    %c0_575 = arith.constant 0 : index
    %c3_576 = arith.constant 3 : index
    %725 = memref.load %arg6[%c0_575, %c3_576] : memref<2x9xf32, #tpu.memory_space<smem>>
    %726 = vector.broadcast %725 : f32 to vector<1x256xf32>
    %727 = arith.mulf %726, %722 : vector<1x256xf32>
    %c1_577 = arith.constant 1 : index
    %c3_578 = arith.constant 3 : index
    %728 = memref.load %arg6[%c1_577, %c3_578] : memref<2x9xf32, #tpu.memory_space<smem>>
    %729 = vector.broadcast %728 : f32 to vector<1x256xf32>
    %730 = arith.mulf %729, %724 : vector<1x256xf32>
    %731 = arith.addf %727, %730 : vector<1x256xf32>
    %732 = arith.addf %720, %731 : vector<1x256xf32>
    %c0_579 = arith.constant 0 : index
    %c4_580 = arith.constant 4 : index
    %c17_581 = arith.constant 17 : index
    %733 = vector.load %arg14[%c0_579, %c4_580, %c17_581] : memref<2x9x290xf32, #tpu.memory_space<vmem>>, vector<1x1x256xf32>
    %734 = vector.shape_cast %733 : vector<1x1x256xf32> to vector<1x256xf32>
    %c1_582 = arith.constant 1 : index
    %c4_583 = arith.constant 4 : index
    %c17_584 = arith.constant 17 : index
    %735 = vector.load %arg14[%c1_582, %c4_583, %c17_584] : memref<2x9x290xf32, #tpu.memory_space<vmem>>, vector<1x1x256xf32>
    %736 = vector.shape_cast %735 : vector<1x1x256xf32> to vector<1x256xf32>
    %c0_585 = arith.constant 0 : index
    %c4_586 = arith.constant 4 : index
    %737 = memref.load %arg6[%c0_585, %c4_586] : memref<2x9xf32, #tpu.memory_space<smem>>
    %738 = vector.broadcast %737 : f32 to vector<1x256xf32>
    %739 = arith.mulf %738, %734 : vector<1x256xf32>
    %c1_587 = arith.constant 1 : index
    %c4_588 = arith.constant 4 : index
    %740 = memref.load %arg6[%c1_587, %c4_588] : memref<2x9xf32, #tpu.memory_space<smem>>
    %741 = vector.broadcast %740 : f32 to vector<1x256xf32>
    %742 = arith.mulf %741, %736 : vector<1x256xf32>
    %743 = arith.addf %739, %742 : vector<1x256xf32>
    %744 = arith.addf %732, %743 : vector<1x256xf32>
    %c0_589 = arith.constant 0 : index
    %c5_590 = arith.constant 5 : index
    %c17_591 = arith.constant 17 : index
    %745 = vector.load %arg14[%c0_589, %c5_590, %c17_591] : memref<2x9x290xf32, #tpu.memory_space<vmem>>, vector<1x1x256xf32>
    %746 = vector.shape_cast %745 : vector<1x1x256xf32> to vector<1x256xf32>
    %c1_592 = arith.constant 1 : index
    %c5_593 = arith.constant 5 : index
    %c17_594 = arith.constant 17 : index
    %747 = vector.load %arg14[%c1_592, %c5_593, %c17_594] : memref<2x9x290xf32, #tpu.memory_space<vmem>>, vector<1x1x256xf32>
    %748 = vector.shape_cast %747 : vector<1x1x256xf32> to vector<1x256xf32>
    %c0_595 = arith.constant 0 : index
    %c5_596 = arith.constant 5 : index
    %749 = memref.load %arg6[%c0_595, %c5_596] : memref<2x9xf32, #tpu.memory_space<smem>>
    %750 = vector.broadcast %749 : f32 to vector<1x256xf32>
    %751 = arith.mulf %750, %746 : vector<1x256xf32>
    %c1_597 = arith.constant 1 : index
    %c5_598 = arith.constant 5 : index
    %752 = memref.load %arg6[%c1_597, %c5_598] : memref<2x9xf32, #tpu.memory_space<smem>>
    %753 = vector.broadcast %752 : f32 to vector<1x256xf32>
    %754 = arith.mulf %753, %748 : vector<1x256xf32>
    %755 = arith.addf %751, %754 : vector<1x256xf32>
    %756 = arith.addf %744, %755 : vector<1x256xf32>
    %c0_599 = arith.constant 0 : index
    %c6_600 = arith.constant 6 : index
    %c17_601 = arith.constant 17 : index
    %757 = vector.load %arg14[%c0_599, %c6_600, %c17_601] : memref<2x9x290xf32, #tpu.memory_space<vmem>>, vector<1x1x256xf32>
    %758 = vector.shape_cast %757 : vector<1x1x256xf32> to vector<1x256xf32>
    %c1_602 = arith.constant 1 : index
    %c6_603 = arith.constant 6 : index
    %c17_604 = arith.constant 17 : index
    %759 = vector.load %arg14[%c1_602, %c6_603, %c17_604] : memref<2x9x290xf32, #tpu.memory_space<vmem>>, vector<1x1x256xf32>
    %760 = vector.shape_cast %759 : vector<1x1x256xf32> to vector<1x256xf32>
    %c0_605 = arith.constant 0 : index
    %c6_606 = arith.constant 6 : index
    %761 = memref.load %arg6[%c0_605, %c6_606] : memref<2x9xf32, #tpu.memory_space<smem>>
    %762 = vector.broadcast %761 : f32 to vector<1x256xf32>
    %763 = arith.mulf %762, %758 : vector<1x256xf32>
    %c1_607 = arith.constant 1 : index
    %c6_608 = arith.constant 6 : index
    %764 = memref.load %arg6[%c1_607, %c6_608] : memref<2x9xf32, #tpu.memory_space<smem>>
    %765 = vector.broadcast %764 : f32 to vector<1x256xf32>
    %766 = arith.mulf %765, %760 : vector<1x256xf32>
    %767 = arith.addf %763, %766 : vector<1x256xf32>
    %768 = arith.addf %756, %767 : vector<1x256xf32>
    %c0_609 = arith.constant 0 : index
    %c7_610 = arith.constant 7 : index
    %c17_611 = arith.constant 17 : index
    %769 = vector.load %arg14[%c0_609, %c7_610, %c17_611] : memref<2x9x290xf32, #tpu.memory_space<vmem>>, vector<1x1x256xf32>
    %770 = vector.shape_cast %769 : vector<1x1x256xf32> to vector<1x256xf32>
    %c1_612 = arith.constant 1 : index
    %c7_613 = arith.constant 7 : index
    %c17_614 = arith.constant 17 : index
    %771 = vector.load %arg14[%c1_612, %c7_613, %c17_614] : memref<2x9x290xf32, #tpu.memory_space<vmem>>, vector<1x1x256xf32>
    %772 = vector.shape_cast %771 : vector<1x1x256xf32> to vector<1x256xf32>
    %c0_615 = arith.constant 0 : index
    %c7_616 = arith.constant 7 : index
    %773 = memref.load %arg6[%c0_615, %c7_616] : memref<2x9xf32, #tpu.memory_space<smem>>
    %774 = vector.broadcast %773 : f32 to vector<1x256xf32>
    %775 = arith.mulf %774, %770 : vector<1x256xf32>
    %c1_617 = arith.constant 1 : index
    %c7_618 = arith.constant 7 : index
    %776 = memref.load %arg6[%c1_617, %c7_618] : memref<2x9xf32, #tpu.memory_space<smem>>
    %777 = vector.broadcast %776 : f32 to vector<1x256xf32>
    %778 = arith.mulf %777, %772 : vector<1x256xf32>
    %779 = arith.addf %775, %778 : vector<1x256xf32>
    %780 = arith.addf %768, %779 : vector<1x256xf32>
    %c0_619 = arith.constant 0 : index
    %c8_620 = arith.constant 8 : index
    %c17_621 = arith.constant 17 : index
    %781 = vector.load %arg14[%c0_619, %c8_620, %c17_621] : memref<2x9x290xf32, #tpu.memory_space<vmem>>, vector<1x1x256xf32>
    %782 = vector.shape_cast %781 : vector<1x1x256xf32> to vector<1x256xf32>
    %c1_622 = arith.constant 1 : index
    %c8_623 = arith.constant 8 : index
    %c17_624 = arith.constant 17 : index
    %783 = vector.load %arg14[%c1_622, %c8_623, %c17_624] : memref<2x9x290xf32, #tpu.memory_space<vmem>>, vector<1x1x256xf32>
    %784 = vector.shape_cast %783 : vector<1x1x256xf32> to vector<1x256xf32>
    %c0_625 = arith.constant 0 : index
    %c8_626 = arith.constant 8 : index
    %785 = memref.load %arg6[%c0_625, %c8_626] : memref<2x9xf32, #tpu.memory_space<smem>>
    %786 = vector.broadcast %785 : f32 to vector<1x256xf32>
    %787 = arith.mulf %786, %782 : vector<1x256xf32>
    %c1_627 = arith.constant 1 : index
    %c8_628 = arith.constant 8 : index
    %788 = memref.load %arg6[%c1_627, %c8_628] : memref<2x9xf32, #tpu.memory_space<smem>>
    %789 = vector.broadcast %788 : f32 to vector<1x256xf32>
    %790 = arith.mulf %789, %784 : vector<1x256xf32>
    %791 = arith.addf %787, %790 : vector<1x256xf32>
    %792 = arith.addf %780, %791 : vector<1x256xf32>
    %cst_629 = arith.constant 0.000000e+00 : f32
    %793 = vector.broadcast %cst_629 : f32 to vector<1x256xf32>
    %794 = arith.subf %793, %792 : vector<1x256xf32>
    %795 = math.exp %794 : vector<1x256xf32>
    %cst_630 = arith.constant 1.000000e+00 : f32
    %796 = vector.broadcast %cst_630 : f32 to vector<1x256xf32>
    %797 = arith.addf %796, %795 : vector<1x256xf32>
    %cst_631 = arith.constant 1.000000e+00 : f32
    %798 = vector.broadcast %cst_631 : f32 to vector<1x256xf32>
    %799 = arith.divf %798, %797 : vector<1x256xf32>
    %c64_632 = arith.constant 64 : index
    %c0_633 = arith.constant 0 : index
    %800 = vector.load %arg13[%c64_632, %c0_633] : memref<144x256xf32, #tpu.memory_space<vmem>>, vector<16x256xf32>
    %801 = vector.broadcast %24 : vector<16x1xf32> to vector<16x256xf32>
    %802 = arith.mulf %800, %801 : vector<16x256xf32>
    %803 = vector.broadcast %799 : vector<1x256xf32> to vector<16x256xf32>
    %804 = arith.mulf %802, %803 : vector<16x256xf32>
    %c64_634 = arith.constant 64 : index
    %c0_635 = arith.constant 0 : index
    %805 = vector.load %arg12[%c64_634, %c0_635] : memref<144x256xf32, #tpu.memory_space<vmem>>, vector<16x256xf32>
    tpu.vector_store %arg12[%c64_634, %c0_635], %804 {strides = array<i32>} : memref<144x256xf32, #tpu.memory_space<vmem>>, vector<16x256xf32>,
    %c0_636 = arith.constant 0 : index
    %c1_637 = arith.constant 1 : index
    %c17_638 = arith.constant 17 : index
    %806 = vector.load %arg14[%c0_636, %c1_637, %c17_638] : memref<2x9x290xf32, #tpu.memory_space<vmem>>, vector<1x1x256xf32>
    %807 = vector.shape_cast %806 : vector<1x1x256xf32> to vector<1x256xf32>
    %c1_639 = arith.constant 1 : index
    %c1_640 = arith.constant 1 : index
    %c17_641 = arith.constant 17 : index
    %808 = vector.load %arg14[%c1_639, %c1_640, %c17_641] : memref<2x9x290xf32, #tpu.memory_space<vmem>>, vector<1x1x256xf32>
    %809 = vector.shape_cast %808 : vector<1x1x256xf32> to vector<1x256xf32>
    %c0_642 = arith.constant 0 : index
    %c0_643 = arith.constant 0 : index
    %810 = memref.load %arg6[%c0_642, %c0_643] : memref<2x9xf32, #tpu.memory_space<smem>>
    %811 = vector.broadcast %810 : f32 to vector<1x256xf32>
    %812 = arith.mulf %811, %807 : vector<1x256xf32>
    %c1_644 = arith.constant 1 : index
    %c0_645 = arith.constant 0 : index
    %813 = memref.load %arg6[%c1_644, %c0_645] : memref<2x9xf32, #tpu.memory_space<smem>>
    %814 = vector.broadcast %813 : f32 to vector<1x256xf32>
    %815 = arith.mulf %814, %809 : vector<1x256xf32>
    %816 = arith.addf %812, %815 : vector<1x256xf32>
    %c0_646 = arith.constant 0 : index
    %c2_647 = arith.constant 2 : index
    %c17_648 = arith.constant 17 : index
    %817 = vector.load %arg14[%c0_646, %c2_647, %c17_648] : memref<2x9x290xf32, #tpu.memory_space<vmem>>, vector<1x1x256xf32>
    %818 = vector.shape_cast %817 : vector<1x1x256xf32> to vector<1x256xf32>
    %c1_649 = arith.constant 1 : index
    %c2_650 = arith.constant 2 : index
    %c17_651 = arith.constant 17 : index
    %819 = vector.load %arg14[%c1_649, %c2_650, %c17_651] : memref<2x9x290xf32, #tpu.memory_space<vmem>>, vector<1x1x256xf32>
    %820 = vector.shape_cast %819 : vector<1x1x256xf32> to vector<1x256xf32>
    %c0_652 = arith.constant 0 : index
    %c1_653 = arith.constant 1 : index
    %821 = memref.load %arg6[%c0_652, %c1_653] : memref<2x9xf32, #tpu.memory_space<smem>>
    %822 = vector.broadcast %821 : f32 to vector<1x256xf32>
    %823 = arith.mulf %822, %818 : vector<1x256xf32>
    %c1_654 = arith.constant 1 : index
    %c1_655 = arith.constant 1 : index
    %824 = memref.load %arg6[%c1_654, %c1_655] : memref<2x9xf32, #tpu.memory_space<smem>>
    %825 = vector.broadcast %824 : f32 to vector<1x256xf32>
    %826 = arith.mulf %825, %820 : vector<1x256xf32>
    %827 = arith.addf %823, %826 : vector<1x256xf32>
    %828 = arith.addf %816, %827 : vector<1x256xf32>
    %c0_656 = arith.constant 0 : index
    %c0_657 = arith.constant 0 : index
    %c18_658 = arith.constant 18 : index
    %829 = vector.load %arg14[%c0_656, %c0_657, %c18_658] : memref<2x9x290xf32, #tpu.memory_space<vmem>>, vector<1x1x256xf32>
    %830 = vector.shape_cast %829 : vector<1x1x256xf32> to vector<1x256xf32>
    %c1_659 = arith.constant 1 : index
    %c0_660 = arith.constant 0 : index
    %c18_661 = arith.constant 18 : index
    %831 = vector.load %arg14[%c1_659, %c0_660, %c18_661] : memref<2x9x290xf32, #tpu.memory_space<vmem>>, vector<1x1x256xf32>
    %832 = vector.shape_cast %831 : vector<1x1x256xf32> to vector<1x256xf32>
    %833 = arith.mulf %830, %26 : vector<1x256xf32>
    %834 = arith.mulf %832, %26 : vector<1x256xf32>
    %c0_662 = arith.constant 0 : index
    %c2_663 = arith.constant 2 : index
    %835 = memref.load %arg6[%c0_662, %c2_663] : memref<2x9xf32, #tpu.memory_space<smem>>
    %836 = vector.broadcast %835 : f32 to vector<1x256xf32>
    %837 = arith.mulf %836, %833 : vector<1x256xf32>
    %c1_664 = arith.constant 1 : index
    %c2_665 = arith.constant 2 : index
    %838 = memref.load %arg6[%c1_664, %c2_665] : memref<2x9xf32, #tpu.memory_space<smem>>
    %839 = vector.broadcast %838 : f32 to vector<1x256xf32>
    %840 = arith.mulf %839, %834 : vector<1x256xf32>
    %841 = arith.addf %837, %840 : vector<1x256xf32>
    %842 = arith.addf %828, %841 : vector<1x256xf32>
    %c0_666 = arith.constant 0 : index
    %c4_667 = arith.constant 4 : index
    %c17_668 = arith.constant 17 : index
    %843 = vector.load %arg14[%c0_666, %c4_667, %c17_668] : memref<2x9x290xf32, #tpu.memory_space<vmem>>, vector<1x1x256xf32>
    %844 = vector.shape_cast %843 : vector<1x1x256xf32> to vector<1x256xf32>
    %c1_669 = arith.constant 1 : index
    %c4_670 = arith.constant 4 : index
    %c17_671 = arith.constant 17 : index
    %845 = vector.load %arg14[%c1_669, %c4_670, %c17_671] : memref<2x9x290xf32, #tpu.memory_space<vmem>>, vector<1x1x256xf32>
    %846 = vector.shape_cast %845 : vector<1x1x256xf32> to vector<1x256xf32>
    %c0_672 = arith.constant 0 : index
    %c3_673 = arith.constant 3 : index
    %847 = memref.load %arg6[%c0_672, %c3_673] : memref<2x9xf32, #tpu.memory_space<smem>>
    %848 = vector.broadcast %847 : f32 to vector<1x256xf32>
    %849 = arith.mulf %848, %844 : vector<1x256xf32>
    %c1_674 = arith.constant 1 : index
    %c3_675 = arith.constant 3 : index
    %850 = memref.load %arg6[%c1_674, %c3_675] : memref<2x9xf32, #tpu.memory_space<smem>>
    %851 = vector.broadcast %850 : f32 to vector<1x256xf32>
    %852 = arith.mulf %851, %846 : vector<1x256xf32>
    %853 = arith.addf %849, %852 : vector<1x256xf32>
    %854 = arith.addf %842, %853 : vector<1x256xf32>
    %c0_676 = arith.constant 0 : index
    %c5_677 = arith.constant 5 : index
    %c17_678 = arith.constant 17 : index
    %855 = vector.load %arg14[%c0_676, %c5_677, %c17_678] : memref<2x9x290xf32, #tpu.memory_space<vmem>>, vector<1x1x256xf32>
    %856 = vector.shape_cast %855 : vector<1x1x256xf32> to vector<1x256xf32>
    %c1_679 = arith.constant 1 : index
    %c5_680 = arith.constant 5 : index
    %c17_681 = arith.constant 17 : index
    %857 = vector.load %arg14[%c1_679, %c5_680, %c17_681] : memref<2x9x290xf32, #tpu.memory_space<vmem>>, vector<1x1x256xf32>
    %858 = vector.shape_cast %857 : vector<1x1x256xf32> to vector<1x256xf32>
    %c0_682 = arith.constant 0 : index
    %c4_683 = arith.constant 4 : index
    %859 = memref.load %arg6[%c0_682, %c4_683] : memref<2x9xf32, #tpu.memory_space<smem>>
    %860 = vector.broadcast %859 : f32 to vector<1x256xf32>
    %861 = arith.mulf %860, %856 : vector<1x256xf32>
    %c1_684 = arith.constant 1 : index
    %c4_685 = arith.constant 4 : index
    %862 = memref.load %arg6[%c1_684, %c4_685] : memref<2x9xf32, #tpu.memory_space<smem>>
    %863 = vector.broadcast %862 : f32 to vector<1x256xf32>
    %864 = arith.mulf %863, %858 : vector<1x256xf32>
    %865 = arith.addf %861, %864 : vector<1x256xf32>
    %866 = arith.addf %854, %865 : vector<1x256xf32>
    %c0_686 = arith.constant 0 : index
    %c3_687 = arith.constant 3 : index
    %c18_688 = arith.constant 18 : index
    %867 = vector.load %arg14[%c0_686, %c3_687, %c18_688] : memref<2x9x290xf32, #tpu.memory_space<vmem>>, vector<1x1x256xf32>
    %868 = vector.shape_cast %867 : vector<1x1x256xf32> to vector<1x256xf32>
    %c1_689 = arith.constant 1 : index
    %c3_690 = arith.constant 3 : index
    %c18_691 = arith.constant 18 : index
    %869 = vector.load %arg14[%c1_689, %c3_690, %c18_691] : memref<2x9x290xf32, #tpu.memory_space<vmem>>, vector<1x1x256xf32>
    %870 = vector.shape_cast %869 : vector<1x1x256xf32> to vector<1x256xf32>
    %871 = arith.mulf %868, %26 : vector<1x256xf32>
    %872 = arith.mulf %870, %26 : vector<1x256xf32>
    %c0_692 = arith.constant 0 : index
    %c5_693 = arith.constant 5 : index
    %873 = memref.load %arg6[%c0_692, %c5_693] : memref<2x9xf32, #tpu.memory_space<smem>>
    %874 = vector.broadcast %873 : f32 to vector<1x256xf32>
    %875 = arith.mulf %874, %871 : vector<1x256xf32>
    %c1_694 = arith.constant 1 : index
    %c5_695 = arith.constant 5 : index
    %876 = memref.load %arg6[%c1_694, %c5_695] : memref<2x9xf32, #tpu.memory_space<smem>>
    %877 = vector.broadcast %876 : f32 to vector<1x256xf32>
    %878 = arith.mulf %877, %872 : vector<1x256xf32>
    %879 = arith.addf %875, %878 : vector<1x256xf32>
    %880 = arith.addf %866, %879 : vector<1x256xf32>
    %c0_696 = arith.constant 0 : index
    %c7_697 = arith.constant 7 : index
    %c17_698 = arith.constant 17 : index
    %881 = vector.load %arg14[%c0_696, %c7_697, %c17_698] : memref<2x9x290xf32, #tpu.memory_space<vmem>>, vector<1x1x256xf32>
    %882 = vector.shape_cast %881 : vector<1x1x256xf32> to vector<1x256xf32>
    %c1_699 = arith.constant 1 : index
    %c7_700 = arith.constant 7 : index
    %c17_701 = arith.constant 17 : index
    %883 = vector.load %arg14[%c1_699, %c7_700, %c17_701] : memref<2x9x290xf32, #tpu.memory_space<vmem>>, vector<1x1x256xf32>
    %884 = vector.shape_cast %883 : vector<1x1x256xf32> to vector<1x256xf32>
    %c0_702 = arith.constant 0 : index
    %c6_703 = arith.constant 6 : index
    %885 = memref.load %arg6[%c0_702, %c6_703] : memref<2x9xf32, #tpu.memory_space<smem>>
    %886 = vector.broadcast %885 : f32 to vector<1x256xf32>
    %887 = arith.mulf %886, %882 : vector<1x256xf32>
    %c1_704 = arith.constant 1 : index
    %c6_705 = arith.constant 6 : index
    %888 = memref.load %arg6[%c1_704, %c6_705] : memref<2x9xf32, #tpu.memory_space<smem>>
    %889 = vector.broadcast %888 : f32 to vector<1x256xf32>
    %890 = arith.mulf %889, %884 : vector<1x256xf32>
    %891 = arith.addf %887, %890 : vector<1x256xf32>
    %892 = arith.addf %880, %891 : vector<1x256xf32>
    %c0_706 = arith.constant 0 : index
    %c8_707 = arith.constant 8 : index
    %c17_708 = arith.constant 17 : index
    %893 = vector.load %arg14[%c0_706, %c8_707, %c17_708] : memref<2x9x290xf32, #tpu.memory_space<vmem>>, vector<1x1x256xf32>
    %894 = vector.shape_cast %893 : vector<1x1x256xf32> to vector<1x256xf32>
    %c1_709 = arith.constant 1 : index
    %c8_710 = arith.constant 8 : index
    %c17_711 = arith.constant 17 : index
    %895 = vector.load %arg14[%c1_709, %c8_710, %c17_711] : memref<2x9x290xf32, #tpu.memory_space<vmem>>, vector<1x1x256xf32>
    %896 = vector.shape_cast %895 : vector<1x1x256xf32> to vector<1x256xf32>
    %c0_712 = arith.constant 0 : index
    %c7_713 = arith.constant 7 : index
    %897 = memref.load %arg6[%c0_712, %c7_713] : memref<2x9xf32, #tpu.memory_space<smem>>
    %898 = vector.broadcast %897 : f32 to vector<1x256xf32>
    %899 = arith.mulf %898, %894 : vector<1x256xf32>
    %c1_714 = arith.constant 1 : index
    %c7_715 = arith.constant 7 : index
    %900 = memref.load %arg6[%c1_714, %c7_715] : memref<2x9xf32, #tpu.memory_space<smem>>
    %901 = vector.broadcast %900 : f32 to vector<1x256xf32>
    %902 = arith.mulf %901, %896 : vector<1x256xf32>
    %903 = arith.addf %899, %902 : vector<1x256xf32>
    %904 = arith.addf %892, %903 : vector<1x256xf32>
    %c0_716 = arith.constant 0 : index
    %c6_717 = arith.constant 6 : index
    %c18_718 = arith.constant 18 : index
    %905 = vector.load %arg14[%c0_716, %c6_717, %c18_718] : memref<2x9x290xf32, #tpu.memory_space<vmem>>, vector<1x1x256xf32>
    %906 = vector.shape_cast %905 : vector<1x1x256xf32> to vector<1x256xf32>
    %c1_719 = arith.constant 1 : index
    %c6_720 = arith.constant 6 : index
    %c18_721 = arith.constant 18 : index
    %907 = vector.load %arg14[%c1_719, %c6_720, %c18_721] : memref<2x9x290xf32, #tpu.memory_space<vmem>>, vector<1x1x256xf32>
    %908 = vector.shape_cast %907 : vector<1x1x256xf32> to vector<1x256xf32>
    %909 = arith.mulf %906, %26 : vector<1x256xf32>
    %910 = arith.mulf %908, %26 : vector<1x256xf32>
    %c0_722 = arith.constant 0 : index
    %c8_723 = arith.constant 8 : index
    %911 = memref.load %arg6[%c0_722, %c8_723] : memref<2x9xf32, #tpu.memory_space<smem>>
    %912 = vector.broadcast %911 : f32 to vector<1x256xf32>
    %913 = arith.mulf %912, %909 : vector<1x256xf32>
    %c1_724 = arith.constant 1 : index
    %c8_725 = arith.constant 8 : index
    %914 = memref.load %arg6[%c1_724, %c8_725] : memref<2x9xf32, #tpu.memory_space<smem>>
    %915 = vector.broadcast %914 : f32 to vector<1x256xf32>
    %916 = arith.mulf %915, %910 : vector<1x256xf32>
    %917 = arith.addf %913, %916 : vector<1x256xf32>
    %918 = arith.addf %904, %917 : vector<1x256xf32>
    %cst_726 = arith.constant 0.000000e+00 : f32
    %919 = vector.broadcast %cst_726 : f32 to vector<1x256xf32>
    %920 = arith.subf %919, %918 : vector<1x256xf32>
    %921 = math.exp %920 : vector<1x256xf32>
    %cst_727 = arith.constant 1.000000e+00 : f32
    %922 = vector.broadcast %cst_727 : f32 to vector<1x256xf32>
    %923 = arith.addf %922, %921 : vector<1x256xf32>
    %cst_728 = arith.constant 1.000000e+00 : f32
    %924 = vector.broadcast %cst_728 : f32 to vector<1x256xf32>
    %925 = arith.divf %924, %923 : vector<1x256xf32>
    %c80_729 = arith.constant 80 : index
    %c0_730 = arith.constant 0 : index
    %926 = vector.load %arg13[%c80_729, %c0_730] : memref<144x256xf32, #tpu.memory_space<vmem>>, vector<16x256xf32>
    %927 = vector.broadcast %24 : vector<16x1xf32> to vector<16x256xf32>
    %928 = arith.mulf %926, %927 : vector<16x256xf32>
    %929 = vector.broadcast %925 : vector<1x256xf32> to vector<16x256xf32>
    %930 = arith.mulf %928, %929 : vector<16x256xf32>
    %c80_731 = arith.constant 80 : index
    %c0_732 = arith.constant 0 : index
    %931 = vector.load %arg12[%c80_731, %c0_732] : memref<144x256xf32, #tpu.memory_space<vmem>>, vector<16x256xf32>
    tpu.vector_store %arg12[%c80_731, %c0_732], %930 {strides = array<i32>} : memref<144x256xf32, #tpu.memory_space<vmem>>, vector<16x256xf32>,
    %c0_733 = arith.constant 0 : index
    %c5_734 = arith.constant 5 : index
    %c16_735 = arith.constant 16 : index
    %932 = vector.load %arg14[%c0_733, %c5_734, %c16_735] : memref<2x9x290xf32, #tpu.memory_space<vmem>>, vector<1x1x256xf32>
    %933 = vector.shape_cast %932 : vector<1x1x256xf32> to vector<1x256xf32>
    %c1_736 = arith.constant 1 : index
    %c5_737 = arith.constant 5 : index
    %c16_738 = arith.constant 16 : index
    %934 = vector.load %arg14[%c1_736, %c5_737, %c16_738] : memref<2x9x290xf32, #tpu.memory_space<vmem>>, vector<1x1x256xf32>
    %935 = vector.shape_cast %934 : vector<1x1x256xf32> to vector<1x256xf32>
    %936 = arith.mulf %933, %25 : vector<1x256xf32>
    %937 = arith.mulf %935, %25 : vector<1x256xf32>
    %c0_739 = arith.constant 0 : index
    %c0_740 = arith.constant 0 : index
    %938 = memref.load %arg6[%c0_739, %c0_740] : memref<2x9xf32, #tpu.memory_space<smem>>
    %939 = vector.broadcast %938 : f32 to vector<1x256xf32>
    %940 = arith.mulf %939, %936 : vector<1x256xf32>
    %c1_741 = arith.constant 1 : index
    %c0_742 = arith.constant 0 : index
    %941 = memref.load %arg6[%c1_741, %c0_742] : memref<2x9xf32, #tpu.memory_space<smem>>
    %942 = vector.broadcast %941 : f32 to vector<1x256xf32>
    %943 = arith.mulf %942, %937 : vector<1x256xf32>
    %944 = arith.addf %940, %943 : vector<1x256xf32>
    %c0_743 = arith.constant 0 : index
    %c3_744 = arith.constant 3 : index
    %c17_745 = arith.constant 17 : index
    %945 = vector.load %arg14[%c0_743, %c3_744, %c17_745] : memref<2x9x290xf32, #tpu.memory_space<vmem>>, vector<1x1x256xf32>
    %946 = vector.shape_cast %945 : vector<1x1x256xf32> to vector<1x256xf32>
    %c1_746 = arith.constant 1 : index
    %c3_747 = arith.constant 3 : index
    %c17_748 = arith.constant 17 : index
    %947 = vector.load %arg14[%c1_746, %c3_747, %c17_748] : memref<2x9x290xf32, #tpu.memory_space<vmem>>, vector<1x1x256xf32>
    %948 = vector.shape_cast %947 : vector<1x1x256xf32> to vector<1x256xf32>
    %c0_749 = arith.constant 0 : index
    %c1_750 = arith.constant 1 : index
    %949 = memref.load %arg6[%c0_749, %c1_750] : memref<2x9xf32, #tpu.memory_space<smem>>
    %950 = vector.broadcast %949 : f32 to vector<1x256xf32>
    %951 = arith.mulf %950, %946 : vector<1x256xf32>
    %c1_751 = arith.constant 1 : index
    %c1_752 = arith.constant 1 : index
    %952 = memref.load %arg6[%c1_751, %c1_752] : memref<2x9xf32, #tpu.memory_space<smem>>
    %953 = vector.broadcast %952 : f32 to vector<1x256xf32>
    %954 = arith.mulf %953, %948 : vector<1x256xf32>
    %955 = arith.addf %951, %954 : vector<1x256xf32>
    %956 = arith.addf %944, %955 : vector<1x256xf32>
    %c0_753 = arith.constant 0 : index
    %c4_754 = arith.constant 4 : index
    %c17_755 = arith.constant 17 : index
    %957 = vector.load %arg14[%c0_753, %c4_754, %c17_755] : memref<2x9x290xf32, #tpu.memory_space<vmem>>, vector<1x1x256xf32>
    %958 = vector.shape_cast %957 : vector<1x1x256xf32> to vector<1x256xf32>
    %c1_756 = arith.constant 1 : index
    %c4_757 = arith.constant 4 : index
    %c17_758 = arith.constant 17 : index
    %959 = vector.load %arg14[%c1_756, %c4_757, %c17_758] : memref<2x9x290xf32, #tpu.memory_space<vmem>>, vector<1x1x256xf32>
    %960 = vector.shape_cast %959 : vector<1x1x256xf32> to vector<1x256xf32>
    %c0_759 = arith.constant 0 : index
    %c2_760 = arith.constant 2 : index
    %961 = memref.load %arg6[%c0_759, %c2_760] : memref<2x9xf32, #tpu.memory_space<smem>>
    %962 = vector.broadcast %961 : f32 to vector<1x256xf32>
    %963 = arith.mulf %962, %958 : vector<1x256xf32>
    %c1_761 = arith.constant 1 : index
    %c2_762 = arith.constant 2 : index
    %964 = memref.load %arg6[%c1_761, %c2_762] : memref<2x9xf32, #tpu.memory_space<smem>>
    %965 = vector.broadcast %964 : f32 to vector<1x256xf32>
    %966 = arith.mulf %965, %960 : vector<1x256xf32>
    %967 = arith.addf %963, %966 : vector<1x256xf32>
    %968 = arith.addf %956, %967 : vector<1x256xf32>
    %c0_763 = arith.constant 0 : index
    %c8_764 = arith.constant 8 : index
    %c16_765 = arith.constant 16 : index
    %969 = vector.load %arg14[%c0_763, %c8_764, %c16_765] : memref<2x9x290xf32, #tpu.memory_space<vmem>>, vector<1x1x256xf32>
    %970 = vector.shape_cast %969 : vector<1x1x256xf32> to vector<1x256xf32>
    %c1_766 = arith.constant 1 : index
    %c8_767 = arith.constant 8 : index
    %c16_768 = arith.constant 16 : index
    %971 = vector.load %arg14[%c1_766, %c8_767, %c16_768] : memref<2x9x290xf32, #tpu.memory_space<vmem>>, vector<1x1x256xf32>
    %972 = vector.shape_cast %971 : vector<1x1x256xf32> to vector<1x256xf32>
    %973 = arith.mulf %970, %25 : vector<1x256xf32>
    %974 = arith.mulf %972, %25 : vector<1x256xf32>
    %c0_769 = arith.constant 0 : index
    %c3_770 = arith.constant 3 : index
    %975 = memref.load %arg6[%c0_769, %c3_770] : memref<2x9xf32, #tpu.memory_space<smem>>
    %976 = vector.broadcast %975 : f32 to vector<1x256xf32>
    %977 = arith.mulf %976, %973 : vector<1x256xf32>
    %c1_771 = arith.constant 1 : index
    %c3_772 = arith.constant 3 : index
    %978 = memref.load %arg6[%c1_771, %c3_772] : memref<2x9xf32, #tpu.memory_space<smem>>
    %979 = vector.broadcast %978 : f32 to vector<1x256xf32>
    %980 = arith.mulf %979, %974 : vector<1x256xf32>
    %981 = arith.addf %977, %980 : vector<1x256xf32>
    %982 = arith.addf %968, %981 : vector<1x256xf32>
    %c0_773 = arith.constant 0 : index
    %c6_774 = arith.constant 6 : index
    %c17_775 = arith.constant 17 : index
    %983 = vector.load %arg14[%c0_773, %c6_774, %c17_775] : memref<2x9x290xf32, #tpu.memory_space<vmem>>, vector<1x1x256xf32>
    %984 = vector.shape_cast %983 : vector<1x1x256xf32> to vector<1x256xf32>
    %c1_776 = arith.constant 1 : index
    %c6_777 = arith.constant 6 : index
    %c17_778 = arith.constant 17 : index
    %985 = vector.load %arg14[%c1_776, %c6_777, %c17_778] : memref<2x9x290xf32, #tpu.memory_space<vmem>>, vector<1x1x256xf32>
    %986 = vector.shape_cast %985 : vector<1x1x256xf32> to vector<1x256xf32>
    %c0_779 = arith.constant 0 : index
    %c4_780 = arith.constant 4 : index
    %987 = memref.load %arg6[%c0_779, %c4_780] : memref<2x9xf32, #tpu.memory_space<smem>>
    %988 = vector.broadcast %987 : f32 to vector<1x256xf32>
    %989 = arith.mulf %988, %984 : vector<1x256xf32>
    %c1_781 = arith.constant 1 : index
    %c4_782 = arith.constant 4 : index
    %990 = memref.load %arg6[%c1_781, %c4_782] : memref<2x9xf32, #tpu.memory_space<smem>>
    %991 = vector.broadcast %990 : f32 to vector<1x256xf32>
    %992 = arith.mulf %991, %986 : vector<1x256xf32>
    %993 = arith.addf %989, %992 : vector<1x256xf32>
    %994 = arith.addf %982, %993 : vector<1x256xf32>
    %c0_783 = arith.constant 0 : index
    %c7_784 = arith.constant 7 : index
    %c17_785 = arith.constant 17 : index
    %995 = vector.load %arg14[%c0_783, %c7_784, %c17_785] : memref<2x9x290xf32, #tpu.memory_space<vmem>>, vector<1x1x256xf32>
    %996 = vector.shape_cast %995 : vector<1x1x256xf32> to vector<1x256xf32>
    %c1_786 = arith.constant 1 : index
    %c7_787 = arith.constant 7 : index
    %c17_788 = arith.constant 17 : index
    %997 = vector.load %arg14[%c1_786, %c7_787, %c17_788] : memref<2x9x290xf32, #tpu.memory_space<vmem>>, vector<1x1x256xf32>
    %998 = vector.shape_cast %997 : vector<1x1x256xf32> to vector<1x256xf32>
    %c0_789 = arith.constant 0 : index
    %c5_790 = arith.constant 5 : index
    %999 = memref.load %arg6[%c0_789, %c5_790] : memref<2x9xf32, #tpu.memory_space<smem>>
    %1000 = vector.broadcast %999 : f32 to vector<1x256xf32>
    %1001 = arith.mulf %1000, %996 : vector<1x256xf32>
    %c1_791 = arith.constant 1 : index
    %c5_792 = arith.constant 5 : index
    %1002 = memref.load %arg6[%c1_791, %c5_792] : memref<2x9xf32, #tpu.memory_space<smem>>
    %1003 = vector.broadcast %1002 : f32 to vector<1x256xf32>
    %1004 = arith.mulf %1003, %998 : vector<1x256xf32>
    %1005 = arith.addf %1001, %1004 : vector<1x256xf32>
    %1006 = arith.addf %994, %1005 : vector<1x256xf32>
    %c0_793 = arith.constant 0 : index
    %c2_794 = arith.constant 2 : index
    %c32_795 = arith.constant 32 : index
    %1007 = vector.load %arg14[%c0_793, %c2_794, %c32_795] : memref<2x9x290xf32, #tpu.memory_space<vmem>>, vector<1x1x256xf32>
    %1008 = vector.shape_cast %1007 : vector<1x1x256xf32> to vector<1x256xf32>
    %c1_796 = arith.constant 1 : index
    %c2_797 = arith.constant 2 : index
    %c32_798 = arith.constant 32 : index
    %1009 = vector.load %arg14[%c1_796, %c2_797, %c32_798] : memref<2x9x290xf32, #tpu.memory_space<vmem>>, vector<1x1x256xf32>
    %1010 = vector.shape_cast %1009 : vector<1x1x256xf32> to vector<1x256xf32>
    %1011 = arith.mulf %1008, %25 : vector<1x256xf32>
    %1012 = arith.mulf %1010, %25 : vector<1x256xf32>
    %c0_799 = arith.constant 0 : index
    %c6_800 = arith.constant 6 : index
    %1013 = memref.load %arg6[%c0_799, %c6_800] : memref<2x9xf32, #tpu.memory_space<smem>>
    %1014 = vector.broadcast %1013 : f32 to vector<1x256xf32>
    %1015 = arith.mulf %1014, %1011 : vector<1x256xf32>
    %c1_801 = arith.constant 1 : index
    %c6_802 = arith.constant 6 : index
    %1016 = memref.load %arg6[%c1_801, %c6_802] : memref<2x9xf32, #tpu.memory_space<smem>>
    %1017 = vector.broadcast %1016 : f32 to vector<1x256xf32>
    %1018 = arith.mulf %1017, %1012 : vector<1x256xf32>
    %1019 = arith.addf %1015, %1018 : vector<1x256xf32>
    %1020 = arith.addf %1006, %1019 : vector<1x256xf32>
    %c0_803 = arith.constant 0 : index
    %c0_804 = arith.constant 0 : index
    %c33_805 = arith.constant 33 : index
    %1021 = vector.load %arg14[%c0_803, %c0_804, %c33_805] : memref<2x9x290xf32, #tpu.memory_space<vmem>>, vector<1x1x256xf32>
    %1022 = vector.shape_cast %1021 : vector<1x1x256xf32> to vector<1x256xf32>
    %c1_806 = arith.constant 1 : index
    %c0_807 = arith.constant 0 : index
    %c33_808 = arith.constant 33 : index
    %1023 = vector.load %arg14[%c1_806, %c0_807, %c33_808] : memref<2x9x290xf32, #tpu.memory_space<vmem>>, vector<1x1x256xf32>
    %1024 = vector.shape_cast %1023 : vector<1x1x256xf32> to vector<1x256xf32>
    %c0_809 = arith.constant 0 : index
    %c7_810 = arith.constant 7 : index
    %1025 = memref.load %arg6[%c0_809, %c7_810] : memref<2x9xf32, #tpu.memory_space<smem>>
    %1026 = vector.broadcast %1025 : f32 to vector<1x256xf32>
    %1027 = arith.mulf %1026, %1022 : vector<1x256xf32>
    %c1_811 = arith.constant 1 : index
    %c7_812 = arith.constant 7 : index
    %1028 = memref.load %arg6[%c1_811, %c7_812] : memref<2x9xf32, #tpu.memory_space<smem>>
    %1029 = vector.broadcast %1028 : f32 to vector<1x256xf32>
    %1030 = arith.mulf %1029, %1024 : vector<1x256xf32>
    %1031 = arith.addf %1027, %1030 : vector<1x256xf32>
    %1032 = arith.addf %1020, %1031 : vector<1x256xf32>
    %c0_813 = arith.constant 0 : index
    %c1_814 = arith.constant 1 : index
    %c33_815 = arith.constant 33 : index
    %1033 = vector.load %arg14[%c0_813, %c1_814, %c33_815] : memref<2x9x290xf32, #tpu.memory_space<vmem>>, vector<1x1x256xf32>
    %1034 = vector.shape_cast %1033 : vector<1x1x256xf32> to vector<1x256xf32>
    %c1_816 = arith.constant 1 : index
    %c1_817 = arith.constant 1 : index
    %c33_818 = arith.constant 33 : index
    %1035 = vector.load %arg14[%c1_816, %c1_817, %c33_818] : memref<2x9x290xf32, #tpu.memory_space<vmem>>, vector<1x1x256xf32>
    %1036 = vector.shape_cast %1035 : vector<1x1x256xf32> to vector<1x256xf32>
    %c0_819 = arith.constant 0 : index
    %c8_820 = arith.constant 8 : index
    %1037 = memref.load %arg6[%c0_819, %c8_820] : memref<2x9xf32, #tpu.memory_space<smem>>
    %1038 = vector.broadcast %1037 : f32 to vector<1x256xf32>
    %1039 = arith.mulf %1038, %1034 : vector<1x256xf32>
    %c1_821 = arith.constant 1 : index
    %c8_822 = arith.constant 8 : index
    %1040 = memref.load %arg6[%c1_821, %c8_822] : memref<2x9xf32, #tpu.memory_space<smem>>
    %1041 = vector.broadcast %1040 : f32 to vector<1x256xf32>
    %1042 = arith.mulf %1041, %1036 : vector<1x256xf32>
    %1043 = arith.addf %1039, %1042 : vector<1x256xf32>
    %1044 = arith.addf %1032, %1043 : vector<1x256xf32>
    %cst_823 = arith.constant 0.000000e+00 : f32
    %1045 = vector.broadcast %cst_823 : f32 to vector<1x256xf32>
    %1046 = arith.subf %1045, %1044 : vector<1x256xf32>
    %1047 = math.exp %1046 : vector<1x256xf32>
    %cst_824 = arith.constant 1.000000e+00 : f32
    %1048 = vector.broadcast %cst_824 : f32 to vector<1x256xf32>
    %1049 = arith.addf %1048, %1047 : vector<1x256xf32>
    %cst_825 = arith.constant 1.000000e+00 : f32
    %1050 = vector.broadcast %cst_825 : f32 to vector<1x256xf32>
    %1051 = arith.divf %1050, %1049 : vector<1x256xf32>
    %c96_826 = arith.constant 96 : index
    %c0_827 = arith.constant 0 : index
    %1052 = vector.load %arg13[%c96_826, %c0_827] : memref<144x256xf32, #tpu.memory_space<vmem>>, vector<16x256xf32>
    %1053 = vector.broadcast %24 : vector<16x1xf32> to vector<16x256xf32>
    %1054 = arith.mulf %1052, %1053 : vector<16x256xf32>
    %1055 = vector.broadcast %1051 : vector<1x256xf32> to vector<16x256xf32>
    %1056 = arith.mulf %1054, %1055 : vector<16x256xf32>
    %c96_828 = arith.constant 96 : index
    %c0_829 = arith.constant 0 : index
    %1057 = vector.load %arg12[%c96_828, %c0_829] : memref<144x256xf32, #tpu.memory_space<vmem>>, vector<16x256xf32>
    tpu.vector_store %arg12[%c96_828, %c0_829], %1056 {strides = array<i32>} : memref<144x256xf32, #tpu.memory_space<vmem>>, vector<16x256xf32>,
    %c0_830 = arith.constant 0 : index
    %c3_831 = arith.constant 3 : index
    %c17_832 = arith.constant 17 : index
    %1058 = vector.load %arg14[%c0_830, %c3_831, %c17_832] : memref<2x9x290xf32, #tpu.memory_space<vmem>>, vector<1x1x256xf32>
    %1059 = vector.shape_cast %1058 : vector<1x1x256xf32> to vector<1x256xf32>
    %c1_833 = arith.constant 1 : index
    %c3_834 = arith.constant 3 : index
    %c17_835 = arith.constant 17 : index
    %1060 = vector.load %arg14[%c1_833, %c3_834, %c17_835] : memref<2x9x290xf32, #tpu.memory_space<vmem>>, vector<1x1x256xf32>
    %1061 = vector.shape_cast %1060 : vector<1x1x256xf32> to vector<1x256xf32>
    %c0_836 = arith.constant 0 : index
    %c0_837 = arith.constant 0 : index
    %1062 = memref.load %arg6[%c0_836, %c0_837] : memref<2x9xf32, #tpu.memory_space<smem>>
    %1063 = vector.broadcast %1062 : f32 to vector<1x256xf32>
    %1064 = arith.mulf %1063, %1059 : vector<1x256xf32>
    %c1_838 = arith.constant 1 : index
    %c0_839 = arith.constant 0 : index
    %1065 = memref.load %arg6[%c1_838, %c0_839] : memref<2x9xf32, #tpu.memory_space<smem>>
    %1066 = vector.broadcast %1065 : f32 to vector<1x256xf32>
    %1067 = arith.mulf %1066, %1061 : vector<1x256xf32>
    %1068 = arith.addf %1064, %1067 : vector<1x256xf32>
    %c0_840 = arith.constant 0 : index
    %c4_841 = arith.constant 4 : index
    %c17_842 = arith.constant 17 : index
    %1069 = vector.load %arg14[%c0_840, %c4_841, %c17_842] : memref<2x9x290xf32, #tpu.memory_space<vmem>>, vector<1x1x256xf32>
    %1070 = vector.shape_cast %1069 : vector<1x1x256xf32> to vector<1x256xf32>
    %c1_843 = arith.constant 1 : index
    %c4_844 = arith.constant 4 : index
    %c17_845 = arith.constant 17 : index
    %1071 = vector.load %arg14[%c1_843, %c4_844, %c17_845] : memref<2x9x290xf32, #tpu.memory_space<vmem>>, vector<1x1x256xf32>
    %1072 = vector.shape_cast %1071 : vector<1x1x256xf32> to vector<1x256xf32>
    %c0_846 = arith.constant 0 : index
    %c1_847 = arith.constant 1 : index
    %1073 = memref.load %arg6[%c0_846, %c1_847] : memref<2x9xf32, #tpu.memory_space<smem>>
    %1074 = vector.broadcast %1073 : f32 to vector<1x256xf32>
    %1075 = arith.mulf %1074, %1070 : vector<1x256xf32>
    %c1_848 = arith.constant 1 : index
    %c1_849 = arith.constant 1 : index
    %1076 = memref.load %arg6[%c1_848, %c1_849] : memref<2x9xf32, #tpu.memory_space<smem>>
    %1077 = vector.broadcast %1076 : f32 to vector<1x256xf32>
    %1078 = arith.mulf %1077, %1072 : vector<1x256xf32>
    %1079 = arith.addf %1075, %1078 : vector<1x256xf32>
    %1080 = arith.addf %1068, %1079 : vector<1x256xf32>
    %c0_850 = arith.constant 0 : index
    %c5_851 = arith.constant 5 : index
    %c17_852 = arith.constant 17 : index
    %1081 = vector.load %arg14[%c0_850, %c5_851, %c17_852] : memref<2x9x290xf32, #tpu.memory_space<vmem>>, vector<1x1x256xf32>
    %1082 = vector.shape_cast %1081 : vector<1x1x256xf32> to vector<1x256xf32>
    %c1_853 = arith.constant 1 : index
    %c5_854 = arith.constant 5 : index
    %c17_855 = arith.constant 17 : index
    %1083 = vector.load %arg14[%c1_853, %c5_854, %c17_855] : memref<2x9x290xf32, #tpu.memory_space<vmem>>, vector<1x1x256xf32>
    %1084 = vector.shape_cast %1083 : vector<1x1x256xf32> to vector<1x256xf32>
    %c0_856 = arith.constant 0 : index
    %c2_857 = arith.constant 2 : index
    %1085 = memref.load %arg6[%c0_856, %c2_857] : memref<2x9xf32, #tpu.memory_space<smem>>
    %1086 = vector.broadcast %1085 : f32 to vector<1x256xf32>
    %1087 = arith.mulf %1086, %1082 : vector<1x256xf32>
    %c1_858 = arith.constant 1 : index
    %c2_859 = arith.constant 2 : index
    %1088 = memref.load %arg6[%c1_858, %c2_859] : memref<2x9xf32, #tpu.memory_space<smem>>
    %1089 = vector.broadcast %1088 : f32 to vector<1x256xf32>
    %1090 = arith.mulf %1089, %1084 : vector<1x256xf32>
    %1091 = arith.addf %1087, %1090 : vector<1x256xf32>
    %1092 = arith.addf %1080, %1091 : vector<1x256xf32>
    %c0_860 = arith.constant 0 : index
    %c6_861 = arith.constant 6 : index
    %c17_862 = arith.constant 17 : index
    %1093 = vector.load %arg14[%c0_860, %c6_861, %c17_862] : memref<2x9x290xf32, #tpu.memory_space<vmem>>, vector<1x1x256xf32>
    %1094 = vector.shape_cast %1093 : vector<1x1x256xf32> to vector<1x256xf32>
    %c1_863 = arith.constant 1 : index
    %c6_864 = arith.constant 6 : index
    %c17_865 = arith.constant 17 : index
    %1095 = vector.load %arg14[%c1_863, %c6_864, %c17_865] : memref<2x9x290xf32, #tpu.memory_space<vmem>>, vector<1x1x256xf32>
    %1096 = vector.shape_cast %1095 : vector<1x1x256xf32> to vector<1x256xf32>
    %c0_866 = arith.constant 0 : index
    %c3_867 = arith.constant 3 : index
    %1097 = memref.load %arg6[%c0_866, %c3_867] : memref<2x9xf32, #tpu.memory_space<smem>>
    %1098 = vector.broadcast %1097 : f32 to vector<1x256xf32>
    %1099 = arith.mulf %1098, %1094 : vector<1x256xf32>
    %c1_868 = arith.constant 1 : index
    %c3_869 = arith.constant 3 : index
    %1100 = memref.load %arg6[%c1_868, %c3_869] : memref<2x9xf32, #tpu.memory_space<smem>>
    %1101 = vector.broadcast %1100 : f32 to vector<1x256xf32>
    %1102 = arith.mulf %1101, %1096 : vector<1x256xf32>
    %1103 = arith.addf %1099, %1102 : vector<1x256xf32>
    %1104 = arith.addf %1092, %1103 : vector<1x256xf32>
    %c0_870 = arith.constant 0 : index
    %c7_871 = arith.constant 7 : index
    %c17_872 = arith.constant 17 : index
    %1105 = vector.load %arg14[%c0_870, %c7_871, %c17_872] : memref<2x9x290xf32, #tpu.memory_space<vmem>>, vector<1x1x256xf32>
    %1106 = vector.shape_cast %1105 : vector<1x1x256xf32> to vector<1x256xf32>
    %c1_873 = arith.constant 1 : index
    %c7_874 = arith.constant 7 : index
    %c17_875 = arith.constant 17 : index
    %1107 = vector.load %arg14[%c1_873, %c7_874, %c17_875] : memref<2x9x290xf32, #tpu.memory_space<vmem>>, vector<1x1x256xf32>
    %1108 = vector.shape_cast %1107 : vector<1x1x256xf32> to vector<1x256xf32>
    %c0_876 = arith.constant 0 : index
    %c4_877 = arith.constant 4 : index
    %1109 = memref.load %arg6[%c0_876, %c4_877] : memref<2x9xf32, #tpu.memory_space<smem>>
    %1110 = vector.broadcast %1109 : f32 to vector<1x256xf32>
    %1111 = arith.mulf %1110, %1106 : vector<1x256xf32>
    %c1_878 = arith.constant 1 : index
    %c4_879 = arith.constant 4 : index
    %1112 = memref.load %arg6[%c1_878, %c4_879] : memref<2x9xf32, #tpu.memory_space<smem>>
    %1113 = vector.broadcast %1112 : f32 to vector<1x256xf32>
    %1114 = arith.mulf %1113, %1108 : vector<1x256xf32>
    %1115 = arith.addf %1111, %1114 : vector<1x256xf32>
    %1116 = arith.addf %1104, %1115 : vector<1x256xf32>
    %c0_880 = arith.constant 0 : index
    %c8_881 = arith.constant 8 : index
    %c17_882 = arith.constant 17 : index
    %1117 = vector.load %arg14[%c0_880, %c8_881, %c17_882] : memref<2x9x290xf32, #tpu.memory_space<vmem>>, vector<1x1x256xf32>
    %1118 = vector.shape_cast %1117 : vector<1x1x256xf32> to vector<1x256xf32>
    %c1_883 = arith.constant 1 : index
    %c8_884 = arith.constant 8 : index
    %c17_885 = arith.constant 17 : index
    %1119 = vector.load %arg14[%c1_883, %c8_884, %c17_885] : memref<2x9x290xf32, #tpu.memory_space<vmem>>, vector<1x1x256xf32>
    %1120 = vector.shape_cast %1119 : vector<1x1x256xf32> to vector<1x256xf32>
    %c0_886 = arith.constant 0 : index
    %c5_887 = arith.constant 5 : index
    %1121 = memref.load %arg6[%c0_886, %c5_887] : memref<2x9xf32, #tpu.memory_space<smem>>
    %1122 = vector.broadcast %1121 : f32 to vector<1x256xf32>
    %1123 = arith.mulf %1122, %1118 : vector<1x256xf32>
    %c1_888 = arith.constant 1 : index
    %c5_889 = arith.constant 5 : index
    %1124 = memref.load %arg6[%c1_888, %c5_889] : memref<2x9xf32, #tpu.memory_space<smem>>
    %1125 = vector.broadcast %1124 : f32 to vector<1x256xf32>
    %1126 = arith.mulf %1125, %1120 : vector<1x256xf32>
    %1127 = arith.addf %1123, %1126 : vector<1x256xf32>
    %1128 = arith.addf %1116, %1127 : vector<1x256xf32>
    %c0_890 = arith.constant 0 : index
    %c0_891 = arith.constant 0 : index
    %c33_892 = arith.constant 33 : index
    %1129 = vector.load %arg14[%c0_890, %c0_891, %c33_892] : memref<2x9x290xf32, #tpu.memory_space<vmem>>, vector<1x1x256xf32>
    %1130 = vector.shape_cast %1129 : vector<1x1x256xf32> to vector<1x256xf32>
    %c1_893 = arith.constant 1 : index
    %c0_894 = arith.constant 0 : index
    %c33_895 = arith.constant 33 : index
    %1131 = vector.load %arg14[%c1_893, %c0_894, %c33_895] : memref<2x9x290xf32, #tpu.memory_space<vmem>>, vector<1x1x256xf32>
    %1132 = vector.shape_cast %1131 : vector<1x1x256xf32> to vector<1x256xf32>
    %c0_896 = arith.constant 0 : index
    %c6_897 = arith.constant 6 : index
    %1133 = memref.load %arg6[%c0_896, %c6_897] : memref<2x9xf32, #tpu.memory_space<smem>>
    %1134 = vector.broadcast %1133 : f32 to vector<1x256xf32>
    %1135 = arith.mulf %1134, %1130 : vector<1x256xf32>
    %c1_898 = arith.constant 1 : index
    %c6_899 = arith.constant 6 : index
    %1136 = memref.load %arg6[%c1_898, %c6_899] : memref<2x9xf32, #tpu.memory_space<smem>>
    %1137 = vector.broadcast %1136 : f32 to vector<1x256xf32>
    %1138 = arith.mulf %1137, %1132 : vector<1x256xf32>
    %1139 = arith.addf %1135, %1138 : vector<1x256xf32>
    %1140 = arith.addf %1128, %1139 : vector<1x256xf32>
    %c0_900 = arith.constant 0 : index
    %c1_901 = arith.constant 1 : index
    %c33_902 = arith.constant 33 : index
    %1141 = vector.load %arg14[%c0_900, %c1_901, %c33_902] : memref<2x9x290xf32, #tpu.memory_space<vmem>>, vector<1x1x256xf32>
    %1142 = vector.shape_cast %1141 : vector<1x1x256xf32> to vector<1x256xf32>
    %c1_903 = arith.constant 1 : index
    %c1_904 = arith.constant 1 : index
    %c33_905 = arith.constant 33 : index
    %1143 = vector.load %arg14[%c1_903, %c1_904, %c33_905] : memref<2x9x290xf32, #tpu.memory_space<vmem>>, vector<1x1x256xf32>
    %1144 = vector.shape_cast %1143 : vector<1x1x256xf32> to vector<1x256xf32>
    %c0_906 = arith.constant 0 : index
    %c7_907 = arith.constant 7 : index
    %1145 = memref.load %arg6[%c0_906, %c7_907] : memref<2x9xf32, #tpu.memory_space<smem>>
    %1146 = vector.broadcast %1145 : f32 to vector<1x256xf32>
    %1147 = arith.mulf %1146, %1142 : vector<1x256xf32>
    %c1_908 = arith.constant 1 : index
    %c7_909 = arith.constant 7 : index
    %1148 = memref.load %arg6[%c1_908, %c7_909] : memref<2x9xf32, #tpu.memory_space<smem>>
    %1149 = vector.broadcast %1148 : f32 to vector<1x256xf32>
    %1150 = arith.mulf %1149, %1144 : vector<1x256xf32>
    %1151 = arith.addf %1147, %1150 : vector<1x256xf32>
    %1152 = arith.addf %1140, %1151 : vector<1x256xf32>
    %c0_910 = arith.constant 0 : index
    %c2_911 = arith.constant 2 : index
    %c33_912 = arith.constant 33 : index
    %1153 = vector.load %arg14[%c0_910, %c2_911, %c33_912] : memref<2x9x290xf32, #tpu.memory_space<vmem>>, vector<1x1x256xf32>
    %1154 = vector.shape_cast %1153 : vector<1x1x256xf32> to vector<1x256xf32>
    %c1_913 = arith.constant 1 : index
    %c2_914 = arith.constant 2 : index
    %c33_915 = arith.constant 33 : index
    %1155 = vector.load %arg14[%c1_913, %c2_914, %c33_915] : memref<2x9x290xf32, #tpu.memory_space<vmem>>, vector<1x1x256xf32>
    %1156 = vector.shape_cast %1155 : vector<1x1x256xf32> to vector<1x256xf32>
    %c0_916 = arith.constant 0 : index
    %c8_917 = arith.constant 8 : index
    %1157 = memref.load %arg6[%c0_916, %c8_917] : memref<2x9xf32, #tpu.memory_space<smem>>
    %1158 = vector.broadcast %1157 : f32 to vector<1x256xf32>
    %1159 = arith.mulf %1158, %1154 : vector<1x256xf32>
    %c1_918 = arith.constant 1 : index
    %c8_919 = arith.constant 8 : index
    %1160 = memref.load %arg6[%c1_918, %c8_919] : memref<2x9xf32, #tpu.memory_space<smem>>
    %1161 = vector.broadcast %1160 : f32 to vector<1x256xf32>
    %1162 = arith.mulf %1161, %1156 : vector<1x256xf32>
    %1163 = arith.addf %1159, %1162 : vector<1x256xf32>
    %1164 = arith.addf %1152, %1163 : vector<1x256xf32>
    %cst_920 = arith.constant 0.000000e+00 : f32
    %1165 = vector.broadcast %cst_920 : f32 to vector<1x256xf32>
    %1166 = arith.subf %1165, %1164 : vector<1x256xf32>
    %1167 = math.exp %1166 : vector<1x256xf32>
    %cst_921 = arith.constant 1.000000e+00 : f32
    %1168 = vector.broadcast %cst_921 : f32 to vector<1x256xf32>
    %1169 = arith.addf %1168, %1167 : vector<1x256xf32>
    %cst_922 = arith.constant 1.000000e+00 : f32
    %1170 = vector.broadcast %cst_922 : f32 to vector<1x256xf32>
    %1171 = arith.divf %1170, %1169 : vector<1x256xf32>
    %c112_923 = arith.constant 112 : index
    %c0_924 = arith.constant 0 : index
    %1172 = vector.load %arg13[%c112_923, %c0_924] : memref<144x256xf32, #tpu.memory_space<vmem>>, vector<16x256xf32>
    %1173 = vector.broadcast %24 : vector<16x1xf32> to vector<16x256xf32>
    %1174 = arith.mulf %1172, %1173 : vector<16x256xf32>
    %1175 = vector.broadcast %1171 : vector<1x256xf32> to vector<16x256xf32>
    %1176 = arith.mulf %1174, %1175 : vector<16x256xf32>
    %c112_925 = arith.constant 112 : index
    %c0_926 = arith.constant 0 : index
    %1177 = vector.load %arg12[%c112_925, %c0_926] : memref<144x256xf32, #tpu.memory_space<vmem>>, vector<16x256xf32>
    tpu.vector_store %arg12[%c112_925, %c0_926], %1176 {strides = array<i32>} : memref<144x256xf32, #tpu.memory_space<vmem>>, vector<16x256xf32>,
    %c0_927 = arith.constant 0 : index
    %c4_928 = arith.constant 4 : index
    %c17_929 = arith.constant 17 : index
    %1178 = vector.load %arg14[%c0_927, %c4_928, %c17_929] : memref<2x9x290xf32, #tpu.memory_space<vmem>>, vector<1x1x256xf32>
    %1179 = vector.shape_cast %1178 : vector<1x1x256xf32> to vector<1x256xf32>
    %c1_930 = arith.constant 1 : index
    %c4_931 = arith.constant 4 : index
    %c17_932 = arith.constant 17 : index
    %1180 = vector.load %arg14[%c1_930, %c4_931, %c17_932] : memref<2x9x290xf32, #tpu.memory_space<vmem>>, vector<1x1x256xf32>
    %1181 = vector.shape_cast %1180 : vector<1x1x256xf32> to vector<1x256xf32>
    %c0_933 = arith.constant 0 : index
    %c0_934 = arith.constant 0 : index
    %1182 = memref.load %arg6[%c0_933, %c0_934] : memref<2x9xf32, #tpu.memory_space<smem>>
    %1183 = vector.broadcast %1182 : f32 to vector<1x256xf32>
    %1184 = arith.mulf %1183, %1179 : vector<1x256xf32>
    %c1_935 = arith.constant 1 : index
    %c0_936 = arith.constant 0 : index
    %1185 = memref.load %arg6[%c1_935, %c0_936] : memref<2x9xf32, #tpu.memory_space<smem>>
    %1186 = vector.broadcast %1185 : f32 to vector<1x256xf32>
    %1187 = arith.mulf %1186, %1181 : vector<1x256xf32>
    %1188 = arith.addf %1184, %1187 : vector<1x256xf32>
    %c0_937 = arith.constant 0 : index
    %c5_938 = arith.constant 5 : index
    %c17_939 = arith.constant 17 : index
    %1189 = vector.load %arg14[%c0_937, %c5_938, %c17_939] : memref<2x9x290xf32, #tpu.memory_space<vmem>>, vector<1x1x256xf32>
    %1190 = vector.shape_cast %1189 : vector<1x1x256xf32> to vector<1x256xf32>
    %c1_940 = arith.constant 1 : index
    %c5_941 = arith.constant 5 : index
    %c17_942 = arith.constant 17 : index
    %1191 = vector.load %arg14[%c1_940, %c5_941, %c17_942] : memref<2x9x290xf32, #tpu.memory_space<vmem>>, vector<1x1x256xf32>
    %1192 = vector.shape_cast %1191 : vector<1x1x256xf32> to vector<1x256xf32>
    %c0_943 = arith.constant 0 : index
    %c1_944 = arith.constant 1 : index
    %1193 = memref.load %arg6[%c0_943, %c1_944] : memref<2x9xf32, #tpu.memory_space<smem>>
    %1194 = vector.broadcast %1193 : f32 to vector<1x256xf32>
    %1195 = arith.mulf %1194, %1190 : vector<1x256xf32>
    %c1_945 = arith.constant 1 : index
    %c1_946 = arith.constant 1 : index
    %1196 = memref.load %arg6[%c1_945, %c1_946] : memref<2x9xf32, #tpu.memory_space<smem>>
    %1197 = vector.broadcast %1196 : f32 to vector<1x256xf32>
    %1198 = arith.mulf %1197, %1192 : vector<1x256xf32>
    %1199 = arith.addf %1195, %1198 : vector<1x256xf32>
    %1200 = arith.addf %1188, %1199 : vector<1x256xf32>
    %c0_947 = arith.constant 0 : index
    %c3_948 = arith.constant 3 : index
    %c18_949 = arith.constant 18 : index
    %1201 = vector.load %arg14[%c0_947, %c3_948, %c18_949] : memref<2x9x290xf32, #tpu.memory_space<vmem>>, vector<1x1x256xf32>
    %1202 = vector.shape_cast %1201 : vector<1x1x256xf32> to vector<1x256xf32>
    %c1_950 = arith.constant 1 : index
    %c3_951 = arith.constant 3 : index
    %c18_952 = arith.constant 18 : index
    %1203 = vector.load %arg14[%c1_950, %c3_951, %c18_952] : memref<2x9x290xf32, #tpu.memory_space<vmem>>, vector<1x1x256xf32>
    %1204 = vector.shape_cast %1203 : vector<1x1x256xf32> to vector<1x256xf32>
    %1205 = arith.mulf %1202, %26 : vector<1x256xf32>
    %1206 = arith.mulf %1204, %26 : vector<1x256xf32>
    %c0_953 = arith.constant 0 : index
    %c2_954 = arith.constant 2 : index
    %1207 = memref.load %arg6[%c0_953, %c2_954] : memref<2x9xf32, #tpu.memory_space<smem>>
    %1208 = vector.broadcast %1207 : f32 to vector<1x256xf32>
    %1209 = arith.mulf %1208, %1205 : vector<1x256xf32>
    %c1_955 = arith.constant 1 : index
    %c2_956 = arith.constant 2 : index
    %1210 = memref.load %arg6[%c1_955, %c2_956] : memref<2x9xf32, #tpu.memory_space<smem>>
    %1211 = vector.broadcast %1210 : f32 to vector<1x256xf32>
    %1212 = arith.mulf %1211, %1206 : vector<1x256xf32>
    %1213 = arith.addf %1209, %1212 : vector<1x256xf32>
    %1214 = arith.addf %1200, %1213 : vector<1x256xf32>
    %c0_957 = arith.constant 0 : index
    %c7_958 = arith.constant 7 : index
    %c17_959 = arith.constant 17 : index
    %1215 = vector.load %arg14[%c0_957, %c7_958, %c17_959] : memref<2x9x290xf32, #tpu.memory_space<vmem>>, vector<1x1x256xf32>
    %1216 = vector.shape_cast %1215 : vector<1x1x256xf32> to vector<1x256xf32>
    %c1_960 = arith.constant 1 : index
    %c7_961 = arith.constant 7 : index
    %c17_962 = arith.constant 17 : index
    %1217 = vector.load %arg14[%c1_960, %c7_961, %c17_962] : memref<2x9x290xf32, #tpu.memory_space<vmem>>, vector<1x1x256xf32>
    %1218 = vector.shape_cast %1217 : vector<1x1x256xf32> to vector<1x256xf32>
    %c0_963 = arith.constant 0 : index
    %c3_964 = arith.constant 3 : index
    %1219 = memref.load %arg6[%c0_963, %c3_964] : memref<2x9xf32, #tpu.memory_space<smem>>
    %1220 = vector.broadcast %1219 : f32 to vector<1x256xf32>
    %1221 = arith.mulf %1220, %1216 : vector<1x256xf32>
    %c1_965 = arith.constant 1 : index
    %c3_966 = arith.constant 3 : index
    %1222 = memref.load %arg6[%c1_965, %c3_966] : memref<2x9xf32, #tpu.memory_space<smem>>
    %1223 = vector.broadcast %1222 : f32 to vector<1x256xf32>
    %1224 = arith.mulf %1223, %1218 : vector<1x256xf32>
    %1225 = arith.addf %1221, %1224 : vector<1x256xf32>
    %1226 = arith.addf %1214, %1225 : vector<1x256xf32>
    %c0_967 = arith.constant 0 : index
    %c8_968 = arith.constant 8 : index
    %c17_969 = arith.constant 17 : index
    %1227 = vector.load %arg14[%c0_967, %c8_968, %c17_969] : memref<2x9x290xf32, #tpu.memory_space<vmem>>, vector<1x1x256xf32>
    %1228 = vector.shape_cast %1227 : vector<1x1x256xf32> to vector<1x256xf32>
    %c1_970 = arith.constant 1 : index
    %c8_971 = arith.constant 8 : index
    %c17_972 = arith.constant 17 : index
    %1229 = vector.load %arg14[%c1_970, %c8_971, %c17_972] : memref<2x9x290xf32, #tpu.memory_space<vmem>>, vector<1x1x256xf32>
    %1230 = vector.shape_cast %1229 : vector<1x1x256xf32> to vector<1x256xf32>
    %c0_973 = arith.constant 0 : index
    %c4_974 = arith.constant 4 : index
    %1231 = memref.load %arg6[%c0_973, %c4_974] : memref<2x9xf32, #tpu.memory_space<smem>>
    %1232 = vector.broadcast %1231 : f32 to vector<1x256xf32>
    %1233 = arith.mulf %1232, %1228 : vector<1x256xf32>
    %c1_975 = arith.constant 1 : index
    %c4_976 = arith.constant 4 : index
    %1234 = memref.load %arg6[%c1_975, %c4_976] : memref<2x9xf32, #tpu.memory_space<smem>>
    %1235 = vector.broadcast %1234 : f32 to vector<1x256xf32>
    %1236 = arith.mulf %1235, %1230 : vector<1x256xf32>
    %1237 = arith.addf %1233, %1236 : vector<1x256xf32>
    %1238 = arith.addf %1226, %1237 : vector<1x256xf32>
    %c0_977 = arith.constant 0 : index
    %c6_978 = arith.constant 6 : index
    %c18_979 = arith.constant 18 : index
    %1239 = vector.load %arg14[%c0_977, %c6_978, %c18_979] : memref<2x9x290xf32, #tpu.memory_space<vmem>>, vector<1x1x256xf32>
    %1240 = vector.shape_cast %1239 : vector<1x1x256xf32> to vector<1x256xf32>
    %c1_980 = arith.constant 1 : index
    %c6_981 = arith.constant 6 : index
    %c18_982 = arith.constant 18 : index
    %1241 = vector.load %arg14[%c1_980, %c6_981, %c18_982] : memref<2x9x290xf32, #tpu.memory_space<vmem>>, vector<1x1x256xf32>
    %1242 = vector.shape_cast %1241 : vector<1x1x256xf32> to vector<1x256xf32>
    %1243 = arith.mulf %1240, %26 : vector<1x256xf32>
    %1244 = arith.mulf %1242, %26 : vector<1x256xf32>
    %c0_983 = arith.constant 0 : index
    %c5_984 = arith.constant 5 : index
    %1245 = memref.load %arg6[%c0_983, %c5_984] : memref<2x9xf32, #tpu.memory_space<smem>>
    %1246 = vector.broadcast %1245 : f32 to vector<1x256xf32>
    %1247 = arith.mulf %1246, %1243 : vector<1x256xf32>
    %c1_985 = arith.constant 1 : index
    %c5_986 = arith.constant 5 : index
    %1248 = memref.load %arg6[%c1_985, %c5_986] : memref<2x9xf32, #tpu.memory_space<smem>>
    %1249 = vector.broadcast %1248 : f32 to vector<1x256xf32>
    %1250 = arith.mulf %1249, %1244 : vector<1x256xf32>
    %1251 = arith.addf %1247, %1250 : vector<1x256xf32>
    %1252 = arith.addf %1238, %1251 : vector<1x256xf32>
    %c0_987 = arith.constant 0 : index
    %c1_988 = arith.constant 1 : index
    %c33_989 = arith.constant 33 : index
    %1253 = vector.load %arg14[%c0_987, %c1_988, %c33_989] : memref<2x9x290xf32, #tpu.memory_space<vmem>>, vector<1x1x256xf32>
    %1254 = vector.shape_cast %1253 : vector<1x1x256xf32> to vector<1x256xf32>
    %c1_990 = arith.constant 1 : index
    %c1_991 = arith.constant 1 : index
    %c33_992 = arith.constant 33 : index
    %1255 = vector.load %arg14[%c1_990, %c1_991, %c33_992] : memref<2x9x290xf32, #tpu.memory_space<vmem>>, vector<1x1x256xf32>
    %1256 = vector.shape_cast %1255 : vector<1x1x256xf32> to vector<1x256xf32>
    %c0_993 = arith.constant 0 : index
    %c6_994 = arith.constant 6 : index
    %1257 = memref.load %arg6[%c0_993, %c6_994] : memref<2x9xf32, #tpu.memory_space<smem>>
    %1258 = vector.broadcast %1257 : f32 to vector<1x256xf32>
    %1259 = arith.mulf %1258, %1254 : vector<1x256xf32>
    %c1_995 = arith.constant 1 : index
    %c6_996 = arith.constant 6 : index
    %1260 = memref.load %arg6[%c1_995, %c6_996] : memref<2x9xf32, #tpu.memory_space<smem>>
    %1261 = vector.broadcast %1260 : f32 to vector<1x256xf32>
    %1262 = arith.mulf %1261, %1256 : vector<1x256xf32>
    %1263 = arith.addf %1259, %1262 : vector<1x256xf32>
    %1264 = arith.addf %1252, %1263 : vector<1x256xf32>
    %c0_997 = arith.constant 0 : index
    %c2_998 = arith.constant 2 : index
    %c33_999 = arith.constant 33 : index
    %1265 = vector.load %arg14[%c0_997, %c2_998, %c33_999] : memref<2x9x290xf32, #tpu.memory_space<vmem>>, vector<1x1x256xf32>
    %1266 = vector.shape_cast %1265 : vector<1x1x256xf32> to vector<1x256xf32>
    %c1_1000 = arith.constant 1 : index
    %c2_1001 = arith.constant 2 : index
    %c33_1002 = arith.constant 33 : index
    %1267 = vector.load %arg14[%c1_1000, %c2_1001, %c33_1002] : memref<2x9x290xf32, #tpu.memory_space<vmem>>, vector<1x1x256xf32>
    %1268 = vector.shape_cast %1267 : vector<1x1x256xf32> to vector<1x256xf32>
    %c0_1003 = arith.constant 0 : index
    %c7_1004 = arith.constant 7 : index
    %1269 = memref.load %arg6[%c0_1003, %c7_1004] : memref<2x9xf32, #tpu.memory_space<smem>>
    %1270 = vector.broadcast %1269 : f32 to vector<1x256xf32>
    %1271 = arith.mulf %1270, %1266 : vector<1x256xf32>
    %c1_1005 = arith.constant 1 : index
    %c7_1006 = arith.constant 7 : index
    %1272 = memref.load %arg6[%c1_1005, %c7_1006] : memref<2x9xf32, #tpu.memory_space<smem>>
    %1273 = vector.broadcast %1272 : f32 to vector<1x256xf32>
    %1274 = arith.mulf %1273, %1268 : vector<1x256xf32>
    %1275 = arith.addf %1271, %1274 : vector<1x256xf32>
    %1276 = arith.addf %1264, %1275 : vector<1x256xf32>
    %c0_1007 = arith.constant 0 : index
    %c0_1008 = arith.constant 0 : index
    %c34_1009 = arith.constant 34 : index
    %1277 = vector.load %arg14[%c0_1007, %c0_1008, %c34_1009] : memref<2x9x290xf32, #tpu.memory_space<vmem>>, vector<1x1x256xf32>
    %1278 = vector.shape_cast %1277 : vector<1x1x256xf32> to vector<1x256xf32>
    %c1_1010 = arith.constant 1 : index
    %c0_1011 = arith.constant 0 : index
    %c34_1012 = arith.constant 34 : index
    %1279 = vector.load %arg14[%c1_1010, %c0_1011, %c34_1012] : memref<2x9x290xf32, #tpu.memory_space<vmem>>, vector<1x1x256xf32>
    %1280 = vector.shape_cast %1279 : vector<1x1x256xf32> to vector<1x256xf32>
    %1281 = arith.mulf %1278, %26 : vector<1x256xf32>
    %1282 = arith.mulf %1280, %26 : vector<1x256xf32>
    %c0_1013 = arith.constant 0 : index
    %c8_1014 = arith.constant 8 : index
    %1283 = memref.load %arg6[%c0_1013, %c8_1014] : memref<2x9xf32, #tpu.memory_space<smem>>
    %1284 = vector.broadcast %1283 : f32 to vector<1x256xf32>
    %1285 = arith.mulf %1284, %1281 : vector<1x256xf32>
    %c1_1015 = arith.constant 1 : index
    %c8_1016 = arith.constant 8 : index
    %1286 = memref.load %arg6[%c1_1015, %c8_1016] : memref<2x9xf32, #tpu.memory_space<smem>>
    %1287 = vector.broadcast %1286 : f32 to vector<1x256xf32>
    %1288 = arith.mulf %1287, %1282 : vector<1x256xf32>
    %1289 = arith.addf %1285, %1288 : vector<1x256xf32>
    %1290 = arith.addf %1276, %1289 : vector<1x256xf32>
    %cst_1017 = arith.constant 0.000000e+00 : f32
    %1291 = vector.broadcast %cst_1017 : f32 to vector<1x256xf32>
    %1292 = arith.subf %1291, %1290 : vector<1x256xf32>
    %1293 = math.exp %1292 : vector<1x256xf32>
    %cst_1018 = arith.constant 1.000000e+00 : f32
    %1294 = vector.broadcast %cst_1018 : f32 to vector<1x256xf32>
    %1295 = arith.addf %1294, %1293 : vector<1x256xf32>
    %cst_1019 = arith.constant 1.000000e+00 : f32
    %1296 = vector.broadcast %cst_1019 : f32 to vector<1x256xf32>
    %1297 = arith.divf %1296, %1295 : vector<1x256xf32>
    %c128_1020 = arith.constant 128 : index
    %c0_1021 = arith.constant 0 : index
    %1298 = vector.load %arg13[%c128_1020, %c0_1021] : memref<144x256xf32, #tpu.memory_space<vmem>>, vector<16x256xf32>
    %1299 = vector.broadcast %24 : vector<16x1xf32> to vector<16x256xf32>
    %1300 = arith.mulf %1298, %1299 : vector<16x256xf32>
    %1301 = vector.broadcast %1297 : vector<1x256xf32> to vector<16x256xf32>
    %1302 = arith.mulf %1300, %1301 : vector<16x256xf32>
    %c128_1022 = arith.constant 128 : index
    %c0_1023 = arith.constant 0 : index
    %1303 = vector.load %arg12[%c128_1022, %c0_1023] : memref<144x256xf32, #tpu.memory_space<vmem>>, vector<16x256xf32>
    tpu.vector_store %arg12[%c128_1022, %c0_1023], %1302 {strides = array<i32>} : memref<144x256xf32, #tpu.memory_space<vmem>>, vector<16x256xf32>,
    %c0_1024 = arith.constant 0 : index
    %c0_1025 = arith.constant 0 : index
    %1304 = vector.load %arg7[%c0_1024, %c0_1025] : memref<32x144xf32, #tpu.memory_space<vmem>>, vector<32x144xf32>
    %c0_1026 = arith.constant 0 : index
    %c0_1027 = arith.constant 0 : index
    %1305 = vector.load %arg12[%c0_1026, %c0_1027] : memref<144x256xf32, #tpu.memory_space<vmem>>, vector<144x256xf32>
    %cst_1028 = arith.constant dense<0.000000e+00> : vector<32x256xf32>
    %1306 = tpu.matmul %1304, %1305, %cst_1028 {dimension_numbers = #tpu.dot_dimension_numbers<[1], [0], [0], [1], [0, 0, 1, 1], [], []>, precision = #tpu.contract_precision<fp32>} : vector<32x144xf32>, vector<144x256xf32>, vector<32x256xf32> -> vector<32x256xf32>
    %c0_1029 = arith.constant 0 : index
    %c0_1030 = arith.constant 0 : index
    %1307 = vector.load %arg8[%c0_1029, %c0_1030] : memref<32x1xf32, #tpu.memory_space<vmem>>, vector<32x1xf32>
    %1308 = vector.broadcast %1307 : vector<32x1xf32> to vector<32x256xf32>
    %1309 = arith.addf %1306, %1308 : vector<32x256xf32>
    %cst_1031 = arith.constant 0.000000e+00 : f32
    %1310 = vector.broadcast %cst_1031 : f32 to vector<32x256xf32>
    %1311 = arith.maximumf %1309, %1310 : vector<32x256xf32>
    %1312 = vector.shape_cast %1311 : vector<32x256xf32> to vector<1x32x256xf32>
    %c0_1032 = arith.constant 0 : index
    %c0_1033 = arith.constant 0 : index
    %c0_1034 = arith.constant 0 : index
    %1313 = vector.load %arg10[%c0_1032, %c0_1033, %c0_1034] : memref<1x32x256xf32, #tpu.memory_space<vmem>>, vector<1x32x256xf32>
    tpu.vector_store %arg10[%c0_1032, %c0_1033, %c0_1034], %1312 {strides = array<i32>} : memref<1x32x256xf32, #tpu.memory_space<vmem>>, vector<1x32x256xf32>,
    return
  }
  func.func @transform_0(%arg0: i32) -> (i32, i32, i32) {
    %c0_i32 = arith.constant 0 : i32
    %c0_i32_0 = arith.constant 0 : i32
    %c0_i32_1 = arith.constant 0 : i32
    return %arg0, %c0_i32, %c0_i32_0 : i32, i32, i32
  }
  func.func @transform_1(%arg0: i32) -> (i32, i32) {
    %c0_i32 = arith.constant 0 : i32
    %c0_i32_0 = arith.constant 0 : i32
    %c0_i32_1 = arith.constant 0 : i32
    return %c0_i32, %c0_i32_0 : i32, i32
  }
  func.func @transform_2(%arg0: i32) -> (i32, i32) {
    %c0_i32 = arith.constant 0 : i32
    %c0_i32_0 = arith.constant 0 : i32
    %c0_i32_1 = arith.constant 0 : i32
    return %c0_i32, %c0_i32_0 : i32, i32
  }
  func.func @transform_3(%arg0: i32) -> (i32, i32) {
    %c0_i32 = arith.constant 0 : i32
    %c0_i32_0 = arith.constant 0 : i32
    %c0_i32_1 = arith.constant 0 : i32
    return %c0_i32, %c0_i32_0 : i32, i32
  }
  func.func @transform_4(%arg0: i32) -> (i32, i32) {
    %c0_i32 = arith.constant 0 : i32
    %c0_i32_0 = arith.constant 0 : i32
    %c0_i32_1 = arith.constant 0 : i32
    return %c0_i32, %c0_i32_0 : i32, i32
  }
  func.func @transform_5(%arg0: i32) -> (i32, i32) {
    %c0_i32 = arith.constant 0 : i32
    %c0_i32_0 = arith.constant 0 : i32
    %c0_i32_1 = arith.constant 0 : i32
    return %c0_i32, %c0_i32_0 : i32, i32
  }
  func.func @transform_6(%arg0: i32) -> (i32, i32) {
    %c0_i32 = arith.constant 0 : i32
    %c0_i32_0 = arith.constant 0 : i32
    %c0_i32_1 = arith.constant 0 : i32
    return %c0_i32, %c0_i32_0 : i32, i32
  }
  func.func @transform_7(%arg0: i32) -> (i32, i32) {
    %c0_i32 = arith.constant 0 : i32
    %c0_i32_0 = arith.constant 0 : i32
    %c0_i32_1 = arith.constant 0 : i32
    return %c0_i32, %c0_i32_0 : i32, i32
  }
  func.func @transform_8(%arg0: i32) -> (i32, i32) {
    %c0_i32 = arith.constant 0 : i32
    %c0_i32_0 = arith.constant 0 : i32
    %c0_i32_1 = arith.constant 0 : i32
    return %c0_i32, %c0_i32_0 : i32, i32
  }
  func.func @transform_9(%arg0: i32) -> (i32, i32, i32) {
    %c0_i32 = arith.constant 0 : i32
    %c0_i32_0 = arith.constant 0 : i32
    %c0_i32_1 = arith.constant 0 : i32
    return %arg0, %c0_i32, %c0_i32_0 : i32, i32, i32
  }
}

</mosaic_0001>

<bundles_post_ra>
// kernel: tpu_custom_call.1
= control target key start
LH: loop header
LB: loop body
LE: loop exit
PB: predicated region body
PF: predicated region fallthrough
CT: control target
= control target key end

     0   :  { %s11700_s0 = inlined_call_operand.vmem [shape: f32[2,16,256], index: 0, kind: input, shape index: {}]   ;;  %s11701_s1 = inlined_call_operand.vmem [shape: f32[16,16], index: 1, kind: input, shape index: {}]   ;;  %s11702_s2 = inlined_call_operand.vmem [shape: f32[16,16], index: 2, kind: input, shape index: {}]   ;;  %s11703_s3 = inlined_call_operand.hbm [shape: f32[144,144], index: 3, kind: input, shape index: {}]   ;;  %s11704_s4 = inlined_call_operand.vmem [shape: f32[144,1], index: 4, kind: input, shape index: {}]   ;;  %s11705_s5 = inlined_call_operand.vmem [shape: f32[2,9], index: 5, kind: input, shape index: {}]   ;;  %s11706_s6 = inlined_call_operand.vmem [shape: f32[32,144], index: 6, kind: input, shape index: {}]   ;;  %s11707_s7 = inlined_call_operand.vmem [shape: f32[32,1], index: 7, kind: input, shape index: {}]   ;;  %s11708_s8 = inlined_call_operand.vmem [shape: f32[2,256], index: 8, kind: input, shape index: {}]   ;;  %s11709_s9 = inlined_call_operand.hbm [shape: f32[2,32,256], index: 9, kind: output, shape index: {}]  }
   0x1   :  { %12042 = sst [smem:[#allocation87_spill]] %s11700_s0 }
   0x2   :  { %12043 = sst [smem:[#allocation88_spill]] %s11701_s1 }
   0x3   :  { %12044 = sst [smem:[#allocation89_spill]] %s11703_s3 }
   0x4   :  { %14 = vsyncpa [#allocation7], 0 }
   0x5   :  { %15 = vsyncpa [#allocation9], 0 }
   0x6   :  { %16 = vsyncpa [#allocation8], 0 }
   0x7   :  { %18 = vsyncpa [#allocation8 + $0x1], 0  ;;  %s7943_s30 = smov 0   ;;  %s7945_s10 = smov 0  }
   0x8   :  { %s7947_s11 = smov 0   ;;  %s7949_s12 = smov 0  }
   0x9 LB: > { %s7964_s13 = sadd.s32 4294967295, %s7868_s12   ;;  %s6735_s14 = sadd.s32 4294967294, %s7868_s12   ;;  %s7868_s12 = sphi %s7949_s12, %s12673_s12   ;;  %s7864_s11 = sphi %s7947_s11, %s12672_s11   ;;  %s7860_s10 = sphi %s7945_s10, %s12671_s10   ;;  %s7856_s30 = sphi %s7943_s30, %s12670_s30  }
   0xa   : > { %s7968_s15 = sadd.s32 1, %s7868_s12   ;;  %s225_s16 = sadd.s32 1, %s7864_s11 }
   0xb   : > { %s222_s17 = ssub.s32 %s7868_s12, %s7968_s15  ;;  %p235_p0 = scmp.ne.s32.totalorder %s7864_s11, %s7860_s10 }
   0xc   : > { %p223_p1 = scmp.eq.s32.totalorder %s222_s17, 0  ;;  %p236_p2 = scmp.eq.s32.totalorder %s7964_s13, 1 }
   0xd   : > { %p241_p3 = scmp.ne.s32.totalorder %s7860_s10, %s7856_s30  ;;  %p242_p4 = scmp.eq.s32.totalorder %s6735_s14, 1 }
   0xe   : > { %s7979_s18 = scalar_select %p223_p1, %s7864_s11, %s225_s16  }
   0xf   : > { %p7981_p5 = por %p236_p2, %p235_p0  ;;  %p7985_p6 = por %p242_p4, %p241_p3 }
  0x10   : > { %p6736_p7 = scmp.ge.s32.totalorder %s7868_s12, 1  ;;  %p249_p8 = scmp.lt.s32.totalorder %s7868_s12, 3 }
  0x11   : > { %s12045_s19 = scalar_select %p7981_p5, 1, 0 }
  0x12   : > { %s12046_s20 = scalar_select %p7985_p6, 1, 0 }
  0x13   : > { %p11710_p9 = scmp.eq.s32.totalorder %s7964_s13, 0  ;;  %p7992_p10 = pnand %p6736_p7, %p249_p8 }
  0x14   : > { %s7870_s22 = smov [#allocation6]   ;;  %s284_s26 = sshll.u32 %s11705_s5, 4  ;;  %s8007_s26 = int_to_ptr.vmem [resolvable:$true] %s284_s26 }
  0x15   : > { %s12047_s21 = scalar_select %p7992_p10, 1, 0 }
  0x16   : > { %s267_s23 = sshll.u32 %s7870_s22, 4  ;;  %p7631_p11 = pneg %p7992_p10  ;;  %s268_s23 = int_to_ptr.vmem [resolvable:$true] %s267_s23 }
  0x17   : > { %s12049_s3 = sld [smem:[#allocation89_spill]] }
  0x18   : > { %p8003_p12 = pnand %p11710_p9, %p7631_p11 }
  0x1a   : > { %p7757_p0 = pneg %p8003_p12 }
  0x1d   : > { %s7755_s14 = scalar_lea.hbm %s12049_s3, 4608 }
  0x1e   : > { %p7756_p13 = scmp.ne.s32.totalorder %s12049_s3, %s7755_s14  ;;  %p7762_p3 = scmp.lt.u32.totalorder %s7755_s14, %s12049_s3 }
  0x20   : > { %p7758_p1 = pnand %p7757_p0, %p7756_p13 }
  0x22   : > { %p7759_p2 = pneg %p7758_p1 }
  0x24   : > { %p7764_p4 = pnand %p7762_p3, %p7759_p2 }
  0x26   : > { %7767 = shalt.err (!%p7764_p4)
}
  0x27   : > { %s7768_s25 = scalar_lea.vmem %s268_s23, 4608  ;;  %p7776_p9 = scmp.lt.s32.totalorder %s268_s23, %s268_s23 }
  0x28   : > { %p7769_p7 = scmp.ne.s32.totalorder %s268_s23, %s7768_s25  ;;  %p7777_p6 = scmp.lt.s32.totalorder %s7768_s25, %s7768_s25 }
  0x2a   : > { %p7771_p8 = pnand %p7769_p7, %p7757_p0  ;;  %p7778_p5 = por %p7777_p6, %p7776_p9 }
  0x2c   : > { %p7772_p11 = pneg %p7771_p8 }
  0x2e   : > { %p7779_p10 = pnand %p7778_p5, %p7772_p11 }
  0x30   : > { %7782 = shalt.err (!%p7779_p10)
}
  0x31   : > { %s7871_s28 = smov 256   ;;  %s7872_s29 = smov 16  }
  0x32   : > { %7634 = dma.hbm_to_vmem [thread:$0]  (!%p8003_p12), %s12049_s3, 4608, %s268_s23, [#allocation7], %s7871_s28, %s7871_s28, %s7872_s29  }
  0x33   : > { %s7783_s17 = scalar_lea.vmem %s8007_s26, 32  ;;  %p7791_p5 = scmp.lt.s32.totalorder %s8007_s26, %s8007_s26 }
  0x34   : > { %p7784_p13 = scmp.ne.s32.totalorder %s8007_s26, %s7783_s17  ;;  %p7792_p9 = scmp.lt.s32.totalorder %s7783_s17, %s7783_s17 }
  0x36   : > { %p7786_p1 = pnand %p7784_p13, %p7757_p0  ;;  %p7793_p10 = por %p7792_p9, %p7791_p5 }
  0x38   : > { %p7787_p6 = pneg %p7786_p1 }
  0x3a   : > { %p7794_p2 = pnand %p7793_p10, %p7787_p6 }
  0x3c   : > { %7797 = shalt.err (!%p7794_p2)
}
  0x3d   : > { %s7873_s22 = smov [#allocation10]   ;;  %p12050_p3 = scmp.ne.s32.totalorder %s12047_s21, 0 }
  0x3e   : > { %7637 = dma.vmem_to_smem (!%p8003_p12), %s8007_s26, 32, %s7873_s22, [#allocation9]  }
  0x3f   : > { %314 = sbr.rel (%p12050_p3) target bundleno = 1927 (0x787), region = 56 }
  0x46   : > { %p12051_p4 = scmp.eq.s32.totalorder %s7964_s13, 0 }
  0x48   : > { %7843 = dma.done.wait (%p12051_p4), [#allocation7], 4608   ;;  %p12052_p0 = pmov %p12051_p4 }
  0x4a   : > { %7845 = vsyncadd (%p12052_p0), [#allocation7], 4294962688  ;;  %p12053_p7 = pmov %p12052_p0 }
  0x4b   : > { %p12054_p8 = pmov %p12052_p0 }
  0x4c   : > { %7847 = dma.done.wait (%p12053_p7), [#allocation9], 32  }
  0x4d   : > { %7849 = vsyncadd (%p12054_p8), [#allocation9], 4294967264 }
  0x4e   : > { %324 = sfence }
  0x4f   : > { %p355_p11 = scmp.lt.s32.totalorder %s7964_s13, 1  ;;  %v11715_v0 = vlaneseq  ;;  %v7874_v1 = vmov 0.0   ;;  %vm414_vm0 = vcmask 277504   ;;  %s12056_s0 = sld [smem:[#allocation87_spill]]  ;;  %vm440_vm1 = vcmask 1047688  }
  0x50   : > { %416 = vst [vmem:[#allocation2 + $0x18] sm:$0xff] %v7874_v1  ;;  %412 = vst [vmem:[#allocation2] sm:$0xff] %v7874_v1  ;;  %s11873_s25 = smov 17   ;;  %v6746_v9 = vld [vmem:[%s11708_s8 + $0x1] ss:$2 sm:$0x3] }
  0x51   : > { %3128 = vst [vmem:[#allocation5] sm:$0xff] %v7874_v1  ;;  %3129 = vst [vmem:[#allocation5 + $0x8] sm:$0xff] %v7874_v1  ;;  %s356_s21 = scalar_select %p355_p11, %s7964_s13, 1  ;;  %v8054_v2 = vshrl.u32 %v11715_v0, 7  ;;  %vm431_vm2 = vcmask 138240   ;;  %vm526_vm3 = vcmask 15360  }
  0x52   : > { %3131 = vst [vmem:[#allocation5 + $0x18] sm:$0x1] %v7874_v1  ;;  %3132 = vst [vmem:[#allocation5 + $0x20] sm:$0x1] %v7874_v1  ;;  %s7876_s17 = smov 2   ;;  %s11918_s22 = smov 16  }
  0x53   : > { %3135 = vst [vmem:[#allocation5 + $0x30] sm:$0xff] %v7874_v1  ;;  %3136 = vst [vmem:[#allocation5 + $0x38] sm:$0xff] %v7874_v1  ;;  %s6905_s23 = sshll.u32 %s356_s21, 5  ;;  %v8070_v5 = vsub.s32 1, %v8054_v2  ;;  %v8073_v6 = vsub.s32 0, %v8054_v2  ;;  %s7878_s21 = smov 18  }
  0x54   : > { %3138 = vst [vmem:[#allocation5 + $0x48] sm:$0x1] %v7874_v1  ;;  %3139 = vst [vmem:[#allocation5 + $0x50] sm:$0x1] %v7874_v1  ;;  %s7880_s26 = smov 34   ;;  %s11869_s27 = smov 127  }
  0x55   : > { %12055 = vst [vmem:[#allocation15_spill] sm:$0xff] %v8054_v2  ;;  %418 = vst.msk [vmem:[#allocation2 + $0x28] sm:$0xff] %vm414_vm0, %v7874_v1  ;;  %s8063_s24 = scalar_lea.vmem %s12056_s0, %s6905_s23  ;;  %v521_v10 = vrot.slane %v6746_v9, %v8070_v5  ;;  %v517_v11 = vrot.slane %v6746_v9, %v8073_v6  ;;  %v409_v12 = vld [vmem:[%s11708_s8] ss:$2 sm:$0x3]  ;;  %s7879_s23 = smov 32  }
  0x56   : > { %3130 = vst.msk [vmem:[#allocation5 + $0x10] sm:$0xff] %vm414_vm0, %v7874_v1  ;;  %3137 = vst.msk [vmem:[#allocation5 + $0x40] sm:$0xff] %vm414_vm0, %v7874_v1  ;;  %v362_v3 = vld [vmem:[%s8063_s24 + $0x10] sm:$0xff]  ;;  %v360_v4 = vld [vmem:[%s8063_s24] sm:$0xff]  ;;  %v459_v13 = vrot.slane %v409_v12, %v8070_v5  ;;  %v455_v14 = vrot.slane %v409_v12, %v8073_v6  ;;  %s11713_s28 = smov 111   ;;  %s7883_s29 = smov 95  }
  0x57   : > { %415 = vst.msk [vmem:[#allocation2 + $0x10] sm:$0xff] %vm414_vm0, %v7874_v1  ;;  %427 = vrot.lane.b32.xlu1 %v362_v3, %s11873_s25  ;;  %423 = vrot.lane.b32.xlu0 %v360_v4, %s11873_s25  ;;  %12057 = vst [vmem:[#allocation16_spill] sm:$0xff] %v8070_v5  ;;  %v363_v7 = vld [vmem:[%s8063_s24 + $0x18] sm:$0xff]  ;;  %v361_v8 = vld [vmem:[%s8063_s24 + $0x8] sm:$0xff]  ;;  %s7884_s14 = smov 126   ;;  %s11871_s16 = smov 112  }
  0x58   : > { %12058 = vst [vmem:[#allocation17_spill] sm:$0xff] %v8073_v6  ;;  %vm376_vm4 = vcmask 130048   ;;  %vm666_vm5 = vcmask 146432   ;;  %vm718_vm6 = vcmask 261120   ;;  %vm494_vm7 = vcmask 1039360   ;;  %s12425_s1 = sld [smem:[#allocation88_spill]] }
  0x59   : > { %vm643_vm8 = vcmask 908288   ;;  %vm784_vm9 = vcmask 777216   ;;  %vm555_vm10 = vcmask 1031168   ;;  %vm606_vm11 = vcmask 916480   ;;  %s10281_s0 = sld [smem:[#allocation10 + $0x83]]  ;;  %s10311_s3 = sld [smem:[#allocation10 + $0x87]] }
  0x5a   : > { %vm695_vm12 = vcmask 900096   ;;  %vm747_vm13 = vcmask 785408   ;;  %vm835_vm14 = vcmask 769024   ;;  %vm3133_vm15 = vcmask 270336   ;;  %p12667_p13 = scmp.ne.s32.totalorder %s12045_s19, 0 }
  0x5b   : > { %429 = vrot.lane.b32.xlu1 %v363_v7, %s11873_s25  ;;  %425 = vrot.lane.b32.xlu0 %v361_v8, %s11873_s25  ;;  %s6826_s25 = sld [smem:[#allocation10 + $0x6]] }
  0x5f   : > { %524 = vrot.lane.b32.xlu1 %v521_v10, %s7876_s17  ;;  %522 = vrot.lane.b32.xlu0 %v517_v11, %s7876_s17 }
  0x63   : > { %576 = vrot.lane.b32.xlu1 %v459_v13, %s11918_s22  ;;  %574 = vrot.lane.b32.xlu0 %v455_v14, %s11918_s22 }
  0x67   : > { %664 = vrot.lane.b32.xlu1 %v521_v10, %s7878_s21  ;;  %662 = vrot.lane.b32.xlu0 %v517_v11, %s7878_s21 }
  0x6b   : > { %716 = vrot.lane.b32.xlu1 %v459_v13, %s7879_s23  ;;  %714 = vrot.lane.b32.xlu0 %v455_v14, %s7879_s23 }
  0x6f   : > { %805 = vrot.lane.b32.xlu1 %v521_v10, %s7880_s26  ;;  %803 = vrot.lane.b32.xlu0 %v517_v11, %s7880_s26 }
  0xc9   : > { %v428_v15 = vpop.permute.xlu1 %427  ;;  %v424_v16 = vpop.permute.xlu0 %423 }
  0xca   : > { %444 = vst.msk [vmem:[#allocation2 + $0x18] sm:$0xff] %vm440_vm1, %v428_v15  ;;  %441 = vst.msk [vmem:[#allocation2] sm:$0xff] %vm440_vm1, %v424_v16 }
  0xcd   : > { %v430_v17 = vpop.permute.xlu1 %429  ;;  %v426_v18 = vpop.permute.xlu0 %425 }
  0xce   : > { %v8100_v19 = vsel %vm431_vm2, %v428_v15, %v430_v17  ;;  %446 = vst.msk [vmem:[#allocation2 + $0x28] sm:$0xff] %vm431_vm2, %v430_v17  ;;  %v8104_v20 = vsel %vm431_vm2, %v424_v16, %v426_v18  ;;  %443 = vst.msk [vmem:[#allocation2 + $0x10] sm:$0xff] %vm431_vm2, %v426_v18 }
  0xcf   : > { %v463_v21 = vmul.f32 %v459_v13, %v8104_v20  ;;  %v465_v22 = vmul.f32 %v459_v13, %v8100_v19 }
  0xd1   : > { %v8109_v23 = vld [vmem:[#allocation2] sm:$0xff]  ;;  %v1082_v24 = vand.u32 4294901760, %v463_v21  ;;  %v1086_v25 = vand.u32 4294901760, %v465_v22  ;;  %v8111_v26 = vld [vmem:[#allocation2 + $0x18] sm:$0xff]  ;;  %v523_v57 = vpop.permute.xlu0 %522  ;;  %v525_v60 = vpop.permute.xlu1 %524 }
  0xd2   : > { %482 = vrot.lane.b32.xlu0 %v8109_v23, %s11869_s27  ;;  %v462_v27 = vmul.f32 %v8109_v23, %v455_v14  ;;  %v464_v28 = vmul.f32 %v8111_v26, %v455_v14  ;;  %v531_v59 = vmul.f32 %v523_v57, %v8109_v23  ;;  %v534_v7 = vmul.f32 %v523_v57, %v8111_v26 }
  0xd3   : > { %v8117_v29 = vpack.c.bf16 %v1086_v25, %v1082_v24  ;;  %v8119_v30 = vsub.f32 %v463_v21, %v1082_v24  ;;  %v8121_v31 = vsub.f32 %v465_v22, %v1086_v25  ;;  %v527_v10 = vsel %vm526_vm3, %v523_v57, %v525_v60 }
  0xd4   : > { %v1084_v32 = vand.u32 4294901760, %v462_v27  ;;  %v1088_v33 = vand.u32 4294901760, %v464_v28  ;;  %v532_v12 = vmul.f32 %v527_v10, %v8104_v20  ;;  %v535_v14 = vmul.f32 %v527_v10, %v8100_v19 }
  0xd5   : > { %12059 = vst [vmem:[#allocation18_spill] sm:$0xff] %v8117_v29  ;;  %v8123_v34 = vld [vmem:[#allocation2 + $0x10] sm:$0xff]  ;;  %6908 = vmatprep.subr.bf16.mxu1 %v8117_v29  ;;  %v1473_v35 = vand.u32 4294901760, %v8119_v30  ;;  %v1485_v36 = vand.u32 4294901760, %v8121_v31  ;;  %v8140_v41 = vld [vmem:[#allocation2 + $0x28] sm:$0xff]  ;;  %v575_v58 = vpop.permute.xlu0 %574  ;;  %v577_v9 = vpop.permute.xlu1 %576 }
  0xd6   : > { %631 = vrot.lane.b32.xlu0 %v8109_v23, %s11713_s28  ;;  %486 = vrot.lane.b32.xlu1 %v8123_v34, %s11869_s27  ;;  %v8134_v38 = vpack.c.bf16 %v1088_v33, %v1084_v32  ;;  %v8136_v39 = vsub.f32 %v462_v27, %v1084_v32  ;;  %v8138_v40 = vsub.f32 %v464_v28, %v1088_v33 }
  0xd7   : > { %v1474_v42 = vsub.f32 %v8119_v30, %v1473_v35  ;;  %v1486_v43 = vsub.f32 %v8121_v31, %v1485_v36  ;;  %v8154_v54 = vpack.c.bf16 %v1485_v36, %v1473_v35  ;;  %v533_v62 = vmul.f32 %v525_v60, %v8123_v34 }
  0xd8   : > { %6910 = vmatpush1.bf16.msra.mxu1 %v8134_v38  ;;  %v1479_v44 = vand.u32 4294901760, %v8136_v39  ;;  %v1491_v45 = vand.u32 4294901760, %v8138_v40  ;;  %v582_v63 = vmul.f32 %v575_v58, %v8109_v23  ;;  %v536_v1 = vmul.f32 %v525_v60, %v8140_v41 }
  0xd9   : > { %v1475_v46 = vand.u32 4294901760, %v1474_v42  ;;  %v1487_v47 = vand.u32 4294901760, %v1486_v43  ;;  %12060 = vst [vmem:[#allocation19_spill] sm:$0xff] %v8154_v54  ;;  %v663_v61 = vpop.permute.xlu0 %662  ;;  %v584_v11 = vmul.f32 %v577_v9, %v8123_v34  ;;  %v587_v13 = vmul.f32 %v577_v9, %v8140_v41  ;;  %v665_v18 = vpop.permute.xlu1 %664 }
  0xda   : > { %772 = vrot.lane.b32.xlu0 %v8109_v23, %s7883_s29  ;;  %492 = vrot.lane.b32.xlu1 %v8140_v41, %s11869_s27  ;;  %v1480_v48 = vsub.f32 %v8136_v39, %v1479_v44  ;;  %v1492_v49 = vsub.f32 %v8138_v40, %v1491_v45  ;;  %v8160_v56 = vpack.c.bf16 %v1491_v45, %v1479_v44 }
  0xdb   : > { %v6943_v50 = vpack.c.bf16 %v1487_v47, %v1475_v46  ;;  %v671_v3 = vmul.f32 %v663_v61, %v8109_v23  ;;  %v578_v15 = vsel %vm376_vm4, %v575_v58, %v577_v9  ;;  %v585_v16 = vmul.f32 %v575_v58, %v8111_v26 }
  0xdc   : > { %v1481_v51 = vand.u32 4294901760, %v1480_v48  ;;  %v1493_v52 = vand.u32 4294901760, %v1492_v49  ;;  %12061 = vst [vmem:[#allocation20_spill] sm:$0xff] %v8160_v56  ;;  %v583_v17 = vmul.f32 %v578_v15, %v8104_v20  ;;  %v673_v21 = vmul.f32 %v665_v18, %v8123_v34 }
  0xdd   : > { %6944 = vmatprep.subr.bf16.mxu0 %v6943_v50  ;;  %v715_v4 = vpop.permute.xlu0 %714  ;;  %v586_v22 = vmul.f32 %v578_v15, %v8100_v19  ;;  %v667_v24 = vsel %vm666_vm5, %v663_v61, %v665_v18  ;;  %v676_v25 = vmul.f32 %v665_v18, %v8140_v41  ;;  %v717_v28 = vpop.permute.xlu1 %716  ;;  %v674_v32 = vmul.f32 %v663_v61, %v8111_v26  ;;  %v849_v50 = vld [vmem:[#allocation6 + $0x8] sm:$0xff] }
  0xde   : > { %488 = vrot.lane.b32.xlu1 %v8111_v26, %s11869_s27  ;;  %484 = vrot.lane.b32.xlu0 %v8104_v20, %s11869_s27  ;;  %v6945_v55 = vpack.c.bf16 %v1493_v52, %v1481_v51  ;;  %v723_v8 = vmul.f32 %v715_v4, %v8109_v23  ;;  %v672_v27 = vmul.f32 %v667_v24, %v8104_v20  ;;  %v1029_v51 = vsel %vm376_vm4, %v849_v50, 0 }
  0xdf   : > { %v675_v33 = vmul.f32 %v667_v24, %v8100_v19  ;;  %v719_v35 = vsel %vm718_vm6, %v715_v4, %v717_v28  ;;  %v725_v36 = vmul.f32 %v717_v28, %v8123_v34  ;;  %v728_v45 = vmul.f32 %v717_v28, %v8140_v41 }
  0xe0   : > { %6946 = vmatpush1.bf16.msra.mxu0 %v6945_v55  ;;  %v724_v42 = vmul.f32 %v719_v35, %v8104_v20  ;;  %v727_v46 = vmul.f32 %v719_v35, %v8100_v19  ;;  %v726_v48 = vmul.f32 %v715_v4, %v8111_v26  ;;  %v8236_v57 = vand.u32 4294901760, %v1029_v51 }
  0xe1   : > { %v806_v43 = vpop.permute.xlu1 %805  ;;  %v804_v44 = vpop.permute.xlu0 %803 }
  0xe2   : > { %635 = vrot.lane.b32.xlu1 %v8123_v34, %s11713_s28  ;;  %490 = vrot.lane.b32.xlu0 %v8100_v19, %s11869_s27  ;;  %v807_v47 = vsel %vm414_vm0, %v804_v44, %v806_v43  ;;  %v813_v52 = vmul.f32 %v806_v43, %v8123_v34  ;;  %12062 = vst [vmem:[#allocation21_spill] sm:$0xff] %v8236_v57  ;;  %s6824_s27 = sld [smem:[#allocation10 + $0x5]] }
  0xe3   : > { %v812_v49 = vmul.f32 %v807_v47, %v8104_v20  ;;  %v815_v55 = vmul.f32 %v807_v47, %v8100_v19  ;;  %v8239_v58 = vsub.f32 %v1029_v51, %v8236_v57  ;;  %1716 = vmatprep.mubr.f32.mxu0 %v8236_v57 }
  0xe5   : > { %12063 = vst [vmem:[#allocation22_spill] sm:$0xff] %v8239_v58  ;;  %v11717_v60 = vand.u32 4294901760, %v8239_v58 }
  0xe6   : > { %641 = vrot.lane.b32.xlu1 %v8140_v41, %s11713_s28  ;;  %633 = vrot.lane.b32.xlu0 %v8104_v20, %s11713_s28 }
  0xea   : > { %637 = vrot.lane.b32.xlu1 %v8111_v26, %s11713_s28  ;;  %639 = vrot.lane.b32.xlu0 %v8100_v19, %s11713_s28  ;;  %s7887_s28 = smov 96  }
  0xee   : > { %776 = vrot.lane.b32.xlu1 %v8123_v34, %s7883_s29  ;;  %774 = vrot.lane.b32.xlu0 %v8104_v20, %s7883_s29  ;;  %v816_v20 = vmul.f32 %v806_v43, %v8140_v41  ;;  %v814_v34 = vmul.f32 %v804_v44, %v8111_v26 }
  0xf2   : > { %782 = vrot.lane.b32.xlu1 %v8140_v41, %s7883_s29  ;;  %780 = vrot.lane.b32.xlu0 %v8100_v19, %s7883_s29  ;;  %v1185_v19 = vsub.f32 %v8239_v58, %v11717_v60 }
  0xf4   : > { %v1186_v61 = vand.u32 4294901760, %v1185_v19 }
  0xf6   : > { %778 = vrot.lane.b32.xlu1 %v8111_v26, %s7883_s29  ;;  %543 = vrot.lane.b32.xlu0 %v531_v59, %s7884_s14  ;;  %s7886_s29 = smov 110   ;;  %v811_v59 = vmul.f32 %v804_v44, %v8109_v23 }
  0xf7   : > { %1187 = vmatprep.mubr.f32.mxu1 %v1186_v61 }
  0xfa   : > { %547 = vrot.lane.b32.xlu1 %v533_v62, %s7884_s14  ;;  %594 = vrot.lane.b32.xlu0 %v582_v63, %s11871_s16 }
  0xfe   : > { %553 = vrot.lane.b32.xlu1 %v536_v1, %s7884_s14  ;;  %683 = vrot.lane.b32.xlu0 %v671_v3, %s7886_s29 }
 0x102   : > { %549 = vrot.lane.b32.xlu1 %v534_v7, %s7884_s14  ;;  %735 = vrot.lane.b32.xlu0 %v723_v8, %s7887_s28 }
 0x106   : > { %598 = vrot.lane.b32.xlu1 %v584_v11, %s11871_s16  ;;  %545 = vrot.lane.b32.xlu0 %v532_v12, %s7884_s14 }
 0x10a   : > { %604 = vrot.lane.b32.xlu1 %v587_v13, %s11871_s16  ;;  %551 = vrot.lane.b32.xlu0 %v535_v14, %s7884_s14  ;;  %s7888_s14 = smov 94  }
 0x10e   : > { %600 = vrot.lane.b32.xlu1 %v585_v16, %s11871_s16  ;;  %596 = vrot.lane.b32.xlu0 %v583_v17, %s11871_s16 }
 0x112   : > { %687 = vrot.lane.b32.xlu1 %v673_v21, %s7886_s29  ;;  %602 = vrot.lane.b32.xlu0 %v586_v22, %s11871_s16  ;;  %s6793_s16 = sld [smem:[#allocation10 + $0x86]] }
 0x116   : > { %693 = vrot.lane.b32.xlu1 %v676_v25, %s7886_s29  ;;  %685 = vrot.lane.b32.xlu0 %v672_v27, %s7886_s29 }
 0x11a   : > { %689 = vrot.lane.b32.xlu1 %v674_v32, %s7886_s29  ;;  %691 = vrot.lane.b32.xlu0 %v675_v33, %s7886_s29  ;;  %s6777_s29 = sld [smem:[#allocation10 + $0x7]] }
 0x11e   : > { %739 = vrot.lane.b32.xlu1 %v725_v36, %s7887_s28  ;;  %737 = vrot.lane.b32.xlu0 %v724_v42, %s7887_s28 }
 0x122   : > { %745 = vrot.lane.b32.xlu1 %v728_v45, %s7887_s28  ;;  %743 = vrot.lane.b32.xlu0 %v727_v46, %s7887_s28 }
 0x126   : > { %741 = vrot.lane.b32.xlu1 %v726_v48, %s7887_s28  ;;  %825 = vrot.lane.b32.xlu0 %v812_v49, %s7888_s14  ;;  %s6779_s28 = sld [smem:[#allocation10 + $0x8]] }
 0x12a   : > { %827 = vrot.lane.b32.xlu1 %v813_v52, %s7888_s14  ;;  %831 = vrot.lane.b32.xlu0 %v815_v55, %s7888_s14 }
 0x12e   : > { %833 = vrot.lane.b32.xlu1 %v816_v20, %s7888_s14  ;;  %823 = vrot.lane.b32.xlu0 %v811_v59, %s7888_s14 }
 0x132   : > { %829 = vrot.lane.b32.xlu1 %v814_v34, %s7888_s14  ;;  %s6778_s14 = sld [smem:[#allocation10 + $0x87]] }
 0x144   : > { %v483_v62 = vpop.permute.xlu0 %482 }
 0x148   : > { %v487_v63 = vpop.permute.xlu1 %486  ;;  %v632_v1 = vpop.permute.xlu0 %631 }
 0x14c   : > { %v493_v3 = vpop.permute.xlu1 %492  ;;  %v773_v41 = vpop.permute.xlu0 %772 }
 0x150   : > { %v489_v23 = vpop.permute.xlu1 %488  ;;  %v485_v4 = vpop.permute.xlu0 %484 }
 0x151   : > { %v495_v7 = vsel %vm494_vm7, %v483_v62, %v485_v4  ;;  %v496_v8 = vsel %vm494_vm7, %v485_v4, %v487_v63 }
 0x152   : > { %v1090_v9 = vand.u32 4294901760, %v496_v8  ;;  %v1092_v10 = vand.u32 4294901760, %v495_v7 }
 0x154   : > { %v8251_v11 = vsub.f32 %v496_v8, %v1090_v9  ;;  %v8253_v26 = vsub.f32 %v495_v7, %v1092_v10  ;;  %v636_v12 = vpop.permute.xlu1 %635  ;;  %v491_v13 = vpop.permute.xlu0 %490 }
 0x155   : > { %v497_v14 = vsel %vm494_vm7, %v489_v23, %v491_v13  ;;  %v498_v15 = vsel %vm494_vm7, %v491_v13, %v493_v3 }
 0x156   : > { %v1094_v16 = vand.u32 4294901760, %v498_v15  ;;  %v1096_v17 = vand.u32 4294901760, %v497_v14  ;;  %v1497_v18 = vand.u32 4294901760, %v8251_v11  ;;  %v1503_v21 = vand.u32 4294901760, %v8253_v26 }
 0x158   : > { %v8259_v22 = vpack.c.bf16 %v1094_v16, %v1090_v9  ;;  %v8261_v24 = vpack.c.bf16 %v1096_v17, %v1092_v10  ;;  %v8263_v25 = vsub.f32 %v498_v15, %v1094_v16  ;;  %v8265_v27 = vsub.f32 %v497_v14, %v1096_v17  ;;  %v642_v28 = vpop.permute.xlu1 %641  ;;  %v634_v32 = vpop.permute.xlu0 %633 }
 0x159   : > { %v1498_v36 = vsub.f32 %v8251_v11, %v1497_v18  ;;  %v1504_v42 = vsub.f32 %v8253_v26, %v1503_v21  ;;  %v8290_v62 = vsel %vm643_vm8, %v632_v1, %v634_v32  ;;  %v8293_v63 = vsel %vm643_vm8, %v634_v32, %v636_v12 }
 0x15a   : > { %6912 = vmatprep.subr.bf16.mxu1 %v8259_v22  ;;  %v1509_v33 = vand.u32 4294901760, %v8263_v25  ;;  %v1515_v35 = vand.u32 4294901760, %v8265_v27  ;;  %v11732_v10 = vand.u32 4294901760, %v8293_v63  ;;  %v11728_v12 = vand.u32 4294901760, %v8290_v62 }
 0x15b   : > { %6914 = vmatpush1.bf16.msra.mxu1 %v8261_v24  ;;  %v1499_v51 = vand.u32 4294901760, %v1498_v36  ;;  %v1505_v52 = vand.u32 4294901760, %v1504_v42 }
 0x15c   : > { %v638_v45 = vpop.permute.xlu1 %637  ;;  %v640_v46 = vpop.permute.xlu0 %639  ;;  %v1510_v47 = vsub.f32 %v8263_v25, %v1509_v33  ;;  %v1516_v48 = vsub.f32 %v8265_v27, %v1515_v35  ;;  %v8332_v42 = vsub.f32 %v8293_v63, %v11732_v10  ;;  %v8365_v0 = vpack.c.bf16 %v1509_v33, %v1497_v18  ;;  %v8401_v10 = vld [vmem:[#allocation6] sm:$0xff] }
 0x15d   : > { %v8284_v59 = vsel %vm643_vm8, %v640_v46, %v642_v28  ;;  %v8287_v61 = vsel %vm643_vm8, %v638_v45, %v640_v46  ;;  %v8337_v45 = vsub.f32 %v8290_v62, %v11728_v12  ;;  %v8369_v60 = vpack.c.bf16 %v1515_v35, %v1503_v21 }
 0x15e   : > { %v1511_v49 = vand.u32 4294901760, %v1510_v47  ;;  %v1517_v50 = vand.u32 4294901760, %v1516_v48  ;;  %v11729_v3 = vand.u32 4294901760, %v8284_v59  ;;  %v11727_v9 = vand.u32 4294901760, %v8287_v61  ;;  %12067 = vst [vmem:[#allocation26_spill] sm:$0xff] %v8332_v42  ;;  %12072 = vst [vmem:[#allocation31_spill] sm:$0xff] %v8365_v0 }
 0x15f   : > { %12068 = vst [vmem:[#allocation27_spill] sm:$0xff] %v8337_v45  ;;  %12073 = vst [vmem:[#allocation32_spill] sm:$0xff] %v8369_v60  ;;  %v12079_v5 = vand.u32 4294901760, %v8284_v59 }
 0x160   : > { %v777_v55 = vpop.permute.xlu1 %776  ;;  %v775_v20 = vpop.permute.xlu0 %774  ;;  %v6947_v19 = vpack.c.bf16 %v1511_v49, %v1499_v51  ;;  %v6949_v34 = vpack.c.bf16 %v1517_v50, %v1505_v52  ;;  %v8314_v15 = vsub.f32 %v8284_v59, %v11729_v3  ;;  %v8319_v28 = vsub.f32 %v8287_v61, %v11727_v9 }
 0x161   : > { %v8297_v23 = vsel %vm784_vm9, %v773_v41, %v775_v20  ;;  %v8300_v4 = vsel %vm784_vm9, %v775_v20, %v777_v55 }
 0x162   : > { %6948 = vmatprep.subr.bf16.mxu0 %v6947_v19  ;;  %v11721_v41 = vand.u32 4294901760, %v8300_v4  ;;  %v11719_v14 = vand.u32 4294901760, %v8297_v23  ;;  %12064 = vst [vmem:[#allocation23_spill] sm:$0xff] %v8314_v15  ;;  %12065 = vst [vmem:[#allocation24_spill] sm:$0xff] %v8319_v28  ;;  %v11724_v52 = vand.u32 4294901760, %v8314_v15  ;;  %v11723_v55 = vand.u32 4294901760, %v8319_v28 }
 0x163   : > { %6950 = vmatpush1.bf16.msra.mxu0 %v6949_v34  ;;  %v1569_v34 = vand.u32 4294901760, %v8332_v42 }
 0x164   : > { %v783_v7 = vpop.permute.xlu1 %782  ;;  %v781_v8 = vpop.permute.xlu0 %780  ;;  %v8343_v47 = vsub.f32 %v8300_v4, %v11721_v41  ;;  %v8348_v48 = vsub.f32 %v8297_v23, %v11719_v14 }
 0x165   : > { %v8304_v1 = vsel %vm784_vm9, %v781_v8, %v783_v7  ;;  %v11722_v7 = vand.u32 4294901760, %v8337_v45  ;;  %v8375_v53 = vpack.c.bf16 %v11724_v52, %v1569_v34 }
 0x166   : > { %v11720_v13 = vand.u32 4294901760, %v8304_v1  ;;  %12069 = vst [vmem:[#allocation28_spill] sm:$0xff] %v8343_v47  ;;  %12070 = vst [vmem:[#allocation29_spill] sm:$0xff] %v8348_v48 }
 0x167   : > { %12074 = vst [vmem:[#allocation33_spill] sm:$0xff] %v8375_v53  ;;  %v8381_v37 = vpack.c.bf16 %v11723_v55, %v11722_v7 }
 0x168   : > { %v779_v16 = vpop.permute.xlu1 %778  ;;  %v544_v17 = vpop.permute.xlu0 %543  ;;  %v8324_v32 = vsub.f32 %v8304_v1, %v11720_v13 }
 0x169   : > { %v8327_v36 = vsel %vm784_vm9, %v779_v16, %v781_v8  ;;  %v11726_v8 = vand.u32 4294901760, %v8343_v47  ;;  %v11731_v16 = vand.u32 4294901760, %v8348_v48  ;;  %12075 = vst [vmem:[#allocation34_spill] sm:$0xff] %v8381_v37 }
 0x16a   : > { %12066 = vst [vmem:[#allocation25_spill] sm:$0xff] %v8324_v32  ;;  %v11718_v46 = vand.u32 4294901760, %v8327_v36  ;;  %v11725_v20 = vand.u32 4294901760, %v8324_v32 }
 0x16c   : > { %v8353_v49 = vsub.f32 %v8327_v36, %v11718_v46  ;;  %v548_v50 = vpop.permute.xlu1 %547  ;;  %v595_v51 = vpop.permute.xlu0 %594  ;;  %v8387_v18 = vpack.c.bf16 %v11725_v20, %v11726_v8 }
 0x16e   : > { %12071 = vst [vmem:[#allocation30_spill] sm:$0xff] %v8353_v49  ;;  %v11730_v19 = vand.u32 4294901760, %v8353_v49  ;;  %12076 = vst [vmem:[#allocation35_spill] sm:$0xff] %v8387_v18 }
 0x170   : > { %v554_v44 = vpop.permute.xlu1 %553  ;;  %v8371_v43 = vpop.permute.xlu0 %683  ;;  %v8393_v21 = vpack.c.bf16 %v11730_v19, %v11731_v16 }
 0x172   : > { %12077 = vst [vmem:[#allocation36_spill] sm:$0xff] %v8393_v21 }
 0x174   : > { %v550_v33 = vpop.permute.xlu1 %549  ;;  %v8395_v35 = vpop.permute.xlu0 %735 }
 0x178   : > { %v599_v46 = vpop.permute.xlu1 %598  ;;  %v546_v14 = vpop.permute.xlu0 %545 }
 0x179   : > { %v556_v13 = vsel %vm555_vm10, %v544_v17, %v546_v14  ;;  %v557_v41 = vsel %vm555_vm10, %v546_v14, %v548_v50 }
 0x17a   : > { %v1098_v7 = vand.u32 4294901760, %v557_v41  ;;  %v1100_v55 = vand.u32 4294901760, %v556_v13 }
 0x17c   : > { %v8397_v52 = vsub.f32 %v557_v41, %v1098_v7  ;;  %v8399_v20 = vsub.f32 %v556_v13, %v1100_v55  ;;  %v605_v8 = vpop.permute.xlu1 %604  ;;  %v552_v9 = vpop.permute.xlu0 %551 }
 0x17d   : > { %v558_v12 = vsel %vm555_vm10, %v550_v33, %v552_v9  ;;  %v559_v3 = vsel %vm555_vm10, %v552_v9, %v554_v44  ;;  %v12078_v9 = vand.u32 4294901760, %v8293_v63  ;;  %v12082_v63 = vand.u32 4294901760, %v8290_v62 }
 0x17e   : > { %v1102_v19 = vand.u32 4294901760, %v559_v3  ;;  %v1104_v16 = vand.u32 4294901760, %v558_v12 }
 0x17f   : > { %v8417_v2 = vpack.c.bf16 %v12079_v5, %v12078_v9  ;;  %v12083_v5 = vand.u32 4294901760, %v8287_v61  ;;  %v8441_v9 = vsub.f32 %v8332_v42, %v1569_v34  ;;  %v12088_v34 = vand.u32 4294901760, %v8314_v15 }
 0x180   : > { %v8405_v17 = vpack.c.bf16 %v1102_v19, %v1098_v7  ;;  %v8407_v41 = vpack.c.bf16 %v1104_v16, %v1100_v55  ;;  %v8409_v13 = vsub.f32 %v559_v3, %v1102_v19  ;;  %v8411_v50 = vsub.f32 %v558_v12, %v1104_v16  ;;  %v601_v33 = vpop.permute.xlu1 %600  ;;  %v597_v44 = vpop.permute.xlu0 %596 }
 0x181   : > { %12080 = vst [vmem:[#allocation37_spill] sm:$0xff] %v8417_v2  ;;  %v607_v6 = vsel %vm606_vm11, %v595_v51, %v597_v44  ;;  %v608_v14 = vsel %vm606_vm11, %v597_v44, %v599_v46  ;;  %v8422_v7 = vand.u32 4294901760, %v8401_v10  ;;  %v8431_v59 = vpack.c.bf16 %v12083_v5, %v12082_v63 }
 0x182   : > { %v1106_v55 = vand.u32 4294901760, %v608_v14  ;;  %v1108_v3 = vand.u32 4294901760, %v607_v6  ;;  %6916 = vmatprep.subr.bf16.mxu1 %v8405_v17  ;;  %v11741_v12 = vand.u32 4294901760, %v8409_v13  ;;  %v12085_v46 = vand.u32 4294901760, %v8397_v52 }
 0x183   : > { %12081 = vst [vmem:[#allocation38_spill] sm:$0xff] %v8422_v7  ;;  %12084 = vst [vmem:[#allocation39_spill] sm:$0xff] %v8431_v59  ;;  %6918 = vmatpush1.bf16.msra.mxu1 %v8407_v41  ;;  %v12086_v16 = vand.u32 4294901760, %v8399_v20  ;;  %v12087_v57 = vand.u32 4294901760, %v8411_v50 }
 0x184   : > { %v1522_v51 = vsub.f32 %v8397_v52, %v12085_v46  ;;  %v8443_v19 = vsub.f32 %v608_v14, %v1106_v55  ;;  %v8445_v62 = vsub.f32 %v607_v6, %v1108_v3  ;;  %v688_v61 = vpop.permute.xlu1 %687  ;;  %v603_v63 = vpop.permute.xlu0 %602  ;;  %v1534_v5 = vsub.f32 %v8409_v13, %v11741_v12 }
 0x185   : > { %v1528_v44 = vsub.f32 %v8399_v20, %v12086_v16  ;;  %v1540_v46 = vsub.f32 %v8411_v50, %v12087_v57  ;;  %v609_v21 = vsel %vm606_vm11, %v601_v33, %v603_v63  ;;  %v610_v16 = vsel %vm606_vm11, %v603_v63, %v605_v8 }
 0x186   : > { %v8458_v14 = vsub.f32 %v8314_v15, %v12088_v34  ;;  %v12089_v6 = vand.u32 4294901760, %v8319_v28  ;;  %v1110_v37 = vand.u32 4294901760, %v610_v16  ;;  %v1112_v12 = vand.u32 4294901760, %v609_v21 }
 0x187   : > { %v1535_v53 = vand.u32 4294901760, %v1534_v5  ;;  %v1541_v60 = vand.u32 4294901760, %v1540_v46  ;;  %v1523_v57 = vand.u32 4294901760, %v1522_v51  ;;  %v1529_v0 = vand.u32 4294901760, %v1528_v44 }
 0x188   : > { %v8463_v18 = vsub.f32 %v8319_v28, %v12089_v6  ;;  %v11745_v8 = vand.u32 4294901760, %v8445_v62  ;;  %v8467_v63 = vpack.c.bf16 %v1110_v37, %v1106_v55  ;;  %v8469_v34 = vpack.c.bf16 %v1112_v12, %v1108_v3  ;;  %v694_v6 = vpop.permute.xlu1 %693  ;;  %v686_v58 = vpop.permute.xlu0 %685 }
 0x189   : > { %v8471_v56 = vsub.f32 %v610_v16, %v1110_v37  ;;  %v8473_v54 = vsub.f32 %v609_v21, %v1112_v12  ;;  %v696_v5 = vsel %vm695_vm12, %v8371_v43, %v686_v58  ;;  %v697_v51 = vsel %vm695_vm12, %v686_v58, %v688_v61 }
 0x18a   : > { %v6951_v44 = vpack.c.bf16 %v1535_v53, %v1523_v57  ;;  %v6953_v46 = vpack.c.bf16 %v1541_v60, %v1529_v0  ;;  %v1122_v33 = vand.u32 4294901760, %v697_v51  ;;  %v1124_v28 = vand.u32 4294901760, %v696_v5  ;;  %6920 = vmatprep.subr.bf16.mxu1 %v8467_v63 }
 0x18b   : > { %v11747_v55 = vand.u32 4294901760, %v8471_v56  ;;  %v12090_v37 = vand.u32 4294901760, %v8337_v45  ;;  %6922 = vmatpush1.bf16.msra.mxu1 %v8469_v34  ;;  %v12091_v3 = vand.u32 4294901760, %v8443_v19  ;;  %v1552_v0 = vsub.f32 %v8445_v62, %v11745_v8 }
 0x18c   : > { %6952 = vmatprep.subr.bf16.mxu0 %v6951_v44  ;;  %v11750_v53 = vand.u32 4294901760, %v8473_v54  ;;  %v1571_v58 = vand.u32 4294901760, %v8441_v9  ;;  %v8492_v60 = vsub.f32 %v697_v51, %v1122_v33  ;;  %v8494_v12 = vsub.f32 %v696_v5, %v1124_v28  ;;  %v690_v61 = vpop.permute.xlu1 %689  ;;  %6924 = vmatprep.subr.bf16.mxu1 %v8417_v2  ;;  %v692_v16 = vpop.permute.xlu0 %691 }
 0x18d   : > { %v1576_v21 = vsub.f32 %v8337_v45, %v12090_v37  ;;  %v1546_v43 = vsub.f32 %v8443_v19, %v12091_v3  ;;  %6954 = vmatpush1.bf16.msra.mxu0 %v6953_v46  ;;  %v1558_v57 = vsub.f32 %v8471_v56, %v11747_v55  ;;  %v1583_v44 = vand.u32 4294901760, %v8458_v14 }
 0x18e   : > { %v698_v37 = vsel %vm695_vm12, %v690_v61, %v692_v16  ;;  %v699_v3 = vsel %vm695_vm12, %v692_v16, %v694_v6  ;;  %v1564_v9 = vsub.f32 %v8473_v54, %v11750_v53  ;;  %v1589_v5 = vand.u32 4294901760, %v8463_v18 }
 0x18f   : > { %v1126_v51 = vand.u32 4294901760, %v699_v3  ;;  %v1128_v46 = vand.u32 4294901760, %v698_v37  ;;  %v1559_v8 = vand.u32 4294901760, %v1558_v57  ;;  %6926 = vmatpush1.bf16.msra.mxu1 %v8431_v59  ;;  %v1547_v55 = vand.u32 4294901760, %v1546_v43 }
 0x190   : > { %v1553_v15 = vand.u32 4294901760, %v1552_v0  ;;  %v1565_v14 = vand.u32 4294901760, %v1564_v9  ;;  %v11755_v61 = vand.u32 4294901760, %v8494_v12  ;;  %v740_v18 = vpop.permute.xlu1 %739  ;;  %v738_v2 = vpop.permute.xlu0 %737 }
 0x191   : > { %v8510_v42 = vpack.c.bf16 %v1126_v51, %v1122_v33  ;;  %v8512_v6 = vpack.c.bf16 %v1128_v46, %v1124_v28  ;;  %v8514_v16 = vsub.f32 %v699_v3, %v1126_v51  ;;  %v8516_v53 = vsub.f32 %v698_v37, %v1128_v46 }
 0x192   : > { %v748_v57 = vsel %vm747_vm13, %v8395_v35, %v738_v2  ;;  %v749_v45 = vsel %vm747_vm13, %v738_v2, %v740_v18  ;;  %v6955_v43 = vpack.c.bf16 %v1559_v8, %v1547_v55  ;;  %v6957_v0 = vpack.c.bf16 %v1565_v14, %v1553_v15 }
 0x193   : > { %12092 = vst [vmem:[#allocation40_spill] sm:$0xff] %v8512_v6  ;;  %12093 = vst [vmem:[#allocation41_spill] sm:$0xff] %v8516_v53  ;;  %v1130_v9 = vand.u32 4294901760, %v749_v45  ;;  %v1132_v59 = vand.u32 4294901760, %v748_v57  ;;  %6928 = vmatprep.subr.bf16.mxu1 %v8510_v42  ;;  %v12094_v28 = vand.u32 4294901760, %v8492_v60  ;;  %v11758_v37 = vand.u32 4294901760, %v8514_v16 }
 0x194   : > { %6956 = vmatprep.subr.bf16.mxu0 %v6955_v43  ;;  %6930 = vmatpush1.bf16.msra.mxu1 %v8512_v6  ;;  %v6959_v3 = vpack.c.bf16 %v1583_v44, %v1571_v58  ;;  %v1577_v51 = vand.u32 4294901760, %v1576_v21  ;;  %v1600_v2 = vsub.f32 %v8494_v12, %v11755_v61  ;;  %v1611_v15 = vand.u32 4294901760, %v8516_v53  ;;  %v746_v55 = vpop.permute.xlu1 %745  ;;  %v744_v46 = vpop.permute.xlu0 %743 }
 0x195   : > { %v1594_v33 = vsub.f32 %v8492_v60, %v12094_v28  ;;  %v8531_v35 = vsub.f32 %v749_v45, %v1130_v9  ;;  %v8533_v8 = vsub.f32 %v748_v57, %v1132_v59  ;;  %6958 = vmatpush1.bf16.msra.mxu0 %v6957_v0  ;;  %v1606_v14 = vsub.f32 %v8514_v16, %v11758_v37 }
 0x196   : > { %6960 = vmatprep.subr.bf16.mxu0 %v6959_v3  ;;  %v751_v21 = vsel %vm747_vm13, %v744_v46, %v746_v55  ;;  %v6961_v58 = vpack.c.bf16 %v1589_v5, %v1577_v51  ;;  %v1612_v44 = vsub.f32 %v8516_v53, %v1611_v15  ;;  %v8542_v18 = vsub.f32 %v8401_v10, %v8422_v7 }
 0x197   : > { %12095 = vst [vmem:[#allocation42_spill] sm:$0xff] %v8531_v35  ;;  %12096 = vst [vmem:[#allocation43_spill] sm:$0xff] %v8533_v8  ;;  %v1134_v45 = vand.u32 4294901760, %v751_v21  ;;  %v1595_v57 = vand.u32 4294901760, %v1594_v33  ;;  %v1607_v43 = vand.u32 4294901760, %v1606_v14  ;;  %v1617_v0 = vand.u32 4294901760, %v8531_v35 }
 0x198   : > { %v1601_v28 = vand.u32 4294901760, %v1600_v2  ;;  %v1613_v61 = vand.u32 4294901760, %v1612_v44  ;;  %v1623_v6 = vand.u32 4294901760, %v8533_v8  ;;  %v742_v5 = vpop.permute.xlu1 %741  ;;  %v826_v51 = vpop.permute.xlu0 %825  ;;  %v12098_v10 = vand.u32 4294901760, %v8300_v4 }
 0x199   : > { %v8546_v37 = vpack.c.bf16 %v1134_v45, %v1130_v9  ;;  %v8548_v3 = vsub.f32 %v751_v21, %v1134_v45  ;;  %6962 = vmatpush1.bf16.msra.mxu0 %v6961_v58  ;;  %v6963_v55 = vpack.c.bf16 %v1607_v43, %v1595_v57  ;;  %v12099_v33 = vand.u32 4294901760, %v8304_v1 }
 0x19a   : > { %v750_v2 = vsel %vm747_vm13, %v742_v5, %v744_v46  ;;  %v6965_v44 = vpack.c.bf16 %v1613_v61, %v1601_v28  ;;  %v1618_v21 = vsub.f32 %v8531_v35, %v1617_v0  ;;  %v12101_v45 = vand.u32 4294901760, %v8343_v47 }
 0x19b   : > { %12097 = vst [vmem:[#allocation44_spill] sm:$0xff] %v8548_v3  ;;  %v8554_v14 = vpack.c.bf16 %v12099_v33, %v12098_v10  ;;  %v1136_v9 = vand.u32 4294901760, %v750_v2  ;;  %6932 = vmatprep.subr.bf16.mxu1 %v8546_v37  ;;  %6964 = vmatprep.subr.bf16.mxu0 %v6963_v55  ;;  %v1629_v58 = vand.u32 4294901760, %v8548_v3  ;;  %v12102_v1 = vand.u32 4294901760, %v8297_v23 }
 0x19c   : > { %v1642_v4 = vsub.f32 %v8343_v47, %v12101_v45  ;;  %v12103_v57 = vand.u32 4294901760, %v8327_v36  ;;  %v1624_v61 = vsub.f32 %v8533_v8, %v1623_v6  ;;  %v12104_v43 = vand.u32 4294901760, %v8324_v32  ;;  %v828_v23 = vpop.permute.xlu1 %827  ;;  %v832_v45 = vpop.permute.xlu0 %831 }
 0x19d   : > { %12100 = vst [vmem:[#allocation45_spill] sm:$0xff] %v8554_v14  ;;  %v12105_v5 = vand.u32 4294901760, %v8348_v48  ;;  %v8577_v10 = vpack.c.bf16 %v1136_v9, %v1132_v59  ;;  %v8579_v33 = vsub.f32 %v750_v2, %v1136_v9  ;;  %6966 = vmatpush1.bf16.msra.mxu0 %v6965_v44  ;;  %v1630_v36 = vsub.f32 %v8548_v3, %v1629_v58 }
 0x19e   : > { %v8568_v46 = vpack.c.bf16 %v12103_v57, %v12102_v1  ;;  %v1654_v28 = vsub.f32 %v8324_v32, %v12104_v43  ;;  %v12106_v1 = vand.u32 4294901760, %v8397_v52  ;;  %v12107_v57 = vand.u32 4294901760, %v8409_v13 }
 0x19f   : > { %v1648_v55 = vsub.f32 %v8348_v48, %v12105_v5  ;;  %v837_v43 = vsel %vm835_vm14, %v826_v51, %v828_v23  ;;  %v12109_v32 = vand.u32 4294901760, %v8399_v20  ;;  %v12110_v59 = vand.u32 4294901760, %v8411_v50  ;;  %6934 = vmatpush1.bf16.msra.mxu1 %v8577_v10 }
 0x1a0   : > { %v8586_v53 = vpack.c.bf16 %v12107_v57, %v12106_v1  ;;  %v12112_v2 = vand.u32 4294901760, %v8443_v19  ;;  %v12113_v44 = vand.u32 4294901760, %v8471_v56  ;;  %v12115_v48 = vand.u32 4294901760, %v8445_v62  ;;  %6936 = vmatprep.subr.bf16.mxu1 %v8554_v14 }
 0x1a1   : > { %v8593_v5 = vpack.c.bf16 %v12110_v59, %v12109_v32  ;;  %v12116_v47 = vand.u32 4294901760, %v8473_v54  ;;  %v1635_v23 = vand.u32 4294901760, %v8579_v33  ;;  %v1146_v57 = vand.u32 4294901760, %v837_v43 }
 0x1a2   : > { %12108 = vst [vmem:[#allocation46_spill] sm:$0xff] %v8586_v53  ;;  %v8599_v9 = vpack.c.bf16 %v12113_v44, %v12112_v2  ;;  %v1619_v53 = vand.u32 4294901760, %v1618_v21  ;;  %v1631_v32 = vand.u32 4294901760, %v1630_v36  ;;  %v1655_v59 = vand.u32 4294901760, %v1654_v28  ;;  %v834_v21 = vpop.permute.xlu1 %833  ;;  %v824_v36 = vpop.permute.xlu0 %823 }
 0x1a3   : > { %12111 = vst [vmem:[#allocation47_spill] sm:$0xff] %v8593_v5  ;;  %v8605_v1 = vpack.c.bf16 %v12116_v47, %v12115_v48  ;;  %v12118_v5 = vand.u32 4294901760, %v8353_v49  ;;  %v12119_v44 = vand.u32 4294901760, %v8492_v60  ;;  %v12122_v48 = vand.u32 4294901760, %v8494_v12  ;;  %6938 = vmatpush1.bf16.msra.mxu1 %v8568_v46 }
 0x1a4   : > { %12114 = vst [vmem:[#allocation48_spill] sm:$0xff] %v8599_v9  ;;  %v12120_v9 = vand.u32 4294901760, %v8514_v16  ;;  %v8623_v8 = vsub.f32 %v837_v43, %v1146_v57  ;;  %v6967_v3 = vpack.c.bf16 %v1631_v32, %v1619_v53  ;;  %v1636_v28 = vsub.f32 %v8579_v33, %v1635_v23 }
 0x1a5   : > { %12117 = vst [vmem:[#allocation49_spill] sm:$0xff] %v8605_v1  ;;  %v1660_v2 = vsub.f32 %v8353_v49, %v12118_v5  ;;  %v8621_v1 = vpack.c.bf16 %v1611_v15, %v12122_v48  ;;  %v8626_v35 = vpack.c.bf16 %v1629_v58, %v1617_v0  ;;  %v839_v5 = vsel %vm835_vm14, %v832_v45, %v834_v21 }
 0x1a6   : > { %v8617_v47 = vpack.c.bf16 %v12120_v9, %v12119_v44  ;;  %v836_v49 = vsel %vm835_vm14, %v824_v36, %v826_v51  ;;  %v1625_v14 = vand.u32 4294901760, %v1624_v61  ;;  %v8630_v9 = vpack.c.bf16 %v1635_v23, %v1623_v6  ;;  %6968 = vmatprep.subr.bf16.mxu0 %v6967_v3  ;;  %v830_v51 = vpop.permute.xlu1 %829 }
 0x1a7   : > { %12123 = vst [vmem:[#allocation51_spill] sm:$0xff] %v8621_v1  ;;  %12124 = vst [vmem:[#allocation52_spill] sm:$0xff] %v8626_v35  ;;  %v1665_v44 = vand.u32 4294901760, %v8623_v8  ;;  %v1150_v15 = vand.u32 4294901760, %v839_v5  ;;  %v1148_v48 = vand.u32 4294901760, %v836_v49  ;;  %v1637_v43 = vand.u32 4294901760, %v1636_v28 }
 0x1a8   : > { %12121 = vst [vmem:[#allocation50_spill] sm:$0xff] %v8617_v47  ;;  %12125 = vst [vmem:[#allocation53_spill] sm:$0xff] %v8630_v9  ;;  %v1643_v53 = vand.u32 4294901760, %v1642_v4  ;;  %v1661_v32 = vand.u32 4294901760, %v1660_v2  ;;  %v838_v6 = vsel %vm835_vm14, %v830_v51, %v832_v45  ;;  %v1649_v21 = vand.u32 4294901760, %v1648_v55  ;;  %v877_v47 = vld [vmem:[#allocation6 + $0xe8] sm:$0xff] }
 0x1a9   : > { %v8634_v1 = vpack.c.bf16 %v1150_v15, %v1146_v57  ;;  %v8636_v0 = vsub.f32 %v839_v5, %v1150_v15  ;;  %v8638_v58 = vsub.f32 %v836_v49, %v1148_v48  ;;  %v6969_v61 = vpack.c.bf16 %v1637_v43, %v1625_v14 }
 0x1aa   : > { %v6971_v23 = vpack.c.bf16 %v1655_v59, %v1643_v53  ;;  %v12127_v36 = vand.u32 4294901760, %v8542_v18  ;;  %v1152_v57 = vand.u32 4294901760, %v838_v6  ;;  %v1666_v49 = vsub.f32 %v8623_v8, %v1665_v44 }
 0x1ab   : > { %12126 = vst [vmem:[#allocation54_spill] sm:$0xff] %v8634_v1  ;;  %v1677_v3 = vand.u32 4294901760, %v8636_v0  ;;  %v1671_v4 = vand.u32 4294901760, %v8638_v58  ;;  %6940 = vmatprep.subr.bf16.mxu1 %v8634_v1  ;;  %6970 = vmatpush1.bf16.msra.mxu0 %v6969_v61  ;;  %v6973_v55 = vpack.c.bf16 %v1661_v32, %v1649_v21  ;;  %v851_v61 = vld [vmem:[#allocation6 + $0x18] sm:$0xff]  ;;  %v850_v21 = vld [vmem:[#allocation6 + $0x10] sm:$0xff] }
 0x1ac   : > { %v1191_v9 = vsub.f32 %v8542_v18, %v12127_v36  ;;  %6972 = vmatprep.subr.bf16.mxu0 %v6971_v23  ;;  %v8648_v14 = vpack.c.bf16 %v1152_v57, %v1148_v48  ;;  %v8650_v45 = vsub.f32 %v838_v6, %v1152_v57  ;;  %v1667_v15 = vand.u32 4294901760, %v1666_v49  ;;  %v853_v36 = vld [vmem:[#allocation6 + $0x28] sm:$0xff] }
 0x1ad   : > { %v1678_v59 = vsub.f32 %v8636_v0, %v1677_v3  ;;  %v8653_v28 = vpack.c.bf16 %v1677_v3, %v1665_v44  ;;  %v1672_v53 = vsub.f32 %v8638_v58, %v1671_v4  ;;  %v1032_v23 = vsel %vm376_vm4, %v851_v61, 0 }
 0x1ae   : > { %12128 = vst [vmem:[#allocation55_spill] sm:$0xff] %v8648_v14  ;;  %v1192_v2 = vand.u32 4294901760, %v1191_v9  ;;  %v1683_v5 = vand.u32 4294901760, %v8650_v45  ;;  %6942 = vmatpush1.bf16.msra.mxu1 %v8648_v14  ;;  %v12131_v3 = vpack.c.bf16 %v8121_v31, %v8119_v30  ;;  %v8673_v57 = vand.u32 4294901760, %v850_v21 }
 0x1af   : > { %12129 = vst [vmem:[#allocation56_spill] sm:$0xff] %v8653_v28  ;;  %6974 = vmatpush1.bf16.msra.mxu0 %v6973_v55  ;;  %v1679_v43 = vand.u32 4294901760, %v1678_v59  ;;  %7339 = vmatprep.subr.bf16.mxu1 %v8117_v29  ;;  %v1673_v9 = vand.u32 4294901760, %v1672_v53  ;;  %v1035_v49 = vsel %vm376_vm4, %v853_v36, 0  ;;  %v855_v55 = vld [vmem:[#allocation6 + $0x38] sm:$0xff]  ;;  %v12134_v59 = vpack.c.bf16 %v8138_v40, %v8136_v39 }
 0x1b0   : > { %v1684_v51 = vsub.f32 %v8650_v45, %v1683_v5  ;;  %v8660_v32 = vpack.c.bf16 %v1683_v5, %v1671_v4  ;;  %v8670_v4 = vand.u32 4294901760, %v1032_v23  ;;  %12133 = vst [vmem:[#allocation59_spill] sm:$0xff] %v8673_v57  ;;  %v12135_v30 = vpack.c.bf16 %v8263_v25, %v8251_v11  ;;  %v857_v25 = vld [vmem:[#allocation6 + $0x48] sm:$0xff]  ;;  %v859_v36 = vld [vmem:[#allocation6 + $0x58] sm:$0xff] }
 0x1b1   : > { %v6975_v48 = vpack.c.bf16 %v1679_v43, %v1667_v15  ;;  %1193 = vmatmul.mubr.f32.vlgmr.msra.gmra.mrb[0].mxu1 %v1192_v2  ;;  %v852_v2 = vld [vmem:[#allocation6 + $0x20] sm:$0xff]  ;;  %v8688_v5 = vand.u32 4294901760, %v1035_v49  ;;  %v1038_v15 = vsel %vm376_vm4, %v855_v55, 0  ;;  %v8692_v39 = vsub.f32 %v850_v21, %v8673_v57 }
 0x1b2   : > { %12130 = vst [vmem:[#allocation57_spill] sm:$0xff] %v8660_v32  ;;  %7348 = vmatpush1.bf16.msra.mxu1 %v8134_v38  ;;  %v1685_v44 = vand.u32 4294901760, %v1684_v51  ;;  %12132 = vst [vmem:[#allocation58_spill] sm:$0xff] %v8670_v4  ;;  %v8685_v31 = vsub.f32 %v1032_v23, %v8670_v4  ;;  %v6987_v40 = vpack.c.bf16 %v8409_v13, %v8397_v52  ;;  %v8697_v11 = vand.u32 4294901760, %v852_v2 }
 0x1b3   : > { %6976 = vmatprep.subr.bf16.mxu0 %v6975_v48  ;;  %7340 = vmatprep.subr.bf16.mxu1 %v8259_v22  ;;  %12136 = vst [vmem:[#allocation60_spill] sm:$0xff] %v8688_v5  ;;  %v12138_v53 = vpack.c.bf16 %v8265_v27, %v8253_v26  ;;  %v854_v48 = vld [vmem:[#allocation6 + $0x30] sm:$0xff]  ;;  %v11771_v51 = vand.u32 4294901760, %v8692_v39  ;;  %v8709_v52 = vsub.f32 %v1035_v49, %v8688_v5  ;;  %v1041_v27 = vsel %vm376_vm4, %v857_v25, 0  ;;  %v856_v49 = vld [vmem:[#allocation6 + $0x40] sm:$0xff] }
 0x1b4   : > { %v6977_v6 = vpack.c.bf16 %v1685_v44, %v1673_v9  ;;  %12137 = vst [vmem:[#allocation61_spill] sm:$0xff] %v8697_v11  ;;  %v11773_v43 = vand.u32 4294901760, %v8685_v31  ;;  %v12139_v9 = vld [vmem:[#allocation37_spill] sm:$0xff]  ;;  %v8706_v44 = vand.u32 4294901760, %v1038_v15  ;;  %v6989_v26 = vpack.c.bf16 %v8411_v50, %v8399_v20  ;;  %v12142_v50 = vld [vmem:[#allocation39_spill] sm:$0xff] }
 0x1b5   : > { %v8719_v61 = vsub.f32 %v852_v2, %v8697_v11  ;;  %v6991_v23 = vpack.c.bf16 %v8471_v56, %v8443_v19  ;;  %v8727_v21 = vand.u32 4294901760, %v854_v48  ;;  %v11769_v20 = vand.u32 4294901760, %v8709_v52 }
 0x1b6   : > { %6978 = vmatpush1.bf16.msra.mxu0 %v6977_v6  ;;  %7349 = vmatpush1.bf16.msra.mxu1 %v8261_v24  ;;  %12140 = vst [vmem:[#allocation37_spill] sm:$0xff] %v8706_v44  ;;  %v1201_v13 = vsub.f32 %v8685_v31, %v11773_v43  ;;  %v1207_v6 = vsub.f32 %v8692_v39, %v11771_v51  ;;  %v8733_v2 = vand.u32 4294901760, %v1041_v27  ;;  %v863_v51 = vld [vmem:[#allocation6 + $0x78] sm:$0xff] }
 0x1b7   : > { %6980 = vmatprep.subr.bf16.mxu0 %v12131_v3  ;;  %7341 = vmatprep.subr.bf16.mxu1 %v8405_v17  ;;  %12141 = vst [vmem:[#allocation62_spill] sm:$0xff] %v8727_v21  ;;  %v8736_v56 = vsub.f32 %v1038_v15, %v8706_v44  ;;  %v1217_v19 = vsub.f32 %v8709_v52, %v11769_v20  ;;  %v861_v20 = vld [vmem:[#allocation6 + $0x68] sm:$0xff] }
 0x1b8   : > { %v1202_v3 = vand.u32 4294901760, %v1201_v13  ;;  %v1208_v55 = vand.u32 4294901760, %v1207_v6  ;;  %12143 = vst [vmem:[#allocation39_spill] sm:$0xff] %v8733_v2  ;;  %v8746_v25 = vsub.f32 %v854_v48, %v8727_v21  ;;  %v12145_v13 = vld [vmem:[#allocation23_spill] sm:$0xff]  ;;  %v8754_v6 = vand.u32 4294901760, %v856_v49  ;;  %v12147_v48 = vld [vmem:[#allocation40_spill] sm:$0xff] }
 0x1b9   : > { %1718 = vmatmul.mubr.f32.vlgmr.msra.gmra.mrb[0].mxu0 %v8422_v7  ;;  %v8778_v43 = vsub.f32 %v1041_v27, %v8733_v2  ;;  %v12153_v27 = vld [vmem:[#allocation41_spill] sm:$0xff] }
 0x1ba   : > { %6982 = vmatpush1.bf16.msra.mxu0 %v12134_v59  ;;  %7350 = vmatpush1.bf16.msra.mxu1 %v8407_v41  ;;  %v11770_v59 = vand.u32 4294901760, %v8719_v61 }
 0x1bb   : > { %6984 = vmatprep.subr.bf16.mxu0 %v12135_v30  ;;  %7342 = vmatprep.subr.bf16.mxu1 %v8467_v63  ;;  %v6993_v30 = vpack.c.bf16 %v8473_v54, %v8445_v62  ;;  %v1218_v54 = vand.u32 4294901760, %v1217_v19  ;;  %v11772_v62 = vand.u32 4294901760, %v8736_v56  ;;  %v12150_v19 = vld [vmem:[#allocation24_spill] sm:$0xff] }
 0x1bc   : > { %1724 = vmatprep.mubr.f32.mxu0 %v8670_v4  ;;  %1203 = vmatprep.mubr.f32.mxu1 %v1202_v3  ;;  %v1223_v15 = vsub.f32 %v8719_v61, %v11770_v59  ;;  %v11774_v3 = vand.u32 4294901760, %v8746_v25 }
 0x1bd   : > { %1726 = vmatmul.mubr.f32.gmra.mrb[2].mxu0 %v8673_v57  ;;  %1209 = vmatmul.mubr.f32.gmra.mrb[2].mxu1 %v1208_v55  ;;  %v12149_v55 = vld [vmem:[#allocation27_spill] sm:$0xff] }
 0x1be   : > { %6986 = vmatpush1.bf16.msra.mxu0 %v12138_v53  ;;  %7351 = vmatpush1.bf16.msra.mxu1 %v8469_v34  ;;  %v12144_v53 = vld [vmem:[#allocation26_spill] sm:$0xff] }
 0x1bf   : > { %6988 = vmatprep.subr.bf16.mxu0 %v6987_v40  ;;  %7343 = vmatprep.subr.bf16.mxu1 %v12139_v9  ;;  %v1044_v40 = vsel %vm376_vm4, %v859_v36, 0  ;;  %12146 = vst [vmem:[#allocation26_spill] sm:$0xff] %v8754_v6  ;;  %v1224_v36 = vand.u32 4294901760, %v1223_v15  ;;  %v1047_v15 = vsel %vm376_vm4, %v861_v20, 0  ;;  %v860_v20 = vld [vmem:[#allocation6 + $0x60] sm:$0xff] }
 0x1c0   : > { %1732 = vmatprep.mubr.f32.mxu0 %v8688_v5  ;;  %v8760_v59 = vand.u32 4294901760, %v1044_v40  ;;  %1219 = vmatprep.mubr.f32.mxu1 %v1218_v54 }
 0x1c1   : > { %1734 = vmatmul.mubr.f32.gmra.mrb[4].mxu0 %v8697_v11  ;;  %1225 = vmatmul.mubr.f32.gmra.mrb[4].mxu1 %v1224_v36  ;;  %v8791_v36 = vand.u32 4294901760, %v1047_v15 }
 0x1c2   : > { %6990 = vmatpush1.bf16.msra.mxu0 %v6989_v26  ;;  %7352 = vmatpush1.bf16.msra.mxu1 %v12142_v50  ;;  %v6995_v26 = vpack.c.bf16 %v12145_v13, %v12144_v53  ;;  %12148 = vst [vmem:[#allocation23_spill] sm:$0xff] %v8760_v59  ;;  %v1233_v53 = vsub.f32 %v8736_v56, %v11772_v62 }
 0x1c3   : > { %6992 = vmatprep.subr.bf16.mxu0 %v6991_v23  ;;  %7344 = vmatprep.subr.bf16.mxu1 %v8510_v42  ;;  %v858_v23 = vld [vmem:[#allocation6 + $0x50] sm:$0xff]  ;;  %v6997_v13 = vpack.c.bf16 %v12150_v19, %v12149_v55  ;;  %v6999_v62 = vpack.c.bf16 %v8514_v16, %v8492_v60  ;;  %v8781_v55 = vsub.f32 %v856_v49, %v8754_v6  ;;  %v8802_v60 = vand.u32 4294901760, %v860_v20 }
 0x1c4   : > { %1740 = vmatprep.mubr.f32.mxu0 %v8706_v44  ;;  %v1234_v19 = vand.u32 4294901760, %v1233_v53  ;;  %v7001_v49 = vpack.c.bf16 %v12153_v27, %v8494_v12  ;;  %12154 = vst [vmem:[#allocation27_spill] sm:$0xff] %v8791_v36  ;;  %v865_v53 = vld [vmem:[#allocation6 + $0x88] sm:$0xff]  ;;  %v12158_v12 = vand.u32 4294901760, %v8778_v43  ;;  %v867_v44 = vld [vmem:[#allocation6 + $0x98] sm:$0xff] }
 0x1c5   : > { %1742 = vmatmul.mubr.f32.gmra.mrb[6].mxu0 %v8727_v21  ;;  %v1050_v21 = vsel %vm376_vm4, %v863_v51, 0  ;;  %v12155_v51 = vld [vmem:[#allocation42_spill] sm:$0xff]  ;;  %12157 = vst [vmem:[#allocation24_spill] sm:$0xff] %v8802_v60 }
 0x1c6   : > { %6994 = vmatpush1.bf16.msra.mxu0 %v6993_v30  ;;  %7353 = vmatpush1.bf16.msra.mxu1 %v12147_v48  ;;  %v8768_v30 = vand.u32 4294901760, %v858_v23  ;;  %v1249_v27 = vsub.f32 %v8778_v43, %v12158_v12 }
 0x1c7   : > { %6996 = vmatprep.subr.bf16.mxu0 %v6995_v26  ;;  %7345 = vmatprep.subr.bf16.mxu1 %v8546_v37  ;;  %v1239_v26 = vsub.f32 %v8746_v25, %v11774_v3  ;;  %v12152_v3 = vld [vmem:[#allocation45_spill] sm:$0xff] }
 0x1c8   : > { %1748 = vmatprep.mubr.f32.mxu0 %v8733_v2  ;;  %12151 = vst [vmem:[#allocation40_spill] sm:$0xff] %v8768_v30  ;;  %1235 = vmatprep.mubr.f32.mxu1 %v1234_v19  ;;  %v862_v19 = vld [vmem:[#allocation6 + $0x70] sm:$0xff] }
 0x1c9   : > { %1750 = vmatmul.mubr.f32.gmra.mrb[8].mxu0 %v8754_v6  ;;  %v1240_v54 = vand.u32 4294901760, %v1239_v26  ;;  %v12156_v26 = vld [vmem:[#allocation44_spill] sm:$0xff]  ;;  %v12159_v6 = vand.u32 4294901760, %v8781_v55 }
 0x1ca   : > { %6998 = vmatpush1.bf16.msra.mxu0 %v6997_v13  ;;  %7354 = vmatpush1.bf16.msra.mxu1 %v8577_v10  ;;  %v8794_v13 = vsub.f32 %v1044_v40, %v8760_v59  ;;  %v7003_v16 = vpack.c.bf16 %v12156_v26, %v12155_v51  ;;  %v1053_v51 = vsel %vm376_vm4, %v865_v53, 0  ;;  %v8826_v53 = vand.u32 4294901760, %v862_v19 }
 0x1cb   : > { %7000 = vmatprep.subr.bf16.mxu0 %v6999_v62  ;;  %7346 = vmatprep.subr.bf16.mxu1 %v12152_v3  ;;  %v8797_v62 = vsub.f32 %v858_v23, %v8768_v30  ;;  %v1255_v40 = vsub.f32 %v8781_v55, %v12159_v6  ;;  %v8811_v23 = vand.u32 4294901760, %v1050_v21  ;;  %v12161_v6 = vld [vmem:[#allocation28_spill] sm:$0xff] }
 0x1cc   : > { %1756 = vmatprep.mubr.f32.mxu0 %v8760_v59  ;;  %1241 = vmatmul.mubr.f32.gmra.mrb[6].mxu1 %v1240_v54  ;;  %v1250_v54 = vand.u32 4294901760, %v1249_v27  ;;  %v11789_v26 = vand.u32 4294901760, %v8794_v13  ;;  %v8829_v27 = vsub.f32 %v860_v20, %v8802_v60  ;;  %v1056_v20 = vsel %vm376_vm4, %v867_v44, 0 }
 0x1cd   : > { %1758 = vmatmul.mubr.f32.gmra.mrb[10].mxu0 %v8768_v30  ;;  %v11794_v12 = vand.u32 4294901760, %v8797_v62  ;;  %v12160_v30 = vld [vmem:[#allocation43_spill] sm:$0xff]  ;;  %v1256_v11 = vand.u32 4294901760, %v1255_v40  ;;  %v8850_v5 = vsub.f32 %v862_v19, %v8826_v53  ;;  %v7011_v44 = vpack.c.bf16 %v8636_v0, %v8623_v8  ;;  %v866_v19 = vld [vmem:[#allocation6 + $0x90] sm:$0xff] }
 0x1ce   : > { %7002 = vmatpush1.bf16.msra.mxu0 %v7001_v49  ;;  %7355 = vmatpush1.bf16.msra.mxu1 %v8568_v46  ;;  %v7005_v59 = vpack.c.bf16 %v8579_v33, %v12160_v30  ;;  %v12162_v49 = vld [vmem:[#allocation25_spill] sm:$0xff]  ;;  %v1265_v33 = vsub.f32 %v8794_v13, %v11789_v26  ;;  %v864_v40 = vld [vmem:[#allocation6 + $0x80] sm:$0xff]  ;;  %v8875_v57 = vand.u32 4294901760, %v866_v19 }
 0x1cf   : > { %7004 = vmatprep.subr.bf16.mxu0 %v7003_v16  ;;  %7347 = vmatprep.subr.bf16.mxu1 %v8634_v1  ;;  %v7007_v2 = vpack.c.bf16 %v12162_v49, %v12161_v6  ;;  %v8823_v16 = vsub.f32 %v1047_v15, %v8791_v36  ;;  %v1271_v30 = vsub.f32 %v8797_v62, %v11794_v12  ;;  %v8838_v15 = vand.u32 4294901760, %v1053_v51  ;;  %v12163_v26 = vld [vmem:[#allocation29_spill] sm:$0xff]  ;;  %v869_v12 = vld [vmem:[#allocation6 + $0xa8] sm:$0xff] }
 0x1d0   : > { %1764 = vmatprep.mubr.f32.mxu0 %v8791_v36  ;;  %1251 = vmatprep.mubr.f32.mxu1 %v1250_v54  ;;  %v1266_v54 = vand.u32 4294901760, %v1265_v33  ;;  %v11798_v49 = vand.u32 4294901760, %v8829_v27  ;;  %v8855_v33 = vand.u32 4294901760, %v864_v40  ;;  %v1059_v8 = vsel %vm376_vm4, %v869_v12, 0  ;;  %12168 = vst [vmem:[#allocation44_spill] sm:$0xff] %v8875_v57 }
 0x1d1   : > { %1766 = vmatmul.mubr.f32.gmra.mrb[12].mxu0 %v8802_v60  ;;  %v11797_v6 = vand.u32 4294901760, %v8823_v16  ;;  %v12164_v60 = vld [vmem:[#allocation30_spill] sm:$0xff]  ;;  %1257 = vmatmul.mubr.f32.gmra.mrb[8].mxu1 %v1256_v11  ;;  %v8864_v11 = vand.u32 4294901760, %v1056_v20  ;;  %v8900_v4 = vsub.f32 %v866_v19, %v8875_v57 }
 0x1d2   : > { %7006 = vmatpush1.bf16.msra.mxu0 %v7005_v59  ;;  %7356 = vmatpush1.bf16.msra.mxu1 %v8648_v14  ;;  %v7009_v36 = vpack.c.bf16 %v12164_v60, %v12163_v26  ;;  %v8847_v59 = vsub.f32 %v1050_v21, %v8811_v23  ;;  %12165 = vst [vmem:[#allocation45_spill] sm:$0xff] %v8855_v33 }
 0x1d3   : > { %7008 = vmatprep.subr.bf16.mxu0 %v7007_v2  ;;  %1772 = vmatprep.mubr.f32.mxu0 %v8811_v23  ;;  %v1272_v2 = vand.u32 4294901760, %v1271_v30  ;;  %v1281_v60 = vsub.f32 %v8823_v16, %v11797_v6  ;;  %v1287_v21 = vsub.f32 %v8829_v27, %v11798_v49  ;;  %12166 = vst [vmem:[#allocation41_spill] sm:$0xff] %v8864_v11  ;;  %v11802_v30 = vand.u32 4294901760, %v8850_v5  ;;  %v871_v6 = vld [vmem:[#allocation6 + $0xb8] sm:$0xff] }
 0x1d4   : > { %1267 = vmatprep.mubr.f32.mxu1 %v1266_v54  ;;  %v11801_v26 = vand.u32 4294901760, %v8847_v59  ;;  %v7013_v54 = vpack.c.bf16 %v8650_v45, %v8638_v58  ;;  %v8872_v49 = vsub.f32 %v1053_v51, %v8838_v15  ;;  %v8878_v12 = vsub.f32 %v864_v40, %v8855_v33  ;;  %v868_v51 = vld [vmem:[#allocation6 + $0xa0] sm:$0xff]  ;;  %12173 = vst [vmem:[#allocation30_spill] sm:$0xff] %v8900_v4 }
 0x1d5   : > { %1774 = vmatmul.mubr.f32.gmra.mrb[14].mxu0 %v8826_v53  ;;  %v1282_v0 = vand.u32 4294901760, %v1281_v60  ;;  %1273 = vmatmul.mubr.f32.gmra.mrb[10].mxu1 %v1272_v2  ;;  %v1303_v58 = vsub.f32 %v8850_v5, %v11802_v30  ;;  %v8887_v45 = vand.u32 4294901760, %v1059_v8  ;;  %v1062_v40 = vsel %vm376_vm4, %v871_v6, 0 }
 0x1d6   : > { %7010 = vmatpush1.bf16.msra.mxu0 %v7009_v36  ;;  %1780 = vmatprep.mubr.f32.mxu0 %v8838_v15  ;;  %12167 = vst [vmem:[#allocation42_spill] sm:$0xff] %v8872_v49  ;;  %v1288_v36 = vand.u32 4294901760, %v1287_v21  ;;  %12169 = vst [vmem:[#allocation43_spill] sm:$0xff] %v8878_v12  ;;  %v11808_v60 = vand.u32 4294901760, %v8872_v49  ;;  %v11809_v21 = vand.u32 4294901760, %v8878_v12  ;;  %v8897_v30 = vand.u32 4294901760, %v868_v51 }
 0x1d7   : > { %7012 = vmatprep.subr.bf16.mxu0 %v7011_v44  ;;  %1283 = vmatprep.mubr.f32.mxu1 %v1282_v0  ;;  %v1297_v44 = vsub.f32 %v8847_v59, %v11801_v26  ;;  %12170 = vst [vmem:[#allocation28_spill] sm:$0xff] %v8887_v45  ;;  %v873_v0 = vld [vmem:[#allocation6 + $0xc8] sm:$0xff]  ;;  %v8894_v26 = vsub.f32 %v1056_v20, %v8864_v11  ;;  %v8909_v20 = vand.u32 4294901760, %v1062_v40 }
 0x1d8   : > { %12172 = vst [vmem:[#allocation29_spill] sm:$0xff] %v8897_v30  ;;  %v1313_v6 = vsub.f32 %v8872_v49, %v11808_v60  ;;  %v8915_v32 = vsub.f32 %v1059_v8, %v8887_v45  ;;  %v8921_v28 = vsub.f32 %v868_v51, %v8897_v30 }
 0x1d9   : > { %1782 = vmatmul.mubr.f32.gmra.mrb[16].mxu0 %v8855_v33  ;;  %v1298_v2 = vand.u32 4294901760, %v1297_v44  ;;  %12171 = vst [vmem:[#allocation25_spill] sm:$0xff] %v8894_v26  ;;  %1289 = vmatmul.mubr.f32.gmra.mrb[12].mxu1 %v1288_v36  ;;  %v1319_v44 = vsub.f32 %v8878_v12, %v11809_v21  ;;  %12174 = vst [vmem:[#allocation63_spill] sm:$0xff] %v8909_v20  ;;  %v870_v36 = vld [vmem:[#allocation6 + $0xb0] sm:$0xff]  ;;  %v11812_v19 = vand.u32 4294901760, %v8894_v26 }
 0x1da   : > { %7014 = vmatpush1.bf16.msra.mxu0 %v7013_v54  ;;  %1788 = vmatprep.mubr.f32.mxu0 %v8864_v11  ;;  %v1304_v54 = vand.u32 4294901760, %v1303_v58  ;;  %v1065_v58 = vsel %vm376_vm4, %v873_v0, 0  ;;  %v1314_v7 = vand.u32 4294901760, %v1313_v6  ;;  %12175 = vst [vmem:[#allocation64_spill] sm:$0xff] %v8915_v32  ;;  %v8918_v21 = vand.u32 4294901760, %v870_v36  ;;  %12177 = vst [vmem:[#allocation66_spill] sm:$0xff] %v8921_v28 }
 0x1db   : > { %7016 = vmatprep.subr.bf16.mxu0 %v8117_v29  ;;  %1299 = vmatprep.mubr.f32.mxu1 %v1298_v2  ;;  %v11813_v2 = vand.u32 4294901760, %v8900_v4  ;;  %v875_v29 = vld [vmem:[#allocation6 + $0xd8] sm:$0xff]  ;;  %v1320_v60 = vand.u32 4294901760, %v1319_v44  ;;  %v1329_v0 = vsub.f32 %v8894_v26, %v11812_v19  ;;  %v8930_v8 = vand.u32 4294901760, %v1065_v58 }
 0x1dc   : > { %12176 = vst [vmem:[#allocation65_spill] sm:$0xff] %v8918_v21  ;;  %v1068_v44 = vsel %vm376_vm4, %v875_v29, 0  ;;  %v11822_v51 = vand.u32 4294901760, %v8915_v32  ;;  %v8936_v14 = vsub.f32 %v1062_v40, %v8909_v20  ;;  %v879_v26 = vld [vmem:[#allocation6 + $0xf8] sm:$0xff] }
 0x1dd   : > { %1790 = vmatmul.mubr.f32.gmra.mrb[18].mxu0 %v8875_v57  ;;  %1305 = vmatmul.mubr.f32.gmra.mrb[14].mxu1 %v1304_v54  ;;  %v1335_v6 = vsub.f32 %v8900_v4, %v11813_v2  ;;  %12178 = vst [vmem:[#allocation67_spill] sm:$0xff] %v8930_v8  ;;  %v872_v54 = vld [vmem:[#allocation6 + $0xc0] sm:$0xff]  ;;  %v1330_v35 = vand.u32 4294901760, %v1329_v0  ;;  %v8942_v4 = vsub.f32 %v870_v36, %v8918_v21  ;;  %v8951_v40 = vand.u32 4294901760, %v1068_v44 }
 0x1de   : > { %1796 = vmatprep.mubr.f32.mxu0 %v8887_v45  ;;  %1315 = vmatprep.mubr.f32.mxu1 %v1314_v7  ;;  %v11823_v7 = vand.u32 4294901760, %v8921_v28  ;;  %12179 = vst [vmem:[#allocation68_spill] sm:$0xff] %v8936_v14  ;;  %v8939_v2 = vand.u32 4294901760, %v872_v54  ;;  %v1345_v29 = vsub.f32 %v8915_v32, %v11822_v51  ;;  %v11830_v36 = vand.u32 4294901760, %v8936_v14 }
 0x1df   : > { %v1336_v19 = vand.u32 4294901760, %v1335_v6  ;;  %12181 = vst [vmem:[#allocation70_spill] sm:$0xff] %v8942_v4  ;;  %12182 = vst [vmem:[#allocation71_spill] sm:$0xff] %v8951_v40  ;;  %v1071_v6 = vsel %vm376_vm4, %v877_v47, 0  ;;  %v8957_v1 = vsub.f32 %v1065_v58, %v8930_v8  ;;  %v8976_v32 = vsub.f32 %v1068_v44, %v8951_v40 }
 0x1e0   : > { %12180 = vst [vmem:[#allocation69_spill] sm:$0xff] %v8939_v2  ;;  %v1351_v0 = vsub.f32 %v8921_v28, %v11823_v7  ;;  %v1346_v12 = vand.u32 4294901760, %v1345_v29  ;;  %v8963_v28 = vsub.f32 %v872_v54, %v8939_v2  ;;  %v1361_v47 = vsub.f32 %v8936_v14, %v11830_v36  ;;  %v881_v36 = vld [vmem:[#allocation6 + $0x108] sm:$0xff] }
 0x1e1   : > { %1798 = vmatmul.mubr.f32.gmra.mrb[20].mxu0 %v8897_v30  ;;  %1321 = vmatmul.mubr.f32.gmra.mrb[16].mxu1 %v1320_v60  ;;  %v874_v60 = vld [vmem:[#allocation6 + $0xd0] sm:$0xff]  ;;  %12183 = vst [vmem:[#allocation72_spill] sm:$0xff] %v8957_v1  ;;  %v8972_v58 = vand.u32 4294901760, %v1071_v6  ;;  %12187 = vst [vmem:[#allocation76_spill] sm:$0xff] %v8976_v32 }
 0x1e2   : > { %1804 = vmatprep.mubr.f32.mxu0 %v8909_v20  ;;  %1331 = vmatprep.mubr.f32.mxu1 %v1330_v35  ;;  %v11833_v35 = vand.u32 4294901760, %v8942_v4  ;;  %v1352_v51 = vand.u32 4294901760, %v1351_v0  ;;  %v8960_v7 = vand.u32 4294901760, %v874_v60  ;;  %12185 = vst [vmem:[#allocation74_spill] sm:$0xff] %v8963_v28  ;;  %v1074_v0 = vsel %vm376_vm4, %v879_v26, 0 }
 0x1e3   : > { %12186 = vst [vmem:[#allocation75_spill] sm:$0xff] %v8972_v58  ;;  %v1362_v54 = vand.u32 4294901760, %v1361_v47  ;;  %v11848_v47 = vand.u32 4294901760, %v8976_v32 }
 0x1e4   : > { %12184 = vst [vmem:[#allocation73_spill] sm:$0xff] %v8960_v7  ;;  %v1367_v29 = vsub.f32 %v8942_v4, %v11833_v35  ;;  %v8981_v14 = vsub.f32 %v874_v60, %v8960_v7  ;;  %v8994_v60 = vand.u32 4294901760, %v1074_v0 }
 0x1e5   : > { %1806 = vmatmul.mubr.f32.gmra.mrb[22].mxu0 %v8918_v21  ;;  %1337 = vmatmul.mubr.f32.gmra.mrb[18].mxu1 %v1336_v19  ;;  %v876_v19 = vld [vmem:[#allocation6 + $0xe0] sm:$0xff] }
 0x1e6   : > { %1812 = vmatprep.mubr.f32.mxu0 %v8930_v8  ;;  %1347 = vmatprep.mubr.f32.mxu1 %v1346_v12  ;;  %v11840_v12 = vand.u32 4294901760, %v8957_v1  ;;  %12188 = vst [vmem:[#allocation77_spill] sm:$0xff] %v8981_v14  ;;  %v1368_v35 = vand.u32 4294901760, %v1367_v29  ;;  %v8984_v4 = vand.u32 4294901760, %v876_v19  ;;  %12190 = vst [vmem:[#allocation79_spill] sm:$0xff] %v8994_v60  ;;  %v11851_v29 = vand.u32 4294901760, %v8981_v14 }
 0x1e8   : > { %12189 = vst [vmem:[#allocation78_spill] sm:$0xff] %v8984_v4  ;;  %v1377_v26 = vsub.f32 %v8957_v1, %v11840_v12  ;;  %v1393_v12 = vsub.f32 %v8976_v32, %v11848_v47  ;;  %v1399_v49 = vsub.f32 %v8981_v14, %v11851_v29  ;;  %v9020_v32 = vsub.f32 %v1074_v0, %v8994_v60  ;;  %v933_v0 = vld [vmem:[%s11704_s4 + $0x68] sm:$0xff] }
 0x1e9   : > { %1814 = vmatmul.mubr.f32.gmra.mrb[24].mxu0 %v8939_v2  ;;  %v11841_v2 = vand.u32 4294901760, %v8963_v28  ;;  %1353 = vmatmul.mubr.f32.gmra.mrb[20].mxu1 %v1352_v51  ;;  %v878_v51 = vld [vmem:[#allocation6 + $0xf0] sm:$0xff] }
 0x1ea   : > { %1820 = vmatprep.mubr.f32.mxu0 %v8951_v40  ;;  %1363 = vmatprep.mubr.f32.mxu1 %v1362_v54  ;;  %v8999_v54 = vsub.f32 %v1071_v6, %v8972_v58  ;;  %v1378_v40 = vand.u32 4294901760, %v1377_v26  ;;  %v1394_v6 = vand.u32 4294901760, %v1393_v12  ;;  %v1400_v12 = vand.u32 4294901760, %v1399_v49  ;;  %v882_v49 = vld [vmem:[#allocation6 + $0x110] sm:$0xff] }
 0x1eb   : > { %v1383_v44 = vsub.f32 %v8963_v28, %v11841_v2  ;;  %v883_v2 = vld [vmem:[#allocation6 + $0x118] sm:$0xff]  ;;  %v9005_v28 = vsub.f32 %v876_v19, %v8984_v4  ;;  %v880_v19 = vld [vmem:[#allocation6 + $0x100] sm:$0xff] }
 0x1ec   : > { %12191 = vst [vmem:[#allocation80_spill] sm:$0xff] %v8999_v54  ;;  %v11856_v26 = vand.u32 4294901760, %v8999_v54 }
 0x1ed   : > { %1822 = vmatmul.mubr.f32.gmra.mrb[26].mxu0 %v8960_v7  ;;  %v1077_v7 = vsel %vm376_vm4, %v881_v36, 0  ;;  %12192 = vst [vmem:[#allocation81_spill] sm:$0xff] %v9005_v28  ;;  %1369 = vmatmul.mubr.f32.gmra.mrb[22].mxu1 %v1368_v35  ;;  %v1384_v1 = vand.u32 4294901760, %v1383_v44  ;;  %v9011_v36 = vand.u32 4294901760, %v878_v51  ;;  %v11857_v35 = vand.u32 4294901760, %v9005_v28 }
 0x1ee   : > { %1828 = vmatprep.mubr.f32.mxu0 %v8972_v58  ;;  %1379 = vmatprep.mubr.f32.mxu1 %v1378_v40  ;;  %v9015_v47 = vand.u32 4294901760, %v1077_v7  ;;  %v1080_v44 = vsel %vm376_vm4, %v883_v2, 0  ;;  %v1409_v29 = vsub.f32 %v8999_v54, %v11856_v26  ;;  %v11867_v26 = vand.u32 4294901760, %v9020_v32 }
 0x1ef   : > { %12193 = vst [vmem:[#allocation82_spill] sm:$0xff] %v9011_v36  ;;  %v9026_v40 = vsub.f32 %v878_v51, %v9011_v36  ;;  %v1415_v14 = vsub.f32 %v9005_v28, %v11857_v35  ;;  %v7889_v51 = vmov 0  }
 0x1f0   : > { %12194 = vst [vmem:[#allocation83_spill] sm:$0xff] %v9015_v47  ;;  %v1410_v2 = vand.u32 4294901760, %v1409_v29  ;;  %7702 = vset.pattern.permute.xlu1 %v7889_v51  ;;  %v9043_v28 = vsub.f32 %v1077_v7, %v9015_v47  ;;  %v1425_v29 = vsub.f32 %v9020_v32, %v11867_v26  ;;  %7701 = vset.pattern.permute.xlu0 %v7889_v51  ;;  %v12198_v26 = vld [vmem:[#allocation22_spill] sm:$0xff] }
 0x1f1   : > { %1830 = vmatmul.mubr.f32.gmra.mrb[28].mxu0 %v8984_v4  ;;  %1385 = vmatmul.mubr.f32.gmra.mrb[24].mxu1 %v1384_v1  ;;  %v9032_v4 = vand.u32 4294901760, %v880_v19  ;;  %v9039_v1 = vand.u32 4294901760, %v1080_v44  ;;  %v11866_v35 = vand.u32 4294901760, %v9026_v40  ;;  %v1416_v54 = vand.u32 4294901760, %v1415_v14 }
 0x1f2   : > { %1836 = vmatprep.mubr.f32.mxu0 %v8994_v60  ;;  %1395 = vmatprep.mubr.f32.mxu1 %v1394_v6  ;;  %v9055_v60 = vand.u32 4294901760, %v882_v49  ;;  %v1426_v7 = vand.u32 4294901760, %v1425_v29  ;;  %v11868_v51 = vand.u32 4294901760, %v9043_v28 }
 0x1f3   : > { %12195 = vst [vmem:[#allocation84_spill] sm:$0xff] %v9032_v4  ;;  %12196 = vst [vmem:[#allocation85_spill] sm:$0xff] %v9039_v1  ;;  %1005 = vperm.xlu1 %7702, %v933_v0   ;;  %v9049_v6 = vsub.f32 %v880_v19, %v9032_v4  ;;  %v920_v0 = vld [vmem:[%s11704_s4] sm:$0xff] }
 0x1f4   : > { %12197 = vst [vmem:[#allocation86_spill] sm:$0xff] %v9055_v60  ;;  %v1441_v19 = vsub.f32 %v9043_v28, %v11868_v51 }
 0x1f5   : > { %1838 = vmatmul.mubr.f32.gmra.mrb[30].mxu0 %v9011_v36  ;;  %1401 = vmatmul.mubr.f32.gmra.mrb[26].mxu1 %v1400_v12  ;;  %v1431_v36 = vsub.f32 %v9026_v40, %v11866_v35  ;;  %v11877_v14 = vand.u32 4294901760, %v9049_v6  ;;  %v9067_v12 = vsub.f32 %v1080_v44, %v9039_v1  ;;  %v9079_v44 = vsub.f32 %v882_v49, %v9055_v60  ;;  %v924_v49 = vld [vmem:[%s11704_s4 + $0x20] sm:$0xff] }
 0x1f6   : > { %1844 = vmatprep.mubr.f32.mxu0 %v9015_v47  ;;  %1411 = vmatprep.mubr.f32.mxu1 %v1410_v2  ;;  %v1442_v35 = vand.u32 4294901760, %v1441_v19 }
 0x1f7   : > { %940 = vperm.xlu1 %7702, %v920_v0   ;;  %v1432_v2 = vand.u32 4294901760, %v1431_v36  ;;  %v1447_v29 = vsub.f32 %v9049_v6, %v11877_v14  ;;  %v922_v0 = vld [vmem:[%s11704_s4 + $0x10] sm:$0xff]  ;;  %v11876_v51 = vand.u32 4294901760, %v9067_v12  ;;  %v11875_v19 = vand.u32 4294901760, %v9079_v44 }
 0x1f8   : > { %v12206_v14 = vld [vmem:[#allocation19_spill] sm:$0xff] }
 0x1f9   : > { %1846 = vmatmul.mubr.f32.gmra.mrb[32].mxu0 %v9032_v4  ;;  %1417 = vmatmul.mubr.f32.gmra.mrb[28].mxu1 %v1416_v54  ;;  %v1448_v54 = vand.u32 4294901760, %v1447_v29  ;;  %v1457_v36 = vsub.f32 %v9067_v12, %v11876_v51  ;;  %v12205_v51 = vld [vmem:[#allocation25_spill] sm:$0xff] }
 0x1fa   : > { %1852 = vmatprep.mubr.f32.mxu0 %v9039_v1  ;;  %1427 = vmatprep.mubr.f32.mxu1 %v1426_v7  ;;  %v932_v7 = vld [vmem:[%s11704_s4 + $0x60] sm:$0xff] }
 0x1fb   : > { %950 = vperm.xlu1 %7702, %v922_v0   ;;  %1000 = vperm.xlu0 %7701, %v932_v7   ;;  %v921_v0 = vld [vmem:[%s11704_s4 + $0x8] sm:$0xff]  ;;  %v928_v7 = vld [vmem:[%s11704_s4 + $0x40] sm:$0xff] }
 0x1fd   : > { %1854 = vmatmul.mubr.f32.gmra.mrb[34].mxu0 %v9055_v60  ;;  %1433 = vmatmul.mubr.f32.gmra.mrb[30].mxu1 %v1432_v2  ;;  %v1458_v2 = vand.u32 4294901760, %v1457_v36  ;;  %v927_v36 = vld [vmem:[%s11704_s4 + $0x38] sm:$0xff] }
 0x1fe   : > { %1998 = vmatprep.mubr.f32.mxu0 %v12198_v26  ;;  %1443 = vmatprep.mubr.f32.mxu1 %v1442_v35  ;;  %v1463_v35 = vsub.f32 %v9079_v44, %v11875_v19  ;;  %v12204_v19 = vld [vmem:[#allocation55_spill] sm:$0xff] }
 0x1ff   : > { %960 = vperm.xlu1 %7702, %v924_v49   ;;  %945 = vperm.xlu0 %7701, %v921_v0   ;;  %v925_v49 = vld [vmem:[%s11704_s4 + $0x28] sm:$0xff] }
 0x200   : > { %v1464_v29 = vand.u32 4294901760, %v1463_v35  ;;  %v926_v35 = vld [vmem:[%s11704_s4 + $0x30] sm:$0xff]  ;;  %v929_v0 = vld [vmem:[%s11704_s4 + $0x48] sm:$0xff] }
 0x201   : > { %2001 = vmatmul.mubr.f32.vlgmr.msra.gmra.mrb[0].mxu0 %v8542_v18  ;;  %1449 = vmatmul.mubr.f32.gmra.mrb[32].mxu1 %v1448_v54  ;;  %v923_v54 = vld [vmem:[%s11704_s4 + $0x18] sm:$0xff] }
 0x202   : > { %7018 = vmatpush1.bf16.msra.mxu0 %v8134_v38  ;;  %2008 = vmatprep.mubr.f32.mxu0 %v8685_v31 }
 0x203   : > { %7020 = vmatprep.subr.bf16.mxu0 %v8259_v22  ;;  %1459 = vmatprep.mubr.f32.mxu1 %v1458_v2  ;;  %v930_v2 = vld [vmem:[%s11704_s4 + $0x50] sm:$0xff] }
 0x204   : > { %975 = vperm.xlu1 %7702, %v927_v36   ;;  %955 = vperm.xlu0 %7701, %v923_v54   ;;  %v9155_v36 = vld [vmem:[%s11708_s8 + $0x1] ss:$2 sm:$0x3]  ;;  %v931_v54 = vld [vmem:[%s11704_s4 + $0x58] sm:$0xff] }
 0x205   : > { %2011 = vmatmul.mubr.f32.gmra.mrb[2].mxu0 %v8692_v39  ;;  %1465 = vmatmul.mubr.f32.gmra.mrb[34].mxu1 %v1464_v29  ;;  %v934_v29 = vld [vmem:[%s11704_s4 + $0x70] sm:$0xff] }
 0x206   : > { %7022 = vmatpush1.bf16.msra.mxu0 %v8261_v24  ;;  %2018 = vmatprep.mubr.f32.mxu0 %v8709_v52 }
 0x207   : > { %7024 = vmatprep.subr.bf16.mxu0 %v8405_v17  ;;  %2968 = vmatprep.mubr.f32.mxu1 %v8811_v23 }
 0x208   : > { %980 = vperm.xlu1 %7702, %v928_v7   ;;  %965 = vperm.xlu0 %7701, %v925_v49   ;;  %v9171_v7 = vld [vmem:[%s11708_s8] ss:$2 sm:$0x3]  ;;  %v12199_v49 = vld [vmem:[#allocation42_spill] sm:$0xff] }
 0x209   : > { %2021 = vmatmul.mubr.f32.gmra.mrb[4].mxu0 %v8719_v61  ;;  %2970 = vmatmul.mubr.f32.vlgmr.msra.gmra.mrb[36].mxu1 %v8826_v53 }
 0x20a   : > { %7026 = vmatpush1.bf16.msra.mxu0 %v8407_v41  ;;  %2028 = vmatprep.mubr.f32.mxu0 %v8736_v56 }
 0x20b   : > { %7028 = vmatprep.subr.bf16.mxu0 %v8467_v63  ;;  %2976 = vmatprep.mubr.f32.mxu1 %v8838_v15 }
 0x20c   : > { %990 = vperm.xlu1 %7702, %v930_v2   ;;  %970 = vperm.xlu0 %7701, %v926_v35   ;;  %v935_v2 = vld [vmem:[%s11704_s4 + $0x78] sm:$0xff]  ;;  %v12200_v35 = vld [vmem:[#allocation54_spill] sm:$0xff] }
 0x20d   : > { %2031 = vmatmul.mubr.f32.gmra.mrb[6].mxu0 %v8746_v25  ;;  %2978 = vmatmul.mubr.f32.gmra.mrb[38].mxu1 %v8855_v33  ;;  %v12222_v33 = vand.u32 4294901760, %v12198_v26  ;;  %v12230_v26 = vld [vmem:[#allocation46_spill] sm:$0xff] }
 0x20e   : > { %7030 = vmatpush1.bf16.msra.mxu0 %v8469_v34  ;;  %2038 = vmatprep.mubr.f32.mxu0 %v8778_v43 }
 0x20f   : > { %7032 = vmatprep.subr.bf16.mxu0 %v12139_v9  ;;  %2984 = vmatprep.mubr.f32.mxu1 %v8864_v11 }
 0x210   : > { %1010 = vperm.xlu1 %7702, %v934_v29   ;;  %985 = vperm.xlu0 %7701, %v929_v0   ;;  %v12201_v29 = vld [vmem:[#allocation69_spill] sm:$0xff]  ;;  %v12202_v0 = vld [vmem:[#allocation43_spill] sm:$0xff] }
 0x211   : > { %2041 = vmatmul.mubr.f32.gmra.mrb[8].mxu0 %v8781_v55  ;;  %2986 = vmatmul.mubr.f32.gmra.mrb[40].mxu1 %v8875_v57  ;;  %v12221_v57 = vld [vmem:[#allocation81_spill] sm:$0xff] }
 0x212   : > { %7034 = vmatpush1.bf16.msra.mxu0 %v12142_v50  ;;  %2048 = vmatprep.mubr.f32.mxu0 %v8794_v13 }
 0x213   : > { %7036 = vmatprep.subr.bf16.mxu0 %v8510_v42  ;;  %2992 = vmatprep.mubr.f32.mxu1 %v8887_v45  ;;  %v12215_v45 = vld [vmem:[#allocation70_spill] sm:$0xff] }
 0x214   : > { %4272 = vrot.lane.b32.xlu1 %v9155_v36, %s7876_s17  ;;  %995 = vperm.xlu0 %7701, %v931_v54   ;;  %v12203_v54 = vld [vmem:[#allocation71_spill] sm:$0xff]  ;;  %s6825_s17 = sld [smem:[#allocation10 + $0x85]] }
 0x215   : > { %2051 = vmatmul.mubr.f32.gmra.mrb[10].mxu0 %v8797_v62  ;;  %2994 = vmatmul.mubr.f32.gmra.mrb[42].mxu1 %v8897_v30  ;;  %v12213_v30 = vld [vmem:[#allocation68_spill] sm:$0xff] }
 0x216   : > { %7038 = vmatpush1.bf16.msra.mxu0 %v12147_v48  ;;  %2058 = vmatprep.mubr.f32.mxu0 %v8823_v16 }
 0x217   : > { %7040 = vmatprep.subr.bf16.mxu0 %v8546_v37  ;;  %3000 = vmatprep.mubr.f32.mxu1 %v8909_v20  ;;  %v12212_v20 = vld [vmem:[#allocation79_spill] sm:$0xff] }
 0x218   : > { %5000 = vrot.lane.b32.xlu1 %v9171_v7, %s7879_s23  ;;  %1015 = vperm.xlu0 %7701, %v935_v2   ;;  %v12209_v2 = vld [vmem:[#allocation64_spill] sm:$0xff]  ;;  %s6780_s23 = sld [smem:[#allocation10 + $0x88]] }
 0x219   : > { %2061 = vmatmul.mubr.f32.gmra.mrb[12].mxu0 %v8829_v27  ;;  %3002 = vmatmul.mubr.f32.gmra.mrb[44].mxu1 %v8918_v21  ;;  %v12208_v21 = vld [vmem:[#allocation30_spill] sm:$0xff] }
 0x21a   : > { %7042 = vmatpush1.bf16.msra.mxu0 %v8577_v10  ;;  %2068 = vmatprep.mubr.f32.mxu0 %v8847_v59 }
 0x21b   : > { %7044 = vmatprep.subr.bf16.mxu0 %v12152_v3  ;;  %3008 = vmatprep.mubr.f32.mxu1 %v8930_v8  ;;  %v12207_v8 = vld [vmem:[#allocation73_spill] sm:$0xff] }
 0x21c   : > { %4327 = vrot.lane.b32.xlu0 %v9155_v36, %s7878_s21  ;;  %s6852_s21 = sld [smem:[#allocation10 + $0x2]] }
 0x21d   : > { %2071 = vmatmul.mubr.f32.gmra.mrb[14].mxu0 %v8850_v5  ;;  %3010 = vmatmul.mubr.f32.gmra.mrb[46].mxu1 %v12201_v29  ;;  %v12210_v29 = vld [vmem:[#allocation78_spill] sm:$0xff] }
 0x21e   : > { %7046 = vmatpush1.bf16.msra.mxu0 %v8568_v46  ;;  %2078 = vmatprep.mubr.f32.mxu0 %v12199_v49 }
 0x21f   : > { %7048 = vmatprep.subr.bf16.mxu0 %v12200_v35  ;;  %3016 = vmatprep.mubr.f32.mxu1 %v12203_v54  ;;  %v12211_v54 = vld [vmem:[#allocation66_spill] sm:$0xff]  ;;  %v12223_v35 = vand.u32 4294901760, %v8542_v18  ;;  %v12231_v18 = vand.u32 4294901760, %v8719_v61  ;;  %v12237_v61 = vand.u32 4294901760, %v8778_v43 }
 0x220   : > { %v12242_v43 = vld [vmem:[#allocation50_spill] sm:$0xff] }
 0x221   : > { %2081 = vmatmul.mubr.f32.gmra.mrb[16].mxu0 %v12202_v0  ;;  %3018 = vmatmul.mubr.f32.gmra.mrb[48].mxu1 %v12207_v8  ;;  %v12216_v8 = vld [vmem:[#allocation72_spill] sm:$0xff] }
 0x222   : > { %7050 = vmatpush1.bf16.msra.mxu0 %v12204_v19  ;;  %2088 = vmatprep.mubr.f32.mxu0 %v12205_v51 }
 0x223   : > { %7052 = vmatprep.subr.bf16.mxu0 %v12206_v14  ;;  %3024 = vmatprep.mubr.f32.mxu1 %v8972_v58  ;;  %v12214_v14 = vld [vmem:[#allocation82_spill] sm:$0xff] }
 0x224   : > { %v12217_v58 = vld [vmem:[#allocation74_spill] sm:$0xff] }
 0x225   : > { %2091 = vmatmul.mubr.f32.gmra.mrb[18].mxu0 %v12208_v21  ;;  %3026 = vmatmul.mubr.f32.gmra.mrb[50].mxu1 %v12210_v29  ;;  %v12219_v29 = vld [vmem:[#allocation77_spill] sm:$0xff] }
 0x226   : > { %2098 = vmatprep.mubr.f32.mxu0 %v12209_v2  ;;  %3032 = vmatprep.mubr.f32.mxu1 %v12212_v20  ;;  %v12218_v20 = vld [vmem:[#allocation76_spill] sm:$0xff] }
 0x229   : > { %2101 = vmatmul.mubr.f32.gmra.mrb[20].mxu0 %v12211_v54  ;;  %3034 = vmatmul.mubr.f32.gmra.mrb[52].mxu1 %v12214_v14  ;;  %v12220_v14 = vld [vmem:[#allocation80_spill] sm:$0xff] }
 0x22a   : > { %2108 = vmatprep.mubr.f32.mxu0 %v12213_v30  ;;  %3040 = vmatprep.mubr.f32.mxu1 %v9015_v47  ;;  %v7750_v47 = vld [vmem:[%s8063_s24 + $0x18] sm:$0xff] }
 0x22d   : > { %2111 = vmatmul.mubr.f32.gmra.mrb[22].mxu0 %v12215_v45  ;;  %3042 = vmatmul.mubr.f32.gmra.mrb[54].mxu1 %v9032_v4  ;;  %v7749_v4 = vld [vmem:[%s8063_s24 + $0x10] sm:$0xff] }
 0x22e   : > { %2118 = vmatprep.mubr.f32.mxu0 %v12216_v8  ;;  %3048 = vmatprep.mubr.f32.mxu1 %v9039_v1  ;;  %v367_v11 = vadd.f32 %v7750_v47, %v7749_v4  ;;  %v7751_v1 = vld [vmem:[%s8063_s24] sm:$0xff]  ;;  %v12224_v4 = vld [vmem:[#allocation20_spill] sm:$0xff]  ;;  %v12226_v47 = vld [vmem:[#allocation31_spill] sm:$0xff] }
 0x231   : > { %2121 = vmatmul.mubr.f32.gmra.mrb[24].mxu0 %v12217_v58  ;;  %3050 = vmatmul.mubr.f32.gmra.mrb[56].mxu1 %v9055_v60  ;;  %v7752_v60 = vld [vmem:[%s8063_s24 + $0x8] sm:$0xff]  ;;  %s6853_s24 = sld [smem:[#allocation10 + $0x82]] }
 0x232   : > { %2128 = vmatprep.mubr.f32.mxu0 %v12218_v20  ;;  %v364_v19 = vadd.f32 %v7752_v60, %v7751_v1  ;;  %v12227_v60 = vand.u32 4294901760, %v8692_v39  ;;  %v12228_v1 = vld [vmem:[#allocation32_spill] sm:$0xff] }
 0x233   : > { %v12234_v39 = vld [vmem:[#allocation48_spill] sm:$0xff] }
 0x235   : > { %2131 = vmatmul.mubr.f32.gmra.mrb[26].mxu0 %v12219_v29 }
 0x236   : > { %2138 = vmatprep.mubr.f32.mxu0 %v12220_v14 }
 0x239   : > { %2141 = vmatmul.mubr.f32.gmra.mrb[28].mxu0 %v12221_v57 }
 0x23a   : > { %2148 = vmatprep.mubr.f32.mxu0 %v9020_v32 }
 0x23b   : > { %365 = vadd.xlane.f32.xlu0 %v364_v19  ;;  %v12229_v19 = vand.u32 4294901760, %v8709_v52  ;;  %v12235_v52 = vand.u32 4294901760, %v8746_v25  ;;  %v12240_v25 = vld [vmem:[#allocation34_spill] sm:$0xff] }
 0x23c   : > { %368 = vadd.xlane.f32.xlu1 %v367_v11  ;;  %v12225_v11 = vand.u32 4294901760, %v8685_v31  ;;  %v936_v31 = vld [vmem:[%s11704_s4 + $0x80] sm:$0xff] }
 0x23d   : > { %2151 = vmatmul.mubr.f32.gmra.mrb[30].mxu0 %v9026_v40 }
 0x23e   : > { %2158 = vmatprep.mubr.f32.mxu0 %v9043_v28 }
 0x241   : > { %2161 = vmatmul.mubr.f32.gmra.mrb[32].mxu0 %v9049_v6 }
 0x242   : > { %2168 = vmatprep.mubr.f32.mxu0 %v9067_v12 }
 0x245   : > { %2171 = vmatmul.mubr.f32.gmra.mrb[34].mxu0 %v9079_v44 }
 0x246   : > { %2280 = vmatprep.mubr.f32.mxu0 %v12222_v33  ;;  %v12232_v33 = vld [vmem:[#allocation47_spill] sm:$0xff] }
 0x249   : > { %2284 = vmatmul.mubr.f32.vlgmr.msra.gmra.mrb[0].mxu0 %v12223_v35  ;;  %v12233_v35 = vand.u32 4294901760, %v8736_v56  ;;  %v12239_v56 = vand.u32 4294901760, %v8781_v55  ;;  %v12246_v55 = vld [vmem:[#allocation52_spill] sm:$0xff] }
 0x24a   : > { %7054 = vmatpush1.bf16.msra.mxu0 %v12224_v4  ;;  %2292 = vmatprep.mubr.f32.mxu0 %v12225_v11  ;;  %v12236_v4 = vld [vmem:[#allocation49_spill] sm:$0xff]  ;;  %v937_v11 = vld [vmem:[%s11704_s4 + $0x88] sm:$0xff] }
 0x24b   : > { %7056 = vmatprep.subr.bf16.mxu0 %v12226_v47  ;;  %v12238_v47 = vld [vmem:[#allocation33_spill] sm:$0xff] }
 0x24d   : > { %2296 = vmatmul.mubr.f32.gmra.mrb[2].mxu0 %v12227_v60  ;;  %1020 = vperm.xlu1 %7702, %v936_v31   ;;  %v12241_v60 = vand.u32 4294901760, %v8794_v13  ;;  %v12248_v13 = vld [vmem:[#allocation53_spill] sm:$0xff]  ;;  %v12251_v31 = vand.u32 4294901760, %v8850_v5  ;;  %v12259_v5 = vand.u32 4294901760, %v12208_v21  ;;  %v12266_v21 = vand.u32 4294901760, %v12218_v20 }
 0x24e   : > { %7058 = vmatpush1.bf16.msra.mxu0 %v12228_v1  ;;  %2304 = vmatprep.mubr.f32.mxu0 %v12229_v19  ;;  %v12243_v1 = vand.u32 4294901760, %v8797_v62  ;;  %v12244_v19 = vld [vmem:[#allocation51_spill] sm:$0xff]  ;;  %v12272_v20 = vand.u32 4294901760, %v9043_v28 }
 0x24f   : > { %7060 = vmatprep.subr.bf16.mxu0 %v12230_v26  ;;  %v12247_v26 = vand.u32 4294901760, %v8829_v27  ;;  %v12250_v62 = vld [vmem:[#allocation35_spill] sm:$0xff]  ;;  %v12255_v27 = vand.u32 4294901760, %v12202_v0  ;;  %v12263_v0 = vand.u32 4294901760, %v12215_v45  ;;  %v12270_v45 = vand.u32 4294901760, %v9020_v32  ;;  %v12276_v32 = vld [vmem:[#allocation21_spill] sm:$0xff] }
 0x250   : > { %v12279_v28 = vld [vmem:[#allocation59_spill] sm:$0xff] }
 0x251   : > { %2308 = vmatmul.mubr.f32.gmra.mrb[4].mxu0 %v12231_v18  ;;  %3945 = vrot.lane.b32.xlu1 %v9171_v7, %s11918_s22  ;;  %v12245_v7 = vand.u32 4294901760, %v8823_v16  ;;  %v12249_v18 = vand.u32 4294901760, %v8847_v59  ;;  %v12253_v16 = vand.u32 4294901760, %v12199_v49  ;;  %v12257_v59 = vand.u32 4294901760, %v12205_v51  ;;  %s10278_s22 = sld [smem:[#allocation10 + $0x3]] }
 0x252   : > { %7062 = vmatpush1.bf16.msra.mxu0 %v12232_v33  ;;  %2316 = vmatprep.mubr.f32.mxu0 %v12233_v35  ;;  %v12254_v33 = vld [vmem:[#allocation56_spill] sm:$0xff]  ;;  %v12256_v35 = vld [vmem:[#allocation57_spill] sm:$0xff]  ;;  %v12261_v49 = vand.u32 4294901760, %v12211_v54  ;;  %v12264_v51 = vand.u32 4294901760, %v12216_v8  ;;  %v12268_v54 = vand.u32 4294901760, %v12220_v14  ;;  %v12274_v14 = vand.u32 4294901760, %v9067_v12 }
 0x253   : > { %7064 = vmatprep.subr.bf16.mxu0 %v12234_v39  ;;  %1025 = vperm.xlu0 %7701, %v937_v11   ;;  %v12258_v39 = vld [vmem:[#allocation18_spill] sm:$0xff] }
 0x255   : > { %2320 = vmatmul.mubr.f32.gmra.mrb[6].mxu0 %v12235_v52  ;;  %v12260_v52 = vand.u32 4294901760, %v12209_v2  ;;  %v12267_v2 = vand.u32 4294901760, %v12219_v29  ;;  %v12273_v29 = vand.u32 4294901760, %v9049_v6  ;;  %v12280_v6 = vld [vmem:[#allocation60_spill] sm:$0xff] }
 0x256   : > { %7066 = vmatpush1.bf16.msra.mxu0 %v12236_v4  ;;  %2328 = vmatprep.mubr.f32.mxu0 %v12237_v61  ;;  %v12262_v4 = vand.u32 4294901760, %v12213_v30  ;;  %v12265_v61 = vand.u32 4294901760, %v12217_v58  ;;  %v12269_v30 = vand.u32 4294901760, %v12221_v57  ;;  %v12271_v58 = vand.u32 4294901760, %v9026_v40  ;;  %v12278_v40 = vld [vmem:[#allocation58_spill] sm:$0xff] }
 0x257   : > { %7068 = vmatprep.subr.bf16.mxu0 %v12238_v47  ;;  %5359 = vrot.lane.b32.xlu0 %v9155_v36, %s7880_s26  ;;  %v12252_v36 = vld [vmem:[#allocation36_spill] sm:$0xff]  ;;  %v12275_v57 = vand.u32 4294901760, %v9079_v44  ;;  %v12277_v47 = vld [vmem:[#allocation38_spill] sm:$0xff]  ;;  %v12281_v44 = vld [vmem:[#allocation61_spill] sm:$0xff]  ;;  %s12381_s26 = smov 17  }
 0x259   : > { %2332 = vmatmul.mubr.f32.gmra.mrb[8].mxu0 %v12239_v56 }
 0x25a   : > { %7070 = vmatpush1.bf16.msra.mxu0 %v12240_v25  ;;  %2340 = vmatprep.mubr.f32.mxu0 %v12241_v60  ;;  %v12283_v25 = vld [vmem:[#allocation62_spill] sm:$0xff] }
 0x25b   : > { %7072 = vmatprep.subr.bf16.mxu0 %v12242_v43  ;;  %v12286_v43 = vld [vmem:[#allocation26_spill] sm:$0xff] }
 0x25d   : > { %2344 = vmatmul.mubr.f32.gmra.mrb[10].mxu0 %v12243_v1  ;;  %v12288_v1 = vld [vmem:[#allocation40_spill] sm:$0xff] }
 0x25e   : > { %7074 = vmatpush1.bf16.msra.mxu0 %v12244_v19  ;;  %2352 = vmatprep.mubr.f32.mxu0 %v12245_v7  ;;  %v12290_v7 = vld [vmem:[#allocation24_spill] sm:$0xff] }
 0x25f   : > { %7076 = vmatprep.subr.bf16.mxu0 %v12246_v55 }
 0x261   : > { %2356 = vmatmul.mubr.f32.gmra.mrb[12].mxu0 %v12247_v26 }
 0x262   : > { %7078 = vmatpush1.bf16.msra.mxu0 %v12248_v13  ;;  %2364 = vmatprep.mubr.f32.mxu0 %v12249_v18 }
 0x263   : > { %7080 = vmatprep.subr.bf16.mxu0 %v12250_v62  ;;  %v12300_v62 = vld [vmem:[#allocation29_spill] sm:$0xff] }
 0x265   : > { %2368 = vmatmul.mubr.f32.gmra.mrb[14].mxu0 %v12251_v31  ;;  %v12301_v31 = vld [vmem:[#allocation63_spill] sm:$0xff] }
 0x266   : > { %7082 = vmatpush1.bf16.msra.mxu0 %v12252_v36  ;;  %2376 = vmatprep.mubr.f32.mxu0 %v12253_v16 }
 0x267   : > { %7084 = vmatprep.subr.bf16.mxu0 %v12254_v33  ;;  %v12302_v33 = vld [vmem:[#allocation65_spill] sm:$0xff] }
 0x269   : > { %2380 = vmatmul.mubr.f32.gmra.mrb[16].mxu0 %v12255_v27  ;;  %v12303_v27 = vld [vmem:[#allocation67_spill] sm:$0xff] }
 0x26a   : > { %7086 = vmatpush1.bf16.msra.mxu0 %v12256_v35  ;;  %2388 = vmatprep.mubr.f32.mxu0 %v12257_v59 }
 0x26b   : > { %7088 = vmatprep.subr.bf16.mxu0 %v12258_v39  ;;  %v12304_v39 = vld [vmem:[#allocation69_spill] sm:$0xff] }
 0x26d   : > { %2392 = vmatmul.mubr.f32.gmra.mrb[18].mxu0 %v12259_v5  ;;  %v12305_v5 = vld [vmem:[#allocation71_spill] sm:$0xff] }
 0x26e   : > { %2400 = vmatprep.mubr.f32.mxu0 %v12260_v52 }
 0x271   : > { %2404 = vmatmul.mubr.f32.gmra.mrb[20].mxu0 %v12261_v49 }
 0x272   : > { %2412 = vmatprep.mubr.f32.mxu0 %v12262_v4  ;;  %v12307_v4 = vld [vmem:[#allocation73_spill] sm:$0xff] }
 0x275   : > { %2416 = vmatmul.mubr.f32.gmra.mrb[22].mxu0 %v12263_v0  ;;  %v12308_v0 = vld [vmem:[#allocation75_spill] sm:$0xff] }
 0x276   : > { %2424 = vmatprep.mubr.f32.mxu0 %v12264_v51 }
 0x279   : > { %2428 = vmatmul.mubr.f32.gmra.mrb[24].mxu0 %v12265_v61 }
 0x27a   : > { %2436 = vmatprep.mubr.f32.mxu0 %v12266_v21  ;;  %v12309_v21 = vld [vmem:[#allocation78_spill] sm:$0xff] }
 0x27d   : > { %2440 = vmatmul.mubr.f32.gmra.mrb[26].mxu0 %v12267_v2  ;;  %v12310_v2 = vld [vmem:[#allocation79_spill] sm:$0xff] }
 0x27e   : > { %2448 = vmatprep.mubr.f32.mxu0 %v12268_v54 }
 0x281   : > { %2452 = vmatmul.mubr.f32.gmra.mrb[28].mxu0 %v12269_v30 }
 0x282   : > { %2460 = vmatprep.mubr.f32.mxu0 %v12270_v45  ;;  %v12311_v45 = vld [vmem:[#allocation82_spill] sm:$0xff] }
 0x284   : > { %v9312_v8 = vpop.f32.mrb[0].mxu1 }
 0x285   : > { %2464 = vmatmul.mubr.f32.gmra.mrb[30].mxu0 %v12271_v58  ;;  %v9316_v11 = vpop.f32.mrb[1].mxu1  ;;  %v12312_v58 = vld [vmem:[#allocation83_spill] sm:$0xff] }
 0x286   : > { %2472 = vmatprep.mubr.f32.mxu0 %v12272_v20 }
 0x289   : > { %2476 = vmatmul.mubr.f32.gmra.mrb[32].mxu0 %v12273_v29 }
 0x28a   : > { %2484 = vmatprep.mubr.f32.mxu0 %v12274_v14  ;;  %v12313_v14 = vld [vmem:[#allocation84_spill] sm:$0xff] }
 0x28d   : > { %2488 = vmatmul.mubr.f32.gmra.mrb[34].mxu0 %v12275_v57  ;;  %v12314_v57 = vld [vmem:[#allocation85_spill] sm:$0xff] }
 0x28e   : > { %2667 = vmatprep.mubr.f32.mxu0 %v12276_v32 }
 0x290   : > { %v9335_v12 = vpop.f32.mrb[2].mxu1 }
 0x291   : > { %2669 = vmatmul.mubr.f32.vlgmr.msra.gmra.mrb[0].mxu0 %v12277_v47  ;;  %v9338_v56 = vpop.f32.mrb[3].mxu1 }
 0x292   : > { %7090 = vmatpush1.bf16.msra.mxu0 %v8134_v38  ;;  %2675 = vmatprep.mubr.f32.mxu0 %v12278_v40  ;;  %v12282_v38 = vld [vmem:[#allocation37_spill] sm:$0xff] }
 0x293   : > { %7092 = vmatprep.subr.bf16.mxu0 %v8259_v22 }
 0x294   : > { %v9343_v22 = vpop.f32.mrb[4].mxu1 }
 0x295   : > { %2677 = vmatmul.mubr.f32.gmra.mrb[2].mxu0 %v12279_v28 }
 0x296   : > { %7094 = vmatpush1.bf16.msra.mxu0 %v8261_v24  ;;  %2683 = vmatprep.mubr.f32.mxu0 %v12280_v6  ;;  %v9346_v24 = vpop.f32.mrb[5].mxu1 }
 0x297   : > { %7096 = vmatprep.subr.bf16.mxu0 %v8405_v17  ;;  %v12284_v17 = vld [vmem:[#allocation39_spill] sm:$0xff] }
 0x299   : > { %2685 = vmatmul.mubr.f32.gmra.mrb[4].mxu0 %v12281_v44 }
 0x29a   : > { %7098 = vmatpush1.bf16.msra.mxu0 %v8407_v41  ;;  %2691 = vmatprep.mubr.f32.mxu0 %v12282_v38 }
 0x29b   : > { %7100 = vmatprep.subr.bf16.mxu0 %v8467_v63  ;;  %v12287_v63 = vld [vmem:[#allocation23_spill] sm:$0xff] }
 0x29d   : > { %2693 = vmatmul.mubr.f32.gmra.mrb[6].mxu0 %v12283_v25 }
 0x29e   : > { %7102 = vmatpush1.bf16.msra.mxu0 %v8469_v34  ;;  %2699 = vmatprep.mubr.f32.mxu0 %v12284_v17  ;;  %v12289_v34 = vld [vmem:[#allocation27_spill] sm:$0xff] }
 0x29f   : > { %7104 = vmatprep.subr.bf16.mxu0 %v12139_v9  ;;  %v9351_v60 = vpop.f32.mrb[6].mxu1 }
 0x2a0   : > { %12285 = vst [vmem:[#allocation22_spill] sm:$0xff] %v9351_v60  ;;  %v9354_v41 = vpop.f32.mrb[7].mxu1 }
 0x2a1   : > { %2701 = vmatmul.mubr.f32.gmra.mrb[8].mxu0 %v12286_v43 }
 0x2a2   : > { %7106 = vmatpush1.bf16.msra.mxu0 %v12142_v50  ;;  %2707 = vmatprep.mubr.f32.mxu0 %v12287_v63 }
 0x2a3   : > { %7108 = vmatprep.subr.bf16.mxu0 %v8510_v42 }
 0x2a4   : > { %v9363_v9 = vpop.f32.mrb[8].mxu1 }
 0x2a5   : > { %2709 = vmatmul.mubr.f32.gmra.mrb[10].mxu0 %v12288_v1  ;;  %v9365_v19 = vpop.f32.mrb[9].mxu1 }
 0x2a6   : > { %7110 = vmatpush1.bf16.msra.mxu0 %v12147_v48  ;;  %2715 = vmatprep.mubr.f32.mxu0 %v12289_v34 }
 0x2a7   : > { %7112 = vmatprep.subr.bf16.mxu0 %v8546_v37  ;;  %v12292_v37 = vld [vmem:[#allocation54_spill] sm:$0xff] }
 0x2a8   : > { %v9371_v42 = vpop.f32.mrb[10].mxu1 }
 0x2a9   : > { %2717 = vmatmul.mubr.f32.gmra.mrb[12].mxu0 %v12290_v7  ;;  %12291 = vst [vmem:[#allocation42_spill] sm:$0xff] %v9371_v42  ;;  %v9373_v50 = vpop.f32.mrb[11].mxu1 }
 0x2aa   : > { %7114 = vmatpush1.bf16.msra.mxu0 %v8577_v10  ;;  %2723 = vmatprep.mubr.f32.mxu0 %v8811_v23  ;;  %v12295_v10 = vld [vmem:[#allocation45_spill] sm:$0xff]  ;;  %v12296_v23 = vld [vmem:[#allocation55_spill] sm:$0xff] }
 0x2ab   : > { %7116 = vmatprep.subr.bf16.mxu0 %v12152_v3  ;;  %v12297_v3 = vld [vmem:[#allocation41_spill] sm:$0xff] }
 0x2ac   : > { %v9379_v48 = vpop.f32.mrb[12].mxu1 }
 0x2ad   : > { %2725 = vmatmul.mubr.f32.gmra.mrb[14].mxu0 %v8826_v53  ;;  %12293 = vst [vmem:[#allocation43_spill] sm:$0xff] %v9379_v48  ;;  %v9381_v55 = vpop.f32.mrb[13].mxu1  ;;  %v12298_v53 = vld [vmem:[#allocation44_spill] sm:$0xff] }
 0x2ae   : > { %7118 = vmatpush1.bf16.msra.mxu0 %v8568_v46  ;;  %2731 = vmatprep.mubr.f32.mxu0 %v8838_v15  ;;  %12294 = vst [vmem:[#allocation25_spill] sm:$0xff] %v9381_v55  ;;  %v12299_v46 = vld [vmem:[#allocation28_spill] sm:$0xff] }
 0x2af   : > { %7120 = vmatprep.subr.bf16.mxu0 %v12292_v37 }
 0x2b0   : > { %v9386_v26 = vpop.f32.mrb[14].mxu1 }
 0x2b1   : > { %2733 = vmatmul.mubr.f32.gmra.mrb[16].mxu0 %v12295_v10  ;;  %v9388_v13 = vpop.f32.mrb[15].mxu1 }
 0x2b2   : > { %7122 = vmatpush1.bf16.msra.mxu0 %v12296_v23  ;;  %2739 = vmatprep.mubr.f32.mxu0 %v12297_v3  ;;  %v12315_v23 = vld [vmem:[#allocation86_spill] sm:$0xff] }
 0x2b4   : > { %v9392_v15 = vpop.f32.mrb[16].mxu1 }
 0x2b5   : > { %2741 = vmatmul.mubr.f32.gmra.mrb[18].mxu0 %v12298_v53  ;;  %v9394_v18 = vpop.f32.mrb[17].mxu1 }
 0x2b6   : > { %2747 = vmatprep.mubr.f32.mxu0 %v12299_v46 }
 0x2b8   : > { %v9398_v36 = vpop.f32.mrb[18].mxu1 }
 0x2b9   : > { %2749 = vmatmul.mubr.f32.gmra.mrb[20].mxu0 %v12300_v62  ;;  %v9400_v16 = vpop.f32.mrb[19].mxu1 }
 0x2ba   : > { %2755 = vmatprep.mubr.f32.mxu0 %v12301_v31 }
 0x2bc   : > { %v9404_v35 = vpop.f32.mrb[20].mxu1 }
 0x2bd   : > { %2757 = vmatmul.mubr.f32.gmra.mrb[22].mxu0 %v12302_v33  ;;  %v9406_v59 = vpop.f32.mrb[21].mxu1 }
 0x2be   : > { %2763 = vmatprep.mubr.f32.mxu0 %v12303_v27 }
 0x2c0   : > { %v9410_v52 = vpop.f32.mrb[22].mxu1 }
 0x2c1   : > { %2765 = vmatmul.mubr.f32.gmra.mrb[24].mxu0 %v12304_v39  ;;  %12306 = vst [vmem:[#allocation19_spill] sm:$0xff] %v9410_v52  ;;  %v9412_v49 = vpop.f32.mrb[23].mxu1 }
 0x2c2   : > { %2771 = vmatprep.mubr.f32.mxu0 %v12305_v5 }
 0x2c4   : > { %v9416_v51 = vpop.f32.mrb[24].mxu1 }
 0x2c5   : > { %2773 = vmatmul.mubr.f32.gmra.mrb[26].mxu0 %v12307_v4  ;;  %v9418_v61 = vpop.f32.mrb[25].mxu1 }
 0x2c6   : > { %2779 = vmatprep.mubr.f32.mxu0 %v12308_v0 }
 0x2c8   : > { %v9422_v54 = vpop.f32.mrb[26].mxu1 }
 0x2c9   : > { %2781 = vmatmul.mubr.f32.gmra.mrb[28].mxu0 %v12309_v21  ;;  %v9424_v30 = vpop.f32.mrb[27].mxu1 }
 0x2ca   : > { %2787 = vmatprep.mubr.f32.mxu0 %v12310_v2  ;;  %v1006_v2 = vpop.permute.xlu1 %1005 }
 0x2cc   : > { %v9428_v20 = vpop.f32.mrb[28].mxu1 }
 0x2cd   : > { %2789 = vmatmul.mubr.f32.gmra.mrb[30].mxu0 %v12311_v45  ;;  %v9430_v29 = vpop.f32.mrb[29].mxu1 }
 0x2ce   : > { %2795 = vmatprep.mubr.f32.mxu0 %v12312_v58  ;;  %v941_v45 = vpop.permute.xlu1 %940  ;;  %v1001_v58 = vpop.permute.xlu0 %1000 }
 0x2d0   : > { %v9434_v37 = vpop.f32.mrb[30].mxu1 }
 0x2d1   : > { %2797 = vmatmul.mubr.f32.gmra.mrb[32].mxu0 %v12313_v14  ;;  %v9436_v10 = vpop.f32.mrb[31].mxu1 }
 0x2d2   : > { %2803 = vmatprep.mubr.f32.mxu0 %v12314_v57  ;;  %v951_v14 = vpop.permute.xlu1 %950  ;;  %v9501_v57 = vpop.permute.xlu0 %945 }
 0x2d4   : > { %v9440_v3 = vpop.f32.mrb[32].mxu1 }
 0x2d5   : > { %2805 = vmatmul.mubr.f32.gmra.mrb[34].mxu0 %v12315_v23  ;;  %v9442_v53 = vpop.f32.mrb[33].mxu1 }
 0x2d6   : > { %2912 = vmatprep.mubr.f32.mxu0 %v12276_v32  ;;  %v961_v23 = vpop.permute.xlu1 %960 }
 0x2d8   : > { %v9446_v46 = vpop.f32.mrb[34].mxu1 }
 0x2d9   : > { %2914 = vmatmul.mubr.f32.vlgmr.msra.gmra.mrb[0].mxu0 %v12277_v47  ;;  %v9448_v62 = vpop.f32.mrb[35].mxu1 }
 0x2da   : > { %2920 = vmatprep.mubr.f32.mxu0 %v12278_v40  ;;  %12316 = vst [vmem:[#allocation30_spill] sm:$0xff] %v9448_v62  ;;  %v12338_v62 = vld [vmem:[#allocation15_spill] sm:$0xff] }
 0x2dc   : > { %v2971_v32 = vpop.f32.mrb[36].mxu1 }
 0x2dd   : > { %2922 = vmatmul.mubr.f32.gmra.mrb[2].mxu0 %v12279_v28  ;;  %v2973_v47 = vpop.f32.mrb[37].mxu1 }
 0x2de   : > { %2928 = vmatprep.mubr.f32.mxu0 %v12280_v6 }
 0x2e0   : > { %v9461_v40 = vpop.f32.mrb[38].mxu1 }
 0x2e1   : > { %2930 = vmatmul.mubr.f32.gmra.mrb[4].mxu0 %v12281_v44  ;;  %v9463_v28 = vpop.f32.mrb[39].mxu1 }
 0x2e2   : > { %2936 = vmatprep.mubr.f32.mxu0 %v12282_v38 }
 0x2e4   : > { %v9465_v6 = vpop.f32.mrb[40].mxu1 }
 0x2e5   : > { %2938 = vmatmul.mubr.f32.gmra.mrb[6].mxu0 %v12283_v25  ;;  %v9467_v44 = vpop.f32.mrb[41].mxu1 }
 0x2e6   : > { %2944 = vmatprep.mubr.f32.mxu0 %v12284_v17  ;;  %12317 = vst [vmem:[#allocation64_spill] sm:$0xff] %v9467_v44 }
 0x2e8   : > { %v9469_v38 = vpop.f32.mrb[42].mxu1 }
 0x2e9   : > { %2946 = vmatmul.mubr.f32.gmra.mrb[8].mxu0 %v12286_v43  ;;  %12318 = vst [vmem:[#allocation66_spill] sm:$0xff] %v9469_v38  ;;  %v9471_v25 = vpop.f32.mrb[43].mxu1 }
 0x2ea   : > { %2952 = vmatprep.mubr.f32.mxu0 %v12287_v63  ;;  %12319 = vst [vmem:[#allocation68_spill] sm:$0xff] %v9471_v25 }
 0x2ec   : > { %v9473_v17 = vpop.f32.mrb[44].mxu1 }
 0x2ed   : > { %2954 = vmatmul.mubr.f32.gmra.mrb[10].mxu0 %v12288_v1  ;;  %12320 = vst [vmem:[#allocation70_spill] sm:$0xff] %v9473_v17  ;;  %v9475_v43 = vpop.f32.mrb[45].mxu1 }
 0x2ee   : > { %2960 = vmatprep.mubr.f32.mxu0 %v12289_v34  ;;  %12321 = vst [vmem:[#allocation72_spill] sm:$0xff] %v9475_v43 }
 0x2f0   : > { %v9477_v63 = vpop.f32.mrb[46].mxu1 }
 0x2f1   : > { %2962 = vmatmul.mubr.f32.gmra.mrb[12].mxu0 %v12290_v7  ;;  %12322 = vst [vmem:[#allocation74_spill] sm:$0xff] %v9477_v63  ;;  %v9479_v1 = vpop.f32.mrb[47].mxu1  ;;  %v7890_v63 = vmov 1966171168  }
 0x2f2   : > { %12323 = vst [vmem:[#allocation76_spill] sm:$0xff] %v9479_v1  ;;  %v3163_v43 = vunpack.c.l.s4 %v7890_v63  ;;  %v9525_v63 = vadd.f32 %v9312_v8, %v941_v45  ;;  %v9543_v8 = vadd.f32 %v9343_v22, %v951_v14 }
 0x2f4   : > { %v9481_v34 = vpop.f32.mrb[48].mxu1  ;;  %v3164_v48 = vunpack.c.0.s8 %v3163_v43 }
 0x2f5   : > { %12324 = vst [vmem:[#allocation77_spill] sm:$0xff] %v9481_v34  ;;  %v9483_v7 = vpop.f32.mrb[49].mxu1 }
 0x2f6   : > { %12325 = vst [vmem:[#allocation80_spill] sm:$0xff] %v9483_v7 }
 0x2f8   : > { %v9485_v31 = vpop.f32.mrb[50].mxu1 }
 0x2f9   : > { %12326 = vst [vmem:[#allocation81_spill] sm:$0xff] %v9485_v31  ;;  %v9487_v33 = vpop.f32.mrb[51].mxu1 }
 0x2fa   : > { %12327 = vst [vmem:[#allocation20_spill] sm:$0xff] %v9487_v33  ;;  %v9503_v33 = vpop.permute.xlu0 %955 }
 0x2fc   : > { %v9489_v27 = vpop.f32.mrb[52].mxu1 }
 0x2fd   : > { %12328 = vst [vmem:[#allocation31_spill] sm:$0xff] %v9489_v27  ;;  %v9491_v39 = vpop.f32.mrb[53].mxu1  ;;  %v976_v27 = vpop.permute.xlu1 %975 }
 0x2fe   : > { %12329 = vst [vmem:[#allocation32_spill] sm:$0xff] %v9491_v39  ;;  %v9505_v31 = vpop.permute.xlu0 %965  ;;  %v1307_v25 = vadd.f32 %v9386_v26, %v976_v27  ;;  %v1309_v52 = vadd.f32 %v9388_v13, %v976_v27  ;;  %v9533_v26 = vadd.f32 %v9316_v11, %v941_v45  ;;  %v9537_v13 = vadd.f32 %v9338_v56, %v9501_v57 }
 0x2ff   : > { %v9553_v56 = vadd.f32 %v9363_v9, %v961_v23 }
 0x300   : > { %v9493_v5 = vpop.f32.mrb[54].mxu1 }
 0x301   : > { %12330 = vst [vmem:[#allocation46_spill] sm:$0xff] %v9493_v5  ;;  %v9495_v4 = vpop.f32.mrb[55].mxu1  ;;  %v981_v39 = vpop.permute.xlu1 %980 }
 0x302   : > { %12331 = vst [vmem:[#allocation47_spill] sm:$0xff] %v9495_v4  ;;  %v9507_v5 = vpop.permute.xlu0 %970 }
 0x303   : > { %12334 = vst [vmem:[#allocation33_spill] sm:$0xff] %v9507_v5 }
 0x304   : > { %v9497_v0 = vpop.f32.mrb[56].mxu1 }
 0x305   : > { %12332 = vst [vmem:[#allocation48_spill] sm:$0xff] %v9497_v0  ;;  %v9499_v21 = vpop.f32.mrb[57].mxu1  ;;  %v991_v4 = vpop.permute.xlu1 %990 }
 0x306   : > { %12333 = vst [vmem:[#allocation49_spill] sm:$0xff] %v9499_v21  ;;  %v986_v7 = vpop.permute.xlu0 %985 }
 0x309   : > { %v1011_v0 = vpop.permute.xlu1 %1010 }
 0x30a   : > { %v9509_v34 = vpop.permute.xlu0 %995 }
 0x30b   : > { %v1373_v9 = vadd.f32 %v9412_v49, %v9509_v34  ;;  %v9581_v49 = vadd.f32 %v9428_v20, %v1011_v0 }
 0x30d   : > { %v9511_v21 = vpop.permute.xlu1 %4272 }
 0x30e   : > { %12335 = vst [vmem:[#allocation34_spill] sm:$0xff] %v9511_v21  ;;  %v1016_v1 = vpop.permute.xlu0 %1015  ;;  %v9522_v21 = vsub.s32 %v3164_v48, %v12338_v62 }
 0x311   : > { %v9513_v17 = vpop.permute.xlu1 %5000 }
 0x312   : > { %12336 = vst [vmem:[#allocation50_spill] sm:$0xff] %v9513_v17  ;;  %v9515_v55 = vpop.permute.xlu0 %4327  ;;  %v1323_v17 = vadd.f32 %v9392_v15, %v981_v39  ;;  %v9546_v15 = vadd.f32 %v9346_v24, %v951_v14  ;;  %v1341_v24 = vadd.f32 %v9400_v16, %v986_v7  ;;  %v9575_v16 = vadd.f32 %v9422_v54, %v1006_v2 }
 0x313   : > { %12337 = vst [vmem:[#allocation51_spill] sm:$0xff] %v9515_v55 }
 0x315   : > { %v9519_v60 = vpop.xlane.xlu1 %368 }
 0x316   : > { %v9528_v55 = vpop.xlane.xlu0 %365 }
 0x319   : > { %v1021_v27 = vpop.permute.xlu1 %1020 }
 0x31a   : > { %v9593_v54 = vadd.f32 %v9440_v3, %v1021_v27  ;;  %v9601_v20 = vadd.f32 %v9442_v53, %v1021_v27  ;;  %v12350_v27 = vld [vmem:[#allocation33_spill] sm:$0xff] }
 0x380   : > { %v2726_v5 = vpop.f32.mrb[14].mxu0 }
 0x381   : > { %v7386_v38 = vadd.f32 %v2726_v5, %v1307_v25  ;;  %v2728_v42 = vpop.f32.mrb[15].mxu0  ;;  %v1339_v25 = vadd.f32 %v9398_v36, %v986_v7  ;;  %v9572_v5 = vadd.f32 %v9418_v61, %v1001_v58  ;;  %v1026_v36 = vpop.permute.xlu0 %1025  ;;  %v9590_v7 = vadd.f32 %v9436_v10, %v1016_v1  ;;  %v12340_v10 = vld [vmem:[#allocation64_spill] sm:$0xff] }
 0x382   : > { %v7389_v44 = vadd.f32 %v2728_v42, %v1309_v52  ;;  %v1325_v42 = vadd.f32 %v9394_v18, %v981_v39  ;;  %v9556_v18 = vadd.f32 %v9365_v19, %v961_v23  ;;  %v1387_v19 = vadd.f32 %v9416_v51, %v1001_v58  ;;  %v12346_v23 = vld [vmem:[#allocation42_spill] sm:$0xff] }
 0x383   : > { %v9530_v43 = vadd.f32 %v7386_v38, %v2971_v32  ;;  %v9550_v32 = vadd.f32 %v9354_v41, %v9503_v33  ;;  %v9584_v51 = vadd.f32 %v9430_v29, %v1011_v0  ;;  %v9604_v29 = vadd.f32 %v9446_v46, %v1026_v36 }
 0x384   : > { %v9540_v48 = vadd.f32 %v7389_v44, %v2973_v47  ;;  %v2734_v52 = vpop.f32.mrb[16].mxu0  ;;  %v9560_v47 = vadd.f32 %v9373_v50, %v9505_v31  ;;  %v1355_v44 = vadd.f32 %v9404_v35, %v991_v4  ;;  %v9578_v35 = vadd.f32 %v9424_v30, %v1006_v2 }
 0x385   : > { %v7392_v11 = vadd.f32 %v2734_v52, %v1323_v17  ;;  %v2736_v38 = vpop.f32.mrb[17].mxu0  ;;  %v1357_v17 = vadd.f32 %v9406_v59, %v991_v4  ;;  %v9598_v4 = vadd.f32 %v9335_v12, %v9501_v57  ;;  %v12343_v12 = vld [vmem:[#allocation22_spill] sm:$0xff] }
 0x386   : > { %v7395_v22 = vadd.f32 %v2736_v38, %v1325_v42  ;;  %v9616_v14 = vadd.f32 %v12343_v12, %v9503_v33  ;;  %v9624_v42 = vadd.f32 %v12346_v23, %v9505_v31  ;;  %v12347_v38 = vld [vmem:[#allocation66_spill] sm:$0xff]  ;;  %v12348_v33 = vld [vmem:[#allocation19_spill] sm:$0xff] }
 0x387   : > { %v7393_v41 = vadd.f32 %v7392_v11, %v9461_v40 }
 0x388   : > { %v7396_v50 = vadd.f32 %v7395_v22, %v9463_v28  ;;  %v2742_v39 = vpop.f32.mrb[18].mxu0  ;;  %v9587_v28 = vadd.f32 %v9434_v37, %v1016_v1  ;;  %v12339_v37 = vld [vmem:[#allocation30_spill] sm:$0xff] }
 0x389   : > { %v7398_v59 = vadd.f32 %v2742_v39, %v1339_v25  ;;  %v2744_v40 = vpop.f32.mrb[19].mxu0  ;;  %v9607_v0 = vadd.f32 %v12339_v37, %v1026_v36  ;;  %v9610_v3 = vmax.f32 %v7393_v41, 0.0  ;;  %v12349_v25 = vld [vmem:[#allocation68_spill] sm:$0xff]  ;;  %v9647_v37 = vmax.f32 %v9530_v43, 0.0 }
 0x38a   : > { %v7401_v61 = vadd.f32 %v2744_v40, %v1341_v24  ;;  %v9618_v53 = vmax.f32 %v7396_v50, 0.0  ;;  %v1371_v24 = vadd.f32 %v12348_v33, %v9509_v34  ;;  %v12351_v50 = vld [vmem:[#allocation43_spill] sm:$0xff] }
 0x38b   : > { %v7399_v30 = vadd.f32 %v7398_v59, %v9465_v6  ;;  %12341 = vst [vmem:[#allocation52_spill] sm:$0xff] %v9610_v3  ;;  %v9640_v39 = vadd.f32 %v12351_v50, %v12350_v27  ;;  %12353 = vst [vmem:[#allocation56_spill] sm:$0xff] %v9647_v37 }
 0x38c   : > { %v7402_v1 = vadd.f32 %v7401_v61, %v12340_v10  ;;  %v2750_v2 = vpop.f32.mrb[20].mxu0  ;;  %12344 = vst [vmem:[#allocation35_spill] sm:$0xff] %v9618_v53 }
 0x38d   : > { %v9612_v45 = vmax.f32 %v7399_v30, 0.0  ;;  %v7404_v6 = vadd.f32 %v2750_v2, %v1355_v44  ;;  %v2752_v58 = vpop.f32.mrb[21].mxu0  ;;  %v12352_v30 = vld [vmem:[#allocation25_spill] sm:$0xff] }
 0x38e   : > { %v9620_v46 = vmax.f32 %v7402_v1, 0.0  ;;  %v7407_v57 = vadd.f32 %v2752_v58, %v1357_v17  ;;  %v9644_v34 = vadd.f32 %v12352_v30, %v12350_v27 }
 0x38f   : > { %12342 = vst [vmem:[#allocation53_spill] sm:$0xff] %v9612_v45  ;;  %v3484_v52 = vmax.f32 %v9610_v3, %v9612_v45  ;;  %v3523_v11 = vadd.f32 %v9612_v45, %v9610_v3  ;;  %v7405_v22 = vadd.f32 %v7404_v6, %v12347_v38 }
 0x390   : > { %12345 = vst [vmem:[#allocation36_spill] sm:$0xff] %v9620_v46  ;;  %v3491_v44 = vmax.f32 %v9618_v53, %v9620_v46  ;;  %v3530_v41 = vadd.f32 %v9620_v46, %v9618_v53  ;;  %v7408_v31 = vadd.f32 %v7407_v57, %v12349_v25  ;;  %v2758_v17 = vpop.f32.mrb[22].mxu0  ;;  %v12355_v57 = vld [vmem:[#allocation70_spill] sm:$0xff]  ;;  %v12357_v25 = vld [vmem:[#allocation72_spill] sm:$0xff] }
 0x391   : > { %v3485_v36 = vrot.slane %v3484_v52, 4  ;;  %v3524_v59 = vrot.slane %v3523_v11, 4  ;;  %v7410_v40 = vadd.f32 %v2758_v17, %v1371_v24  ;;  %v2760_v61 = vpop.f32.mrb[23].mxu0  ;;  %v9649_v12 = vmax.f32 %v7405_v22, 0.0 }
 0x392   : > { %v3492_v10 = vrot.slane %v3491_v44, 4  ;;  %v3531_v1 = vrot.slane %v3530_v41, 4  ;;  %v7413_v2 = vadd.f32 %v2760_v61, %v1373_v9  ;;  %v9652_v24 = vmax.f32 %v7408_v31, 0.0 }
 0x393   : > { %v3486_v6 = vmax.f32 %v3484_v52, %v3485_v36  ;;  %v3525_v58 = vadd.f32 %v3524_v59, %v3523_v11  ;;  %12354 = vst [vmem:[#allocation57_spill] sm:$0xff] %v9649_v12  ;;  %v7411_v23 = vadd.f32 %v7410_v40, %v12355_v57  ;;  %v9669_v59 = vmax.f32 %v9540_v48, 0.0 }
 0x394   : > { %v3493_v38 = vmax.f32 %v3491_v44, %v3492_v10  ;;  %v3532_v33 = vadd.f32 %v3531_v1, %v3530_v41  ;;  %12356 = vst [vmem:[#allocation18_spill] sm:$0xff] %v9652_v24  ;;  %v7414_v17 = vadd.f32 %v7413_v2, %v12357_v25  ;;  %v2766_v27 = vpop.f32.mrb[24].mxu0 }
 0x395   : > { %v3487_v50 = vrot.slane %v3486_v6, 2  ;;  %v3526_v30 = vrot.slane %v3525_v58, 2  ;;  %v9655_v43 = vmax.f32 %v7411_v23, 0.0  ;;  %v7416_v45 = vadd.f32 %v2766_v27, %v1387_v19  ;;  %v2768_v46 = vpop.f32.mrb[25].mxu0  ;;  %12360 = vst [vmem:[#allocation58_spill] sm:$0xff] %v9669_v59 }
 0x396   : > { %v3494_v9 = vrot.slane %v3493_v38, 2  ;;  %v3533_v52 = vrot.slane %v3532_v33, 2  ;;  %v9657_v11 = vmax.f32 %v7414_v17, 0.0  ;;  %v7419_v22 = vadd.f32 %v2768_v46, %v9572_v5  ;;  %v12361_v17 = vld [vmem:[#allocation74_spill] sm:$0xff] }
 0x397   : > { %12358 = vst [vmem:[#allocation21_spill] sm:$0xff] %v9655_v43  ;;  %v9660_v36 = vmax.f32 %v3486_v6, %v3487_v50  ;;  %v9662_v44 = vadd.f32 %v3526_v30, %v3525_v58  ;;  %v3568_v41 = vmax.f32 %v9649_v12, %v9655_v43  ;;  %v3607_v31 = vadd.f32 %v9655_v43, %v9649_v12  ;;  %v12362_v50 = vld [vmem:[#allocation76_spill] sm:$0xff] }
 0x398   : > { %12359 = vst [vmem:[#allocation38_spill] sm:$0xff] %v9657_v11  ;;  %v9671_v19 = vmax.f32 %v3493_v38, %v3494_v9  ;;  %v3575_v40 = vmax.f32 %v9652_v24, %v9657_v11  ;;  %v3614_v5 = vadd.f32 %v9657_v11, %v9652_v24  ;;  %v2774_v46 = vpop.f32.mrb[26].mxu0  ;;  %v9678_v10 = vadd.f32 %v3533_v52, %v3532_v33 }
 0x399   : > { %v3489_v61 = vrot.slane %v9660_v36, 1  ;;  %v3569_v1 = vrot.slane %v3568_v41, 4  ;;  %v3608_v2 = vrot.slane %v3607_v31, 4  ;;  %v2776_v6 = vpop.f32.mrb[27].mxu0  ;;  %v7417_v27 = vadd.f32 %v7416_v45, %v12361_v17 }
 0x39a   : > { %v3496_v48 = vrot.slane %v9671_v19, 1  ;;  %v3576_v57 = vrot.slane %v3575_v40, 4  ;;  %v3615_v23 = vrot.slane %v3614_v5, 4  ;;  %v7420_v30 = vadd.f32 %v7419_v22, %v12362_v50 }
 0x39b   : > { %v3570_v38 = vmax.f32 %v3568_v41, %v3569_v1  ;;  %v3609_v25 = vadd.f32 %v3608_v2, %v3607_v31  ;;  %v7422_v33 = vadd.f32 %v2774_v46, %v9575_v16  ;;  %v7425_v52 = vadd.f32 %v2776_v6, %v9578_v35  ;;  %v12364_v1 = vld [vmem:[#allocation77_spill] sm:$0xff]  ;;  %v12365_v2 = vld [vmem:[#allocation80_spill] sm:$0xff] }
 0x39c   : > { %v3577_v9 = vmax.f32 %v3575_v40, %v3576_v57  ;;  %v3616_v43 = vadd.f32 %v3615_v23, %v3614_v5  ;;  %v2782_v11 = vpop.f32.mrb[28].mxu0  ;;  %v9687_v3 = vmax.f32 %v7417_v27, 0.0  ;;  %v9699_v6 = vmax.f32 %v7420_v30, 0.0 }
 0x39d   : > { %v3571_v58 = vrot.slane %v3570_v38, 2  ;;  %v3610_v24 = vrot.slane %v3609_v25, 2  ;;  %v2784_v53 = vpop.f32.mrb[29].mxu0  ;;  %v7423_v45 = vadd.f32 %v7422_v33, %v12364_v1  ;;  %v7426_v22 = vadd.f32 %v7425_v52, %v12365_v2 }
 0x39e   : > { %12363 = vst [vmem:[#allocation59_spill] sm:$0xff] %v9687_v3  ;;  %v3578_v41 = vrot.slane %v3577_v9, 2  ;;  %v3617_v31 = vrot.slane %v3616_v43, 2  ;;  %v7428_v16 = vadd.f32 %v2782_v11, %v9581_v49  ;;  %v7431_v35 = vadd.f32 %v2784_v53, %v9584_v51  ;;  %12366 = vst [vmem:[#allocation60_spill] sm:$0xff] %v9699_v6 }
 0x39f   : > { %v9691_v40 = vmax.f32 %v3570_v38, %v3571_v58  ;;  %v9693_v5 = vadd.f32 %v3610_v24, %v3609_v25  ;;  %v9701_v57 = vmax.f32 %v7423_v45, 0.0  ;;  %v9703_v23 = vmax.f32 %v7426_v22, 0.0  ;;  %v12369_v58 = vld [vmem:[#allocation81_spill] sm:$0xff]  ;;  %v12370_v38 = vld [vmem:[#allocation20_spill] sm:$0xff] }
 0x3a0   : > { %v9697_v46 = vmax.f32 %v3577_v9, %v3578_v41  ;;  %v2790_v17 = vpop.f32.mrb[30].mxu0  ;;  %v9706_v50 = vadd.f32 %v3617_v31, %v3616_v43  ;;  %v7429_v24 = vadd.f32 %v7428_v16, %v12369_v58  ;;  %v7432_v25 = vadd.f32 %v7431_v35, %v12370_v38 }
 0x3a1   : > { %12367 = vst [vmem:[#allocation61_spill] sm:$0xff] %v9701_v57  ;;  %12368 = vst [vmem:[#allocation37_spill] sm:$0xff] %v9703_v23  ;;  %v2792_v49 = vpop.f32.mrb[31].mxu0  ;;  %v3652_v11 = vmax.f32 %v9687_v3, %v9701_v57  ;;  %v3691_v30 = vadd.f32 %v9701_v57, %v9687_v3  ;;  %v3659_v9 = vmax.f32 %v9699_v6, %v9703_v23 }
 0x3a2   : > { %v3698_v43 = vadd.f32 %v9703_v23, %v9699_v6  ;;  %v9720_v33 = vmax.f32 %v7429_v24, 0.0  ;;  %v9722_v52 = vmax.f32 %v7432_v25, 0.0  ;;  %v7434_v1 = vadd.f32 %v2790_v17, %v9587_v28  ;;  %v12373_v24 = vld [vmem:[#allocation31_spill] sm:$0xff]  ;;  %v12374_v25 = vld [vmem:[#allocation32_spill] sm:$0xff] }
 0x3a3   : > { %v3653_v41 = vrot.slane %v3652_v11, 4  ;;  %v3692_v31 = vrot.slane %v3691_v30, 4  ;;  %v7437_v45 = vadd.f32 %v2792_v49, %v9590_v7  ;;  %v3660_v22 = vrot.slane %v3659_v9, 4 }
 0x3a4   : > { %12371 = vst [vmem:[#allocation62_spill] sm:$0xff] %v9720_v33  ;;  %12372 = vst [vmem:[#allocation39_spill] sm:$0xff] %v9722_v52  ;;  %v2798_v2 = vpop.f32.mrb[32].mxu0  ;;  %v3699_v16 = vrot.slane %v3698_v43, 4  ;;  %v3490_v58 = vmax.f32 %v9660_v36, %v3489_v61  ;;  %v7435_v27 = vadd.f32 %v7434_v1, %v12373_v24  ;;  %v3497_v28 = vmax.f32 %v9671_v19, %v3496_v48 }
 0x3a5   : > { %v7440_v35 = vadd.f32 %v2798_v2, %v9593_v54  ;;  %v2800_v38 = vpop.f32.mrb[33].mxu0  ;;  %v3654_v51 = vmax.f32 %v3652_v11, %v3653_v41  ;;  %v3693_v53 = vadd.f32 %v3692_v31, %v3691_v30  ;;  %v7438_v12 = vadd.f32 %v7437_v45, %v12374_v25  ;;  %v12377_v41 = vld [vmem:[#allocation46_spill] sm:$0xff] }
 0x3a6   : > { %v3661_v57 = vmax.f32 %v3659_v9, %v3660_v22  ;;  %v3700_v23 = vadd.f32 %v3699_v16, %v3698_v43  ;;  %v7443_v7 = vadd.f32 %v2800_v38, %v9601_v20  ;;  %v9732_v3 = vmax.f32 %v7435_v27, 0.0 }
 0x3a7   : > { %v3655_v17 = vrot.slane %v3654_v51, 2  ;;  %v3694_v49 = vrot.slane %v3693_v53, 2  ;;  %v9734_v54 = vmax.f32 %v7438_v12, 0.0  ;;  %v3500_v30 = vcombine.low %v3490_v58, %v3497_v28 }
 0x3a8   : > { %12375 = vst [vmem:[#allocation26_spill] sm:$0xff] %v9732_v3  ;;  %v2806_v36 = vpop.f32.mrb[34].mxu0  ;;  %v3662_v61 = vrot.slane %v3661_v57, 2  ;;  %v3701_v11 = vrot.slane %v3700_v23, 2  ;;  %v7441_v31 = vadd.f32 %v7440_v35, %v12377_v41  ;;  %v3736_v20 = vmax.f32 %v9720_v33, %v9732_v3 }
 0x3a9   : > { %12376 = vst [vmem:[#allocation23_spill] sm:$0xff] %v9734_v54  ;;  %v2808_v1 = vpop.f32.mrb[35].mxu0  ;;  %v9737_v45 = vmax.f32 %v3654_v51, %v3655_v17  ;;  %v9739_v9 = vadd.f32 %v3694_v49, %v3693_v53  ;;  %v3775_v19 = vadd.f32 %v9732_v3, %v9720_v33  ;;  %v3743_v27 = vmax.f32 %v9722_v52, %v9734_v54  ;;  %v12380_v33 = vld [vmem:[#allocation47_spill] sm:$0xff] }
 0x3aa   : > { %v9745_v48 = vmax.f32 %v3661_v57, %v3662_v61  ;;  %v9747_v12 = vadd.f32 %v3701_v11, %v3700_v23  ;;  %v3782_v43 = vadd.f32 %v9734_v54, %v9722_v52  ;;  %v3619_v51 = vrot.slane %v9706_v50, 1 }
 0x3ab   : > { %v3737_v2 = vrot.slane %v3736_v20, 4  ;;  %v3776_v22 = vrot.slane %v3775_v19, 4  ;;  %v3744_v58 = vrot.slane %v3743_v27, 4  ;;  %v3507_v17 = vrot.slane %v3500_v30, %v9522_v21 }
 0x3ac   : > { %v2915_v16 = vpop.f32.mrb[0].mxu0  ;;  %v3783_v23 = vrot.slane %v3782_v43, 4  ;;  %v12378_v11 = vrot.slane %v9662_v44, 1  ;;  %v12379_v35 = vrot.slane %v9678_v10, 1  ;;  %v7444_v24 = vadd.f32 %v7443_v7, %v12380_v33 }
 0x3ad   : > { %v2917_v38 = vpop.f32.mrb[1].mxu0  ;;  %v3738_v25 = vmax.f32 %v3736_v20, %v3737_v2  ;;  %v3777_v28 = vadd.f32 %v3776_v22, %v3775_v19  ;;  %v3745_v49 = vmax.f32 %v3743_v27, %v3744_v58  ;;  %v3514_v54 = vrot.slane %v3507_v17, %v9522_v21 }
 0x3ae   : > { %v3784_v61 = vadd.f32 %v3783_v23, %v3782_v43  ;;  %v3529_v41 = vadd.f32 %v12378_v11, %v9662_v44  ;;  %v3536_v53 = vadd.f32 %v12379_v35, %v9678_v10  ;;  %v9772_v44 = vmax.f32 %v7441_v31, 0.0 }
 0x3af   : > { %v3739_v57 = vrot.slane %v3738_v25, 2  ;;  %v3778_v3 = vrot.slane %v3777_v28, 2  ;;  %v3746_v19 = vrot.slane %v3745_v49, 2  ;;  %3515 = vrot.lane.b32.xlu1 %v3514_v54, %s12381_s26  ;;  %v7446_v10 = vadd.f32 %v2806_v36, %v9604_v29 }
 0x3b0   : > { %v2923_v20 = vpop.f32.mrb[2].mxu0  ;;  %v3785_v2 = vrot.slane %v3784_v61, 2  ;;  %v3537_v30 = vmul.f32 0.0625, %v3529_v41  ;;  %v3538_v27 = vmul.f32 0.0625, %v3536_v53  ;;  %12382 = vst [vmem:[#allocation40_spill] sm:$0xff] %v9772_v44  ;;  %v9777_v33 = vmax.f32 %v7444_v24, 0.0 }
 0x3b1   : > { %v2925_v43 = vpop.f32.mrb[3].mxu0  ;;  %v9767_v22 = vmax.f32 %v3738_v25, %v3739_v57  ;;  %v9769_v58 = vadd.f32 %v3778_v3, %v3777_v28  ;;  %v9775_v35 = vmax.f32 %v3745_v49, %v3746_v19  ;;  %v7449_v7 = vadd.f32 %v2808_v1, %v9607_v0  ;;  %v12384_v57 = vld [vmem:[#allocation48_spill] sm:$0xff]  ;;  %v12385_v28 = vld [vmem:[#allocation49_spill] sm:$0xff] }
 0x3b2   : > { %v3541_v23 = vcombine.low %v3537_v30, %v3538_v27  ;;  %12383 = vst [vmem:[#allocation27_spill] sm:$0xff] %v9777_v33  ;;  %v9781_v17 = vadd.f32 %v3785_v2, %v3784_v61  ;;  %v7447_v3 = vadd.f32 %v7446_v10, %v12384_v57  ;;  %v7358_v25 = vadd.f32 %v2915_v16, %v9525_v63 }
 0x3b3   : > { %v7450_v24 = vadd.f32 %v7449_v7, %v12385_v28  ;;  %v12388_v61 = vrot.slane %v9691_v40, 1  ;;  %v12389_v63 = vrot.slane %v9697_v46, 1  ;;  %v7360_v2 = vadd.f32 %v2917_v38, %v9533_v26 }
 0x3b4   : > { %v2931_v54 = vpop.f32.mrb[4].mxu0  ;;  %v3548_v36 = vrot.slane %v3541_v23, %v9522_v21  ;;  %v9791_v0 = vmax.f32 %v7447_v3, 0.0  ;;  %v9793_v1 = vmax.f32 %v7358_v25, 0.0  ;;  %v12391_v30 = vrot.slane %v9693_v5, 1 }
 0x3b5   : > { %v9789_v49 = vpop.f32.mrb[5].mxu0  ;;  %v3574_v11 = vmax.f32 %v9691_v40, %v12388_v61  ;;  %v3581_v16 = vmax.f32 %v9697_v46, %v12389_v63  ;;  %v9802_v19 = vmax.f32 %v7450_v24, 0.0  ;;  %v3620_v7 = vadd.f32 %v3619_v51, %v9706_v50 }
 0x3b6   : > { %12386 = vst [vmem:[#allocation24_spill] sm:$0xff] %v9791_v0  ;;  %12387 = vst [vmem:[#allocation54_spill] sm:$0xff] %v9793_v1  ;;  %v3555_v41 = vrot.slane %v3548_v36, %v9522_v21  ;;  %v3613_v27 = vadd.f32 %v12391_v30, %v9693_v5  ;;  %v3820_v10 = vmax.f32 %v9772_v44, %v9791_v0  ;;  %v9820_v5 = vmax.f32 %v7360_v2, 0.0 }
 0x3b7   : > { %12390 = vst [vmem:[#allocation45_spill] sm:$0xff] %v9802_v19  ;;  %v3859_v40 = vadd.f32 %v9791_v0, %v9772_v44  ;;  %v3584_v23 = vcombine.low %v3574_v11, %v3581_v16  ;;  %v3827_v26 = vmax.f32 %v9777_v33, %v9802_v19  ;;  %v3866_v38 = vadd.f32 %v9802_v19, %v9777_v33 }
 0x3b8   : > { %v9813_v46 = vpop.f32.mrb[6].mxu0  ;;  %3556 = vrot.lane.b32.xlu0 %v3555_v41, %s12381_s26  ;;  %12392 = vst [vmem:[#allocation55_spill] sm:$0xff] %v9820_v5  ;;  %v3621_v57 = vmul.f32 0.0625, %v3613_v27  ;;  %v3821_v25 = vrot.slane %v3820_v10, 4  ;;  %v3622_v50 = vmul.f32 0.0625, %v3620_v7  ;;  %v7362_v61 = vadd.f32 %v2923_v20, %v9598_v4 }
 0x3b9   : > { %v9822_v3 = vpop.f32.mrb[7].mxu0  ;;  %v3860_v36 = vrot.slane %v3859_v40, 4  ;;  %v3591_v28 = vrot.slane %v3584_v23, %v9522_v21  ;;  %v3828_v51 = vrot.slane %v3827_v26, 4  ;;  %v3867_v24 = vrot.slane %v3866_v38, 4 }
 0x3ba   : > { %v7364_v11 = vadd.f32 %v2925_v43, %v9537_v13  ;;  %v3822_v63 = vmax.f32 %v3820_v10, %v3821_v25  ;;  %v3625_v2 = vcombine.low %v3621_v57, %v3622_v50  ;;  %v9830_v29 = vmax.f32 %v7362_v61, 0.0 }
 0x3bb   : > { %v3861_v16 = vadd.f32 %v3860_v36, %v3859_v40  ;;  %v3598_v41 = vrot.slane %v3591_v28, %v9522_v21  ;;  %v3829_v27 = vmax.f32 %v3827_v26, %v3828_v51  ;;  %v3868_v31 = vadd.f32 %v3867_v24, %v3866_v38 }
 0x3bc   : > { %v9828_v30 = vpop.f32.mrb[8].mxu0  ;;  %12393 = vst [vmem:[#allocation41_spill] sm:$0xff] %v9830_v29  ;;  %v9832_v53 = vmax.f32 %v7364_v11, 0.0  ;;  %v3823_v7 = vrot.slane %v3822_v63, 2  ;;  %v3632_v13 = vrot.slane %v3625_v2, %v9522_v21  ;;  %v7366_v4 = vadd.f32 %v2931_v54, %v9543_v8 }
 0x3bd   : > { %v9834_v23 = vpop.f32.mrb[9].mxu0  ;;  %v3862_v0 = vrot.slane %v3861_v16, 2  ;;  %3599 = vrot.lane.b32.xlu0 %v3598_v41, %s12381_s26  ;;  %v3830_v20 = vrot.slane %v3829_v27, 2  ;;  %v3869_v43 = vrot.slane %v3868_v31, 2  ;;  %v3145_v10 = vmax.f32 %v9793_v1, %v9830_v29 }
 0x3be   : > { %12394 = vst [vmem:[#allocation44_spill] sm:$0xff] %v9832_v53  ;;  %v3187_v40 = vadd.f32 %v9830_v29, %v9793_v1  ;;  %v9843_v26 = vmax.f32 %v3822_v63, %v3823_v7  ;;  %v3639_v57 = vrot.slane %v3632_v13, %v9522_v21  ;;  %v3152_v25 = vmax.f32 %v9820_v5, %v9832_v53 }
 0x3bf   : > { %v9845_v38 = vadd.f32 %v3862_v0, %v3861_v16  ;;  %v9852_v8 = vmax.f32 %v3829_v27, %v3830_v20  ;;  %v9854_v54 = vadd.f32 %v3869_v43, %v3868_v31  ;;  %v3146_v28 = vrot.slane %v3145_v10, 4 }
 0x3c0   : > { %v9850_v36 = vpop.f32.mrb[10].mxu0  ;;  %v3188_v50 = vrot.slane %v3187_v40, 4  ;;  %3640 = vrot.lane.b32.xlu1 %v3639_v57, %s12381_s26  ;;  %v3153_v61 = vrot.slane %v3152_v25, 4  ;;  %v3194_v11 = vadd.f32 %v9832_v53, %v9820_v5  ;;  %v12395_v13 = vrot.slane %v9737_v45, 1 }
 0x3c1   : > { %v9856_v51 = vpop.f32.mrb[11].mxu0  ;;  %v3147_v31 = vmax.f32 %v3145_v10, %v3146_v28  ;;  %v12396_v24 = vrot.slane %v9745_v48, 1  ;;  %v7368_v10 = vadd.f32 %v9789_v49, %v9546_v15  ;;  %v9886_v19 = vmax.f32 %v7366_v4, 0.0 }
 0x3c2   : > { %v3189_v41 = vadd.f32 %v3188_v50, %v3187_v40  ;;  %v3154_v27 = vmax.f32 %v3152_v25, %v3153_v61  ;;  %v3195_v7 = vrot.slane %v3194_v11, 4  ;;  %v3658_v20 = vmax.f32 %v9737_v45, %v12395_v13 }
 0x3c3   : > { %v3148_v57 = vrot.slane %v3147_v31, 2  ;;  %v3665_v63 = vmax.f32 %v9745_v48, %v12396_v24  ;;  %v12397_v50 = vrot.slane %v9739_v9, 1  ;;  %v12398_v45 = vrot.slane %v9747_v12, 1  ;;  %12399 = vst [vmem:[#allocation28_spill] sm:$0xff] %v9886_v19 }
 0x3c4   : > { %v9869_v43 = vpop.f32.mrb[12].mxu0  ;;  %v3190_v0 = vrot.slane %v3189_v41, 2  ;;  %v3155_v28 = vrot.slane %v3154_v27, 2  ;;  %v3196_v25 = vadd.f32 %v3195_v7, %v3194_v11  ;;  %v9889_v7 = vmax.f32 %v7368_v10, 0.0 }
 0x3c5   : > { %v9876_v40 = vpop.f32.mrb[13].mxu0  ;;  %v3697_v61 = vadd.f32 %v12397_v50, %v9739_v9  ;;  %v3704_v13 = vadd.f32 %v12398_v45, %v9747_v12  ;;  %v3149_v2 = vmax.f32 %v3147_v31, %v3148_v57  ;;  %v3668_v48 = vcombine.low %v3658_v20, %v3665_v63 }
 0x3c6   : > { %v9884_v16 = vadd.f32 %v3190_v0, %v3189_v41  ;;  %v3156_v24 = vmax.f32 %v3154_v27, %v3155_v28  ;;  %v3197_v15 = vrot.slane %v3196_v25, 2  ;;  %12400 = vst [vmem:[#allocation29_spill] sm:$0xff] %v9889_v7  ;;  %v7370_v9 = vadd.f32 %v9813_v46, %v9616_v14 }
 0x3c7   : > { %v3705_v49 = vmul.f32 0.0625, %v3697_v61  ;;  %v3706_v44 = vmul.f32 0.0625, %v3704_v13  ;;  %v3150_v33 = vrot.slane %v3149_v2, 1  ;;  %v3675_v11 = vrot.slane %v3668_v48, %v9522_v21 }
 0x3c8   : > { %v3192_v12 = vrot.slane %v9884_v16, 1  ;;  %v3157_v31 = vrot.slane %v3156_v24, 1  ;;  %v7372_v4 = vadd.f32 %v9822_v3, %v9550_v32  ;;  %v9896_v63 = vadd.f32 %v3197_v15, %v3196_v25 }
 0x3c9   : > { %v3709_v0 = vcombine.low %v3705_v49, %v3706_v44  ;;  %v3682_v41 = vrot.slane %v3675_v11, %v9522_v21  ;;  %v9899_v27 = vmax.f32 %v7370_v9, 0.0  ;;  %v7374_v20 = vadd.f32 %v9828_v30, %v9553_v56 }
 0x3ca   : > { %v9903_v57 = vmax.f32 %v3149_v2, %v3150_v33  ;;  %v9905_v10 = vmax.f32 %v3156_v24, %v3157_v31  ;;  %v9908_v46 = vmax.f32 %v7372_v4, 0.0  ;;  %v12404_v56 = vrot.slane %v9767_v22, 1 }
 0x3cb   : > { %12401 = vst [vmem:[#allocation63_spill] sm:$0xff] %v9899_v27  ;;  %v3716_v14 = vrot.slane %v3709_v0, %v9522_v21  ;;  %3683 = vrot.lane.b32.xlu1 %v3682_v41, %s12381_s26  ;;  %v3232_v32 = vmax.f32 %v9886_v19, %v9899_v27  ;;  %v3271_v44 = vadd.f32 %v9899_v27, %v9886_v19  ;;  %v9915_v3 = vmax.f32 %v7374_v20, 0.0 }
 0x3cc   : > { %12402 = vst [vmem:[#allocation65_spill] sm:$0xff] %v9908_v46  ;;  %v3742_v33 = vmax.f32 %v9767_v22, %v12404_v56  ;;  %v3239_v2 = vmax.f32 %v9889_v7, %v9908_v46  ;;  %v3278_v28 = vadd.f32 %v9908_v46, %v9889_v7  ;;  %v12405_v25 = vrot.slane %v9775_v35, 1 }
 0x3cd   : > { %12403 = vst [vmem:[#allocation67_spill] sm:$0xff] %v9915_v3  ;;  %v3723_v30 = vrot.slane %v3716_v14, %v9522_v21  ;;  %v3233_v61 = vrot.slane %v3232_v32, 4  ;;  %v3272_v45 = vrot.slane %v3271_v44, 4  ;;  %v7376_v13 = vadd.f32 %v9834_v23, %v9556_v18 }
 0x3ce   : > { %v3749_v50 = vmax.f32 %v9775_v35, %v12405_v25  ;;  %v12406_v22 = vrot.slane %v9769_v58, 1  ;;  %v3240_v24 = vrot.slane %v3239_v2, 4  ;;  %v3279_v15 = vrot.slane %v3278_v28, 4 }
 0x3cf   : > { %3724 = vrot.lane.b32.xlu0 %v3723_v30, %s12381_s26  ;;  %v12407_v11 = vrot.slane %v9781_v17, 1  ;;  %v3234_v31 = vmax.f32 %v3232_v32, %v3233_v61  ;;  %v3273_v35 = vadd.f32 %v3272_v45, %v3271_v44  ;;  %v9937_v0 = vmax.f32 %v7376_v13, 0.0 }
 0x3d0   : > { %v3781_v48 = vadd.f32 %v12406_v22, %v9769_v58  ;;  %v3752_v49 = vcombine.low %v3742_v33, %v3749_v50  ;;  %v3241_v41 = vmax.f32 %v3239_v2, %v3240_v24  ;;  %v3280_v18 = vadd.f32 %v3279_v15, %v3278_v28 }
 0x3d1   : > { %v3788_v9 = vadd.f32 %v12407_v11, %v9781_v17  ;;  %12408 = vst [vmem:[#allocation69_spill] sm:$0xff] %v9937_v0  ;;  %v3235_v58 = vrot.slane %v3234_v31, 2  ;;  %v3274_v14 = vrot.slane %v3273_v35, 2  ;;  %v7378_v56 = vadd.f32 %v9850_v36, %v9624_v42 }
 0x3d2   : > { %v3789_v4 = vmul.f32 0.0625, %v3781_v48  ;;  %v3759_v23 = vrot.slane %v3752_v49, %v9522_v21  ;;  %v7380_v33 = vadd.f32 %v9856_v51, %v9560_v47  ;;  %v3242_v30 = vrot.slane %v3241_v41, 2 }
 0x3d3   : > { %v3790_v20 = vmul.f32 0.0625, %v3788_v9  ;;  %v3281_v17 = vrot.slane %v3280_v18, 2  ;;  %v3236_v25 = vmax.f32 %v3234_v31, %v3235_v58  ;;  %v3275_v50 = vadd.f32 %v3274_v14, %v3273_v35 }
 0x3d4   : > { %v3766_v32 = vrot.slane %v3759_v23, %v9522_v21  ;;  %v9945_v2 = vmax.f32 %v7378_v56, 0.0  ;;  %v9947_v28 = vmax.f32 %v7380_v33, 0.0  ;;  %v3243_v61 = vmax.f32 %v3241_v41, %v3242_v30 }
 0x3d5   : > { %v3793_v44 = vcombine.low %v3789_v4, %v3790_v20  ;;  %v3282_v45 = vadd.f32 %v3281_v17, %v3280_v18  ;;  %v7382_v47 = vadd.f32 %v9869_v43, %v9640_v39  ;;  %v3237_v36 = vrot.slane %v3236_v25, 1 }
 0x3d6   : > { %12409 = vst [vmem:[#allocation71_spill] sm:$0xff] %v9945_v2  ;;  %12410 = vst [vmem:[#allocation73_spill] sm:$0xff] %v9947_v28  ;;  %3767 = vrot.lane.b32.xlu1 %v3766_v32, %s12381_s26  ;;  %v3276_v51 = vrot.slane %v3275_v50, 1  ;;  %v3316_v13 = vmax.f32 %v9915_v3, %v9945_v2  ;;  %v3355_v22 = vadd.f32 %v9945_v2, %v9915_v3  ;;  %v3244_v48 = vrot.slane %v3243_v61, 1 }
 0x3d7   : > { %v3800_v42 = vrot.slane %v3793_v44, %v9522_v21  ;;  %v3283_v24 = vrot.slane %v3282_v45, 1  ;;  %v3323_v49 = vmax.f32 %v9937_v0, %v9947_v28  ;;  %v3199_v11 = vrot.slane %v9896_v63, 1 }
 0x3d8   : > { %v3277_v9 = vadd.f32 %v3276_v51, %v3275_v50  ;;  %v3317_v31 = vrot.slane %v3316_v13, 4  ;;  %v3356_v39 = vrot.slane %v3355_v22, 4  ;;  %v9961_v43 = vmax.f32 %v3236_v25, %v3237_v36 }
 0x3d9   : > { %v3807_v15 = vrot.slane %v3800_v42, %v9522_v21  ;;  %v9963_v35 = vmax.f32 %v3243_v61, %v3244_v48  ;;  %v3324_v4 = vrot.slane %v3323_v49, 4  ;;  %v3362_v41 = vadd.f32 %v9947_v28, %v9937_v0 }
 0x3da   : > { %v3284_v18 = vadd.f32 %v3283_v24, %v3282_v45  ;;  %v3318_v23 = vmax.f32 %v3316_v13, %v3317_v31  ;;  %v3357_v20 = vadd.f32 %v3356_v39, %v3355_v22  ;;  %v9968_v58 = vmax.f32 %v7382_v47, 0.0 }
 0x3db   : > { %3808 = vrot.lane.b32.xlu0 %v3807_v15, %s12381_s26  ;;  %v9970_v14 = vmul.f32 0.0625, %v3277_v9  ;;  %v3325_v56 = vmax.f32 %v3323_v49, %v3324_v4  ;;  %v3363_v33 = vrot.slane %v3362_v41, 4  ;;  %v12412_v30 = vrot.slane %v9843_v26, 1 }
 0x3dc   : > { %12411 = vst [vmem:[#allocation75_spill] sm:$0xff] %v9968_v58  ;;  %v3319_v32 = vrot.slane %v3318_v23, 2  ;;  %v3358_v44 = vrot.slane %v3357_v20, 2  ;;  %v3400_v25 = vmax.f32 %v9968_v58, %v9647_v37  ;;  %v3439_v50 = vadd.f32 %v9647_v37, %v9968_v58 }
 0x3dd   : > { %v3826_v17 = vmax.f32 %v9843_v26, %v12412_v30  ;;  %v3326_v61 = vrot.slane %v3325_v56, 2  ;;  %v3364_v45 = vadd.f32 %v3363_v33, %v3362_v41  ;;  %v12413_v42 = vrot.slane %v9852_v8, 1 }
 0x3de   : > { %v7384_v36 = vadd.f32 %v9876_v40, %v9644_v34  ;;  %v3320_v51 = vmax.f32 %v3318_v23, %v3319_v32  ;;  %v3359_v13 = vadd.f32 %v3358_v44, %v3357_v20  ;;  %v3401_v26 = vrot.slane %v3400_v25, 4 }
 0x3df   : > { %v3833_v47 = vmax.f32 %v9852_v8, %v12413_v42  ;;  %v3440_v22 = vrot.slane %v3439_v50, 4  ;;  %v3327_v48 = vmax.f32 %v3325_v56, %v3326_v61  ;;  %v3365_v24 = vrot.slane %v3364_v45, 2 }
 0x3e0   : > { %v9984_v49 = vmax.f32 %v7384_v36, 0.0  ;;  %v3321_v9 = vrot.slane %v3320_v51, 1  ;;  %v3360_v31 = vrot.slane %v3359_v13, 1  ;;  %v3402_v39 = vmax.f32 %v3400_v25, %v3401_v26 }
 0x3e1   : > { %v3836_v15 = vcombine.low %v3826_v17, %v3833_v47  ;;  %v3441_v4 = vadd.f32 %v3440_v22, %v3439_v50  ;;  %v3328_v41 = vrot.slane %v3327_v48, 1  ;;  %v3366_v33 = vadd.f32 %v3365_v24, %v3364_v45 }
 0x3e2   : > { %12414 = vst [vmem:[#allocation78_spill] sm:$0xff] %v9984_v49  ;;  %v3407_v34 = vmax.f32 %v9984_v49, %v9669_v59  ;;  %v3286_v40 = vmul.f32 0.0625, %v3284_v18  ;;  %v3322_v23 = vmax.f32 %v3320_v51, %v3321_v9  ;;  %v3403_v20 = vrot.slane %v3402_v39, 2 }
 0x3e3   : > { %v3843_v8 = vrot.slane %v3836_v15, %v9522_v21  ;;  %v3442_v30 = vrot.slane %v3441_v4, 2  ;;  %v3361_v56 = vadd.f32 %v3360_v31, %v3359_v13  ;;  %v3367_v32 = vrot.slane %v3366_v33, 1 }
 0x3e4   : > { %v3408_v44 = vrot.slane %v3407_v34, 4  ;;  %v3329_v61 = vmax.f32 %v3327_v48, %v3328_v41  ;;  %v3404_v42 = vmax.f32 %v3402_v39, %v3403_v20  ;;  %v3446_v50 = vadd.f32 %v9669_v59, %v9984_v49 }
 0x3e5   : > { %v3850_v17 = vrot.slane %v3843_v8, %v9522_v21  ;;  %v3443_v25 = vadd.f32 %v3442_v30, %v3441_v4  ;;  %v3368_v45 = vadd.f32 %v3367_v32, %v3366_v33  ;;  %v12415_v18 = vrot.slane %v9845_v38, 1 }
 0x3e6   : > { %v3409_v47 = vmax.f32 %v3407_v34, %v3408_v44  ;;  %v12416_v51 = vrot.slane %v9854_v54, 1  ;;  %v3405_v26 = vrot.slane %v3404_v42, 1  ;;  %v3447_v48 = vrot.slane %v3446_v50, 4 }
 0x3e7   : > { %3851 = vrot.lane.b32.xlu1 %v3850_v17, %s12381_s26  ;;  %v3865_v36 = vadd.f32 %v12415_v18, %v9845_v38  ;;  %v3444_v22 = vrot.slane %v3443_v25, 1  ;;  %v3161_v24 = vcombine.low %v9903_v57, %v9905_v10  ;;  %v3369_v15 = vmul.f32 0.0625, %v3361_v56 }
 0x3e8   : > { %v3872_v13 = vadd.f32 %v12416_v51, %v9854_v54  ;;  %v3410_v9 = vrot.slane %v3409_v47, 2  ;;  %v3370_v4 = vmul.f32 0.0625, %v3368_v45  ;;  %v3406_v41 = vmax.f32 %v3404_v42, %v3405_v26 }
 0x3e9   : > { %v3873_v31 = vmul.f32 0.0625, %v3865_v36  ;;  %v3448_v33 = vadd.f32 %v3447_v48, %v3446_v50  ;;  %v3168_v8 = vrot.slane %v3161_v24, %v9522_v21  ;;  %v3193_v54 = vadd.f32 %v3192_v12, %v9884_v16 }
 0x3ea   : > { %v3874_v39 = vmul.f32 0.0625, %v3872_v13  ;;  %v3411_v38 = vmax.f32 %v3409_v47, %v3410_v9  ;;  %v3200_v20 = vadd.f32 %v3199_v11, %v9896_v63  ;;  %v3445_v57 = vadd.f32 %v3444_v22, %v3443_v25 }
 0x3eb   : > { %v3449_v10 = vrot.slane %v3448_v33, 2  ;;  %v3175_v30 = vrot.slane %v3168_v8, %v9522_v21  ;;  %v3248_v56 = vcombine.low %v9961_v43, %v9963_v35  ;;  %v3201_v44 = vmul.f32 0.0625, %v3193_v54  ;;  %v10045_v54 = vpop.permute.xlu0 %5359 }
 0x3ec   : > { %v3877_v34 = vcombine.low %v3873_v31, %v3874_v39  ;;  %v3412_v32 = vrot.slane %v3411_v38, 1  ;;  %v3202_v42 = vmul.f32 0.0625, %v3200_v20  ;;  %v3289_v12 = vcombine.low %v9970_v14, %v3286_v40  ;;  %v7753_v31 = vld [vmem:[#allocation5] sm:$0xff] }
 0x3ed   : > { %v3450_v50 = vadd.f32 %v3449_v10, %v3448_v33  ;;  %3176 = vrot.lane.b32.xlu1 %v3175_v30, %s12381_s26  ;;  %v3255_v16 = vrot.slane %v3248_v56, %v9522_v21  ;;  %v3332_v63 = vcombine.low %v3322_v23, %v3329_v61  ;;  %v3373_v51 = vcombine.low %v3369_v15, %v3370_v4  ;;  %v10037_v33 = vpop.permute.xlu1 %3945 }
 0x3ee   : > { %v3884_v17 = vrot.slane %v3877_v34, %v9522_v21  ;;  %v3413_v11 = vmax.f32 %v3411_v38, %v3412_v32  ;;  %v3205_v45 = vcombine.low %v3201_v44, %v3202_v42  ;;  %v3296_v36 = vrot.slane %v3289_v12, %v9522_v21  ;;  %3134 = vst.msk [vmem:[#allocation5 + $0x28] sm:$0x1] %vm3133_vm15, %v7753_v31 }
 0x3ef   : > { %v3451_v47 = vrot.slane %v3450_v50, 1  ;;  %v3262_v43 = vrot.slane %v3255_v16, %v9522_v21  ;;  %v3339_v35 = vrot.slane %v3332_v63, %v9522_v21  ;;  %v3453_v26 = vmul.f32 0.0625, %v3445_v57  ;;  %3140 = vst.msk [vmem:[#allocation5 + $0x58] sm:$0x1] %vm3133_vm15, %v7753_v31 }
 0x3f0   : > { %v3891_v25 = vrot.slane %v3884_v17, %v9522_v21  ;;  %v3212_v18 = vrot.slane %v3205_v45, %v9522_v21  ;;  %v3416_v13 = vcombine.low %v3406_v41, %v3413_v11  ;;  %v3303_v48 = vrot.slane %v3296_v36, %v9522_v21 }
 0x3f1   : > { %v3452_v14 = vadd.f32 %v3451_v47, %v3450_v50  ;;  %3263 = vrot.lane.b32.xlu1 %v3262_v43, %s12381_s26  ;;  %v3346_v40 = vrot.slane %v3339_v35, %v9522_v21  ;;  %v3380_v24 = vrot.slane %v3373_v51, %v9522_v21  ;;  %v12417_v8 = vlaneseq }
 0x3f2   : > { %3892 = vrot.lane.b32.xlu0 %v3891_v25, %s12381_s26  ;;  %v3219_v23 = vrot.slane %v3212_v18, %v9522_v21  ;;  %v3423_v61 = vrot.slane %v3416_v13, %v9522_v21  ;;  %v10056_v42 = vstv %s6826_s25  ;;  %v10058_v16 = vstv %s6793_s16  ;;  %s12422_s25 = smov 127   ;;  %s6822_s16 = sld [smem:[#allocation10 + $0x4]] }
 0x3f3   : > { %v3454_v22 = vmul.f32 0.0625, %v3452_v14  ;;  %v3387_v39 = vrot.slane %v3380_v24, %v9522_v21  ;;  %vm3182_vm1 = vcmp.ge.s32.totalorder %v12417_v8, 17  ;;  %vm3183_vm9 = vcmp.lt.s32.totalorder %v12417_v8, 273 }
 0x3f4   : > { %v3430_v15 = vrot.slane %v3423_v61, %v9522_v21  ;;  %vm10041_vm10 = vmand %vm3182_vm1, %vm3183_vm9  ;;  %v10060_v11 = vstv %s6777_s29  ;;  %v10062_v25 = vstv %s6778_s14  ;;  %v10064_v47 = vstv %s6825_s17  ;;  %s6823_s29 = sld [smem:[#allocation10 + $0x84]]  ;;  %s6748_s14 = sld [smem:[#allocation10 + $0x1]] }
 0x3f5   : > { %3347 = vrot.lane.b32.xlu1 %v3346_v40, %s12381_s26  ;;  %v3457_v9 = vcombine.low %v3453_v26, %v3454_v22  ;;  %v10073_v14 = vstv %s6824_s27  ;;  %v10077_v24 = vstv %s6853_s24  ;;  %v10081_v31 = vstv %s6852_s21  ;;  %s6749_s17 = sld [smem:[#allocation10 + $0x81]]  ;;  %s10104_s27 = sld [smem:[#allocation10]] }
 0x3f6   : > { %3220 = vrot.lane.b32.xlu0 %v3219_v23, %s12381_s26  ;;  %12420 = vst [vmem:[#allocation79_spill] sm:$0xff] %v10073_v14  ;;  %s10106_s24 = sld [smem:[#allocation10 + $0x80]]  ;;  %s10112_s21 = sld [smem:[#allocation10 + $0x4]]  ;;  %v10339_v1 = vstv %s10278_s22  ;;  %v10342_v46 = vstv %s10281_s0 }
 0x3f7   : > { %v3464_v4 = vrot.slane %v3457_v9, %v9522_v21  ;;  %12429 = vst [vmem:[#allocation83_spill] sm:$0xff] %v10339_v1  ;;  %12430 = vst [vmem:[#allocation84_spill] sm:$0xff] %v10342_v46  ;;  %s10439_s0 = sld [smem:[#allocation10 + $0x88]] }
 0x3f8   : > { %s10442_s22 = sld [smem:[#allocation10 + $0x8]] }
 0x3f9   : > { %3431 = vrot.lane.b32.xlu1 %v3430_v15, %s12381_s26  ;;  %v3471_v41 = vrot.slane %v3464_v4, %v9522_v21 }
 0x3fa   : > { %3304 = vrot.lane.b32.xlu0 %v3303_v48, %s12381_s26 }
 0x3fe   : > { %3388 = vrot.lane.b32.xlu0 %v3387_v39, %s12381_s26 }
 0x402   : > { %3472 = vrot.lane.b32.xlu0 %v3471_v41, %s12381_s26  ;;  %s12421_s26 = smov 112  }
 0x421   : > { %v3516_v38 = vpop.permute.xlu1 %3515 }
 0x422   : > { %v3517_v20 = vrot.slane %v3516_v38, 7 }
 0x424   : > { %v3518_v57 = vsel %vm431_vm2, %v3517_v20, %v3516_v38  ;;  %v10084_v20 = vstv %s6780_s23  ;;  %s10120_s23 = sld [smem:[#allocation10 + $0x84]] }
 0x425   : > { %3521 = vst.msk [vmem:[#allocation5 + $0x4] ss:$8 sm:$0x7] %vm10041_vm10, %v3518_v57 }
 0x42a   : > { %v3557_v21 = vpop.permute.xlu0 %3556 }
 0x42b   : > { %v3558_v10 = vrot.slane %v3557_v21, 7 }
 0x42c   : > { %v4348_v50 = vld [vmem:[#allocation5 + $0x4] ss:$8 sm:$0x7] }
 0x42d   : > { %v3559_v30 = vsel %vm431_vm2, %v3558_v10, %v3557_v21  ;;  %v4174_v63 = vld [vmem:[#allocation5 + $0x4] ss:$8 sm:$0x7]  ;;  %v4352_v35 = vmul.f32 %v10056_v42, %v4348_v50 }
 0x42e   : > { %3562 = vst.msk [vmem:[#allocation5 + $0x34] ss:$8 sm:$0x7] %vm10041_vm10, %v3559_v30  ;;  %v4178_v13 = vmul.f32 %v10060_v11, %v4174_v63  ;;  %v4514_v23 = vld [vmem:[#allocation5 + $0x4] ss:$8 sm:$0x7] }
 0x42f   : > { %v3600_v56 = vpop.permute.xlu0 %3599  ;;  %v4518_v15 = vmul.f32 %v10073_v14, %v4514_v23  ;;  %v4938_v9 = vld [vmem:[#allocation5 + $0x4] ss:$8 sm:$0x7] }
 0x430   : > { %v3601_v32 = vrot.slane %v3600_v56, 7  ;;  %v4942_v21 = vmul.f32 %v10081_v31, %v4938_v9 }
 0x432   : > { %v3602_v17 = vsel %vm431_vm2, %v3601_v32, %v3600_v56  ;;  %v3641_v44 = vpop.permute.xlu1 %3640 }
 0x433   : > { %3605 = vst.msk [vmem:[#allocation5 + $0x5] ss:$8 sm:$0x7] %vm10041_vm10, %v3602_v17  ;;  %v3642_v12 = vrot.slane %v3641_v44, 7  ;;  %v10090_v17 = vstv %s6779_s28  ;;  %s6820_s28 = sld [smem:[#allocation10 + $0x3]] }
 0x435   : > { %v4349_v45 = vld [vmem:[#allocation5 + $0x34] ss:$8 sm:$0x7]  ;;  %v3643_v43 = vsel %vm431_vm2, %v3642_v12, %v3641_v44 }
 0x436   : > { %v4355_v18 = vmul.f32 %v10058_v16, %v4349_v45  ;;  %v4175_v36 = vld [vmem:[#allocation5 + $0x34] ss:$8 sm:$0x7]  ;;  %3646 = vst.msk [vmem:[#allocation5 + $0x35] ss:$8 sm:$0x7] %vm10041_vm10, %v3643_v43 }
 0x437   : > { %v4515_v51 = vld [vmem:[#allocation5 + $0x34] ss:$8 sm:$0x7]  ;;  %v4181_v26 = vmul.f32 %v10062_v25, %v4175_v36 }
 0x438   : > { %v4356_v40 = vadd.f32 %v4355_v18, %v4352_v35  ;;  %v4521_v22 = vmul.f32 %v10064_v47, %v4515_v51  ;;  %v4939_v48 = vld [vmem:[#allocation5 + $0x34] ss:$8 sm:$0x7] }
 0x439   : > { %v4182_v61 = vadd.f32 %v4181_v26, %v4178_v13  ;;  %v4945_v41 = vmul.f32 %v10077_v24, %v4939_v48  ;;  %v12423_v13 = vld [vmem:[#allocation34_spill] sm:$0xff]  ;;  %v12424_v48 = vld [vmem:[#allocation51_spill] sm:$0xff] }
 0x43a   : > { %4358 = vrot.lane.b32.xlu0 %v4356_v40, %s12421_s26  ;;  %v4364_v39 = vld [vmem:[#allocation5 + $0x5] ss:$8 sm:$0x7]  ;;  %v4522_v4 = vadd.f32 %v4521_v22, %v4518_v15  ;;  %v4274_v26 = vrot.slane %v12423_v13, 7  ;;  %v4329_v15 = vrot.slane %v12424_v48, 7 }
 0x43b   : > { %4184 = vrot.lane.b32.xlu1 %v4182_v61, %s12421_s26  ;;  %v4368_v10 = vmul.f32 %v4364_v39, %v10060_v11  ;;  %v4190_v32 = vld [vmem:[#allocation5 + $0x5] ss:$8 sm:$0x7]  ;;  %v4946_v12 = vadd.f32 %v4945_v41, %v4942_v21  ;;  %v10116_v41 = vstv %s6822_s16  ;;  %s6770_s16 = sld [smem:[#allocation10 + $0x83]] }
 0x43c   : > { %v4194_v35 = vmul.f32 %v10090_v17, %v4190_v32  ;;  %v10124_v32 = vstv %s6748_s14  ;;  %s10263_s14 = sld [smem:[#allocation10 + $0x85]]  ;;  %v5108_v0 = vld [vmem:[#allocation5 + $0x34] ss:$8 sm:$0x7] }
 0x43d   : > { %v3684_v8 = vpop.permute.xlu1 %3683  ;;  %v4365_v38 = vld [vmem:[#allocation5 + $0x35] ss:$8 sm:$0x7] }
 0x43e   : > { %v3685_v57 = vrot.slane %v3684_v8, 7  ;;  %v4371_v30 = vmul.f32 %v4365_v38, %v10062_v25  ;;  %v4191_v56 = vld [vmem:[#allocation5 + $0x35] ss:$8 sm:$0x7] }
 0x43f   : > { %4524 = vrot.lane.b32.xlu1 %v4522_v4, %s12422_s25  ;;  %v4197_v45 = vmul.f32 %v10084_v20, %v4191_v56  ;;  %v4275_v4 = vsel %vm526_vm3, %v4274_v26, %v12423_v13 }
 0x440   : > { %v3686_v44 = vsel %vm431_vm2, %v3685_v57, %v3684_v8  ;;  %v4372_v63 = vadd.f32 %v4371_v30, %v4368_v10  ;;  %v10118_v8 = vstv %s6823_s29  ;;  %s10239_s29 = sld [smem:[#allocation10]] }
 0x441   : > { %v3725_v50 = vpop.permute.xlu0 %3724  ;;  %3689 = vst.msk [vmem:[#allocation5 + $0x6] ss:$8 sm:$0x7] %vm10041_vm10, %v3686_v44  ;;  %v4198_v36 = vadd.f32 %v4197_v45, %v4194_v35  ;;  %v10126_v44 = vstv %s6749_s17  ;;  %s10268_s17 = sld [smem:[#allocation10 + $0x81]] }
 0x442   : > { %v3726_v43 = vrot.slane %v3725_v50, 7  ;;  %4374 = vrot.lane.b32.xlu0 %v4372_v63, %s12421_s26 }
 0x443   : > { %4948 = vrot.lane.b32.xlu1 %v4946_v12, %s12422_s25 }
 0x444   : > { %v3727_v18 = vsel %vm431_vm2, %v3726_v43, %v3725_v50 }
 0x445   : > { %3730 = vst.msk [vmem:[#allocation5 + $0x36] ss:$8 sm:$0x7] %vm10041_vm10, %v3727_v18 }
 0x447   : > { %4200 = vrot.lane.b32.xlu1 %v4198_v36, %s12421_s26  ;;  %v10133_v36 = vsel %vm666_vm5, %v4329_v15, %v12424_v48 }
 0x448   : > { %v3768_v51 = vpop.permute.xlu1 %3767  ;;  %v4966_v61 = vld [vmem:[#allocation5 + $0x6] ss:$8 sm:$0x7] }
 0x449   : > { %v3769_v40 = vrot.slane %v3768_v51, 7  ;;  %v4542_v22 = vld [vmem:[#allocation5 + $0x6] ss:$8 sm:$0x7]  ;;  %v4970_v10 = vmul.f32 %v4966_v61, %v10116_v41 }
 0x44a   : > { %v4270_v39 = vld [vmem:[#allocation5 + $0x6] ss:$8 sm:$0x7]  ;;  %v4546_v56 = vmul.f32 %v4542_v22, %v10060_v11 }
 0x44b   : > { %v3770_v23 = vsel %vm431_vm2, %v3769_v40, %v3768_v51  ;;  %v3911_v57 = vld [vmem:[#allocation5 + $0x6] ss:$8 sm:$0x7]  ;;  %v4277_v35 = vmul.f32 %v4275_v4, %v4270_v39 }
 0x44c   : > { %3773 = vst.msk [vmem:[#allocation5 + $0x7] ss:$8 sm:$0x7] %vm10041_vm10, %v3770_v23  ;;  %v4967_v21 = vld [vmem:[#allocation5 + $0x36] ss:$8 sm:$0x7]  ;;  %v3915_v48 = vmul.f32 %v10124_v32, %v3911_v57 }
 0x44d   : > { %v3809_v9 = vpop.permute.xlu0 %3808  ;;  %v4543_v30 = vld [vmem:[#allocation5 + $0x36] ss:$8 sm:$0x7]  ;;  %v4973_v63 = vmul.f32 %v4967_v21, %v10118_v8 }
 0x44e   : > { %v3810_v38 = vrot.slane %v3809_v9, 7  ;;  %v5307_v50 = vld [vmem:[#allocation5 + $0x6] ss:$8 sm:$0x7]  ;;  %v4549_v45 = vmul.f32 %v4543_v30, %v10062_v25 }
 0x44f   : > { %v4271_v43 = vld [vmem:[#allocation5 + $0x36] ss:$8 sm:$0x7]  ;;  %v4974_v40 = vadd.f32 %v4973_v63, %v4970_v10  ;;  %v10155_v63 = vstv %s10106_s24  ;;  %s12426_s24 = smov 111  }
 0x450   : > { %v3811_v12 = vsel %vm431_vm2, %v3810_v38, %v3809_v9  ;;  %v3912_v18 = vld [vmem:[#allocation5 + $0x36] ss:$8 sm:$0x7]  ;;  %v4278_v51 = vmul.f32 %v4275_v4, %v4271_v43  ;;  %v4550_v23 = vadd.f32 %v4549_v45, %v4546_v56  ;;  %v4281_v4 = vmul.f32 %v10081_v31, %v4277_v35 }
 0x451   : > { %3814 = vst.msk [vmem:[#allocation5 + $0x37] ss:$8 sm:$0x7] %vm10041_vm10, %v3811_v12  ;;  %v5308_v13 = vld [vmem:[#allocation5 + $0x36] ss:$8 sm:$0x7]  ;;  %v3918_v61 = vmul.f32 %v10126_v44, %v3912_v18  ;;  %4976 = vrot.lane.b32.xlu1 %v4974_v40, %s12422_s25  ;;  %v5309_v38 = vmul.f32 %v5307_v50, %v10133_v36  ;;  %v10150_v12 = vstv %s10104_s27 }
 0x452   : > { %v4848_v26 = vld [vmem:[#allocation5 + $0x6] ss:$8 sm:$0x7]  ;;  %v5310_v22 = vmul.f32 %v5308_v13, %v10133_v36  ;;  %v4284_v39 = vmul.f32 %v10077_v24, %v4278_v51  ;;  %4552 = vrot.lane.b32.xlu0 %v4550_v23, %s12422_s25  ;;  %v10160_v13 = vstv %s10112_s21  ;;  %s10246_s27 = sld [smem:[#allocation10 + $0x1]]  ;;  %s10252_s21 = sld [smem:[#allocation10 + $0x80]] }
 0x453   : > { %v4849_v9 = vld [vmem:[#allocation5 + $0x36] ss:$8 sm:$0x7]  ;;  %v4850_v21 = vmul.f32 %v4848_v26, %v10133_v36  ;;  %v3919_v30 = vadd.f32 %v3918_v61, %v3915_v48  ;;  %v5313_v50 = vmul.f32 %v5309_v38, %v10073_v14  ;;  %v4251_v35 = vld [vmem:[#allocation5 + $0x7] ss:$8 sm:$0x7]  ;;  %v10163_v26 = vstv %s10120_s23 }
 0x454   : > { %v4851_v15 = vmul.f32 %v4849_v9, %v10133_v36  ;;  %v4285_v10 = vadd.f32 %v4284_v39, %v4281_v4  ;;  %v5316_v56 = vmul.f32 %v5310_v22, %v10064_v47  ;;  %v4558_v51 = vld [vmem:[#allocation5 + $0x7] ss:$8 sm:$0x7]  ;;  %v4255_v48 = vmul.f32 %v10150_v12, %v4251_v35  ;;  %s10270_s23 = sld [smem:[#allocation10 + $0x2]] }
 0x455   : > { %3921 = vrot.lane.b32.xlu1 %v3919_v30, %s12422_s25  ;;  %v4854_v45 = vmul.f32 %v4850_v21, %v10090_v17  ;;  %v5137_v4 = vld [vmem:[#allocation5 + $0x7] ss:$8 sm:$0x7]  ;;  %v4562_v21 = vmul.f32 %v4558_v51, %v10090_v17 }
 0x456   : > { %v4857_v57 = vmul.f32 %v4851_v15, %v10084_v20  ;;  %4287 = vrot.lane.b32.xlu0 %v4285_v10, %s12422_s25  ;;  %v5317_v23 = vadd.f32 %v5316_v56, %v5313_v50  ;;  %v4982_v30 = vld [vmem:[#allocation5 + $0x7] ss:$8 sm:$0x7] }
 0x457   : > { %v4986_v51 = vmul.f32 %v4982_v30, %v10073_v14 }
 0x458   : > { %v4559_v43 = vld [vmem:[#allocation5 + $0x37] ss:$8 sm:$0x7]  ;;  %v4858_v61 = vadd.f32 %v4857_v57, %v4854_v45  ;;  %v5141_v57 = vmul.f32 %v5137_v4, %v10160_v13 }
 0x459   : > { %v3852_v18 = vpop.permute.xlu1 %3851  ;;  %v4565_v22 = vmul.f32 %v4559_v43, %v10084_v20  ;;  %v4252_v9 = vld [vmem:[#allocation5 + $0x37] ss:$8 sm:$0x7] }
 0x45a   : > { %v3853_v40 = vrot.slane %v3852_v18, 7  ;;  %v4983_v39 = vld [vmem:[#allocation5 + $0x37] ss:$8 sm:$0x7]  ;;  %v4258_v15 = vmul.f32 %v10155_v63, %v4252_v9  ;;  %5319 = vrot.lane.b32.xlu0 %v5317_v23, %s12422_s25  ;;  %4860 = vrot.lane.b32.xlu1 %v4858_v61, %s12422_s25 }
 0x45b   : > { %v5138_v10 = vld [vmem:[#allocation5 + $0x37] ss:$8 sm:$0x7]  ;;  %v4566_v45 = vadd.f32 %v4565_v22, %v4562_v21  ;;  %v4989_v43 = vmul.f32 %v4983_v39, %v10064_v47 }
 0x45c   : > { %v3854_v38 = vsel %vm431_vm2, %v3853_v40, %v3852_v18  ;;  %v10174_v56 = vadd.f32 %v4258_v15, %v4255_v48  ;;  %v5144_v50 = vmul.f32 %v5138_v10, %v10163_v26  ;;  %v3928_v35 = vld [vmem:[#allocation5 + $0x37] ss:$8 sm:$0x7] }
 0x45d   : > { %3857 = vst.msk [vmem:[#allocation5 + $0x18] ss:$8 sm:$0x7] %vm10041_vm10, %v3854_v38  ;;  %v3927_v61 = vld [vmem:[#allocation5 + $0x7] ss:$8 sm:$0x7]  ;;  %v4990_v9 = vadd.f32 %v4989_v43, %v4986_v51  ;;  %v3934_v48 = vmul.f32 %v10077_v24, %v3928_v35 }
 0x45e   : > { %v10179_v18 = vadd.f32 %v5144_v50, %v5141_v57  ;;  %4568 = vrot.lane.b32.xlu0 %v4566_v45, %s12422_s25  ;;  %v3931_v39 = vmul.f32 %v10081_v31, %v3927_v61 }
 0x45f   : > { %v3177_v40 = vpop.permute.xlu1 %3176 }
 0x460   : > { %v3178_v23 = vrot.slane %v3177_v40, 7  ;;  %v3935_v30 = vadd.f32 %v3934_v48, %v3931_v39 }
 0x462   : > { %v3179_v4 = vsel %vm431_vm2, %v3178_v23, %v3177_v40  ;;  %4992 = vrot.lane.b32.xlu0 %v4990_v9, %s12422_s25 }
 0x463   : > { %3185 = vst.msk [vmem:[#allocation5] ss:$8 sm:$0x7] %vm10041_vm10, %v3179_v4  ;;  %v3264_v22 = vpop.permute.xlu1 %3263 }
 0x464   : > { %v3893_v15 = vpop.permute.xlu0 %3892  ;;  %v3265_v21 = vrot.slane %v3264_v22, 7 }
 0x465   : > { %v3894_v38 = vrot.slane %v3893_v15, 7 }
 0x466   : > { %v3266_v50 = vsel %vm431_vm2, %v3265_v21, %v3264_v22  ;;  %3937 = vrot.lane.b32.xlu0 %v3935_v30, %s12422_s25 }
 0x467   : > { %v3895_v10 = vsel %vm431_vm2, %v3894_v38, %v3893_v15  ;;  %3269 = vst.msk [vmem:[#allocation5 + $0x1] ss:$8 sm:$0x7] %vm10041_vm10, %v3266_v50  ;;  %v3348_v43 = vpop.permute.xlu1 %3347  ;;  %v10209_v50 = vstv %s6820_s28  ;;  %s10274_s28 = sld [smem:[#allocation10 + $0x82]] }
 0x468   : > { %3898 = vst.msk [vmem:[#allocation5 + $0x48] ss:$8 sm:$0x7] %vm10041_vm10, %v3895_v10  ;;  %v3221_v57 = vpop.permute.xlu0 %3220  ;;  %v3349_v35 = vrot.slane %v3348_v43, 7 }
 0x469   : > { %v3222_v45 = vrot.slane %v3221_v57, 7 }
 0x46a   : > { %v3350_v23 = vsel %vm431_vm2, %v3349_v35, %v3348_v43  ;;  %v4454_v4 = vld [vmem:[#allocation5] ss:$8 sm:$0x7] }
 0x46b   : > { %v3223_v40 = vsel %vm431_vm2, %v3222_v45, %v3221_v57  ;;  %3353 = vst.msk [vmem:[#allocation5 + $0x2] ss:$8 sm:$0x7] %vm10041_vm10, %v3350_v23  ;;  %v3432_v9 = vpop.permute.xlu1 %3431  ;;  %v4772_v21 = vld [vmem:[#allocation5] ss:$8 sm:$0x7]  ;;  %v4458_v43 = vmul.f32 %v4454_v4, %v10124_v32 }
 0x46c   : > { %3226 = vst.msk [vmem:[#allocation5 + $0x30] ss:$8 sm:$0x7] %vm10041_vm10, %v3223_v40  ;;  %v3305_v51 = vpop.permute.xlu0 %3304  ;;  %v3433_v48 = vrot.slane %v3432_v9, 7  ;;  %v4774_v23 = vmul.f32 %v4772_v21, %v10133_v36 }
 0x46d   : > { %v3306_v61 = vrot.slane %v3305_v51, 7  ;;  %v4110_v10 = vld [vmem:[#allocation5] ss:$8 sm:$0x7] }
 0x46e   : > { %v3434_v22 = vsel %vm431_vm2, %v3433_v48, %v3432_v9  ;;  %v4628_v45 = vld [vmem:[#allocation5 + $0x1] ss:$8 sm:$0x7]  ;;  %v5021_v9 = vld [vmem:[#allocation5] ss:$8 sm:$0x7]  ;;  %v4114_v48 = vmul.f32 %v10209_v50, %v4110_v10 }
 0x46f   : > { %v3307_v15 = vsel %vm431_vm2, %v3306_v61, %v3305_v51  ;;  %3437 = vst.msk [vmem:[#allocation5 + $0x3] ss:$8 sm:$0x7] %vm10041_vm10, %v3434_v22  ;;  %v10215_v51 = vstv %s6770_s16  ;;  %v4126_v37 = vld [vmem:[#allocation5 + $0x1] ss:$8 sm:$0x7] }
 0x470   : > { %3310 = vst.msk [vmem:[#allocation5 + $0x31] ss:$8 sm:$0x7] %vm10041_vm10, %v3307_v15  ;;  %v3389_v38 = vpop.permute.xlu0 %3388  ;;  %s10260_s16 = sld [smem:[#allocation10 + $0x5]] }
 0x471   : > { %v3390_v39 = vrot.slane %v3389_v38, 7  ;;  %v4470_v49 = vld [vmem:[#allocation5 + $0x1] ss:$8 sm:$0x7] }
 0x472   : > { %v3901_v53 = vld [vmem:[#allocation5 + $0x48] ss:$8 sm:$0x3] }
 0x473   : > { %v4455_v30 = vld [vmem:[#allocation5 + $0x30] ss:$8 sm:$0x7]  ;;  %v3391_v57 = vsel %vm431_vm2, %v3390_v39, %v3389_v38 }
 0x474   : > { %v4461_v35 = vmul.f32 %v4455_v30, %v10126_v44  ;;  %3394 = vst.msk [vmem:[#allocation5 + $0x32] ss:$8 sm:$0x7] %vm10041_vm10, %v3391_v57  ;;  %v4111_v40 = vld [vmem:[#allocation5 + $0x30] ss:$8 sm:$0x7]  ;;  %v3473_v61 = vpop.permute.xlu0 %3472  ;;  %v4632_v57 = vmul.f32 %v4628_v45, %v10124_v32 }
 0x475   : > { %v4117_v15 = vmul.f32 %v10215_v51, %v4111_v40  ;;  %v4773_v38 = vld [vmem:[#allocation5 + $0x30] ss:$8 sm:$0x7]  ;;  %v3474_v22 = vrot.slane %v3473_v61, 7  ;;  %v4778_v40 = vmul.f32 %v10081_v31, %v4774_v23  ;;  %v4130_v23 = vmul.f32 %v10116_v41, %v4126_v37 }
 0x476   : > { %v4462_v39 = vadd.f32 %v4461_v35, %v4458_v43  ;;  %v4775_v4 = vmul.f32 %v4773_v38, %v10133_v36  ;;  %v5022_v30 = vld [vmem:[#allocation5 + $0x30] ss:$8 sm:$0x7] }
 0x477   : > { %v4629_v59 = vld [vmem:[#allocation5 + $0x31] ss:$8 sm:$0x7]  ;;  %v4118_v2 = vadd.f32 %v4117_v15, %v4114_v48  ;;  %v3475_v28 = vsel %vm431_vm2, %v3474_v22, %v3473_v61  ;;  %v5028_v21 = vmul.f32 %v5022_v30, %v10062_v25  ;;  %v5158_v35 = vld [vmem:[#allocation5 + $0x30] ss:$8 sm:$0x7]  ;;  %v5025_v61 = vmul.f32 %v5021_v9, %v10060_v11 }
 0x478   : > { %v4127_v27 = vld [vmem:[#allocation5 + $0x31] ss:$8 sm:$0x7]  ;;  %v4635_v10 = vmul.f32 %v4629_v59, %v10126_v44  ;;  %4464 = vrot.lane.b32.xlu1 %v4462_v39, %s12422_s25  ;;  %v4781_v43 = vmul.f32 %v10077_v24, %v4775_v4  ;;  %3478 = vst.msk [vmem:[#allocation5 + $0x33] ss:$8 sm:$0x7] %vm10041_vm10, %v3475_v28  ;;  %v5164_v28 = vmul.f32 %v5158_v35, %v10058_v16 }
 0x479   : > { %v4133_v45 = vmul.f32 %v10118_v8, %v4127_v27  ;;  %v5361_v48 = vrot.slane %v10045_v54, 7  ;;  %4120 = vrot.lane.b32.xlu0 %v4118_v2, %s12421_s26  ;;  %v4326_v15 = vld [vmem:[#allocation5 + $0x30] ss:$8 sm:$0x7]  ;;  %v5029_v4 = vadd.f32 %v5028_v21, %v5025_v61  ;;  %v371_v9 = vmul.f32 0.00390625, %v9519_v60 }
 0x47a   : > { %v10234_v59 = vadd.f32 %v4635_v10, %v4632_v57  ;;  %v4782_v38 = vadd.f32 %v4781_v43, %v4778_v40  ;;  %v5157_v22 = vld [vmem:[#allocation5] ss:$8 sm:$0x7]  ;;  %v5038_v34 = vld [vmem:[#allocation5 + $0x31] ss:$8 sm:$0x7]  ;;  %v4333_v27 = vmul.f32 %v10133_v36, %v4326_v15 }
 0x47b   : > { %v4325_v39 = vld [vmem:[#allocation5] ss:$8 sm:$0x7]  ;;  %v373_v2 = vld [vmem:[%s12425_s1 + $0x8] sm:$0xff]  ;;  %v4134_v30 = vadd.f32 %v4133_v45, %v4130_v23  ;;  %v370_v57 = vmul.f32 0.00390625, %v9528_v55  ;;  %v5161_v21 = vmul.f32 %v5157_v22, %v10056_v42  ;;  %v5362_v43 = vsel %vm414_vm0, %v5361_v48, %v10045_v54 }
 0x47c   : > { %4784 = vrot.lane.b32.xlu1 %v4782_v38, %s12422_s25  ;;  %v5358_v37 = vld [vmem:[#allocation5 + $0x30] ss:$8 sm:$0x7]  ;;  %v5037_v10 = vld [vmem:[#allocation5 + $0x1] ss:$8 sm:$0x7]  ;;  %v4332_v40 = vmul.f32 %v10133_v36, %v4325_v39  ;;  %v5044_v45 = vmul.f32 %v5038_v34, %v10084_v20  ;;  %v4339_v61 = vmul.f32 %v10064_v47, %v4333_v27  ;;  %v375_v54 = vmul.f32 %v373_v2, %v371_v9 }
 0x47d   : > { %5031 = vrot.lane.b32.xlu0 %v5029_v4, %s12426_s24  ;;  %v372_v60 = vld [vmem:[%s12425_s1] sm:$0xff]  ;;  %v5165_v55 = vadd.f32 %v5164_v28, %v5161_v21  ;;  %v5365_v38 = vmul.f32 %v5362_v43, %v5358_v37  ;;  %v12427_v23 = vld [vmem:[#allocation50_spill] sm:$0xff]  ;;  %v5041_v39 = vmul.f32 %v5037_v10, %v10090_v17  ;;  %v3947_v27 = vrot.slane %v10037_v33, 7  ;;  %s10285_s1 = sld [smem:[#allocation10 + $0x7]] }
 0x47e   : > { %v5357_v35 = vld [vmem:[#allocation5] ss:$8 sm:$0x7]  ;;  %v5174_v15 = vld [vmem:[#allocation5 + $0x31] ss:$8 sm:$0x7]  ;;  %v374_v48 = vmul.f32 %v372_v60, %v370_v57  ;;  %v4336_v4 = vmul.f32 %v10073_v14, %v4332_v40 }
 0x47f   : > { %v5002_v22 = vrot.slane %v12427_v23, 7  ;;  %v5173_v28 = vld [vmem:[#allocation5 + $0x1] ss:$8 sm:$0x7]  ;;  %v5364_v34 = vmul.f32 %v5362_v43, %v5357_v35  ;;  %v5045_v37 = vadd.f32 %v5044_v45, %v5041_v39  ;;  %v5371_v10 = vmul.f32 %v5365_v38, %v10084_v20 }
 0x480   : > { %4136 = vrot.lane.b32.xlu1 %v4134_v30, %s12421_s26  ;;  %v5180_v30 = vmul.f32 %v5174_v15, %v10062_v25  ;;  %v4340_v21 = vadd.f32 %v4339_v61, %v4336_v4  ;;  %v4143_v2 = vld [vmem:[#allocation5 + $0x32] ss:$8 sm:$0x7]  ;;  %v5177_v9 = vmul.f32 %v5173_v28, %v10060_v11  ;;  %v4294_v57 = vld [vmem:[#allocation5 + $0x31] ss:$8 sm:$0x7]  ;;  %v10309_v4 = vstv %s10263_s14 }
 0x481   : > { %5167 = vrot.lane.b32.xlu0 %v5165_v55, %s12421_s26  ;;  %v10289_v40 = vsel %vm718_vm6, %v5002_v22, %v12427_v23  ;;  %v10292_v60 = vsel %vm376_vm4, %v375_v54, 0.0  ;;  %v10295_v43 = vsel %vm376_vm4, %v374_v48, 0.0  ;;  %v5368_v45 = vmul.f32 %v5364_v34, %v10090_v17  ;;  %v4142_v35 = vld [vmem:[#allocation5 + $0x2] ss:$8 sm:$0x7]  ;;  %s352_s14 = sand.u32 1, %s7860_s10  }
 0x482   : > { %v10301_v55 = vsel %vm376_vm4, %v3947_v27, %v10037_v33  ;;  %v5181_v61 = vadd.f32 %v5180_v30, %v5177_v9  ;;  %v4149_v15 = vmul.f32 %v10064_v47, %v4143_v2  ;;  %v4293_v38 = vld [vmem:[#allocation5 + $0x1] ss:$8 sm:$0x7]  ;;  %v10305_v23 = vstv %s10260_s16  ;;  %v3900_v22 = vld [vmem:[#allocation5 + $0x18] ss:$8 sm:$0x3] }
 0x483   : > { %v5372_v39 = vadd.f32 %v5371_v10, %v5368_v45  ;;  %v4300_v54 = vmul.f32 %v4294_v57, %v10215_v51  ;;  %v4310_v48 = vld [vmem:[#allocation5 + $0x32] ss:$8 sm:$0x7]  ;;  %v10314_v33 = vstv %s10239_s29  ;;  %v4146_v28 = vmul.f32 %v10073_v14, %v4142_v35  ;;  %v4471_v34 = vld [vmem:[#allocation5 + $0x31] ss:$8 sm:$0x7] }
 0x484   : > { %5047 = vrot.lane.b32.xlu1 %v5045_v37, %s12426_s24  ;;  %v4922_v27 = vld [vmem:[#allocation5 + $0x3] ss:$8 sm:$0x7]  ;;  %v4260_v37 = vld [vmem:[#allocation5 + $0x18] ss:$8 sm:$0x7]  ;;  %v10319_v30 = vstv %s10252_s21  ;;  %v10325_v10 = vstv %s10268_s17  ;;  %v4297_v9 = vmul.f32 %v10209_v50, %v4293_v38  ;;  %v4316_v58 = vmul.f32 %v10118_v8, %v4310_v48 }
 0x485   : > { %4342 = vrot.lane.b32.xlu0 %v4340_v21, %s12426_s24  ;;  %v10322_v21 = vstv %s10246_s27  ;;  %v5107_v2 = vld [vmem:[#allocation5 + $0x4] ss:$8 sm:$0x7]  ;;  %v4309_v57 = vld [vmem:[#allocation5 + $0x2] ss:$8 sm:$0x7]  ;;  %v4150_v52 = vadd.f32 %v4149_v15, %v4146_v28  ;;  %v4477_v7 = vmul.f32 %v10077_v24, %v4471_v34  ;;  %v4474_v34 = vmul.f32 %v10081_v31, %v4470_v49 }
 0x486   : > { %12428 = vst [vmem:[#allocation82_spill] sm:$0xff] %v10322_v21  ;;  %v4923_v45 = vld [vmem:[#allocation5 + $0x33] ss:$8 sm:$0x7]  ;;  %v4301_v19 = vadd.f32 %v4300_v54, %v4297_v9  ;;  %v4313_v15 = vmul.f32 %v10116_v41, %v4309_v57  ;;  %v4264_v62 = vmul.f32 %v4260_v37, %v10124_v32  ;;  %s6759_s29 = sld [smem:[#allocation10 + $0x86]]  ;;  %s6743_s17 = sshll.u32 %s352_s14, 6 }
 0x487   : > { %v7754_v35 = vld [vmem:[%s11708_s8] ss:$2 sm:$0x3]  ;;  %v4929_v38 = vmul.f32 %v4923_v45, %v10126_v44  ;;  %v5326_v29 = vld [vmem:[#allocation5 + $0x31] ss:$8 sm:$0x7]  ;;  %v4478_v6 = vadd.f32 %v4477_v7, %v4474_v34 }
 0x488   : > { %5183 = vrot.lane.b32.xlu1 %v5181_v61, %s12421_s26  ;;  %v3902_v61 = vmul.f32 %v7754_v35, %v3900_v22  ;;  %v5190_v3 = vld [vmem:[#allocation5 + $0x32] ss:$8 sm:$0x7]  ;;  %v5118_v22 = vld [vmem:[#allocation5 + $0x35] ss:$8 sm:$0x7]  ;;  %v4317_v57 = vadd.f32 %v4316_v58, %v4313_v15  ;;  %v5332_v49 = vmul.f32 %v5326_v29, %v10058_v16 }
 0x489   : > { %5374 = vrot.lane.b32.xlu0 %v5372_v39, %s12426_s24  ;;  %v4926_v39 = vmul.f32 %v4922_v27, %v10124_v32  ;;  %v4999_v48 = vld [vmem:[#allocation5 + $0x32] ss:$8 sm:$0x7]  ;;  %v3903_v27 = vmul.f32 %v7754_v35, %v3901_v53  ;;  %v4261_v45 = vld [vmem:[#allocation5 + $0x48] ss:$8 sm:$0x7] }
 0x48a   : > { %v5117_v54 = vld [vmem:[#allocation5 + $0x5] ss:$8 sm:$0x7]  ;;  %v5189_v9 = vld [vmem:[#allocation5 + $0x2] ss:$8 sm:$0x7]  ;;  %v3906_v5 = vmul.f32 %v10150_v12, %v3902_v61  ;;  %v5006_v32 = vmul.f32 %v10289_v40, %v4999_v48 }
 0x48b   : > { %v10346_v28 = vadd.f32 %v4929_v38, %v4926_v39  ;;  %v5128_v14 = vld [vmem:[#allocation5 + $0x36] ss:$8 sm:$0x7]  ;;  %v5196_v39 = vmul.f32 %v5190_v3, %v10084_v20  ;;  %v5325_v53 = vld [vmem:[#allocation5 + $0x1] ss:$8 sm:$0x7]  ;;  %v3909_v38 = vmul.f32 %v10155_v63, %v3903_v27  ;;  %v5193_v3 = vmul.f32 %v5189_v9, %v10090_v17 }
 0x48c   : > { %4152 = vrot.lane.b32.xlu1 %v4150_v52, %s12421_s26  ;;  %v5111_v52 = vmul.f32 %v5107_v2, %v10322_v21  ;;  %v4998_v35 = vld [vmem:[#allocation5 + $0x2] ss:$8 sm:$0x7]  ;;  %v5114_v2 = vmul.f32 %v5108_v0, %v10325_v10  ;;  %v12431_v27 = vstv %s10274_s28  ;;  %v5329_v29 = vmul.f32 %v5325_v53, %v10056_v42  ;;  %s6758_s16 = sld [smem:[#allocation10 + $0x6]] }
 0x48d   : > { %4303 = vrot.lane.b32.xlu0 %v4301_v19, %s12421_s26  ;;  %v4267_v19 = vmul.f32 %v4261_v45, %v10126_v44  ;;  %v5342_v61 = vld [vmem:[#allocation5 + $0x32] ss:$8 sm:$0x7]  ;;  %v10362_v58 = vadd.f32 %v3909_v38, %v3906_v5  ;;  %v5124_v21 = vmul.f32 %v5118_v22, %v12431_v27  ;;  %v5127_v44 = vld [vmem:[#allocation5 + $0x6] ss:$8 sm:$0x7]  ;;  %v5005_v48 = vmul.f32 %v10289_v40, %v4998_v35 }
 0x48e   : > { %v3944_v37 = vld [vmem:[#allocation5 + $0x32] ss:$8 sm:$0x7]  ;;  %v12432_v0 = vstv %s10270_s23  ;;  %v5197_v9 = vadd.f32 %v5196_v39, %v5193_v3  ;;  %v5348_v5 = vmul.f32 %v5342_v61, %v10062_v25  ;;  %v4159_v22 = vld [vmem:[#allocation5 + $0x33] ss:$8 sm:$0x7]  ;;  %v5012_v53 = vmul.f32 %v5006_v32, %v10058_v16 }
 0x48f   : > { %v4268_v15 = vadd.f32 %v4267_v19, %v4264_v62  ;;  %v5341_v7 = vld [vmem:[#allocation5 + $0x2] ss:$8 sm:$0x7]  ;;  %v5121_v34 = vmul.f32 %v5117_v54, %v12432_v0  ;;  %v3951_v62 = vmul.f32 %v10301_v55, %v3944_v37  ;;  %v5333_v19 = vadd.f32 %v5332_v49, %v5329_v29  ;;  %v5098_v40 = vld [vmem:[#allocation5 + $0x3] ss:$8 sm:$0x7] }
 0x490   : > { %4319 = vrot.lane.b32.xlu1 %v4317_v57, %s12421_s26  ;;  %v3943_v45 = vld [vmem:[#allocation5 + $0x2] ss:$8 sm:$0x7]  ;;  %v5134_v57 = vmul.f32 %v10342_v46, %v5128_v14  ;;  %v5099_v35 = vld [vmem:[#allocation5 + $0x33] ss:$8 sm:$0x7]  ;;  %v5131_v54 = vmul.f32 %v10339_v1, %v5127_v44  ;;  %v5345_v14 = vmul.f32 %v5341_v7, %v10060_v11  ;;  %v5115_v37 = vadd.f32 %v5114_v2, %v5111_v52 }
 0x491   : > { %4480 = vrot.lane.b32.xlu0 %v4478_v6, %s12422_s25  ;;  %v10375_v38 = vadd.f32 %v4268_v15, %v10174_v56  ;;  %v5147_v6 = vld [vmem:[#allocation5 + $0x18] ss:$8 sm:$0x7]  ;;  %v3950_v39 = vmul.f32 %v10301_v55, %v3943_v45  ;;  %v4381_v61 = vld [vmem:[#allocation5 + $0x33] ss:$8 sm:$0x7]  ;;  %v5125_v56 = vadd.f32 %v5124_v21, %v5121_v34  ;;  %v5009_v49 = vmul.f32 %v5005_v48, %v10056_v42 }
 0x492   : > { %v4838_v0 = vld [vmem:[#allocation5 + $0x18] ss:$8 sm:$0x7]  ;;  %v5102_v32 = vmul.f32 %v5098_v40, %v10314_v33  ;;  %v5105_v44 = vmul.f32 %v5099_v35, %v10319_v30  ;;  %v5135_v29 = vadd.f32 %v5134_v57, %v5131_v54  ;;  %v3957_v7 = vmul.f32 %v10215_v51, %v3951_v62  ;;  %v4158_v45 = vld [vmem:[#allocation5 + $0x3] ss:$8 sm:$0x7] }
 0x493   : > { %12433 = vst [vmem:[#allocation85_spill] sm:$0xff] %v10375_v38  ;;  %v5148_v3 = vld [vmem:[#allocation5 + $0x48] ss:$8 sm:$0x7]  ;;  %v5151_v21 = vmul.f32 %v5147_v6, %v10305_v23  ;;  %v4165_v48 = vmul.f32 %v10058_v16, %v4159_v22  ;;  %v4383_v35 = vmul.f32 %v4381_v61, %v10133_v36  ;;  %v12434_v38 = vstv %s10285_s1 }
 0x494   : > { %5199 = vrot.lane.b32.xlu1 %v5197_v9, %s12421_s26  ;;  %v4620_v15 = vld [vmem:[#allocation5 + $0x30] ss:$8 sm:$0x7]  ;;  %v5349_v9 = vadd.f32 %v5348_v5, %v5345_v14  ;;  %v4380_v52 = vld [vmem:[#allocation5 + $0x3] ss:$8 sm:$0x7]  ;;  %v5154_v2 = vmul.f32 %v5148_v3, %v10309_v4  ;;  %v5106_v57 = vadd.f32 %v5105_v44, %v5102_v32  ;;  %v3954_v5 = vmul.f32 %v10209_v50, %v3950_v39 }
 0x495   : > { %5335 = vrot.lane.b32.xlu0 %v5333_v19, %s12421_s26  ;;  %v4839_v27 = vld [vmem:[#allocation5 + $0x48] ss:$8 sm:$0x7]  ;;  %v4639_v34 = vld [vmem:[#allocation5 + $0x32] ss:$8 sm:$0x7]  ;;  %v5013_v19 = vadd.f32 %v5012_v53, %v5009_v49  ;;  %v4842_v1 = vmul.f32 %v4838_v0, %v12434_v38  ;;  %v12435_v6 = vstv %s10311_s3  ;;  %v4626_v3 = vmul.f32 %v10155_v63, %v4620_v15 }
 0x496   : > { %v4499_v40 = vld [vmem:[#allocation5 + $0x33] ss:$8 sm:$0x7]  ;;  %v4619_v54 = vld [vmem:[#allocation5] ss:$8 sm:$0x7]  ;;  %v5155_v14 = vadd.f32 %v5154_v2, %v5151_v21  ;;  %v4845_v46 = vmul.f32 %v4839_v27, %v12435_v6  ;;  %v4162_v22 = vmul.f32 %v10056_v42, %v4158_v45  ;;  %v4382_v49 = vmul.f32 %v4380_v52, %v10133_v36 }
 0x497   : > { %v4811_v62 = vld [vmem:[#allocation5 + $0x33] ss:$8 sm:$0x7]  ;;  %v4638_v53 = vld [vmem:[#allocation5 + $0x2] ss:$8 sm:$0x7]  ;;  %v5116_v32 = vadd.f32 %v5115_v37, %v5106_v57  ;;  %v4645_v44 = vmul.f32 %v10077_v24, %v4639_v34  ;;  %v4505_v21 = vmul.f32 %v10163_v26, %v4499_v40  ;;  %v4389_v15 = vmul.f32 %v4383_v35, %v10084_v20 }
 0x498   : > { %5351 = vrot.lane.b32.xlu1 %v5349_v9, %s12421_s26  ;;  %v4498_v61 = vld [vmem:[#allocation5 + $0x3] ss:$8 sm:$0x7]  ;;  %v3958_v9 = vadd.f32 %v3957_v7, %v3954_v5  ;;  %v10404_v0 = vadd.f32 %v4845_v46, %v4842_v1  ;;  %v4166_v63 = vadd.f32 %v4165_v48, %v4162_v22  ;;  %v4813_v2 = vmul.f32 %v4811_v62, %v10133_v36  ;;  %v4659_v62 = vld [vmem:[#allocation5 + $0x34] ss:$8 sm:$0x7] }
 0x499   : > { %5015 = vrot.lane.b32.xlu0 %v5013_v19, %s12421_s26  ;;  %v4649_v39 = vld [vmem:[#allocation5 + $0x33] ss:$8 sm:$0x7]  ;;  %v5126_v19 = vadd.f32 %v5125_v56, %v5116_v32  ;;  %v379_v37 = vadd.f32 %v10292_v60, %v10295_v43  ;;  %v4623_v52 = vmul.f32 %v10150_v12, %v4619_v54  ;;  %v4642_v7 = vmul.f32 %v10081_v31, %v4638_v53  ;;  %v4658_v22 = vld [vmem:[#allocation5 + $0x4] ss:$8 sm:$0x7] }
 0x49a   : > { %v4810_v38 = vld [vmem:[#allocation5 + $0x3] ss:$8 sm:$0x7]  ;;  %12436 = vst [vmem:[#allocation86_spill] sm:$0xff] %v10404_v0  ;;  %v4502_v1 = vmul.f32 %v10160_v13, %v4498_v61  ;;  %v4655_v46 = vmul.f32 %v4649_v39, %v10215_v51  ;;  %v4386_v20 = vmul.f32 %v4382_v49, %v10090_v17  ;;  %v4819_v54 = vmul.f32 %v10309_v4, %v4813_v2 }
 0x49b   : > { %v4648_v27 = vld [vmem:[#allocation5 + $0x3] ss:$8 sm:$0x7]  ;;  %v4812_v34 = vmul.f32 %v4810_v38, %v10133_v36  ;;  %v5136_v48 = vadd.f32 %v5135_v29, %v5126_v19  ;;  %v4627_v40 = vadd.f32 %v4626_v3, %v4623_v52  ;;  %v4646_v35 = vadd.f32 %v4645_v44, %v4642_v7  ;;  %v4669_v39 = vld [vmem:[#allocation5 + $0x35] ss:$8 sm:$0x7] }
 0x49c   : > { %v5270_v45 = vld [vmem:[#allocation5 + $0x33] ss:$8 sm:$0x7]  ;;  %3960 = vrot.lane.b32.xlu1 %v3958_v9, %s12421_s26  ;;  %v4652_v60 = vmul.f32 %v10209_v50, %v4648_v27  ;;  %v4506_v12 = vadd.f32 %v4505_v21, %v4502_v1  ;;  %v4390_v57 = vadd.f32 %v4389_v15, %v4386_v20  ;;  %v380_v49 = vrot.slane %v379_v37, 4 }
 0x49d   : > { %4168 = vrot.lane.b32.xlu0 %v4166_v63, %s12421_s26  ;;  %v5269_v56 = vld [vmem:[#allocation5 + $0x3] ss:$8 sm:$0x7]  ;;  %v5272_v43 = vmul.f32 %v5270_v45, %v10133_v36  ;;  %v5146_v5 = vadd.f32 %v10179_v18, %v5136_v48  ;;  %v4637_v6 = vadd.f32 %v10234_v59, %v4627_v40  ;;  %v4816_v3 = vmul.f32 %v10305_v23, %v4812_v34  ;;  %v4689_v19 = vld [vmem:[#allocation5 + $0x37] ss:$8 sm:$0x7] }
 0x49e   : > { %v5271_v17 = vmul.f32 %v5269_v56, %v10133_v36  ;;  %v4656_v29 = vadd.f32 %v4655_v46, %v4652_v60  ;;  %v4665_v18 = vmul.f32 %v10118_v8, %v4659_v62  ;;  %v4662_v59 = vmul.f32 %v10116_v41, %v4658_v22  ;;  %v4679_v8 = vld [vmem:[#allocation5 + $0x36] ss:$8 sm:$0x7]  ;;  %v4688_v52 = vld [vmem:[#allocation5 + $0x7] ss:$8 sm:$0x7] }
 0x49f   : > { %v10427_v53 = vadd.f32 %v5155_v14, %v5146_v5  ;;  %v5278_v61 = vmul.f32 %v5272_v43, %v10077_v24  ;;  %v4647_v32 = vadd.f32 %v4646_v35, %v4637_v6  ;;  %v4820_v44 = vadd.f32 %v4819_v54, %v4816_v3  ;;  %v4668_v14 = vld [vmem:[#allocation5 + $0x5] ss:$8 sm:$0x7]  ;;  %v4699_v20 = vld [vmem:[#allocation5 + $0x48] ss:$8 sm:$0x7] }
 0x4a0   : > { %4508 = vrot.lane.b32.xlu1 %v4506_v12, %s12422_s25  ;;  %v5275_v36 = vmul.f32 %v5271_v17, %v10081_v31  ;;  %v381_v38 = vadd.f32 %v380_v49, %v379_v37  ;;  %v4666_v24 = vadd.f32 %v4665_v18, %v4662_v59  ;;  %v4675_v27 = vmul.f32 %v10064_v47, %v4669_v39  ;;  %v12437_v63 = vld [vmem:[#allocation79_spill] sm:$0xff] }
 0x4a1   : > { %4392 = vrot.lane.b32.xlu0 %v4390_v57, %s12426_s24  ;;  %v4657_v9 = vadd.f32 %v4656_v29, %v4647_v32  ;;  %v4672_v15 = vmul.f32 %v12437_v63, %v4668_v14  ;;  %v4685_v41 = vmul.f32 %v4679_v8, %v10058_v16  ;;  %v4695_v7 = vmul.f32 %v4689_v19, %v10062_v25  ;;  %v4698_v48 = vld [vmem:[#allocation5 + $0x18] ss:$8 sm:$0x7] }
 0x4a2   : > { %v5279_v21 = vadd.f32 %v5278_v61, %v5275_v36  ;;  %v382_v45 = vrot.slane %v381_v38, 2  ;;  %v4692_v16 = vmul.f32 %v4688_v52, %v10060_v11  ;;  %v4038_v40 = vstv %s10439_s0  ;;  %v387_v11 = vld [vmem:[%s11702_s2] sm:$0xff] }
 0x4a3   : > { %v4667_v2 = vadd.f32 %v4666_v24, %v4657_v9  ;;  %v4676_v31 = vadd.f32 %v4675_v27, %v4672_v15  ;;  %v4705_v43 = vmul.f32 %v4699_v20, %v4038_v40  ;;  %v3967_v15 = vld [vmem:[#allocation5 + $0x30] ss:$8 sm:$0x7]  ;;  %v10487_v52 = vstv %s6759_s29  ;;  %s11637_s29 = scalar_lea.vmem [#allocation11], %s6743_s17 }
 0x4a4   : > { %4932 = vrot.lane.b32.xlu1 %v10346_v28, %s12422_s25  ;;  %v4678_v28 = vld [vmem:[#allocation5 + $0x6] ss:$8 sm:$0x7]  ;;  %v383_v1 = vadd.f32 %v382_v45, %v381_v38  ;;  %v4696_v12 = vadd.f32 %v4695_v7, %v4692_v16  ;;  %v3973_v19 = vmul.f32 %v10163_v26, %v3967_v15  ;;  %v10492_v20 = vstv %s6758_s16  ;;  %s6906_s16 = sshll.u32 %s7964_s13, 10  ;;  %s11658_s13 = scalar_lea.sflag [#allocation8], %s352_s14 }
 0x4a5   : > { %4822 = vrot.lane.b32.xlu0 %v4820_v44, %s12422_s25  ;;  %v4682_v47 = vmul.f32 %v10056_v42, %v4678_v28  ;;  %v4677_v37 = vadd.f32 %v4676_v31, %v4667_v2  ;;  %v4035_v42 = vstv %s10442_s22  ;;  %v388_v44 = vld [vmem:[%s11702_s2 + $0x8] sm:$0xff]  ;;  %v3966_v31 = vld [vmem:[#allocation5] ss:$8 sm:$0x7] }
 0x4a6   : > { %v384_v60 = vrot.slane %v383_v1, 1  ;;  %v4702_v25 = vmul.f32 %v4698_v48, %v4035_v42  ;;  %v3999_v2 = vld [vmem:[#allocation5 + $0x35] ss:$8 sm:$0x7]  ;;  %v3970_v7 = vmul.f32 %v10160_v13, %v3966_v31 }
 0x4a7   : > { %v4686_v46 = vadd.f32 %v4685_v41, %v4682_v47  ;;  %v3998_v41 = vld [vmem:[#allocation5 + $0x5] ss:$8 sm:$0x7]  ;;  %v3983_v47 = vld [vmem:[#allocation5 + $0x31] ss:$8 sm:$0x7] }
 0x4a8   : > { %5281 = vrot.lane.b32.xlu1 %v5279_v21, %s12422_s25  ;;  %v385_v54 = vadd.f32 %v384_v60, %v383_v1  ;;  %v4706_v5 = vadd.f32 %v4705_v43, %v4702_v25  ;;  %v4000_v1 = vmul.f32 %v3998_v41, %v10301_v55  ;;  %v3974_v26 = vadd.f32 %v3973_v19, %v3970_v7  ;;  %v4017_v48 = vld [vmem:[#allocation5 + $0x33] ss:$8 sm:$0x7]  ;;  %v4033_v60 = vld [vmem:[#allocation5 + $0x34] ss:$8 sm:$0x7] }
 0x4a9   : > { %v4687_v56 = vadd.f32 %v4686_v46, %v4677_v37  ;;  %v4001_v37 = vmul.f32 %v3999_v2, %v10301_v55  ;;  %v3989_v46 = vmul.f32 %v10309_v4, %v3983_v47  ;;  %v4016_v43 = vld [vmem:[#allocation5 + $0x3] ss:$8 sm:$0x7]  ;;  %v4790_v19 = vld [vmem:[#allocation5 + $0x4] ss:$8 sm:$0x7] }
 0x4aa   : > { %v386_v17 = vmax.f32 %v385_v54, 0.0  ;;  %v4032_v54 = vld [vmem:[#allocation5 + $0x4] ss:$8 sm:$0x7] }
 0x4ab   : > { %v4697_v57 = vadd.f32 %v4696_v12, %v4687_v56  ;;  %v4007_v56 = vmul.f32 %v10487_v52, %v4001_v37  ;;  %v4004_v12 = vmul.f32 %v10492_v20, %v4000_v1  ;;  %v12444_v15 = vld [vmem:[#allocation17_spill] sm:$0xff] }
 0x4ac   : > { %v10462_v3 = vpop.permute.xlu0 %4358  ;;  %v389_v22 = vmul.f32 %v387_v11, %v386_v17  ;;  %v390_v39 = vmul.f32 %v388_v44, %v386_v17  ;;  %v4039_v17 = vmul.f32 %v4038_v40, %v4033_v60  ;;  %v12441_v44 = vld [vmem:[#allocation15_spill] sm:$0xff] }
 0x4ad   : > { %v10446_v34 = vpop.permute.xlu1 %4184  ;;  %v4707_v62 = vadd.f32 %v4706_v5, %v4697_v57  ;;  %v12439_v57 = vstv %s10311_s3  ;;  %s10532_s3 = sld [smem:[#allocation10 + $0x84]]  ;;  %v4791_v47 = vld [vmem:[#allocation5 + $0x34] ss:$8 sm:$0x7] }
 0x4ae   : > { %v391_v18 = vsel %vm376_vm4, %v389_v22, 0.0  ;;  %v394_v9 = vsel %vm376_vm4, %v390_v39, 0.0  ;;  %v4023_v25 = vmul.f32 %v12439_v57, %v4017_v48  ;;  %v10512_v39 = vsub.s32 2, %v12441_v44  ;;  %v5251_v37 = vld [vmem:[#allocation5 + $0x34] ss:$8 sm:$0x7] }
 0x4af   : > { %v4708_v29 = vsub.f32 0.0, %v4707_v62  ;;  %v4008_v62 = vadd.f32 %v4007_v56, %v4004_v12  ;;  %v4487_v7 = vld [vmem:[#allocation5 + $0x35] ss:$8 sm:$0x7]  ;;  %v4797_v56 = vmul.f32 %v4791_v47, %v10215_v51  ;;  %v5257_v60 = vmul.f32 %v5251_v37, %v10319_v30  ;;  %v12447_v47 = vld [vmem:[#allocation84_spill] sm:$0xff] }
 0x4b0   : > { %12442 = vst [vmem:[#allocation64_spill] sm:$0xff] %v10512_v39  ;;  %v5260_v12 = vld [vmem:[#allocation5 + $0x35] ss:$8 sm:$0x7] }
 0x4b1   : > { %v10453_v35 = vpop.permute.xlu1 %4524  ;;  %v4709_v49 = vmul.f32 1.442695, %v4708_v29  ;;  %v12440_v29 = vstv %s10285_s1  ;;  %s10530_s1 = sld [smem:[#allocation10 + $0x4]]  ;;  %v4800_v57 = vld [vmem:[#allocation5 + $0x5] ss:$8 sm:$0x7] }
 0x4b2   : > { %v4020_v22 = vmul.f32 %v12440_v29, %v4016_v43  ;;  %v4091_v43 = vld [vmem:[#allocation5 + $0x37] ss:$8 sm:$0x7]  ;;  %v5259_v29 = vld [vmem:[#allocation5 + $0x5] ss:$8 sm:$0x7] }
 0x4b3   : > { %7703 = vpow2.f32 %v4709_v49 }
 0x4b4   : > { %v10467_v32 = vpop.permute.xlu0 %4374 }
 0x4b5   : > { %v10457_v6 = vpop.permute.xlu1 %4948 }
 0x4b9   : > { %v10464_v61 = vpop.permute.xlu1 %4200 }
 0x4bd   : > { %v7704_v27 = vpop.eup %7703 }
 0x4be   : > { %v4711_v28 = vadd.f32 1.0, %v7704_v27 }
 0x4c0   : > { %7705 = vrcp.f32 %v4711_v28 }
 0x4c3   : > { %v10472_v36 = vpop.permute.xlu1 %4976 }
 0x4c4   : > { %392 = vadd.xlane.f32.xlu0 %v391_v18  ;;  %v10474_v59 = vpop.permute.xlu0 %4552  ;;  %v4024_v18 = vadd.f32 %v4023_v25, %v4020_v22  ;;  %v11942_v25 = vstv %s10530_s1  ;;  %v4081_v22 = vld [vmem:[#allocation5 + $0x6] ss:$8 sm:$0x7] }
 0x4c7   : > { %v3922_v14 = vpop.permute.xlu1 %3921 }
 0x4c8   : > { %v10477_v21 = vpop.permute.xlu0 %4287  ;;  %v3923_v38 = vrot.slane %v3922_v14, 1 }
 0x4ca   : > { %v3924_v24 = vsel %vm494_vm7, %v3922_v14, %v3923_v38  ;;  %v7706_v14 = vpop.eup %7705 }
 0x4cb   : > { %v3926_v8 = vadd.f32 %v3924_v24, %v10362_v58  ;;  %v3982_v58 = vld [vmem:[#allocation5 + $0x1] ss:$8 sm:$0x7]  ;;  %v4734_v40 = vrot.slane %v7706_v14, %v10512_v39  ;;  %v4726_v2 = vrot.slane %v7706_v14, %v12444_v15  ;;  %v5288_v15 = vld [vmem:[#allocation5 + $0x37] ss:$8 sm:$0x7] }
 0x4cc   : > { %395 = vadd.xlane.f32.xlu1 %v394_v9  ;;  %v10481_v63 = vpop.permute.xlu0 %5319  ;;  %v3986_v13 = vmul.f32 %v10305_v23, %v3982_v58  ;;  %v4036_v23 = vmul.f32 %v4035_v42, %v4032_v54  ;;  %v12443_v24 = vld [vmem:[#allocation16_spill] sm:$0xff]  ;;  %v10521_v42 = vpop.permute.xlu1 %4860  ;;  %v11941_v54 = vstv %s10532_s3 }
 0x4cd   : > { %v4730_v27 = vrot.slane %v7706_v14, %v12443_v24  ;;  %v5250_v58 = vld [vmem:[#allocation5 + $0x4] ss:$8 sm:$0x7]  ;;  %v5266_v14 = vmul.f32 %v5260_v12, %v10325_v10 }
 0x4ce   : > { %v3990_v4 = vadd.f32 %v3989_v46, %v3986_v13  ;;  %v4040_v38 = vadd.f32 %v4039_v17, %v4036_v23  ;;  %v4486_v46 = vld [vmem:[#allocation5 + $0x5] ss:$8 sm:$0x7]  ;;  %v5254_v51 = vmul.f32 %v5250_v58, %v10314_v33  ;;  %v4082_v23 = vld [vmem:[#allocation5 + $0x36] ss:$8 sm:$0x7]  ;;  %v4804_v58 = vmul.f32 %v11942_v25, %v4800_v57 }
 0x4cf   : > { %v4911_v13 = vld [vmem:[#allocation5 + $0x5] ss:$8 sm:$0x7]  ;;  %v4088_v12 = vmul.f32 %v10319_v30, %v4082_v23  ;;  %v4085_v23 = vmul.f32 %v10314_v33, %v4081_v22  ;;  %v4444_v22 = vld [vmem:[#allocation5 + $0x32] ss:$8 sm:$0x7] }
 0x4d0   : > { %v10483_v45 = vpop.permute.xlu0 %4568  ;;  %v4913_v44 = vmul.f32 %v4911_v13, %v10301_v55 }
 0x4d2   : > { %v4917_v57 = vmul.f32 %v4913_v44, %v10314_v33 }
 0x4d4   : > { %v10494_v16 = vpop.permute.xlu0 %4992 }
 0x4d5   : > { %12438 = vst [vmem:[#allocation30_spill] sm:$0xff] %v10494_v16 }
 0x4d8   : > { %v3938_v5 = vpop.permute.xlu0 %3937 }
 0x4d9   : > { %v3939_v11 = vrot.slane %v3938_v5, 1 }
 0x4da   : > { %3976 = vrot.lane.b32.xlu0 %v3974_v26, %s12426_s24  ;;  %v4912_v26 = vld [vmem:[#allocation5 + $0x35] ss:$8 sm:$0x7] }
 0x4db   : > { %v3940_v49 = vsel %vm494_vm7, %v3938_v5, %v3939_v11  ;;  %v4794_v5 = vmul.f32 %v4790_v19, %v10209_v50  ;;  %v4914_v17 = vmul.f32 %v4912_v26, %v10301_v55  ;;  %v4801_v11 = vld [vmem:[#allocation5 + $0x35] ss:$8 sm:$0x7]  ;;  %v4097_v50 = vmul.f32 %v10325_v10, %v4091_v43  ;;  %v4101_v43 = vld [vmem:[#allocation5 + $0x48] ss:$8 sm:$0x7] }
 0x4dc   : > { %v10514_v9 = vadd.f32 %v3940_v49, %v3926_v8  ;;  %v4090_v49 = vld [vmem:[#allocation5 + $0x7] ss:$8 sm:$0x7]  ;;  %v5258_v19 = vadd.f32 %v5257_v60, %v5254_v51  ;;  %v12448_v26 = vld [vmem:[#allocation82_spill] sm:$0xff] }
 0x4dd   : > { %3992 = vrot.lane.b32.xlu1 %v3990_v4, %s12426_s24  ;;  %v4489_v4 = vmul.f32 %v4487_v7, %v10301_v55  ;;  %v4530_v7 = vld [vmem:[#allocation5 + $0x18] ss:$8 sm:$0x7]  ;;  %v5263_v13 = vmul.f32 %v5259_v29, %v12448_v26  ;;  %v4920_v60 = vmul.f32 %v4914_v17, %v10319_v30  ;;  %v5287_v51 = vld [vmem:[#allocation5 + $0x7] ss:$8 sm:$0x7]  ;;  %v5294_v17 = vmul.f32 %v5288_v15, %v12447_v47 }
 0x4de   : > { %4010 = vrot.lane.b32.xlu0 %v4008_v62, %s12421_s26  ;;  %v4488_v62 = vmul.f32 %v4486_v46, %v10301_v55  ;;  %v4807_v46 = vmul.f32 %v11941_v54, %v4801_v11  ;;  %v4954_v11 = vld [vmem:[#allocation5 + $0x18] ss:$8 sm:$0x7] }
 0x4df   : > { %v4495_v37 = vmul.f32 %v12447_v47, %v4489_v4  ;;  %v4289_v4 = vrot.slane %v10477_v21, 1  ;;  %v5267_v54 = vadd.f32 %v5266_v14, %v5263_v13  ;;  %v5297_v14 = vld [vmem:[#allocation5 + $0x18] ss:$8 sm:$0x7] }
 0x4e0   : > { %v10582_v44 = vadd.f32 %v4807_v46, %v4804_v58  ;;  %v4443_v13 = vld [vmem:[#allocation5 + $0x2] ss:$8 sm:$0x7] }
 0x4e1   : > { %4026 = vrot.lane.b32.xlu1 %v4024_v18, %s12426_s24  ;;  %v4290_v15 = vsel %vm494_vm7, %v10477_v21, %v4289_v4  ;;  %v4762_v58 = vld [vmem:[#allocation5 + $0x2] ss:$8 sm:$0x7]  ;;  %v4445_v4 = vmul.f32 %v4443_v13, %v10301_v55 }
 0x4e2   : > { %4042 = vrot.lane.b32.xlu0 %v4040_v38, %s12426_s24  ;;  %v10556_v38 = vadd.f32 %v4797_v56, %v4794_v5  ;;  %v4094_v56 = vmul.f32 %v12448_v26, %v4090_v49  ;;  %v12449_v5 = vld [vmem:[#allocation83_spill] sm:$0xff] }
 0x4e3   : > { %v4492_v39 = vmul.f32 %v12449_v5, %v4488_v62  ;;  %v4100_v49 = vld [vmem:[#allocation5 + $0x18] ss:$8 sm:$0x7]  ;;  %v4532_v62 = vmul.f32 %v4530_v7, %v10301_v55  ;;  %v5291_v7 = vmul.f32 %v5287_v51, %v12449_v5 }
 0x4e4   : > { %v4098_v25 = vadd.f32 %v4097_v50, %v4094_v56  ;;  %v4089_v50 = vadd.f32 %v4088_v12, %v4085_v23  ;;  %v10585_v56 = vadd.f32 %v4920_v60, %v4917_v57  ;;  %v4754_v60 = vld [vmem:[#allocation5 + $0x31] ss:$8 sm:$0x7]  ;;  %v4446_v23 = vmul.f32 %v4444_v22, %v10301_v55 }
 0x4e5   : > { %4739 = vrot.lane.b32.xlu1 %v4734_v40, %s12426_s24  ;;  %v10580_v16 = vadd.f32 %v4495_v37, %v4492_v39  ;;  %v4753_v37 = vld [vmem:[#allocation5 + $0x1] ss:$8 sm:$0x7]  ;;  %v10601_v51 = vmul.f32 %v4532_v62, %v10492_v20  ;;  %v10603_v21 = vadd.f32 %v5294_v17, %v5291_v7  ;;  %v4766_v62 = vmul.f32 %v4762_v58, %v12448_v26 }
 0x4e6   : > { %4737 = vrot.lane.b32.xlu0 %v4730_v27, %s12426_s24  ;;  %v4828_v27 = vld [vmem:[#allocation5 + $0x7] ss:$8 sm:$0x7]  ;;  %v4099_v12 = vadd.f32 %v4098_v25, %v4089_v50  ;;  %v12455_v50 = vstv %s10530_s1  ;;  %v4760_v17 = vmul.f32 %v4754_v60, %v10319_v30  ;;  %v4360_v58 = vrot.slane %v10462_v3, 1  ;;  %s6641_s1 = sshll.u32 %s11637_s29, 4  ;;  %s11652_s1 = int_to_ptr.vmem [resolvable:$true] %s6641_s1 }
 0x4ea   : > { %v10525_v8 = vpop.permute.xlu1 %4464  ;;  %4735 = vrot.lane.b32.xlu0 %v4726_v2, %s12426_s24  ;;  %v4829_v2 = vld [vmem:[#allocation5 + $0x37] ss:$8 sm:$0x7] }
 0x4eb   : > { %v10528_v28 = vpop.permute.xlu0 %4120  ;;  %v4835_v29 = vmul.f32 %v4829_v2, %v10487_v52  ;;  %v4832_v2 = vmul.f32 %v4828_v27, %v10492_v20  ;;  %v4757_v20 = vmul.f32 %v4753_v37, %v10314_v33  ;;  %v4452_v37 = vmul.f32 %v10319_v30, %v4446_v23 }
 0x4ec   : > { %v4122_v60 = vrot.slane %v10528_v28, 1  ;;  %v4376_v30 = vrot.slane %v10467_v32, 1 }
 0x4ed   : > { %v10595_v27 = vadd.f32 %v4835_v29, %v4832_v2  ;;  %v12454_v2 = vld [vmem:[#allocation85_spill] sm:$0xff] }
 0x4ee   : > { %v10534_v31 = vpop.permute.xlu1 %4784 }
 0x4ef   : > { %v10536_v41 = vpop.permute.xlu0 %5031 }
 0x4f0   : > { %12445 = vst [vmem:[#allocation22_spill] sm:$0xff] %v10536_v41  ;;  %v12451_v41 = vstv %s10274_s28  ;;  %s7891_s28 = smov [#allocation11]  }
 0x4f1   : > { %v4107_v0 = vmul.f32 %v12451_v41, %v4101_v43  ;;  %v12452_v41 = vstv %s10270_s23  ;;  %v10597_v43 = vadd.f32 %v5267_v54, %v5258_v19  ;;  %v4763_v54 = vld [vmem:[#allocation5 + $0x32] ss:$8 sm:$0x7]  ;;  %s7798_s23 = scalar_lea.vmem %s11652_s1, 1024  ;;  %s7802_s0 = sshll.u32 %s7891_s28, 4  ;;  %s7803_s0 = int_to_ptr.vmem [resolvable:$false] %s7802_s0 }
 0x4f2   : > { %v10538_v1 = vpop.permute.xlu1 %4136  ;;  %v4104_v39 = vmul.f32 %v12452_v41, %v4100_v49  ;;  %v4292_v41 = vadd.f32 %v4290_v15, %v12454_v2  ;;  %v4769_v26 = vmul.f32 %v4763_v54, %v10325_v10  ;;  %p7799_p12 = scmp.ne.s32.totalorder %s11652_s1, %s7798_s23  ;;  %s7804_s22 = scalar_lea.vmem %s7803_s0, 2048 }
 0x4f3   : > { %v10541_v48 = vpop.permute.xlu0 %5167  ;;  %12453 = vst [vmem:[#allocation19_spill] sm:$0xff] %v10597_v43  ;;  %v10613_v43 = vmul.f32 %v5297_v14, %v12455_v50  ;;  %v4449_v14 = vmul.f32 %v10314_v33, %v4445_v4  ;;  %p7805_p5 = scmp.lt.s32.totalorder %s11652_s1, %s7803_s0  ;;  %p7806_p9 = scmp.lt.s32.totalorder %s7804_s22, %s7798_s23 }
 0x4f4   : > { %v5169_v57 = vrot.slane %v10541_v48, 1  ;;  %v4108_v49 = vadd.f32 %v4107_v0, %v4104_v39  ;;  %v4531_v39 = vld [vmem:[#allocation5 + $0x48] ss:$8 sm:$0x7]  ;;  %p7800_p1 = pnand %p7799_p12, %p12667_p13 }
 0x4f5   : > { %v4533_v33 = vmul.f32 %v4531_v39, %v10301_v55  ;;  %v4377_v39 = vsel %vm606_vm11, %v10467_v32, %v4376_v30  ;;  %v12456_v32 = vstv %s10532_s3  ;;  %p7807_p10 = por %p7806_p9, %p7805_p5 }
 0x4f6   : > { %v10551_v18 = vpop.permute.xlu1 %5047  ;;  %v5170_v22 = vsel %vm606_vm11, %v10541_v48, %v5169_v57  ;;  %v4109_v2 = vadd.f32 %v4108_v49, %v4099_v12  ;;  %v4761_v57 = vadd.f32 %v4760_v17, %v4757_v20  ;;  %v4466_v12 = vrot.slane %v10525_v8, 1  ;;  %p7801_p6 = pneg %p7800_p1 }
 0x4f7   : > { %12446 = vst [vmem:[#allocation42_spill] sm:$0xff] %v10551_v18  ;;  %v10558_v40 = vpop.permute.xlu0 %4342  ;;  %v4138_v49 = vrot.slane %v10538_v1, 1  ;;  %v4361_v20 = vsel %vm606_vm11, %v10462_v3, %v4360_v58  ;;  %v4123_v17 = vsel %vm606_vm11, %v10528_v28, %v4122_v60  ;;  %v4453_v60 = vadd.f32 %v4452_v37, %v4449_v14 }
 0x4f8   : > { %v4344_v7 = vrot.slane %v10558_v40, 1  ;;  %v4467_v3 = vsel %vm494_vm7, %v10525_v8, %v4466_v12  ;;  %p7808_p2 = pnand %p7807_p10, %p7801_p6 }
 0x4f9   : > { %v4469_v8 = vadd.f32 %v4467_v3, %v4453_v60 }
 0x4fa   : > { %v5184_v24 = vpop.permute.xlu1 %5183  ;;  %v4345_v10 = vsel %vm643_vm8, %v10558_v40, %v4344_v7  ;;  %v4786_v40 = vrot.slane %v10534_v31, 1 }
 0x4fb   : > { %v10574_v18 = vpop.permute.xlu0 %5374  ;;  %v5185_v19 = vrot.slane %v5184_v24, 1 }
 0x4fc   : > { %12450 = vst [vmem:[#allocation66_spill] sm:$0xff] %v10574_v18  ;;  %v4956_v18 = vmul.f32 %v4954_v11, %v10301_v55  ;;  %v4787_v12 = vsel %vm494_vm7, %v10534_v31, %v4786_v40 }
 0x4fe   : > { %v10593_v46 = vpop.permute.xlu1 %4152  ;;  %v10609_v25 = vmul.f32 %v12449_v5, %v4956_v18 }
 0x4ff   : > { %v4304_v11 = vpop.permute.xlu0 %4303 }
 0x500   : > { %v4305_v29 = vrot.slane %v4304_v11, 1 }
 0x502   : > { %v4306_v13 = vsel %vm606_vm11, %v4304_v11, %v4305_v29  ;;  %v4320_v0 = vpop.permute.xlu1 %4319  ;;  %v5186_v11 = vsel %vm606_vm11, %v5184_v24, %v5185_v19  ;;  %v5172_v29 = vadd.f32 %v5170_v22, %v10427_v53  ;;  %v4770_v24 = vadd.f32 %v4769_v26, %v4766_v62  ;;  %v4955_v53 = vld [vmem:[#allocation5 + $0x48] ss:$8 sm:$0x7] }
 0x503   : > { %v4308_v15 = vadd.f32 %v4306_v13, %v4292_v41  ;;  %v4321_v18 = vrot.slane %v4320_v0, 1  ;;  %v4481_v5 = vpop.permute.xlu0 %4480  ;;  %v4154_v22 = vrot.slane %v10593_v46, 1  ;;  %v4539_v26 = vmul.f32 %v4533_v33, %v10487_v52 }
 0x504   : > { %v5188_v54 = vadd.f32 %v5186_v11, %v5172_v29  ;;  %v4482_v13 = vrot.slane %v4481_v5, 1  ;;  %v4957_v58 = vmul.f32 %v4955_v53, %v10301_v55  ;;  %v4139_v11 = vsel %vm606_vm11, %v10538_v1, %v4138_v49 }
 0x505   : > { %v4322_v48 = vsel %vm606_vm11, %v4320_v0, %v4321_v18  ;;  %v5298_v18 = vld [vmem:[#allocation5 + $0x48] ss:$8 sm:$0x7]  ;;  %v4155_v55 = vsel %vm606_vm11, %v10593_v46, %v4154_v22  ;;  %v4526_v49 = vrot.slane %v10453_v35, 1  ;;  %v4202_v53 = vrot.slane %v10464_v61, 1 }
 0x506   : > { %v4324_v41 = vadd.f32 %v4322_v48, %v4308_v15  ;;  %v5200_v50 = vpop.permute.xlu1 %5199  ;;  %v10660_v30 = vmul.f32 %v5298_v18, %v12456_v32  ;;  %v4570_v32 = vrot.slane %v10483_v45, 1 }
 0x507   : > { %v5201_v4 = vrot.slane %v5200_v50, 1  ;;  %v10635_v23 = vpop.permute.xlu0 %5335 }
 0x508   : > { %v4347_v19 = vadd.f32 %v4345_v10, %v4324_v41  ;;  %v4125_v41 = vadd.f32 %v4123_v17, %v4109_v2  ;;  %v4483_v10 = vsel %vm494_vm7, %v4481_v5, %v4482_v13  ;;  %v4540_v2 = vadd.f32 %v4539_v26, %v10601_v51 }
 0x509   : > { %v5202_v0 = vsel %vm606_vm11, %v5200_v50, %v5201_v4  ;;  %v4771_v50 = vadd.f32 %v4770_v24, %v4761_v57  ;;  %v4963_v57 = vmul.f32 %v12447_v47, %v4957_v58  ;;  %v4186_v5 = vrot.slane %v10446_v34, 1 }
 0x50a   : > { %v5204_v7 = vadd.f32 %v5202_v0, %v5188_v54  ;;  %v10645_v62 = vpop.permute.xlu1 %5351  ;;  %v4363_v15 = vadd.f32 %v4361_v20, %v4347_v19  ;;  %v4141_v37 = vadd.f32 %v4139_v11, %v4125_v41  ;;  %v4485_v4 = vadd.f32 %v4483_v10, %v4469_v8 }
 0x50b   : > { %v10651_v28 = vpop.permute.xlu0 %5015  ;;  %v4789_v31 = vadd.f32 %v4787_v12, %v4771_v50  ;;  %v4950_v19 = vrot.slane %v10457_v6, 1  ;;  %v4978_v17 = vrot.slane %v10472_v36, 1  ;;  %v4964_v22 = vadd.f32 %v4963_v57, %v10609_v25 }
 0x50c   : > { %v5205_v48 = vsub.f32 0.0, %v5204_v7  ;;  %v4379_v29 = vadd.f32 %v4377_v39, %v4363_v15  ;;  %v4157_v54 = vadd.f32 %v4155_v55, %v4141_v37  ;;  %v4187_v7 = vsel %vm606_vm11, %v10446_v34, %v4186_v5 }
 0x50d   : > { %v4554_v15 = vrot.slane %v10474_v59, 1  ;;  %v4497_v18 = vadd.f32 %v10580_v16, %v4485_v4  ;;  %v4799_v3 = vadd.f32 %v10556_v38, %v4789_v31  ;;  %v4951_v60 = vsel %vm494_vm7, %v10457_v6, %v4950_v19 }
 0x50e   : > { %v5206_v52 = vmul.f32 1.442695, %v5205_v48  ;;  %v3961_v14 = vpop.permute.xlu1 %3960  ;;  %v4203_v25 = vsel %vm606_vm11, %v10464_v61, %v4202_v53  ;;  %v4979_v16 = vsel %vm494_vm7, %v10472_v36, %v4978_v17  ;;  %v4862_v36 = vrot.slane %v10521_v42, 1  ;;  %v12458_v17 = vld [vmem:[#allocation86_spill] sm:$0xff] }
 0x50f   : > { %v3962_v1 = vrot.slane %v3961_v14, 1  ;;  %v4169_v33 = vpop.permute.xlu0 %4168  ;;  %v4555_v10 = vsel %vm494_vm7, %v10474_v59, %v4554_v15 }
 0x510   : > { %7707 = vpow2.f32 %v5206_v52  ;;  %v4170_v24 = vrot.slane %v4169_v33, 1  ;;  %v4809_v52 = vadd.f32 %v10582_v44, %v4799_v3  ;;  %v4571_v44 = vsel %vm494_vm7, %v10483_v45, %v4570_v32 }
 0x511   : > { %v3963_v46 = vsel %vm606_vm11, %v3961_v14, %v3962_v1  ;;  %v4863_v45 = vsel %vm494_vm7, %v10521_v42, %v4862_v36 }
 0x512   : > { %v10674_v20 = vadd.f32 %v3963_v46, %v10514_v9  ;;  %v4171_v47 = vsel %vm606_vm11, %v4169_v33, %v4170_v24  ;;  %v4509_v51 = vpop.permute.xlu1 %4508  ;;  %v4527_v9 = vsel %vm494_vm7, %v10453_v35, %v4526_v49  ;;  %v5321_v24 = vrot.slane %v10481_v63, 1  ;;  %v12457_v46 = vld [vmem:[#allocation30_spill] sm:$0xff] }
 0x513   : > { %v4173_v13 = vadd.f32 %v4171_v47, %v4157_v54  ;;  %v4510_v0 = vrot.slane %v4509_v51, 1  ;;  %v4393_v40 = vpop.permute.xlu0 %4392  ;;  %v4994_v19 = vrot.slane %v12457_v46, 1 }
 0x514   : > { %v4394_v39 = vrot.slane %v4393_v40, 1  ;;  %v5322_v42 = vsel %vm494_vm7, %v10481_v63, %v5321_v24 }
 0x515   : > { %v4189_v26 = vadd.f32 %v4187_v7, %v4173_v13  ;;  %v4511_v58 = vsel %vm494_vm7, %v4509_v51, %v4510_v0  ;;  %v5017_v51 = vrot.slane %v10651_v28, 1  ;;  %v12459_v0 = vld [vmem:[#allocation19_spill] sm:$0xff] }
 0x516   : > { %v4513_v34 = vadd.f32 %v4511_v58, %v4497_v18  ;;  %v4395_v11 = vsel %vm643_vm8, %v4393_v40, %v4394_v39  ;;  %v4933_v48 = vpop.permute.xlu1 %4932  ;;  %v12460_v18 = vld [vmem:[#allocation22_spill] sm:$0xff] }
 0x517   : > { %v4205_v41 = vadd.f32 %v4203_v25, %v4189_v26  ;;  %v4397_v35 = vadd.f32 %v4395_v11, %v4379_v29  ;;  %v4934_v50 = vrot.slane %v4933_v48, 1  ;;  %v4823_v38 = vpop.permute.xlu0 %4822  ;;  %v5033_v39 = vrot.slane %v12460_v18, 1  ;;  %v12461_v25 = vld [vmem:[#allocation42_spill] sm:$0xff] }
 0x518   : > { %v4529_v6 = vadd.f32 %v4527_v9, %v4513_v34  ;;  %v4824_v8 = vrot.slane %v4823_v38, 1  ;;  %v5337_v26 = vrot.slane %v10635_v23, 1  ;;  %v5049_v34 = vrot.slane %v12461_v25, 1 }
 0x519   : > { %v4206_v12 = vsub.f32 0.0, %v4205_v41  ;;  %v4398_v61 = vsub.f32 0.0, %v4397_v35  ;;  %v4935_v55 = vsel %vm494_vm7, %v4933_v48, %v4934_v50  ;;  %v5353_v11 = vrot.slane %v10645_v62, 1 }
 0x51a   : > { %v7708_v14 = vpop.eup %7707  ;;  %v4541_v37 = vadd.f32 %v4540_v2, %v4529_v6  ;;  %v4937_v29 = vadd.f32 %v4935_v55, %v10585_v56  ;;  %v4825_v1 = vsel %vm494_vm7, %v4823_v38, %v4824_v8  ;;  %v5282_v33 = vpop.permute.xlu1 %5281  ;;  %v5338_v35 = vsel %vm606_vm11, %v10635_v23, %v5337_v26  ;;  %v12463_v55 = vld [vmem:[#allocation16_spill] sm:$0xff] }
 0x51b   : > { %v5208_v59 = vadd.f32 1.0, %v7708_v14  ;;  %v4207_v57 = vmul.f32 1.442695, %v4206_v12  ;;  %v4399_v5 = vmul.f32 1.442695, %v4398_v61  ;;  %v4827_v4 = vadd.f32 %v4825_v1, %v4809_v52 }
 0x51c   : > { %v4557_v49 = vadd.f32 %v4555_v10, %v4541_v37  ;;  %v4953_v31 = vadd.f32 %v4951_v60, %v4937_v29  ;;  %v5283_v54 = vrot.slane %v5282_v33, 1  ;;  %v5050_v38 = vsel %vm643_vm8, %v12461_v25, %v5049_v34 }
 0x51d   : > { %7709 = vrcp.f32 %v5208_v59  ;;  %v4837_v56 = vadd.f32 %v10595_v27, %v4827_v4  ;;  %v5305_v27 = vadd.f32 %v10660_v30, %v10613_v43  ;;  %v5018_v43 = vsel %vm606_vm11, %v10651_v28, %v5017_v51  ;;  %v12462_v28 = vld [vmem:[#allocation66_spill] sm:$0xff] }
 0x51e   : > { %7711 = vpow2.f32 %v4207_v57  ;;  %v4573_v2 = vadd.f32 %v4571_v44, %v4557_v49  ;;  %v4965_v53 = vadd.f32 %v4964_v22, %v4953_v31  ;;  %v5284_v47 = vsel %vm494_vm7, %v5282_v33, %v5283_v54  ;;  %v12464_v31 = vld [vmem:[#allocation64_spill] sm:$0xff] }
 0x51f   : > { %7713 = vpow2.f32 %v4399_v5  ;;  %v4847_v13 = vadd.f32 %v12458_v17, %v4837_v56  ;;  %v5286_v40 = vadd.f32 %v5284_v47, %v12459_v0  ;;  %v4995_v22 = vsel %vm494_vm7, %v12457_v46, %v4994_v19 }
 0x520   : > { %v4574_v7 = vsub.f32 0.0, %v4573_v2  ;;  %v4981_v15 = vadd.f32 %v4979_v16, %v4965_v53  ;;  %v5376_v10 = vrot.slane %v12462_v28, 1  ;;  %v5354_v8 = vsel %vm606_vm11, %v10645_v62, %v5353_v11  ;;  %v12465_v2 = vld [vmem:[#allocation17_spill] sm:$0xff] }
 0x521   : > { %v4865_v9 = vadd.f32 %v4863_v45, %v4847_v13  ;;  %v5296_v3 = vadd.f32 %v10603_v21, %v5286_v40  ;;  %v5034_v21 = vsel %vm643_vm8, %v12460_v18, %v5033_v39 }
 0x522   : > { %v4575_v58 = vmul.f32 1.442695, %v4574_v7  ;;  %v4997_v60 = vadd.f32 %v4995_v22, %v4981_v15  ;;  %v5377_v1 = vsel %vm643_vm8, %v12462_v28, %v5376_v10  ;;  %v5426_v10 = vld [vmem:[%s11706_s6 + $0x8] sm:$0xff] }
 0x523   : > { %v5306_v30 = vadd.f32 %v5305_v27, %v5296_v3  ;;  %v4866_v16 = vsub.f32 0.0, %v4865_v9 }
 0x524   : > { %7715 = vpow2.f32 %v4575_v58  ;;  %v5020_v48 = vadd.f32 %v5018_v43, %v4997_v60 }
 0x525   : > { %v5324_v41 = vadd.f32 %v5322_v42, %v5306_v30  ;;  %v4867_v61 = vmul.f32 1.442695, %v4866_v16 }
 0x526   : > { %v5036_v50 = vadd.f32 %v5034_v21, %v5020_v48 }
 0x527   : > { %v10730_v63 = vpop.eup %7709  ;;  %v5340_v32 = vadd.f32 %v5338_v35, %v5324_v41 }
 0x528   : > { %v7712_v6 = vpop.eup %7711  ;;  %v5052_v12 = vadd.f32 %v5050_v38, %v5036_v50  ;;  %v5227_v52 = vrot.slane %v10730_v63, %v12463_v55  ;;  %v5231_v22 = vrot.slane %v10730_v63, %v12464_v31  ;;  %v5223_v16 = vrot.slane %v10730_v63, %v12465_v2 }
 0x529   : > { %v7714_v14 = vpop.eup %7713  ;;  %v4209_v23 = vadd.f32 1.0, %v7712_v6  ;;  %v5356_v36 = vadd.f32 %v5354_v8, %v5340_v32  ;;  %v5494_v32 = vsel %vm376_vm4, %v5426_v10, 0 }
 0x52a   : > { %v4401_v37 = vadd.f32 1.0, %v7714_v14  ;;  %v5053_v29 = vsub.f32 0.0, %v5052_v12  ;;  %5234 = vrot.lane.b32.xlu1 %v5227_v52, %s12426_s24  ;;  %v10789_v8 = vand.u32 4294901760, %v5494_v32  ;;  %v5469_v52 = vld [vmem:[%s11707_s7] sm:$0xff] }
 0x52b   : > { %7717 = vrcp.f32 %v4209_v23  ;;  %v5379_v59 = vadd.f32 %v5377_v1, %v5356_v36 }
 0x52c   : > { %v5054_v33 = vmul.f32 1.442695, %v5053_v29  ;;  %7719 = vpow2.f32 %v4867_v61  ;;  %12466 = vst [vmem:[#allocation68_spill] sm:$0xff] %v10789_v8  ;;  %v5470_v61 = vld [vmem:[%s11707_s7 + $0x8] sm:$0xff]  ;;  %v10798_v36 = vsub.f32 %v5494_v32, %v10789_v8 }
 0x52d   : > { %7721 = vrcp.f32 %v4401_v37  ;;  %v5380_v57 = vsub.f32 0.0, %v5379_v59 }
 0x52e   : > { %v7716_v62 = vpop.eup %7715  ;;  %7723 = vpow2.f32 %v5054_v33  ;;  %12467 = vst [vmem:[#allocation33_spill] sm:$0xff] %v10798_v36  ;;  %v11948_v59 = vand.u32 4294901760, %v10798_v36 }
 0x52f   : > { %v4577_v5 = vadd.f32 1.0, %v7716_v62  ;;  %v5381_v4 = vmul.f32 1.442695, %v5380_v57 }
 0x531   : > { %7725 = vrcp.f32 %v4577_v5 }
 0x532   : > { %7727 = vpow2.f32 %v5381_v4  ;;  %v5472_v4 = vld [vmem:[%s11707_s7 + $0x18] sm:$0xff] }
 0x535   : > { %v7718_v24 = vpop.eup %7717 }
 0x536   : > { %v7720_v49 = vpop.eup %7719  ;;  %v4232_v54 = vrot.slane %v7718_v24, %v12464_v31  ;;  %v4228_v44 = vrot.slane %v7718_v24, %v12463_v55  ;;  %v4224_v53 = vrot.slane %v7718_v24, %v12465_v2  ;;  %v5471_v24 = vld [vmem:[%s11707_s7 + $0x10] sm:$0xff] }
 0x537   : > { %v7722_v46 = vpop.eup %7721  ;;  %v4869_v19 = vadd.f32 1.0, %v7720_v49 }
 0x538   : > { %4237 = vrot.lane.b32.xlu0 %v4232_v54, %s12422_s25  ;;  %4235 = vrot.lane.b32.xlu1 %v4228_v44, %s12422_s25  ;;  %v7724_v56 = vpop.eup %7723  ;;  %v4420_v47 = vrot.slane %v7722_v46, %v12463_v55  ;;  %v4424_v17 = vrot.slane %v7722_v46, %v12464_v31  ;;  %v4416_v13 = vrot.slane %v7722_v46, %v12465_v2 }
 0x539   : > { %v5056_v51 = vadd.f32 1.0, %v7724_v56  ;;  %7729 = vrcp.f32 %v4869_v19  ;;  %v5608_v54 = vsub.f32 %v10798_v36, %v11948_v59 }
 0x53b   : > { %v7726_v0 = vpop.eup %7725  ;;  %7731 = vrcp.f32 %v5056_v51  ;;  %v5609_v19 = vand.u32 4294901760, %v5608_v54 }
 0x53c   : > { %4233 = vrot.lane.b32.xlu1 %v4224_v53, %s12422_s25  ;;  %4427 = vrot.lane.b32.xlu0 %v4420_v47, %s12422_s25  ;;  %v7728_v40 = vpop.eup %7727  ;;  %v4596_v45 = vrot.slane %v7726_v0, %v12463_v55  ;;  %v4600_v7 = vrot.slane %v7726_v0, %v12464_v31  ;;  %v4592_v27 = vrot.slane %v7726_v0, %v12465_v2 }
 0x53d   : > { %v5383_v15 = vadd.f32 1.0, %v7728_v40  ;;  %5610 = vmatprep.mubr.f32.mxu1 %v5609_v19  ;;  %v12482_v19 = vld [vmem:[#allocation44_spill] sm:$0xff] }
 0x53f   : > { %7733 = vrcp.f32 %v5383_v15 }
 0x540   : > { %4429 = vrot.lane.b32.xlu1 %v4424_v17, %s12422_s25  ;;  %4425 = vrot.lane.b32.xlu0 %v4416_v13, %s12422_s25  ;;  %s11650_s25 = scalar_lea.hbm %s11709_s9, %s6906_s16 }
 0x543   : > { %v7730_v18 = vpop.eup %7729 }
 0x544   : > { %4603 = vrot.lane.b32.xlu1 %v4596_v45, %s12421_s26  ;;  %4605 = vrot.lane.b32.xlu0 %v4600_v7, %s12421_s26  ;;  %v4892_v39 = vrot.slane %v7730_v18, %v12464_v31  ;;  %v4888_v9 = vrot.slane %v7730_v18, %v12463_v55  ;;  %v4884_v58 = vrot.slane %v7730_v18, %v12465_v2  ;;  %v12469_v18 = vld [vmem:[#allocation52_spill] sm:$0xff] }
 0x545   : > { %v7732_v3 = vpop.eup %7731 }
 0x546   : > { %v5075_v26 = vrot.slane %v7732_v3, %v12463_v55  ;;  %v5071_v25 = vrot.slane %v7732_v3, %v12465_v2  ;;  %v5079_v34 = vrot.slane %v7732_v3, %v12464_v31 }
 0x548   : > { %4601 = vrot.lane.b32.xlu1 %v4592_v27, %s12421_s26  ;;  %5236 = vrot.lane.b32.xlu0 %v5231_v22, %s12426_s24  ;;  %v12468_v27 = vld [vmem:[#allocation35_spill] sm:$0xff] }
 0x549   : > { %v7734_v43 = vpop.eup %7733 }
 0x54a   : > { %v5402_v48 = vrot.slane %v7734_v43, %v12463_v55  ;;  %v5398_v38 = vrot.slane %v7734_v43, %v12465_v2  ;;  %v5406_v28 = vrot.slane %v7734_v43, %v12464_v31 }
 0x54c   : > { %4897 = vrot.lane.b32.xlu0 %v4892_v39, %s12426_s24  ;;  %4895 = vrot.lane.b32.xlu1 %v4888_v9, %s12426_s24 }
 0x550   : > { %5082 = vrot.lane.b32.xlu0 %v5075_v26, %s12421_s26  ;;  %4893 = vrot.lane.b32.xlu1 %v4884_v58, %s12426_s24 }
 0x551   : > { %v393_v60 = vpop.xlane.xlu0 %392 }
 0x552   : > { %v397_v42 = vsub.f32 0.0, %v393_v60 }
 0x554   : > { %v399_v30 = vmul.f32 1.442695, %v397_v42  ;;  %5080 = vrot.lane.b32.xlu0 %v5071_v25, %s12421_s26  ;;  %5084 = vrot.lane.b32.xlu1 %v5079_v34, %s12421_s26  ;;  %v12470_v34 = vld [vmem:[#allocation36_spill] sm:$0xff] }
 0x555   : > { %v3977_v11 = vpop.permute.xlu0 %3976 }
 0x556   : > { %7735 = vpow2.f32 %v399_v30  ;;  %v3978_v21 = vrot.slane %v3977_v11, 1  ;;  %v12471_v30 = vld [vmem:[#allocation53_spill] sm:$0xff] }
 0x558   : > { %5409 = vrot.lane.b32.xlu0 %v5402_v48, %s12426_s24  ;;  %5232 = vrot.lane.b32.xlu1 %v5223_v16, %s12426_s24  ;;  %v3979_v63 = vsel %vm643_vm8, %v3977_v11, %v3978_v21 }
 0x559   : > { %v396_v41 = vpop.xlane.xlu1 %395  ;;  %v4011_v35 = vpop.permute.xlu0 %4010  ;;  %v3981_v37 = vadd.f32 %v3979_v63, %v10674_v20 }
 0x55a   : > { %v398_v50 = vsub.f32 0.0, %v396_v41  ;;  %v4012_v14 = vrot.slane %v4011_v35, 1 }
 0x55c   : > { %v401_v6 = vmul.f32 1.442695, %v398_v50  ;;  %5407 = vrot.lane.b32.xlu0 %v5398_v38, %s12426_s24  ;;  %5411 = vrot.lane.b32.xlu1 %v5406_v28, %s12426_s24  ;;  %v4013_v20 = vsel %vm606_vm11, %v4011_v35, %v4012_v14 }
 0x55d   : > { %v3993_v12 = vpop.permute.xlu1 %3992  ;;  %v4043_v29 = vpop.permute.xlu0 %4042 }
 0x55e   : > { %7737 = vpow2.f32 %v401_v6  ;;  %v3994_v23 = vrot.slane %v3993_v12, 1  ;;  %v4044_v49 = vrot.slane %v4043_v29, 1 }
 0x560   : > { %v7736_v1 = vpop.eup %7735  ;;  %v3995_v33 = vsel %vm643_vm8, %v3993_v12, %v3994_v23  ;;  %5480 = vperm.xlu0 %7701, %v5470_v61   ;;  %5475 = vperm.xlu1 %7702, %v5469_v52   ;;  %v4045_v53 = vsel %vm643_vm8, %v4043_v29, %v4044_v49  ;;  %v12479_v49 = vld [vmem:[#allocation54_spill] sm:$0xff] }
 0x561   : > { %v403_v62 = vadd.f32 1.0, %v7736_v1  ;;  %v3997_v57 = vadd.f32 %v3995_v33, %v3981_v37  ;;  %v4027_v5 = vpop.permute.xlu1 %4026  ;;  %v4738_v47 = vpop.permute.xlu0 %4737 }
 0x562   : > { %v4028_v31 = vrot.slane %v4027_v5, 1 }
 0x563   : > { %7739 = vrcp.f32 %v403_v62  ;;  %v4015_v44 = vadd.f32 %v4013_v20, %v3997_v57 }
 0x564   : > { %v4029_v46 = vsel %vm643_vm8, %v4027_v5, %v4028_v31  ;;  %5490 = vperm.xlu0 %7701, %v5472_v4   ;;  %5485 = vperm.xlu1 %7702, %v5471_v24   ;;  %v12478_v4 = vld [vmem:[#allocation55_spill] sm:$0xff] }
 0x565   : > { %v4031_v56 = vadd.f32 %v4029_v46, %v4015_v44  ;;  %v4736_v45 = vpop.permute.xlu0 %4735  ;;  %v4740_v15 = vpop.permute.xlu1 %4739  ;;  %v12520_v46 = vld [vmem:[#allocation73_spill] sm:$0xff] }
 0x566   : > { %v4741_v9 = vsel %vm643_vm8, %v4736_v45, %v4738_v47  ;;  %v4742_v3 = vsel %vm643_vm8, %v4738_v47, %v4740_v15  ;;  %v12483_v47 = vld [vmem:[#allocation41_spill] sm:$0xff] }
 0x567   : > { %v4047_v51 = vadd.f32 %v4045_v53, %v4031_v56 }
 0x568   : > { %v7738_v17 = vpop.eup %7737 }
 0x569   : > { %v404_v13 = vadd.f32 1.0, %v7738_v17  ;;  %v4048_v0 = vsub.f32 0.0, %v4047_v51 }
 0x56b   : > { %7741 = vrcp.f32 %v404_v13  ;;  %v4049_v40 = vmul.f32 1.442695, %v4048_v0  ;;  %v12519_v13 = vld [vmem:[#allocation63_spill] sm:$0xff] }
 0x56d   : > { %v10815_v7 = vpop.eup %7739  ;;  %7743 = vpow2.f32 %v4049_v40 }
 0x56e   : > { %v4719_v22 = vmul.f32 %v10815_v7, %v12468_v27  ;;  %v4718_v39 = vmul.f32 %v10815_v7, %v12469_v18  ;;  %v4059_v24 = vmul.f32 %v10815_v7, %v12478_v4  ;;  %v4058_v31 = vmul.f32 %v10815_v7, %v12479_v49  ;;  %v5428_v4 = vld [vmem:[%s11706_s6 + $0x18] sm:$0xff] }
 0x56f   : > { %v5497_v49 = vsel %vm376_vm4, %v5428_v4, 0 }
 0x570   : > { %v4745_v26 = vmul.f32 %v4741_v9, %v4718_v39  ;;  %v4746_v58 = vmul.f32 %v4742_v3, %v4719_v22 }
 0x572   : > { %v5539_v60 = vand.u32 4294901760, %v4745_v26  ;;  %v5537_v25 = vand.u32 4294901760, %v4746_v58 }
 0x574   : > { %v10829_v48 = vsub.f32 %v4745_v26, %v5539_v60  ;;  %v10831_v50 = vsub.f32 %v4746_v58, %v5537_v25 }
 0x575   : > { %v10823_v42 = vpop.eup %7741 }
 0x576   : > { %v4721_v43 = vmul.f32 %v10823_v42, %v12470_v34  ;;  %v4720_v11 = vmul.f32 %v10823_v42, %v12471_v30  ;;  %12472 = vst [vmem:[#allocation43_spill] sm:$0xff] %v10829_v48  ;;  %12473 = vst [vmem:[#allocation25_spill] sm:$0xff] %v10831_v50  ;;  %v5774_v10 = vand.u32 4294901760, %v10829_v48  ;;  %v5768_v61 = vand.u32 4294901760, %v10831_v50 }
 0x577   : > { %v7744_v16 = vpop.eup %7743  ;;  %v4061_v56 = vmul.f32 %v10823_v42, %v12482_v19  ;;  %v4060_v51 = vmul.f32 %v10823_v42, %v12483_v47  ;;  %v10937_v47 = vand.u32 4294901760, %v5497_v49 }
 0x578   : > { %v4051_v21 = vadd.f32 1.0, %v7744_v16  ;;  %v4748_v41 = vmul.f32 %v4742_v3, %v4721_v43  ;;  %v4747_v35 = vmul.f32 %v4741_v9, %v4720_v11  ;;  %v5775_v52 = vsub.f32 %v10829_v48, %v5774_v10  ;;  %v12531_v48 = vld [vmem:[#allocation37_spill] sm:$0xff] }
 0x579   : > { %v5769_v37 = vsub.f32 %v10831_v50, %v5768_v61  ;;  %12497 = vst [vmem:[#allocation84_spill] sm:$0xff] %v10937_v47 }
 0x57a   : > { %7745 = vrcp.f32 %v4051_v21  ;;  %v5541_v38 = vand.u32 4294901760, %v4748_v41  ;;  %v5543_v28 = vand.u32 4294901760, %v4747_v35  ;;  %v5776_v57 = vand.u32 4294901760, %v5775_v52  ;;  %v12521_v21 = vld [vmem:[#allocation71_spill] sm:$0xff] }
 0x57b   : > { %v5770_v33 = vand.u32 4294901760, %v5769_v37  ;;  %v4410_v30 = vmul.f32 %v10823_v42, %v12521_v21 }
 0x57c   : > { %v10834_v32 = vsub.f32 %v4748_v41, %v5541_v38  ;;  %v10836_v63 = vpack.c.bf16 %v5543_v28, %v5539_v60  ;;  %v10838_v6 = vsub.f32 %v4747_v35, %v5543_v28  ;;  %v10840_v12 = vpack.c.bf16 %v5541_v38, %v5537_v25  ;;  %v5425_v38 = vld [vmem:[%s11706_s6] sm:$0xff] }
 0x57d   : > { %v10904_v37 = vand.u32 4294901760, %v5425_v38 }
 0x57e   : > { %12474 = vst [vmem:[#allocation70_spill] sm:$0xff] %v10834_v32  ;;  %12475 = vst [vmem:[#allocation72_spill] sm:$0xff] %v10836_v63  ;;  %v5786_v14 = vand.u32 4294901760, %v10838_v6  ;;  %v5780_v23 = vand.u32 4294901760, %v10834_v32 }
 0x57f   : > { %12476 = vst [vmem:[#allocation74_spill] sm:$0xff] %v10838_v6  ;;  %12477 = vst [vmem:[#allocation76_spill] sm:$0xff] %v10840_v12 }
 0x580   : > { %v5787_v29 = vsub.f32 %v10838_v6, %v5786_v14  ;;  %v5781_v1 = vsub.f32 %v10834_v32, %v5780_v23  ;;  %v10867_v0 = vpack.c.bf16 %v5780_v23, %v5768_v61  ;;  %v10869_v3 = vpack.c.bf16 %v5786_v14, %v5774_v10  ;;  %12494 = vst [vmem:[#allocation50_spill] sm:$0xff] %v10904_v37 }
 0x581   : > { %v11061_v6 = vmul.f32 %v10823_v42, %v12531_v48 }
 0x582   : > { %v5782_v62 = vand.u32 4294901760, %v5781_v1  ;;  %v5788_v5 = vand.u32 4294901760, %v5787_v29  ;;  %12484 = vst [vmem:[#allocation81_spill] sm:$0xff] %v10867_v0  ;;  %12485 = vst [vmem:[#allocation20_spill] sm:$0xff] %v10869_v3 }
 0x584   : > { %v7746_v20 = vpop.eup %7745  ;;  %v10853_v54 = vpack.c.bf16 %v5782_v62, %v5770_v33  ;;  %v10855_v44 = vpack.c.bf16 %v5788_v5, %v5776_v57  ;;  %v10911_v57 = vsub.f32 %v5425_v38, %v10904_v37 }
 0x585   : > { %v4070_v53 = vrot.slane %v7746_v20, %v12463_v55  ;;  %v4066_v17 = vrot.slane %v7746_v20, %v12465_v2 }
 0x586   : > { %12480 = vst [vmem:[#allocation77_spill] sm:$0xff] %v10853_v54  ;;  %12481 = vst [vmem:[#allocation80_spill] sm:$0xff] %v10855_v44  ;;  %v11947_v5 = vand.u32 4294901760, %v10911_v57 }
 0x587   : > { %v4074_v40 = vmul.f32 %v4070_v53, %v4059_v24  ;;  %v4076_v45 = vmul.f32 %v4070_v53, %v4061_v56  ;;  %v4073_v15 = vmul.f32 %v4066_v17, %v4058_v31  ;;  %v4075_v27 = vmul.f32 %v4066_v17, %v4060_v51  ;;  %12495 = vst [vmem:[#allocation79_spill] sm:$0xff] %v10911_v57  ;;  %v5427_v24 = vld [vmem:[%s11706_s6 + $0x10] sm:$0xff]  ;;  %v5429_v31 = vld [vmem:[%s11706_s6 + $0x20] sm:$0xff]  ;;  %v5430_v56 = vld [vmem:[%s11706_s6 + $0x28] sm:$0xff] }
 0x588   : > { %v10923_v20 = vsub.f32 %v10911_v57, %v11947_v5  ;;  %v10929_v19 = vand.u32 4294901760, %v5427_v24  ;;  %v5432_v53 = vld [vmem:[%s11706_s6 + $0x38] sm:$0xff]  ;;  %v10939_v51 = vand.u32 4294901760, %v5429_v31  ;;  %v12499_v17 = vld [vmem:[#allocation29_spill] sm:$0xff] }
 0x589   : > { %v5505_v22 = vand.u32 4294901760, %v4074_v40  ;;  %v5509_v18 = vand.u32 4294901760, %v4076_v45  ;;  %v5507_v39 = vand.u32 4294901760, %v4073_v15  ;;  %v5511_v9 = vand.u32 4294901760, %v4075_v27  ;;  %v12518_v5 = vld [vmem:[#allocation65_spill] sm:$0xff] }
 0x58a   : > { %12496 = vst [vmem:[#allocation15_spill] sm:$0xff] %v10929_v19  ;;  %12498 = vst [vmem:[#allocation82_spill] sm:$0xff] %v10939_v51  ;;  %v10981_v4 = vsub.f32 %v5429_v31, %v10939_v51  ;;  %v4219_v59 = vmul.f32 %v10823_v42, %v12518_v5 }
 0x58b   : > { %v10871_v55 = vpack.c.bf16 %v5509_v18, %v5505_v22  ;;  %v10873_v26 = vsub.f32 %v4074_v40, %v5505_v22  ;;  %v10875_v2 = vsub.f32 %v4076_v45, %v5509_v18  ;;  %v10877_v58 = vpack.c.bf16 %v5511_v9, %v5507_v39  ;;  %v12501_v18 = vld [vmem:[#allocation69_spill] sm:$0xff]  ;;  %v12528_v45 = vld [vmem:[#allocation38_spill] sm:$0xff] }
 0x58c   : > { %v10879_v60 = vsub.f32 %v4073_v15, %v5507_v39  ;;  %v10881_v25 = vsub.f32 %v4075_v27, %v5511_v9  ;;  %v4217_v40 = vmul.f32 %v10815_v7, %v12499_v17  ;;  %v5500_v15 = vsel %vm376_vm4, %v5430_v56, 0  ;;  %v12500_v27 = vld [vmem:[#allocation28_spill] sm:$0xff]  ;;  %12510 = vst [vmem:[#allocation86_spill] sm:$0xff] %v10981_v4  ;;  %v12511_v56 = vld [vmem:[#allocation57_spill] sm:$0xff] }
 0x58d   : > { %12486 = vst [vmem:[#allocation31_spill] sm:$0xff] %v10871_v55  ;;  %12487 = vst [vmem:[#allocation32_spill] sm:$0xff] %v10873_v26  ;;  %7124 = vmatprep.subr.bf16.mxu1 %v10871_v55  ;;  %v5672_v34 = vand.u32 4294901760, %v10873_v26  ;;  %v5684_v43 = vand.u32 4294901760, %v10875_v2  ;;  %v4216_v22 = vmul.f32 %v10815_v7, %v12500_v27  ;;  %v10949_v39 = vmul.f32 %v10815_v7, %v12501_v18  ;;  %v12512_v17 = vld [vmem:[#allocation60_spill] sm:$0xff]  ;;  %v12513_v18 = vld [vmem:[#allocation59_spill] sm:$0xff] }
 0x58e   : > { %12488 = vst [vmem:[#allocation46_spill] sm:$0xff] %v10875_v2  ;;  %12489 = vst [vmem:[#allocation47_spill] sm:$0xff] %v10877_v58  ;;  %7126 = vmatpush1.bf16.msra.mxu1 %v10877_v58  ;;  %v5678_v11 = vand.u32 4294901760, %v10879_v60  ;;  %v5690_v16 = vand.u32 4294901760, %v10881_v25  ;;  %v10952_v9 = vsub.f32 %v5427_v24, %v10929_v19  ;;  %v10991_v27 = vmul.f32 %v10815_v7, %v12512_v17  ;;  %v12529_v58 = vld [vmem:[#allocation21_spill] sm:$0xff] }
 0x58f   : > { %12490 = vst [vmem:[#allocation48_spill] sm:$0xff] %v10879_v60  ;;  %12491 = vst [vmem:[#allocation49_spill] sm:$0xff] %v10881_v25  ;;  %v5673_v41 = vsub.f32 %v10873_v26, %v5672_v34  ;;  %v5685_v35 = vsub.f32 %v10875_v2, %v5684_v43  ;;  %v10898_v28 = vpack.c.bf16 %v5684_v43, %v5672_v34  ;;  %v5503_v34 = vsel %vm376_vm4, %v5432_v53, 0  ;;  %v12503_v43 = vld [vmem:[#allocation67_spill] sm:$0xff] }
 0x590   : > { %v5679_v10 = vsub.f32 %v10879_v60, %v5678_v11  ;;  %v5691_v61 = vsub.f32 %v10881_v25, %v5690_v16  ;;  %v10902_v52 = vpack.c.bf16 %v5690_v16, %v5678_v11  ;;  %12502 = vst [vmem:[#allocation83_spill] sm:$0xff] %v10952_v9  ;;  %v10957_v11 = vmul.f32 %v10815_v7, %v12503_v43  ;;  %v12504_v16 = vld [vmem:[#allocation78_spill] sm:$0xff] }
 0x591   : > { %12492 = vst [vmem:[#allocation34_spill] sm:$0xff] %v10898_v28  ;;  %v5674_v14 = vand.u32 4294901760, %v5673_v41  ;;  %v5686_v23 = vand.u32 4294901760, %v5685_v35  ;;  %v10961_v41 = vmul.f32 %v10815_v7, %v12504_v16  ;;  %v12505_v35 = vld [vmem:[#allocation75_spill] sm:$0xff]  ;;  %v10987_v53 = vmul.f32 %v10815_v7, %v12511_v56  ;;  %v12515_v16 = vld [vmem:[#allocation62_spill] sm:$0xff] }
 0x592   : > { %12493 = vst [vmem:[#allocation51_spill] sm:$0xff] %v10902_v52  ;;  %v5680_v29 = vand.u32 4294901760, %v5679_v10  ;;  %v5692_v1 = vand.u32 4294901760, %v5691_v61  ;;  %v10965_v38 = vmul.f32 %v10815_v7, %v12505_v35  ;;  %v12506_v10 = vld [vmem:[#allocation39_spill] sm:$0xff]  ;;  %v10995_v43 = vmul.f32 %v10815_v7, %v12513_v18 }
 0x593   : > { %v10906_v33 = vpack.c.bf16 %v5686_v23, %v5674_v14  ;;  %v10969_v61 = vmul.f32 %v10815_v7, %v12506_v10  ;;  %v12507_v14 = vld [vmem:[#allocation18_spill] sm:$0xff]  ;;  %v11001_v31 = vmul.f32 %v10815_v7, %v12515_v16  ;;  %v12516_v35 = vld [vmem:[#allocation27_spill] sm:$0xff]  ;;  %v4218_v16 = vmul.f32 %v10823_v42, %v12519_v13  ;;  %v12524_v13 = vld [vmem:[#allocation56_spill] sm:$0xff] }
 0x594   : > { %v10908_v62 = vpack.c.bf16 %v5692_v1, %v5680_v29  ;;  %v10973_v23 = vmul.f32 %v10815_v7, %v12507_v14  ;;  %v10976_v29 = vsub.f32 %v5497_v49, %v10937_v47  ;;  %v10978_v1 = vand.u32 4294901760, %v5500_v15  ;;  %v12517_v14 = vld [vmem:[#allocation40_spill] sm:$0xff]  ;;  %v5431_v18 = vld [vmem:[%s11706_s6 + $0x30] sm:$0xff] }
 0x595   : > { %v10997_v49 = vand.u32 4294901760, %v5503_v34  ;;  %v11005_v10 = vmul.f32 %v10815_v7, %v12516_v35  ;;  %v11009_v56 = vmul.f32 %v10815_v7, %v12517_v14  ;;  %v4411_v35 = vmul.f32 %v10823_v42, %v12520_v46  ;;  %v12522_v7 = vld [vmem:[#allocation58_spill] sm:$0xff]  ;;  %v12525_v46 = vld [vmem:[#allocation23_spill] sm:$0xff] }
 0x596   : > { %12508 = vst [vmem:[#allocation85_spill] sm:$0xff] %v10976_v29  ;;  %12509 = vst [vmem:[#allocation30_spill] sm:$0xff] %v10978_v1  ;;  %v11025_v14 = vmul.f32 %v10823_v42, %v12522_v7  ;;  %v11029_v17 = vsub.f32 %v5500_v15, %v10978_v1  ;;  %v11034_v52 = vmul.f32 %v10823_v42, %v12524_v13  ;;  %v11043_v28 = vand.u32 4294901760, %v5431_v18 }
 0x597   : > { %12514 = vst [vmem:[#allocation19_spill] sm:$0xff] %v10997_v49  ;;  %v11038_v21 = vmul.f32 %v10823_v42, %v12525_v46  ;;  %v11041_v7 = vsub.f32 %v5503_v34, %v10997_v49  ;;  %v11048_v5 = vmul.f32 %v10823_v42, %v12528_v45  ;;  %v11052_v57 = vmul.f32 %v10823_v42, %v12529_v58  ;;  %v12533_v45 = vld [vmem:[#allocation26_spill] sm:$0xff] }
 0x598   : > { %12523 = vst [vmem:[#allocation22_spill] sm:$0xff] %v11029_v17  ;;  %12527 = vst [vmem:[#allocation66_spill] sm:$0xff] %v11043_v28  ;;  %v12530_v13 = vand.u32 4294901760, %v10952_v9  ;;  %v11069_v32 = vmul.f32 %v10823_v42, %v12533_v45  ;;  %v12534_v58 = vand.u32 4294901760, %v10976_v29  ;;  %v11084_v45 = vsub.f32 %v5431_v18, %v11043_v28 }
 0x599   : > { %12526 = vst [vmem:[#allocation42_spill] sm:$0xff] %v11041_v7 }
 0x59a   : > { %v11057_v46 = vsub.f32 %v10952_v9, %v12530_v13  ;;  %v11074_v36 = vsub.f32 %v10976_v29, %v12534_v58  ;;  %12536 = vst [vmem:[#allocation16_spill] sm:$0xff] %v11084_v45  ;;  %v12537_v58 = vld [vmem:[#allocation45_spill] sm:$0xff] }
 0x59b   : > { %v11089_v29 = vmul.f32 %v10823_v42, %v12537_v58 }
 0x59c   : > { %v10983_v24 = vpop.permute.xlu1 %5234 }
 0x5aa   : > { %v4236_v3 = vpop.permute.xlu1 %4235  ;;  %v4238_v0 = vpop.permute.xlu0 %4237 }
 0x5ab   : > { %v4240_v15 = vsel %vm494_vm7, %v4236_v3, %v4238_v0  ;;  %v12532_v0 = vld [vmem:[#allocation61_spill] sm:$0xff] }
 0x5ac   : > { %v4244_v55 = vmul.f32 %v4240_v15, %v4217_v40  ;;  %v4246_v34 = vmul.f32 %v4240_v15, %v4219_v59  ;;  %v11065_v50 = vmul.f32 %v10823_v42, %v12532_v0  ;;  %v12535_v59 = vand.u32 4294901760, %v10981_v4  ;;  %v12538_v40 = vld [vmem:[#allocation24_spill] sm:$0xff] }
 0x5ad   : > { %v11093_v1 = vmul.f32 %v10823_v42, %v12538_v40 }
 0x5ae   : > { %v11080_v48 = vsub.f32 %v10981_v4, %v12535_v59  ;;  %v5513_v15 = vand.u32 4294901760, %v4244_v55  ;;  %v5517_v13 = vand.u32 4294901760, %v4246_v34  ;;  %v4234_v0 = vpop.permute.xlu1 %4233  ;;  %v4428_v9 = vpop.permute.xlu0 %4427 }
 0x5af   : > { %v4239_v51 = vsel %vm494_vm7, %v4234_v0, %v4236_v3  ;;  %v12540_v0 = vand.u32 4294901760, %v11029_v17 }
 0x5b0   : > { %v11096_v4 = vsub.f32 %v4244_v55, %v5513_v15  ;;  %v11098_v19 = vsub.f32 %v4246_v34, %v5517_v13  ;;  %v4243_v49 = vmul.f32 %v4239_v51, %v4216_v22  ;;  %v4245_v47 = vmul.f32 %v4239_v51, %v4218_v16 }
 0x5b1   : > { %v11100_v18 = vpack.c.bf16 %v5517_v13, %v5513_v15  ;;  %v11106_v58 = vsub.f32 %v11029_v17, %v12540_v0  ;;  %v12541_v34 = vand.u32 4294901760, %v11041_v7 }
 0x5b2   : > { %v5515_v40 = vand.u32 4294901760, %v4243_v49  ;;  %v5519_v28 = vand.u32 4294901760, %v4245_v47  ;;  %v4430_v59 = vpop.permute.xlu1 %4429  ;;  %v4426_v55 = vpop.permute.xlu0 %4425 }
 0x5b3   : > { %12539 = vst [vmem:[#allocation64_spill] sm:$0xff] %v11100_v18  ;;  %v11112_v22 = vsub.f32 %v11041_v7, %v12541_v34  ;;  %v4432_v16 = vsel %vm494_vm7, %v4428_v9, %v4430_v59  ;;  %7128 = vmatprep.subr.bf16.mxu1 %v11100_v18  ;;  %v4431_v15 = vsel %vm494_vm7, %v4426_v55, %v4428_v9  ;;  %v12545_v55 = vand.u32 4294901760, %v11084_v45 }
 0x5b4   : > { %v11120_v42 = vpack.c.bf16 %v5519_v28, %v5515_v40  ;;  %v11122_v3 = vsub.f32 %v4243_v49, %v5515_v40  ;;  %v11124_v17 = vsub.f32 %v4245_v47, %v5519_v28  ;;  %v4436_v34 = vmul.f32 %v4432_v16, %v10949_v39 }
 0x5b5   : > { %v4438_v7 = vmul.f32 %v4432_v16, %v4411_v35  ;;  %v4435_v51 = vmul.f32 %v4431_v15, %v10957_v11  ;;  %v4437_v59 = vmul.f32 %v4431_v15, %v4410_v30  ;;  %v12543_v11 = vand.u32 4294901760, %v11096_v4 }
 0x5b6   : > { %12542 = vst [vmem:[#allocation17_spill] sm:$0xff] %v11120_v42  ;;  %v5521_v13 = vand.u32 4294901760, %v4436_v34  ;;  %v4604_v0 = vpop.permute.xlu1 %4603  ;;  %7130 = vmatpush1.bf16.msra.mxu1 %v11120_v42  ;;  %v4606_v49 = vpop.permute.xlu0 %4605  ;;  %v12544_v15 = vand.u32 4294901760, %v11098_v19  ;;  %v11144_v9 = vsub.f32 %v11084_v45, %v12545_v55  ;;  %v12546_v28 = vand.u32 4294901760, %v11122_v3 }
 0x5b7   : > { %v5525_v47 = vand.u32 4294901760, %v4438_v7  ;;  %v5523_v40 = vand.u32 4294901760, %v4435_v51  ;;  %v5527_v39 = vand.u32 4294901760, %v4437_v59  ;;  %v4608_v35 = vsel %vm606_vm11, %v4604_v0, %v4606_v49 }
 0x5b8   : > { %v4612_v30 = vmul.f32 %v4608_v35, %v10961_v41  ;;  %v5697_v16 = vsub.f32 %v11096_v4, %v12543_v11  ;;  %v5709_v18 = vsub.f32 %v11098_v19, %v12544_v15  ;;  %v11149_v42 = vsub.f32 %v11122_v3, %v12546_v28 }
 0x5b9   : > { %v11151_v49 = vpack.c.bf16 %v5527_v39, %v5523_v40  ;;  %v11153_v41 = vsub.f32 %v4435_v51, %v5523_v40  ;;  %v11155_v60 = vsub.f32 %v4437_v59, %v5527_v39  ;;  %v12548_v11 = vand.u32 4294901760, %v11124_v17 }
 0x5ba   : > { %v4614_v25 = vmul.f32 %v4608_v35, %v11025_v14  ;;  %v5529_v55 = vand.u32 4294901760, %v4612_v30  ;;  %v4602_v45 = vpop.permute.xlu1 %4601  ;;  %v11163_v37 = vpack.c.bf16 %v5525_v47, %v5521_v13  ;;  %v5237_v26 = vpop.permute.xlu0 %5236  ;;  %v11165_v28 = vsub.f32 %v4436_v34, %v5521_v13 }
 0x5bb   : > { %12547 = vst [vmem:[#allocation35_spill] sm:$0xff] %v11151_v49  ;;  %v11160_v15 = vsub.f32 %v11124_v17, %v12548_v11  ;;  %v11167_v2 = vsub.f32 %v4438_v7, %v5525_v47  ;;  %v4607_v51 = vsel %vm606_vm11, %v4602_v45, %v4604_v0  ;;  %v5239_v59 = vsel %vm643_vm8, %v10983_v24, %v5237_v26 }
 0x5bc   : > { %12549 = vst [vmem:[#allocation52_spill] sm:$0xff] %v11163_v37  ;;  %v5533_v40 = vand.u32 4294901760, %v4614_v25  ;;  %v4611_v39 = vmul.f32 %v4607_v51, %v10965_v38  ;;  %v4613_v11 = vmul.f32 %v4607_v51, %v11034_v52  ;;  %7132 = vmatprep.subr.bf16.mxu1 %v11163_v37  ;;  %v5698_v14 = vand.u32 4294901760, %v5697_v16 }
 0x5bd   : > { %v5243_v7 = vmul.f32 %v5239_v59, %v10969_v61  ;;  %v5245_v34 = vmul.f32 %v5239_v59, %v11038_v21  ;;  %7134 = vmatpush1.bf16.msra.mxu1 %v11151_v49  ;;  %v11180_v45 = vsub.f32 %v4612_v30, %v5529_v55  ;;  %v5710_v37 = vand.u32 4294901760, %v5709_v18 }
 0x5be   : > { %v5531_v26 = vand.u32 4294901760, %v4611_v39  ;;  %v5535_v0 = vand.u32 4294901760, %v4613_v11  ;;  %v4896_v38 = vpop.permute.xlu1 %4895  ;;  %v11182_v47 = vpack.c.bf16 %v5533_v40, %v5529_v55  ;;  %v4898_v52 = vpop.permute.xlu0 %4897  ;;  %v12554_v59 = vand.u32 4294901760, %v11153_v41 }
 0x5bf   : > { %v5561_v51 = vand.u32 4294901760, %v5243_v7  ;;  %v5565_v16 = vand.u32 4294901760, %v5245_v34  ;;  %v4900_v35 = vsel %vm643_vm8, %v4896_v38, %v4898_v52  ;;  %v12555_v49 = vand.u32 4294901760, %v11155_v60 }
 0x5c0   : > { %12550 = vst [vmem:[#allocation36_spill] sm:$0xff] %v11182_v47  ;;  %v11185_v13 = vpack.c.bf16 %v5535_v0, %v5531_v26  ;;  %v11187_v61 = vsub.f32 %v4611_v39, %v5531_v26  ;;  %v11189_v21 = vsub.f32 %v4613_v11, %v5535_v0  ;;  %7136 = vmatprep.subr.bf16.mxu1 %v11182_v47 }
 0x5c1   : > { %v4904_v30 = vmul.f32 %v4900_v35, %v10973_v23  ;;  %v11196_v55 = vsub.f32 %v11153_v41, %v12554_v59  ;;  %v11201_v52 = vsub.f32 %v11155_v60, %v12555_v49  ;;  %v4906_v18 = vmul.f32 %v4900_v35, %v11048_v5 }
 0x5c2   : > { %12551 = vst [vmem:[#allocation53_spill] sm:$0xff] %v11185_v13  ;;  %12552 = vst [vmem:[#allocation55_spill] sm:$0xff] %v11187_v61  ;;  %v11204_v39 = vpack.c.bf16 %v5565_v16, %v5561_v51  ;;  %v11206_v11 = vsub.f32 %v4614_v25, %v5533_v40  ;;  %v12003_v26 = vand.u32 4294901760, %v11187_v61  ;;  %v4894_v47 = vpop.permute.xlu1 %4893  ;;  %7138 = vmatpush1.bf16.msra.mxu1 %v11185_v13  ;;  %v5083_v59 = vpop.permute.xlu0 %5082  ;;  %v5704_v5 = vand.u32 4294901760, %v11149_v42 }
 0x5c3   : > { %12553 = vst [vmem:[#allocation54_spill] sm:$0xff] %v11189_v21  ;;  %v5545_v0 = vand.u32 4294901760, %v4904_v30  ;;  %v5549_v44 = vand.u32 4294901760, %v4906_v18  ;;  %v4899_v54 = vsel %vm643_vm8, %v4894_v47, %v4896_v38  ;;  %7140 = vmatprep.subr.bf16.mxu1 %v10840_v12  ;;  %v5716_v49 = vand.u32 4294901760, %v11160_v15 }
 0x5c4   : > { %12556 = vst [vmem:[#allocation44_spill] sm:$0xff] %v11204_v39  ;;  %12557 = vst [vmem:[#allocation41_spill] sm:$0xff] %v11206_v11  ;;  %v11215_v25 = vsub.f32 %v5243_v7, %v5561_v51  ;;  %v11217_v40 = vsub.f32 %v5245_v34, %v5565_v16  ;;  %v4903_v35 = vmul.f32 %v4899_v54, %v10987_v53  ;;  %v12558_v38 = vand.u32 4294901760, %v11189_v21 }
 0x5c5   : > { %v11220_v23 = vpack.c.bf16 %v5710_v37, %v5698_v14  ;;  %v11225_v13 = vsub.f32 %v11187_v61, %v12003_v26  ;;  %v4905_v42 = vmul.f32 %v4899_v54, %v11052_v57  ;;  %v11233_v15 = vpack.c.bf16 %v5549_v44, %v5545_v0 }
 0x5c6   : > { %v11230_v47 = vsub.f32 %v11189_v21, %v12558_v38  ;;  %v11235_v7 = vsub.f32 %v4904_v30, %v5545_v0  ;;  %v11237_v34 = vsub.f32 %v4906_v18, %v5549_v44  ;;  %v5547_v37 = vand.u32 4294901760, %v4903_v35  ;;  %v5085_v53 = vpop.permute.xlu1 %5084  ;;  %7142 = vmatpush1.bf16.msra.mxu1 %v10836_v63  ;;  %v5081_v14 = vpop.permute.xlu0 %5080 }
 0x5c7   : > { %12559 = vst [vmem:[#allocation29_spill] sm:$0xff] %v11233_v15  ;;  %v5551_v16 = vand.u32 4294901760, %v4905_v42  ;;  %v5087_v26 = vsel %vm606_vm11, %v5083_v59, %v5085_v53  ;;  %v5086_v38 = vsel %vm606_vm11, %v5081_v14, %v5083_v59  ;;  %7144 = vmatprep.subr.bf16.mxu1 %v11233_v15  ;;  %v11244_v54 = vpack.c.bf16 %v5716_v49, %v5704_v5 }
 0x5c8   : > { %v11246_v57 = vsub.f32 %v4903_v35, %v5547_v37  ;;  %v5091_v44 = vmul.f32 %v5087_v26, %v10991_v27  ;;  %v5093_v30 = vmul.f32 %v5087_v26, %v11061_v6  ;;  %v5090_v18 = vmul.f32 %v5086_v38, %v10995_v43 }
 0x5c9   : > { %v11251_v0 = vpack.c.bf16 %v5551_v16, %v5547_v37  ;;  %v11253_v51 = vsub.f32 %v4905_v42, %v5551_v16  ;;  %v5092_v53 = vmul.f32 %v5086_v38, %v11065_v50  ;;  %v12561_v59 = vand.u32 4294901760, %v11165_v28 }
 0x5ca   : > { %v12012_v5 = vand.u32 4294901760, %v11246_v57  ;;  %v5553_v49 = vand.u32 4294901760, %v5091_v44  ;;  %v5557_v35 = vand.u32 4294901760, %v5093_v30  ;;  %v5555_v27 = vand.u32 4294901760, %v5090_v18  ;;  %v5233_v15 = vpop.permute.xlu1 %5232  ;;  %v5410_v6 = vpop.permute.xlu0 %5409 }
 0x5cb   : > { %12560 = vst [vmem:[#allocation28_spill] sm:$0xff] %v11251_v0  ;;  %v11259_v14 = vsub.f32 %v11165_v28, %v12561_v59  ;;  %v5559_v26 = vand.u32 4294901760, %v5092_v53  ;;  %v5238_v43 = vsel %vm643_vm8, %v5233_v15, %v10983_v24  ;;  %7146 = vmatpush1.bf16.msra.mxu1 %v11251_v0 }
 0x5cc   : > { %v11268_v16 = vsub.f32 %v5090_v18, %v5555_v27  ;;  %v11275_v63 = vsub.f32 %v11246_v57, %v12012_v5  ;;  %v5242_v50 = vmul.f32 %v5238_v43, %v11001_v31  ;;  %v11282_v42 = vsub.f32 %v5091_v44, %v5553_v49 }
 0x5cd   : > { %v5722_v38 = vand.u32 4294901760, %v11259_v14  ;;  %v11277_v24 = vpack.c.bf16 %v5559_v26, %v5555_v27  ;;  %v11279_v15 = vsub.f32 %v5092_v53, %v5559_v26  ;;  %v11284_v37 = vsub.f32 %v5093_v30, %v5557_v35 }
 0x5ce   : > { %v5244_v18 = vmul.f32 %v5238_v43, %v11069_v32  ;;  %v5412_v14 = vpop.permute.xlu1 %5411  ;;  %v11287_v0 = vpack.c.bf16 %v5557_v35, %v5553_v49  ;;  %v5408_v59 = vpop.permute.xlu0 %5407  ;;  %v12019_v12 = vand.u32 4294901760, %v11268_v16  ;;  %v5563_v5 = vand.u32 4294901760, %v5242_v50 }
 0x5cf   : > { %12562 = vst [vmem:[#allocation69_spill] sm:$0xff] %v11277_v24  ;;  %v5414_v27 = vsel %vm643_vm8, %v5410_v6, %v5412_v14  ;;  %v5413_v53 = vsel %vm643_vm8, %v5408_v59, %v5410_v6  ;;  %v12564_v32 = vand.u32 4294901760, %v11167_v2 }
 0x5d0   : > { %12563 = vst [vmem:[#allocation67_spill] sm:$0xff] %v11287_v0  ;;  %v5567_v26 = vand.u32 4294901760, %v5244_v18  ;;  %v5418_v31 = vmul.f32 %v5414_v27, %v11005_v10  ;;  %v5420_v44 = vmul.f32 %v5414_v27, %v11089_v29  ;;  %7148 = vmatprep.subr.bf16.mxu1 %v11287_v0  ;;  %v11299_v35 = vsub.f32 %v5242_v50, %v5563_v5 }
 0x5d1   : > { %v5733_v30 = vsub.f32 %v11167_v2, %v12564_v32  ;;  %v5417_v43 = vmul.f32 %v5413_v53, %v11009_v56  ;;  %v5419_v14 = vmul.f32 %v5413_v53, %v11093_v1  ;;  %7150 = vmatpush1.bf16.msra.mxu1 %v11277_v24  ;;  %v12566_v27 = vand.u32 4294901760, %v11253_v51 }
 0x5d2   : > { %v11304_v6 = vpack.c.bf16 %v5567_v26, %v5563_v5  ;;  %v11306_v10 = vsub.f32 %v5244_v18, %v5567_v26  ;;  %v5569_v29 = vand.u32 4294901760, %v5418_v31  ;;  %v5573_v59 = vand.u32 4294901760, %v5420_v44  ;;  %7152 = vmatprep.subr.bf16.mxu1 %v11204_v39 }
 0x5d3   : > { %v5811_v32 = vsub.f32 %v11253_v51, %v12566_v27  ;;  %v5571_v49 = vand.u32 4294901760, %v5417_v43  ;;  %v5575_v56 = vand.u32 4294901760, %v5419_v14  ;;  %v5823_v1 = vsub.f32 %v11268_v16, %v12019_v12 }
 0x5d4   : > { %12565 = vst [vmem:[#allocation78_spill] sm:$0xff] %v11304_v6  ;;  %v11317_v18 = vpack.c.bf16 %v5573_v59, %v5569_v29  ;;  %v5734_v53 = vand.u32 4294901760, %v5733_v30  ;;  %v12568_v26 = vand.u32 4294901760, %v11279_v15  ;;  %v12570_v0 = vand.u32 4294901760, %v11299_v35 }
 0x5d5   : > { %v11322_v24 = vpack.c.bf16 %v5575_v56, %v5571_v49  ;;  %v11324_v27 = vsub.f32 %v5417_v43, %v5571_v49  ;;  %v11326_v50 = vsub.f32 %v5419_v14, %v5575_v56  ;;  %7154 = vmatpush1.bf16.msra.mxu1 %v11304_v6  ;;  %v11332_v5 = vsub.f32 %v5418_v31, %v5569_v29 }
 0x5d6   : > { %12567 = vst [vmem:[#allocation75_spill] sm:$0xff] %v11317_v18  ;;  %v5835_v39 = vsub.f32 %v11279_v15, %v12568_v26  ;;  %v5847_v12 = vsub.f32 %v11299_v35, %v12570_v0  ;;  %v11334_v21 = vsub.f32 %v5420_v44, %v5573_v59  ;;  %7156 = vmatprep.subr.bf16.mxu1 %v11317_v18  ;;  %v12024_v30 = vand.u32 4294901760, %v11180_v45 }
 0x5d7   : > { %12569 = vst [vmem:[#allocation39_spill] sm:$0xff] %v11322_v24  ;;  %v12571_v26 = vand.u32 4294901760, %v11306_v10  ;;  %v12028_v43 = vand.u32 4294901760, %v11324_v27  ;;  %v12031_v14 = vand.u32 4294901760, %v11326_v50  ;;  %v12025_v56 = vand.u32 4294901760, %v11206_v11 }
 0x5d8   : > { %v7167_v6 = vpack.c.bf16 %v5734_v53, %v5722_v38  ;;  %v5745_v0 = vsub.f32 %v11180_v45, %v12024_v30  ;;  %v12036_v31 = vand.u32 4294901760, %v11235_v7  ;;  %v12041_v44 = vand.u32 4294901760, %v11237_v34 }
 0x5d9   : > { %v5859_v49 = vsub.f32 %v11306_v10, %v12571_v26  ;;  %7158 = vmatpush1.bf16.msra.mxu1 %v11322_v24  ;;  %v5757_v29 = vsub.f32 %v11206_v11, %v12025_v56  ;;  %v5752_v59 = vand.u32 4294901760, %v11225_v13  ;;  %v5764_v26 = vand.u32 4294901760, %v11230_v47 }
 0x5da   : > { %v5800_v38 = vand.u32 4294901760, %v11275_v63  ;;  %v5871_v53 = vsub.f32 %v11324_v27, %v12028_v43  ;;  %v5883_v30 = vsub.f32 %v11326_v50, %v12031_v14  ;;  %7160 = vmatprep.subr.bf16.mxu1 %v10906_v33  ;;  %v5793_v56 = vsub.f32 %v11235_v7, %v12036_v31 }
 0x5db   : > { %v5805_v13 = vsub.f32 %v11237_v34, %v12041_v44  ;;  %v5746_v47 = vand.u32 4294901760, %v5745_v0  ;;  %v5812_v63 = vand.u32 4294901760, %v5811_v32  ;;  %v12040_v24 = vand.u32 4294901760, %v11282_v42 }
 0x5dc   : > { %v12039_v43 = vand.u32 4294901760, %v11284_v37  ;;  %v12572_v18 = vand.u32 4294901760, %v10923_v20  ;;  %v5794_v14 = vand.u32 4294901760, %v5793_v56  ;;  %v5824_v33 = vand.u32 4294901760, %v5823_v1 }
 0x5dd   : > { %v5806_v61 = vand.u32 4294901760, %v5805_v13  ;;  %v5836_v8 = vand.u32 4294901760, %v5835_v39  ;;  %v5758_v31 = vand.u32 4294901760, %v5757_v29  ;;  %v11374_v11 = vpack.c.bf16 %v5812_v63, %v5800_v38 }
 0x5de   : > { %5616 = vmatmul.mubr.f32.vlgmr.msra.gmra.mrb[58].mxu1 %v12572_v18  ;;  %v5817_v32 = vsub.f32 %v11282_v42, %v12040_v24  ;;  %v5829_v0 = vsub.f32 %v11284_v37, %v12039_v43  ;;  %v12573_v1 = vand.u32 4294901760, %v11074_v36  ;;  %v5852_v18 = vand.u32 4294901760, %v11217_v40 }
 0x5df   : > { %7162 = vmatpush1.bf16.msra.mxu1 %v10908_v62  ;;  %v11383_v20 = vpack.c.bf16 %v5806_v61, %v5794_v14  ;;  %v11387_v39 = vpack.c.bf16 %v5836_v8, %v5824_v33  ;;  %v5840_v62 = vand.u32 4294901760, %v11215_v25  ;;  %v5848_v38 = vand.u32 4294901760, %v5847_v12 }
 0x5e0   : > { %7164 = vmatprep.subr.bf16.mxu1 %v11220_v23  ;;  %5626 = vmatprep.mubr.f32.mxu1 %v12573_v1  ;;  %v5818_v56 = vand.u32 4294901760, %v5817_v32  ;;  %v5830_v29 = vand.u32 4294901760, %v5829_v0  ;;  %v5860_v13 = vand.u32 4294901760, %v5859_v49  ;;  %v12574_v63 = vand.u32 4294901760, %v11057_v46 }
 0x5e1   : > { %v5841_v23 = vsub.f32 %v11215_v25, %v5840_v62  ;;  %v5853_v61 = vsub.f32 %v11217_v40, %v5852_v18  ;;  %v5864_v36 = vand.u32 4294901760, %v11332_v5  ;;  %v5876_v8 = vand.u32 4294901760, %v11334_v21 }
 0x5e2   : > { %5632 = vmatmul.mubr.f32.gmra.mrb[60].mxu1 %v12574_v63  ;;  %v7183_v14 = vpack.c.bf16 %v5830_v29, %v5818_v56  ;;  %v12575_v33 = vand.u32 4294901760, %v11106_v58  ;;  %v7189_v32 = vpack.c.bf16 %v5860_v13, %v5848_v38  ;;  %v5872_v12 = vand.u32 4294901760, %v5871_v53 }
 0x5e3   : > { %7166 = vmatpush1.bf16.msra.mxu1 %v11244_v54  ;;  %v5884_v49 = vand.u32 4294901760, %v5883_v30  ;;  %v5842_v46 = vand.u32 4294901760, %v5841_v23  ;;  %v5854_v0 = vand.u32 4294901760, %v5853_v61  ;;  %v5865_v1 = vsub.f32 %v11332_v5, %v5864_v36 }
 0x5e4   : > { %5642 = vmatprep.mubr.f32.mxu1 %v12575_v33  ;;  %7168 = vmatprep.subr.bf16.mxu1 %v7167_v6  ;;  %v5877_v63 = vsub.f32 %v11334_v21, %v5876_v8  ;;  %v12576_v43 = vand.u32 4294901760, %v11196_v55  ;;  %v12577_v24 = vand.u32 4294901760, %v11201_v52  ;;  %v5663_v54 = vand.u32 4294901760, %v11144_v9 }
 0x5e5   : > { %v7193_v56 = vpack.c.bf16 %v5884_v49, %v5872_v12  ;;  %v7171_v58 = vpack.c.bf16 %v5758_v31, %v5746_v47  ;;  %v7187_v29 = vpack.c.bf16 %v5854_v0, %v5842_v46  ;;  %v12578_v53 = vand.u32 4294901760, %v11080_v48  ;;  %v12589_v0 = vld [vmem:[#allocation41_spill] sm:$0xff] }
 0x5e6   : > { %v7169_v44 = vpack.c.bf16 %v12577_v24, %v12576_v43  ;;  %v5866_v6 = vand.u32 4294901760, %v5865_v1  ;;  %v5878_v30 = vand.u32 4294901760, %v5877_v63  ;;  %v7173_v38 = vpack.c.bf16 %v5764_v26, %v5752_v59 }
 0x5e7   : > { %5648 = vmatmul.mubr.f32.gmra.mrb[62].mxu1 %v12578_v53  ;;  %v12579_v13 = vand.u32 4294901760, %v11112_v22  ;;  %v7215_v55 = vpack.c.bf16 %v11237_v34, %v11235_v7  ;;  %v7217_v52 = vpack.c.bf16 %v11253_v51, %v11246_v57  ;;  %v7219_v24 = vpack.c.bf16 %v11284_v37, %v11282_v42 }
 0x5e8   : > { %7170 = vmatpush1.bf16.msra.mxu1 %v7169_v44  ;;  %v7191_v9 = vpack.c.bf16 %v5878_v30, %v5866_v6  ;;  %v7221_v48 = vpack.c.bf16 %v11279_v15, %v11268_v16  ;;  %v7223_v43 = vpack.c.bf16 %v11217_v40, %v11215_v25  ;;  %v7225_v22 = vpack.c.bf16 %v11306_v10, %v11299_v35  ;;  %v12594_v6 = vld [vmem:[#allocation54_spill] sm:$0xff] }
 0x5e9   : > { %5658 = vmatprep.mubr.f32.mxu1 %v12579_v13  ;;  %7172 = vmatprep.subr.bf16.mxu1 %v7171_v58  ;;  %v7227_v31 = vpack.c.bf16 %v11334_v21, %v11332_v5  ;;  %v7229_v44 = vpack.c.bf16 %v11326_v50, %v11324_v27  ;;  %v12580_v59 = vand.u32 4294901760, %v11096_v4  ;;  %v12581_v26 = vand.u32 4294901760, %v11098_v19  ;;  %v12592_v58 = vld [vmem:[#allocation55_spill] sm:$0xff] }
 0x5ea   : > { %v12582_v23 = vand.u32 4294901760, %v11122_v3  ;;  %v12583_v25 = vand.u32 4294901760, %v11124_v17  ;;  %v12584_v61 = vand.u32 4294901760, %v11165_v28  ;;  %v12585_v21 = vand.u32 4294901760, %v11167_v2 }
 0x5eb   : > { %v11431_v47 = vpack.c.bf16 %v12581_v26, %v12580_v59  ;;  %5664 = vmatmul.mubr.f32.gmra.mrb[64].mxu1 %v5663_v54  ;;  %v12586_v33 = vand.u32 4294901760, %v11153_v41  ;;  %v12587_v12 = vand.u32 4294901760, %v11155_v60  ;;  %v12588_v46 = vand.u32 4294901760, %v11180_v45  ;;  %v12591_v54 = vld [vmem:[#allocation68_spill] sm:$0xff] }
 0x5ec   : > { %v11437_v40 = vpack.c.bf16 %v12583_v25, %v12582_v23  ;;  %v11443_v5 = vpack.c.bf16 %v12585_v21, %v12584_v61  ;;  %v12590_v1 = vand.u32 4294901760, %v12589_v0  ;;  %7174 = vmatpush1.bf16.msra.mxu1 %v7173_v38  ;;  %5915 = vmatprep.mubr.f32.mxu1 %v12591_v54  ;;  %v12593_v53 = vand.u32 4294901760, %v12592_v58  ;;  %v12600_v38 = vld [vmem:[#allocation77_spill] sm:$0xff] }
 0x5ed   : > { %v11449_v49 = vpack.c.bf16 %v12587_v12, %v12586_v33  ;;  %v12595_v30 = vand.u32 4294901760, %v12594_v6  ;;  %v12596_v59 = vand.u32 4294901760, %v11235_v7  ;;  %v12597_v26 = vand.u32 4294901760, %v11237_v34  ;;  %7176 = vmatprep.subr.bf16.mxu1 %v12600_v38  ;;  %v12635_v38 = vld [vmem:[#allocation83_spill] sm:$0xff] }
 0x5ee   : > { %v11455_v63 = vpack.c.bf16 %v12590_v1, %v12588_v46  ;;  %v12598_v25 = vand.u32 4294901760, %v11246_v57  ;;  %v12599_v61 = vand.u32 4294901760, %v11253_v51  ;;  %v12601_v33 = vand.u32 4294901760, %v11282_v42 }
 0x5ef   : > { %v11462_v13 = vpack.c.bf16 %v12595_v30, %v12593_v53  ;;  %v11468_v23 = vpack.c.bf16 %v12597_v26, %v12596_v59  ;;  %v12602_v12 = vand.u32 4294901760, %v11284_v37  ;;  %v12603_v7 = vand.u32 4294901760, %v11268_v16  ;;  %v12609_v16 = vld [vmem:[#allocation80_spill] sm:$0xff] }
 0x5f0   : > { %v11474_v21 = vpack.c.bf16 %v12599_v61, %v12598_v25  ;;  %v12604_v34 = vand.u32 4294901760, %v11279_v15  ;;  %v11489_v53 = vpack.c.bf16 %v5852_v18, %v5840_v62  ;;  %v12605_v51 = vand.u32 4294901760, %v11299_v35  ;;  %7178 = vmatpush1.bf16.msra.mxu1 %v12609_v16  ;;  %v12610_v15 = vld [vmem:[#allocation46_spill] sm:$0xff]  ;;  %v12611_v35 = vld [vmem:[#allocation32_spill] sm:$0xff]  ;;  %v12614_v62 = vld [vmem:[#allocation49_spill] sm:$0xff] }
 0x5f1   : > { %v11481_v46 = vpack.c.bf16 %v12602_v12, %v12601_v33  ;;  %v12606_v57 = vand.u32 4294901760, %v11306_v10  ;;  %v11497_v59 = vpack.c.bf16 %v5876_v8, %v5864_v36  ;;  %v12607_v42 = vand.u32 4294901760, %v11324_v27  ;;  %7180 = vmatprep.subr.bf16.mxu1 %v11383_v20  ;;  %v12615_v20 = vld [vmem:[#allocation48_spill] sm:$0xff]  ;;  %v12618_v8 = vld [vmem:[#allocation15_spill] sm:$0xff]  ;;  %v12633_v25 = vld [vmem:[#allocation85_spill] sm:$0xff] }
 0x5f2   : > { %v11487_v1 = vpack.c.bf16 %v12604_v34, %v12603_v7  ;;  %v12608_v37 = vand.u32 4294901760, %v11326_v50  ;;  %v12612_v10 = vpack.c.bf16 %v12610_v15, %v12611_v35  ;;  %v12613_v50 = vld [vmem:[#allocation50_spill] sm:$0xff]  ;;  %v7199_v27 = vpack.c.bf16 %v11098_v19, %v11096_v4  ;;  %v12634_v61 = vld [vmem:[#allocation64_spill] sm:$0xff]  ;;  %v12644_v33 = vld [vmem:[#allocation53_spill] sm:$0xff] }
 0x5f3   : > { %v11495_v30 = vpack.c.bf16 %v12606_v57, %v12605_v51  ;;  %v12616_v18 = vpack.c.bf16 %v12614_v62, %v12615_v20  ;;  %v7203_v36 = vpack.c.bf16 %v11167_v2, %v11165_v28  ;;  %v7205_v19 = vpack.c.bf16 %v11155_v60, %v11153_v41  ;;  %v12624_v28 = vld [vmem:[#allocation70_spill] sm:$0xff]  ;;  %v12646_v7 = vld [vmem:[#allocation76_spill] sm:$0xff]  ;;  %v12648_v51 = vld [vmem:[#allocation29_spill] sm:$0xff] }
 0x5f4   : > { %v11503_v26 = vpack.c.bf16 %v12608_v37, %v12607_v42  ;;  %7182 = vmatpush1.bf16.msra.mxu1 %v11374_v11  ;;  %v12617_v11 = vld [vmem:[#allocation84_spill] sm:$0xff]  ;;  %v7207_v4 = vpack.c.bf16 %v12589_v0, %v11180_v45  ;;  %v7209_v2 = vpack.c.bf16 %v12594_v6, %v12592_v58  ;;  %v12627_v41 = vld [vmem:[#allocation74_spill] sm:$0xff]  ;;  %v12628_v45 = vld [vmem:[#allocation43_spill] sm:$0xff] }
 0x5f5   : > { %7184 = vmatprep.subr.bf16.mxu1 %v7183_v14  ;;  %v12619_v14 = vld [vmem:[#allocation30_spill] sm:$0xff]  ;;  %v12630_v0 = vld [vmem:[#allocation31_spill] sm:$0xff]  ;;  %v12647_v34 = vld [vmem:[#allocation72_spill] sm:$0xff] }
 0x5f6   : > { %v12631_v58 = vld [vmem:[#allocation79_spill] sm:$0xff]  ;;  %v12649_v57 = vld [vmem:[#allocation28_spill] sm:$0xff]  ;;  %v12651_v37 = vld [vmem:[#allocation69_spill] sm:$0xff] }
 0x5f7   : > { %v12632_v6 = vld [vmem:[#allocation47_spill] sm:$0xff]  ;;  %v12652_v16 = vld [vmem:[#allocation44_spill] sm:$0xff]  ;;  %v12653_v15 = vld [vmem:[#allocation78_spill] sm:$0xff]  ;;  %v12657_v62 = vand.u32 4294901760, %v12631_v58 }
 0x5f8   : > { %7186 = vmatpush1.bf16.msra.mxu1 %v11387_v39  ;;  %v7201_v39 = vpack.c.bf16 %v11124_v17, %v11122_v3  ;;  %v12622_v17 = vld [vmem:[#allocation66_spill] sm:$0xff]  ;;  %v12623_v3 = vld [vmem:[#allocation33_spill] sm:$0xff]  ;;  %v12650_v42 = vld [vmem:[#allocation67_spill] sm:$0xff] }
 0x5f9   : > { %7188 = vmatprep.subr.bf16.mxu1 %v7187_v29  ;;  %v12625_v29 = vld [vmem:[#allocation25_spill] sm:$0xff]  ;;  %v12645_v12 = vand.u32 4294901760, %v12623_v3  ;;  %v12654_v35 = vld [vmem:[#allocation75_spill] sm:$0xff] }
 0x5fa   : > { %v12626_v60 = vpack.c.bf16 %v12624_v28, %v12625_v29  ;;  %v12658_v20 = vld [vmem:[#allocation51_spill] sm:$0xff] }
 0x5fc   : > { %7190 = vmatpush1.bf16.msra.mxu1 %v7189_v32  ;;  %v12620_v32 = vld [vmem:[#allocation82_spill] sm:$0xff] }
 0x5fd   : > { %7192 = vmatprep.subr.bf16.mxu1 %v7191_v9  ;;  %v12629_v9 = vpack.c.bf16 %v12627_v41, %v12628_v45 }
 0x600   : > { %7194 = vmatpush1.bf16.msra.mxu1 %v7193_v56  ;;  %v12621_v56 = vld [vmem:[#allocation19_spill] sm:$0xff] }
 0x601   : > { %7196 = vmatprep.subr.bf16.mxu1 %v12612_v10  ;;  %v12655_v10 = vld [vmem:[#allocation39_spill] sm:$0xff] }
 0x603   : > { %5917 = vmatmul.mubr.f32.vlgmr.msra.gmra.mrb[58].mxu1 %v12613_v50 }
 0x604   : > { %7198 = vmatpush1.bf16.msra.mxu1 %v12616_v18  ;;  %5923 = vmatprep.mubr.f32.mxu1 %v12617_v11  ;;  %v12659_v18 = vand.u32 4294901760, %v12633_v25 }
 0x605   : > { %7200 = vmatprep.subr.bf16.mxu1 %v7199_v27  ;;  %v12656_v27 = vld [vmem:[#allocation34_spill] sm:$0xff] }
 0x607   : > { %5925 = vmatmul.mubr.f32.gmra.mrb[60].mxu1 %v12618_v8 }
 0x608   : > { %7202 = vmatpush1.bf16.msra.mxu1 %v7201_v39  ;;  %5931 = vmatprep.mubr.f32.mxu1 %v12619_v14  ;;  %v12660_v39 = vand.u32 4294901760, %v12635_v38 }
 0x609   : > { %7204 = vmatprep.subr.bf16.mxu1 %v7203_v36 }
 0x60b   : > { %5933 = vmatmul.mubr.f32.gmra.mrb[62].mxu1 %v12620_v32 }
 0x60c   : > { %7206 = vmatpush1.bf16.msra.mxu1 %v7205_v19  ;;  %5939 = vmatprep.mubr.f32.mxu1 %v12621_v56 }
 0x60d   : > { %7208 = vmatprep.subr.bf16.mxu1 %v7207_v4 }
 0x60f   : > { %5941 = vmatmul.mubr.f32.gmra.mrb[64].mxu1 %v12622_v17 }
 0x610   : > { %7210 = vmatpush1.bf16.msra.mxu1 %v7209_v2  ;;  %6085 = vmatprep.mubr.f32.mxu1 %v12623_v3 }
 0x611   : > { %7212 = vmatprep.subr.bf16.mxu1 %v12626_v60 }
 0x614   : > { %7214 = vmatpush1.bf16.msra.mxu1 %v12629_v9 }
 0x615   : > { %7216 = vmatprep.subr.bf16.mxu1 %v7215_v55  ;;  %v12636_v55 = vld [vmem:[#allocation17_spill] sm:$0xff] }
 0x618   : > { %7218 = vmatpush1.bf16.msra.mxu1 %v7217_v52  ;;  %v12637_v52 = vld [vmem:[#allocation22_spill] sm:$0xff] }
 0x619   : > { %7220 = vmatprep.subr.bf16.mxu1 %v7219_v24  ;;  %v12638_v24 = vld [vmem:[#allocation52_spill] sm:$0xff]  ;;  %v12661_v36 = vand.u32 4294901760, %v12637_v52 }
 0x61c   : > { %7222 = vmatpush1.bf16.msra.mxu1 %v7221_v48  ;;  %v12639_v48 = vld [vmem:[#allocation86_spill] sm:$0xff] }
 0x61d   : > { %7224 = vmatprep.subr.bf16.mxu1 %v7223_v43  ;;  %v12640_v43 = vld [vmem:[#allocation35_spill] sm:$0xff]  ;;  %v12662_v19 = vand.u32 4294901760, %v12639_v48 }
 0x620   : > { %7226 = vmatpush1.bf16.msra.mxu1 %v7225_v22  ;;  %v12641_v22 = vld [vmem:[#allocation42_spill] sm:$0xff] }
 0x621   : > { %7228 = vmatprep.subr.bf16.mxu1 %v7227_v31  ;;  %v12642_v31 = vld [vmem:[#allocation36_spill] sm:$0xff]  ;;  %v12663_v4 = vand.u32 4294901760, %v12641_v22 }
 0x624   : > { %7230 = vmatpush1.bf16.msra.mxu1 %v7229_v44  ;;  %v12643_v44 = vld [vmem:[#allocation16_spill] sm:$0xff] }
 0x625   : > { %7232 = vmatprep.subr.bf16.mxu1 %v12630_v0 }
 0x627   : > { %6088 = vmatmul.mubr.f32.vlgmr.msra.gmra.mrb[58].mxu1 %v12631_v58 }
 0x628   : > { %7234 = vmatpush1.bf16.msra.mxu1 %v12632_v6  ;;  %6095 = vmatprep.mubr.f32.mxu1 %v12633_v25 }
 0x629   : > { %7236 = vmatprep.subr.bf16.mxu1 %v12634_v61 }
 0x62b   : > { %6098 = vmatmul.mubr.f32.gmra.mrb[60].mxu1 %v12635_v38 }
 0x62c   : > { %7238 = vmatpush1.bf16.msra.mxu1 %v12636_v55  ;;  %6105 = vmatprep.mubr.f32.mxu1 %v12637_v52 }
 0x62d   : > { %7240 = vmatprep.subr.bf16.mxu1 %v12638_v24 }
 0x62f   : > { %6108 = vmatmul.mubr.f32.gmra.mrb[62].mxu1 %v12639_v48 }
 0x630   : > { %7242 = vmatpush1.bf16.msra.mxu1 %v12640_v43  ;;  %6115 = vmatprep.mubr.f32.mxu1 %v12641_v22 }
 0x631   : > { %7244 = vmatprep.subr.bf16.mxu1 %v12642_v31 }
 0x633   : > { %6118 = vmatmul.mubr.f32.gmra.mrb[64].mxu1 %v12643_v44 }
 0x634   : > { %7246 = vmatpush1.bf16.msra.mxu1 %v12644_v33  ;;  %6227 = vmatprep.mubr.f32.mxu1 %v12645_v12 }
 0x635   : > { %7248 = vmatprep.subr.bf16.mxu1 %v12646_v7 }
 0x638   : > { %7250 = vmatpush1.bf16.msra.mxu1 %v12647_v34 }
 0x639   : > { %7252 = vmatprep.subr.bf16.mxu1 %v12648_v51 }
 0x63c   : > { %7254 = vmatpush1.bf16.msra.mxu1 %v12649_v57 }
 0x63d   : > { %7256 = vmatprep.subr.bf16.mxu1 %v12650_v42 }
 0x640   : > { %7258 = vmatpush1.bf16.msra.mxu1 %v12651_v37 }
 0x641   : > { %7260 = vmatprep.subr.bf16.mxu1 %v12652_v16 }
 0x644   : > { %7262 = vmatpush1.bf16.msra.mxu1 %v12653_v15 }
 0x645   : > { %7264 = vmatprep.subr.bf16.mxu1 %v12654_v35 }
 0x648   : > { %7266 = vmatpush1.bf16.msra.mxu1 %v12655_v10 }
 0x649   : > { %7268 = vmatprep.subr.bf16.mxu1 %v12656_v27 }
 0x64b   : > { %6231 = vmatmul.mubr.f32.vlgmr.msra.gmra.mrb[58].mxu1 %v12657_v62 }
 0x64c   : > { %7270 = vmatpush1.bf16.msra.mxu1 %v12658_v20  ;;  %6239 = vmatprep.mubr.f32.mxu1 %v12659_v18 }
 0x64d   : > { %7272 = vmatprep.subr.bf16.mxu1 %v11431_v47  ;;  %v12664_v47 = vand.u32 4294901760, %v12643_v44 }
 0x64f   : > { %6243 = vmatmul.mubr.f32.gmra.mrb[60].mxu1 %v12660_v39 }
 0x650   : > { %7274 = vmatpush1.bf16.msra.mxu1 %v11437_v40  ;;  %6251 = vmatprep.mubr.f32.mxu1 %v12661_v36  ;;  %v12665_v40 = vld [vmem:[#allocation81_spill] sm:$0xff] }
 0x651   : > { %7276 = vmatprep.subr.bf16.mxu1 %v11443_v5  ;;  %v12666_v5 = vld [vmem:[#allocation20_spill] sm:$0xff] }
 0x653   : > { %6255 = vmatmul.mubr.f32.gmra.mrb[62].mxu1 %v12662_v19 }
 0x654   : > { %7278 = vmatpush1.bf16.msra.mxu1 %v11449_v49  ;;  %6263 = vmatprep.mubr.f32.mxu1 %v12663_v4  ;;  %v5476_v49 = vpop.permute.xlu1 %5475 }
 0x655   : > { %7280 = vmatprep.subr.bf16.mxu1 %v11455_v63 }
 0x657   : > { %6267 = vmatmul.mubr.f32.gmra.mrb[64].mxu1 %v12664_v47 }
 0x658   : > { %7282 = vmatpush1.bf16.msra.mxu1 %v11462_v13  ;;  %6446 = vmatprep.mubr.f32.mxu1 %v12591_v54 }
 0x659   : > { %7284 = vmatprep.subr.bf16.mxu1 %v12665_v40 }
 0x65c   : > { %7286 = vmatpush1.bf16.msra.mxu1 %v12666_v5 }
 0x65d   : > { %7288 = vmatprep.subr.bf16.mxu1 %v11468_v23 }
 0x660   : > { %7290 = vmatpush1.bf16.msra.mxu1 %v11474_v21 }
 0x661   : > { %7292 = vmatprep.subr.bf16.mxu1 %v11481_v46  ;;  %v5481_v46 = vpop.permute.xlu0 %5480 }
 0x664   : > { %7294 = vmatpush1.bf16.msra.mxu1 %v11487_v1 }
 0x665   : > { %7296 = vmatprep.subr.bf16.mxu1 %v11489_v53  ;;  %v5491_v3 = vpop.permute.xlu0 %5490 }
 0x668   : > { %7298 = vmatpush1.bf16.msra.mxu1 %v11495_v30 }
 0x669   : > { %7300 = vmatprep.subr.bf16.mxu1 %v11497_v59 }
 0x66c   : > { %7302 = vmatpush1.bf16.msra.mxu1 %v11503_v26 }
 0x66d   : > { %7304 = vmatprep.subr.bf16.mxu1 %v12630_v0 }
 0x66f   : > { %6448 = vmatmul.mubr.f32.vlgmr.msra.gmra.mrb[58].mxu1 %v12613_v50 }
 0x670   : > { %7306 = vmatpush1.bf16.msra.mxu1 %v12632_v6  ;;  %6454 = vmatprep.mubr.f32.mxu1 %v12617_v11 }
 0x671   : > { %7308 = vmatprep.subr.bf16.mxu1 %v12634_v61 }
 0x673   : > { %6456 = vmatmul.mubr.f32.gmra.mrb[60].mxu1 %v12618_v8 }
 0x674   : > { %7310 = vmatpush1.bf16.msra.mxu1 %v12636_v55  ;;  %6462 = vmatprep.mubr.f32.mxu1 %v12619_v14 }
 0x675   : > { %7312 = vmatprep.subr.bf16.mxu1 %v12638_v24 }
 0x677   : > { %6464 = vmatmul.mubr.f32.gmra.mrb[62].mxu1 %v12620_v32 }
 0x678   : > { %7314 = vmatpush1.bf16.msra.mxu1 %v12640_v43  ;;  %6470 = vmatprep.mubr.f32.mxu1 %v12621_v56 }
 0x679   : > { %7316 = vmatprep.subr.bf16.mxu1 %v12642_v31 }
 0x67b   : > { %6472 = vmatmul.mubr.f32.gmra.mrb[64].mxu1 %v12622_v17 }
 0x67c   : > { %7318 = vmatpush1.bf16.msra.mxu1 %v12644_v33  ;;  %6579 = vmatprep.mubr.f32.mxu1 %v12591_v54 }
 0x67d   : > { %7320 = vmatprep.subr.bf16.mxu1 %v12646_v7 }
 0x680   : > { %7322 = vmatpush1.bf16.msra.mxu1 %v12647_v34 }
 0x681   : > { %7324 = vmatprep.subr.bf16.mxu1 %v12648_v51 }
 0x684   : > { %7326 = vmatpush1.bf16.msra.mxu1 %v12649_v57 }
 0x685   : > { %7328 = vmatprep.subr.bf16.mxu1 %v12650_v42 }
 0x688   : > { %7330 = vmatpush1.bf16.msra.mxu1 %v12651_v37 }
 0x689   : > { %7332 = vmatprep.subr.bf16.mxu1 %v12652_v16 }
 0x68c   : > { %7334 = vmatpush1.bf16.msra.mxu1 %v12653_v15 }
 0x68d   : > { %7336 = vmatprep.subr.bf16.mxu1 %v12654_v35 }
 0x690   : > { %7338 = vmatpush1.bf16.msra.mxu1 %v12655_v10 }
 0x693   : > { %6581 = vmatmul.mubr.f32.vlgmr.msra.gmra.mrb[58].mxu1 %v12613_v50 }
 0x694   : > { %6587 = vmatprep.mubr.f32.mxu1 %v12617_v11  ;;  %v5486_v11 = vpop.permute.xlu1 %5485 }
 0x697   : > { %6589 = vmatmul.mubr.f32.gmra.mrb[60].mxu1 %v12618_v8 }
 0x698   : > { %6595 = vmatprep.mubr.f32.mxu1 %v12619_v14 }
 0x69b   : > { %6597 = vmatmul.mubr.f32.gmra.mrb[62].mxu1 %v12620_v32 }
 0x69c   : > { %6603 = vmatprep.mubr.f32.mxu1 %v12621_v56 }
 0x69f   : > { %6605 = vmatmul.mubr.f32.gmra.mrb[64].mxu1 %v12622_v17 }
 0x766   : > { %v6582_v63 = vpop.f32.mrb[58].mxu1 }
 0x767   : > { %v7451_v54 = vadd.f32 %v6582_v63, %v5476_v49  ;;  %v6584_v13 = vpop.f32.mrb[59].mxu1 }
 0x768   : > { %v7452_v23 = vadd.f32 %v6584_v13, %v5476_v49 }
 0x769   : > { %v6611_v21 = vmax.f32 %v7451_v54, 0.0 }
 0x76a   : > { %v6612_v1 = vmax.f32 %v7452_v23, 0.0  ;;  %v6590_v53 = vpop.f32.mrb[60].mxu1 }
 0x76b   : > { %6619 = vst [vmem:[%s11637_s29] sm:$0xff] %v6611_v21  ;;  %v7453_v30 = vadd.f32 %v6590_v53, %v5481_v46  ;;  %v6592_v59 = vpop.f32.mrb[61].mxu1 }
 0x76c   : > { %6620 = vst [vmem:[%s11637_s29 + $0x8] sm:$0xff] %v6612_v1  ;;  %v7454_v26 = vadd.f32 %v6592_v59, %v5481_v46 }
 0x76d   : > { %v6613_v50 = vmax.f32 %v7453_v30, 0.0 }
 0x76e   : > { %v6614_v8 = vmax.f32 %v7454_v26, 0.0  ;;  %v6598_v14 = vpop.f32.mrb[62].mxu1 }
 0x76f   : > { %6621 = vst [vmem:[%s11637_s29 + $0x10] sm:$0xff] %v6613_v50  ;;  %v7455_v32 = vadd.f32 %v6598_v14, %v5486_v11  ;;  %v6600_v56 = vpop.f32.mrb[63].mxu1 }
 0x770   : > { %6622 = vst [vmem:[%s11637_s29 + $0x18] sm:$0xff] %v6614_v8  ;;  %v7456_v2 = vadd.f32 %v6600_v56, %v5486_v11 }
 0x771   : > { %v6615_v17 = vmax.f32 %v7455_v32, 0.0 }
 0x772   : > { %v6616_v28 = vmax.f32 %v7456_v2, 0.0  ;;  %v6606_v29 = vpop.f32.mrb[64].mxu1 }
 0x773   : > { %6623 = vst [vmem:[%s11637_s29 + $0x20] sm:$0xff] %v6615_v17  ;;  %v7457_v60 = vadd.f32 %v6606_v29, %v5491_v3  ;;  %v6608_v41 = vpop.f32.mrb[65].mxu1 }
 0x774   : > { %6624 = vst [vmem:[%s11637_s29 + $0x28] sm:$0xff] %v6616_v28  ;;  %v7458_v45 = vadd.f32 %v6608_v41, %v5491_v3 }
 0x775   : > { %v6617_v9 = vmax.f32 %v7457_v60, 0.0 }
 0x776   : > { %v6618_v0 = vmax.f32 %v7458_v45, 0.0 }
 0x777   : > { %6625 = vst [vmem:[%s11637_s29 + $0x30] sm:$0xff] %v6617_v9 }
 0x778   : > { %6626 = vst [vmem:[%s11637_s29 + $0x38] sm:$0xff] %v6618_v0 }
 0x779   : > { %7811 = shalt.err (!%p7808_p2)
}
 0x77a   : > { %s7812_s24 = scalar_lea.hbm %s11650_s25, 1024  ;;  %s7816_s14 = scalar_lea.hbm %s11709_s9, 2048 }
 0x77b   : > { %p7813_p3 = scmp.ne.s32.totalorder %s11650_s25, %s7812_s24  ;;  %p7817_p7 = scmp.lt.u32.totalorder %s11650_s25, %s11709_s9 }
 0x77c   : > { %p7818_p8 = scmp.lt.u32.totalorder %s7816_s14, %s7812_s24  ;;  %p7820_p12 = scmp.lt.u32.totalorder %s7812_s24, %s11650_s25 }
 0x77d   : > { %p7814_p4 = pnand %p7813_p3, %p12667_p13 }
 0x77e   : > { %p7819_p11 = por %p7818_p8, %p7817_p7 }
 0x77f   : > { %p7815_p0 = pneg %p7814_p4 }
 0x780   : > { %p7821_p1 = por %p7820_p12, %p7819_p11 }
 0x782   : > { %p7822_p6 = pnand %p7821_p1, %p7815_p0 }
 0x784   : > { %7825 = shalt.err (!%p7822_p6)
}
 0x785   : > { %s7892_s16 = smov 256   ;;  %s12668_s3 = smov 16  }
 0x786   : > { %7629 = dma.vmem_to_hbm [thread:$0]  (%p12667_p13), %s11652_s1, 1024, %s11650_s25, %s11658_s13, %s7892_s16, %s7892_s16, %s12668_s3  }
 0x787 PF: > { %p7646_p5 = scmp.ge.s32.totalorder %s7868_s12, 2  ;;  %s6656_s26 = sand.u32 1, %s7856_s30  }
 0x788   : > { %p12669_p9 = scmp.ne.s32.totalorder %s12046_s20, 0  ;;  %s6657_s23 = scalar_lea.sflag [#allocation8], %s6656_s26 }
 0x78a   : > { %p7639_p10 = pnand %p7646_p5, %p12669_p9 }
 0x78c   : > { %7851 = dma.done.wait (!%p7639_p10), %s6657_s23, 1024  }
 0x78d   : > { %7853 = vsyncadd (!%p7639_p10), %s6657_s23, 4294966272  ;;  %p21_p2 = scmp.ge.s32.totalorder %s7968_s15, 4   ;;  %s12670_s30 = smov %s7860_s10 }
 0x78e   : > { %s12671_s10 = smov %s7864_s11  ;;  %s12672_s11 = smov %s7979_s18 }
 0x78f   : > { %s12673_s12 = smov %s7968_s15  ;;  %23 = sbr.rel (!%p21_p2) target bundleno = 9 (0x9), region = 119 }
 0x796   :  { %6662 = vsyncpa [#allocation7], 1 }
 0x797   :  { %6664 = vsyncpa [#allocation7 + $0x1], 1 }
 0x798   :  { %6665 = vsyncpa [#allocation8], 1 }
 0x799   :  { %6667 = vsyncpa [#allocation8 + $0x1], 1 }
 0x79a   :  { %6668 = vsyncpa [#allocation9], 1 }
 0x79b   :  { %6670 = vsyncpa [#allocation9 + $0x1], 1 }

</bundles_post_ra>
